<compile_context>
chip_gen: v6e
topology: v6e:2x2x1
jax: 0.10.0
libtpu: 0.0.40
codegen_flags: <defaults>
</compile_context>

<pallas_src>
import math
import jax
import jax.numpy as jnp
from jax.experimental import pallas as pl
from jax.experimental.pallas import tpu as pltpu

# --- module constants (from WikiGPT.py) ---
d_k = 64
d_v = 64
d_embedding = 512
n_heads = 8
n_layers = 6
d_ff = 2048

_LN_EPS = 1e-5


def _layer_norm(x, g, b):
    # x: (M, D) f32, g/b: (1, D) f32  (matches nn.LayerNorm, eps=1e-5)
    mu = jnp.mean(x, axis=-1, keepdims=True)
    var = jnp.mean((x - mu) ** 2, axis=-1, keepdims=True)
    return (x - mu) * jax.lax.rsqrt(var + _LN_EPS) * g + b


def fused_decoder_kernel(
    x_ref,
    wqkv_ref, bqkv_ref,
    wo_ref, bo_ref, g_mha_ref, b_mha_ref,
    g1_ref, b1n_ref,
    w1_ref, b1_ref, w2_ref, b2_ref,
    g_ffn_ref, b_ffn_ref, g2_ref, b2n_ref,
    out_ref,
    act_ref, ctx_ref,
):
    l = pl.program_id(1)

    # First layer of this batch block: load activations into the resident carry.
    @pl.when(l == 0)
    def _():
        act_ref[...] = x_ref[...]

    x3 = act_ref[...]                              # (Bblk, S, D) f32
    Bblk, S, D = x3.shape
    M = Bblk * S
    x2d = x3.reshape(M, D)
    x_bf = x2d.astype(jnp.bfloat16)

    # --- fused Q|K|V projection (bf16 weights, f32 accumulation) ----------
    qkv = jnp.dot(x_bf, wqkv_ref[...], preferred_element_type=jnp.float32)
    qkv = qkv + bqkv_ref[...]
    hd = n_heads * d_k
    q3 = qkv[:, 0 * hd:1 * hd].reshape(Bblk, S, hd)
    k3 = qkv[:, 1 * hd:2 * hd].reshape(Bblk, S, hd)
    v3 = qkv[:, 2 * hd:3 * hd].reshape(Bblk, S, hd)

    # --- causal mask (same as np.triu(ones, k=1).bool()), built once ------
    row = jax.lax.broadcasted_iota(jnp.int32, (S, S), 0)
    col = jax.lax.broadcasted_iota(jnp.int32, (S, S), 1)
    causal = (col > row)[None, :, :]               # (1, S, S)
    inv_sqrt_dk = jnp.float32(1.0 / math.sqrt(d_k))

    # --- per-head scaled dot-product attention (f32, tiny tiles) ----------
    for h in range(n_heads):                       # static unrolled loop
        qh = q3[:, :, h * d_k:(h + 1) * d_k]
        kh = k3[:, :, h * d_k:(h + 1) * d_k]
        vh = v3[:, :, h * d_v:(h + 1) * d_v]
        # batched q @ k^T without materializing a transpose
        scores = jax.lax.dot_general(
            qh, kh, (((2,), (2,)), ((0,), (0,))),
            preferred_element_type=jnp.float32) * inv_sqrt_dk      # (Bblk,S,S)
        scores = jnp.where(causal, jnp.float32(-1e9), scores)
        scores = scores - jnp.max(scores, axis=-1, keepdims=True)
        e = jnp.exp(scores)
        p = e * pl.reciprocal(jnp.sum(e, axis=-1, keepdims=True), approx=True)
        ctx_h = jax.lax.dot_general(
            p, vh, (((2,), (1,)), ((0,), (0,))),
            preferred_element_type=jnp.float32)                    # (Bblk,S,dv)
        ctx_ref[:, :, h * d_v:(h + 1) * d_v] = ctx_h               # no concat

    context = ctx_ref[...].reshape(M, n_heads * d_v)

    # --- output projection + MHA-internal LayerNorm ------------------------
    attn = jnp.dot(context.astype(jnp.bfloat16), wo_ref[...],
                   preferred_element_type=jnp.float32) + bo_ref[...]
    a = _layer_norm(attn + x2d, g_mha_ref[...], b_mha_ref[...])

    # --- norm1 --------------------------------------------------------------
    n1 = _layer_norm(x2d + a, g1_ref[...], b1n_ref[...])

    # --- position-wise FFN (Conv1d k=1 == Linear) + internal LayerNorm ------
    h1 = jnp.dot(n1.astype(jnp.bfloat16), w1_ref[...],
                 preferred_element_type=jnp.float32) + b1_ref[...]
    h1 = jnp.maximum(h1, 0.0)
    h2 = jnp.dot(h1.astype(jnp.bfloat16), w2_ref[...],
                 preferred_element_type=jnp.float32) + b2_ref[...]
    f = _layer_norm(h2 + n1, g_ffn_ref[...], b_ffn_ref[...])

    # --- norm2 --------------------------------------------------------------
    y = _layer_norm(n1 + f, g2_ref[...], b2n_ref[...])
    y3 = y.reshape(Bblk, S, D)
    act_ref[...] = y3                              # carry to next layer

    @pl.when(l == pl.num_programs(1) - 1)
    def _():
        out_ref[...] = y3                          # single HBM writeback


_WEIGHT_ORDER = ("wqkv", "bqkv", "wo", "bo", "g_mha", "b_mha",
                 "g1", "b1n", "w1", "b1", "w2", "b2",
                 "g_ffn", "b_ffn", "g2", "b2n")


def decoder_stack_pallas(x, params, *, block_b=None):
    """x: (B, S, D) f32 embedded inputs; runs all n_layers in one pallas_call."""
    B, S, D = x.shape
    if block_b is None:
        block_b = B                       # whole (small) batch per grid step
    assert B % block_b == 0
    w_args = [params[name] for name in _WEIGHT_ORDER]

    def act_map(b, l):                    # activation block: constant over layers
        return (b, 0, 0)

    def layer_map(b, l):                  # stream layer l's parameters
        return (l, 0, 0)

    in_specs = [pl.BlockSpec((block_b, S, D), act_map)]
    in_specs += [pl.BlockSpec((None,) + tuple(w.shape[1:]), layer_map)
                 for w in w_args]

    return pl.pallas_call(
        fused_decoder_kernel,
        out_shape=jax.ShapeDtypeStruct((B, S, D), jnp.float32),
        grid=(B // block_b, n_layers),
        in_specs=in_specs,
        out_specs=pl.BlockSpec((block_b, S, D), act_map),
        scratch_shapes=[
            pltpu.VMEM((block_b, S, D), jnp.float32),             # layer carry
            pltpu.VMEM((block_b, S, n_heads * d_v), jnp.float32),  # head contexts
        ],
        compiler_params=pltpu.CompilerParams(
            dimension_semantics=("parallel", "arbitrary"),
            vmem_limit_bytes=48 * 1024 * 1024,   # fits v7x's 64 MiB physical VMEM
        ),
    )(x, *w_args)


def init_params(key, vocab_size, max_seq_len):
    keys = jax.random.split(key, 6)
    scale = 0.02

    def normal(k, shape, dtype=jnp.float32):
        return (scale * jax.random.normal(k, shape, dtype=jnp.float32)).astype(dtype)

    def zeros(shape):
        return jnp.zeros(shape, jnp.float32)

    def ones(shape):
        return jnp.ones(shape, jnp.float32)

    L, D, E, F = n_layers, d_embedding, n_heads * d_k, d_ff
    return {
        "src_emb": normal(keys[0], (vocab_size, D)),
        "pos_emb": normal(keys[1], (max_seq_len, D)),
        # fused Q|K|V projection weight, stored (in, out) == torch weight.T, bf16
        "wqkv": normal(keys[2], (L, D, 3 * E), jnp.bfloat16),
        "bqkv": zeros((L, 1, 3 * E)),
        "wo": normal(keys[3], (L, n_heads * d_v, D), jnp.bfloat16),
        "bo": zeros((L, 1, D)),
        "g_mha": ones((L, 1, D)), "b_mha": zeros((L, 1, D)),
        "g1": ones((L, 1, D)), "b1n": zeros((L, 1, D)),
        # Conv1d k=1 weights (out, in, 1) stored transposed (in, out), bf16
        "w1": normal(keys[4], (L, D, F), jnp.bfloat16),
        "b1": zeros((L, 1, F)),
        "w2": normal(keys[5], (L, F, D), jnp.bfloat16),
        "b2": zeros((L, 1, D)),
        "g_ffn": ones((L, 1, D)), "b_ffn": zeros((L, 1, D)),
        "g2": ones((L, 1, D)), "b2n": zeros((L, 1, D)),
    }


def decoder_forward(dec_inputs, params):
    """dec_inputs: (B, S) int32 token ids."""
    B, S = dec_inputs.shape
    # NOTE: reproduces the original code's positions = arange(len(dec_inputs))
    # (arange over the *batch* dimension), broadcast over the sequence.
    positions = jnp.arange(B)[:, None]                                   # (B, 1)
    x = params["src_emb"][dec_inputs] + params["pos_emb"][positions]     # (B,S,D)
    return decoder_stack_pallas(x.astype(jnp.float32), params)


if __name__ == "__main__":
    B, S = 2, 8
    vocab_size, max_seq_len = 100, 16

    key = jax.random.PRNGKey(0)
    k_params, k_tok = jax.random.split(key)
    params = init_params(k_params, vocab_size, max_seq_len)
    dec_inputs = jax.random.randint(k_tok, (B, S), 0, vocab_size, dtype=jnp.int32)

    out = decoder_forward(dec_inputs, params)
    out = jax.block_until_ready(out)
    assert out.shape == (B, S, d_embedding)
    assert bool(jnp.all(jnp.isfinite(out)))
    print("KERNEL_OK")
</pallas_src>

<mosaic_0001>
module attributes {stable_mosaic.version = 11 : i64} {
  func.func @fused_decoder_kernel(%arg0: i32, %arg1: i32, %arg2: memref<2x8x512xf32, #tpu.memory_space<vmem>>, %arg3: memref<1x512x1536xbf16, #tpu.memory_space<vmem>>, %arg4: memref<1x1x1536xf32, #tpu.memory_space<vmem>>, %arg5: memref<1x512x512xbf16, #tpu.memory_space<vmem>>, %arg6: memref<1x1x512xf32, #tpu.memory_space<vmem>>, %arg7: memref<1x1x512xf32, #tpu.memory_space<vmem>>, %arg8: memref<1x1x512xf32, #tpu.memory_space<vmem>>, %arg9: memref<1x1x512xf32, #tpu.memory_space<vmem>>, %arg10: memref<1x1x512xf32, #tpu.memory_space<vmem>>, %arg11: memref<1x512x2048xbf16, #tpu.memory_space<vmem>>, %arg12: memref<1x1x2048xf32, #tpu.memory_space<vmem>>, %arg13: memref<1x2048x512xbf16, #tpu.memory_space<vmem>>, %arg14: memref<1x1x512xf32, #tpu.memory_space<vmem>>, %arg15: memref<1x1x512xf32, #tpu.memory_space<vmem>>, %arg16: memref<1x1x512xf32, #tpu.memory_space<vmem>>, %arg17: memref<1x1x512xf32, #tpu.memory_space<vmem>>, %arg18: memref<1x1x512xf32, #tpu.memory_space<vmem>>, %arg19: memref<2x8x512xf32, #tpu.memory_space<vmem>>, %arg20: memref<2x8x512xf32, #tpu.memory_space<vmem>>, %arg21: memref<2x8x512xf32, #tpu.memory_space<vmem>>) attributes {dimension_semantics = [#tpu.dimension_semantics<parallel>, #tpu.dimension_semantics<arbitrary>], iteration_bounds = array<i64: 1, 6>, scalar_prefetch = 0 : i64, scratch_operands = 2 : i64, tpu.core_type = #tpu.core_type<tc>, window_params = [{transform_indices = @transform_0, window_bounds = array<i64: 2, 8, 512>}, {transform_indices = @transform_1, window_bounds = array<i64: 1, 512, 1536>}, {transform_indices = @transform_2, window_bounds = array<i64: 1, 1, 1536>}, {transform_indices = @transform_3, window_bounds = array<i64: 1, 512, 512>}, {transform_indices = @transform_4, window_bounds = array<i64: 1, 1, 512>}, {transform_indices = @transform_5, window_bounds = array<i64: 1, 1, 512>}, {transform_indices = @transform_6, window_bounds = array<i64: 1, 1, 512>}, {transform_indices = @transform_7, window_bounds = array<i64: 1, 1, 512>}, {transform_indices = @transform_8, window_bounds = array<i64: 1, 1, 512>}, {transform_indices = @transform_9, window_bounds = array<i64: 1, 512, 2048>}, {transform_indices = @transform_10, window_bounds = array<i64: 1, 1, 2048>}, {transform_indices = @transform_11, window_bounds = array<i64: 1, 2048, 512>}, {transform_indices = @transform_12, window_bounds = array<i64: 1, 1, 512>}, {transform_indices = @transform_13, window_bounds = array<i64: 1, 1, 512>}, {transform_indices = @transform_14, window_bounds = array<i64: 1, 1, 512>}, {transform_indices = @transform_15, window_bounds = array<i64: 1, 1, 512>}, {transform_indices = @transform_16, window_bounds = array<i64: 1, 1, 512>}, {transform_indices = @transform_17, window_bounds = array<i64: 2, 8, 512>}]} {
    %c0_i32 = arith.constant 0 : i32
    %0 = arith.cmpi eq, %arg1, %c0_i32 : i32
    %1 = arith.extui %0 : i1 to i32
    %c0_i32_0 = arith.constant 0 : i32
    %2 = arith.cmpi ne, %1, %c0_i32_0 : i32
    scf.if %2 {
      %c0_147 = arith.constant 0 : index
      %c0_148 = arith.constant 0 : index
      %c0_149 = arith.constant 0 : index
      %340 = vector.load %arg2[%c0_147, %c0_148, %c0_149] : memref<2x8x512xf32, #tpu.memory_space<vmem>>, vector<2x8x512xf32>
      %c0_150 = arith.constant 0 : index
      %c0_151 = arith.constant 0 : index
      %c0_152 = arith.constant 0 : index
      %341 = vector.load %arg20[%c0_150, %c0_151, %c0_152] : memref<2x8x512xf32, #tpu.memory_space<vmem>>, vector<2x8x512xf32>
      tpu.vector_store %arg20[%c0_150, %c0_151, %c0_152], %340 {strides = array<i32>} : memref<2x8x512xf32, #tpu.memory_space<vmem>>, vector<2x8x512xf32>,
    } else {
    }
    %c0 = arith.constant 0 : index
    %c0_1 = arith.constant 0 : index
    %c0_2 = arith.constant 0 : index
    %3 = vector.load %arg20[%c0, %c0_1, %c0_2] : memref<2x8x512xf32, #tpu.memory_space<vmem>>, vector<2x8x512xf32>
    %4 = vector.shape_cast %3 : vector<2x8x512xf32> to vector<16x512xf32>
    %5 = arith.truncf %4 : vector<16x512xf32> to vector<16x512xbf16>
    %c0_3 = arith.constant 0 : index
    %c0_4 = arith.constant 0 : index
    %c0_5 = arith.constant 0 : index
    %6 = vector.load %arg3[%c0_3, %c0_4, %c0_5] : memref<1x512x1536xbf16, #tpu.memory_space<vmem>>, vector<1x512x1536xbf16>
    %7 = vector.shape_cast %6 : vector<1x512x1536xbf16> to vector<512x1536xbf16>
    %cst = arith.constant dense<0.000000e+00> : vector<16x1536xf32>
    %8 = tpu.matmul %5, %7, %cst {dimension_numbers = #tpu.dot_dimension_numbers<[1], [0], [0], [1], [0, 0, 1, 1], [], []>} : vector<16x512xbf16>, vector<512x1536xbf16>, vector<16x1536xf32> -> vector<16x1536xf32>
    %c0_6 = arith.constant 0 : index
    %c0_7 = arith.constant 0 : index
    %c0_8 = arith.constant 0 : index
    %9 = vector.load %arg4[%c0_6, %c0_7, %c0_8] : memref<1x1x1536xf32, #tpu.memory_space<vmem>>, vector<1x1x1536xf32>
    %10 = vector.shape_cast %9 : vector<1x1x1536xf32> to vector<1x1536xf32>
    %11 = vector.broadcast %10 : vector<1x1536xf32> to vector<16x1536xf32>
    %12 = arith.addf %8, %11 : vector<16x1536xf32>
    %13 = vector.extract_strided_slice %12 {offsets = [0, 0], sizes = [16, 512], strides = [1, 1]} : vector<16x1536xf32> to vector<16x512xf32>
    %14 = vector.shape_cast %13 : vector<16x512xf32> to vector<2x8x512xf32>
    %15 = vector.extract_strided_slice %12 {offsets = [0, 512], sizes = [16, 512], strides = [1, 1]} : vector<16x1536xf32> to vector<16x512xf32>
    %16 = vector.shape_cast %15 : vector<16x512xf32> to vector<2x8x512xf32>
    %17 = vector.extract_strided_slice %12 {offsets = [0, 1024], sizes = [16, 512], strides = [1, 1]} : vector<16x1536xf32> to vector<16x512xf32>
    %18 = vector.shape_cast %17 : vector<16x512xf32> to vector<2x8x512xf32>
    %19 = tpu.iota {dimensions = array<i32: 0>} : vector<8x8xi32>
    %20 = tpu.iota {dimensions = array<i32: 1>} : vector<8x8xi32>
    %21 = arith.cmpi sgt, %20, %19 : vector<8x8xi32>
    %22 = vector.shape_cast %21 : vector<8x8xi1> to vector<1x8x8xi1>
    %23 = vector.extract_strided_slice %14 {offsets = [0, 0, 0], sizes = [2, 8, 64], strides = [1, 1, 1]} : vector<2x8x512xf32> to vector<2x8x64xf32>
    %24 = vector.extract_strided_slice %16 {offsets = [0, 0, 0], sizes = [2, 8, 64], strides = [1, 1, 1]} : vector<2x8x512xf32> to vector<2x8x64xf32>
    %25 = vector.extract_strided_slice %18 {offsets = [0, 0, 0], sizes = [2, 8, 64], strides = [1, 1, 1]} : vector<2x8x512xf32> to vector<2x8x64xf32>
    %cst_9 = arith.constant dense<0.000000e+00> : vector<2x8x8xf32>
    %26 = tpu.matmul %23, %24, %cst_9 {dimension_numbers = #tpu.dot_dimension_numbers<[2], [2], [1], [1], [0, 0, 0, 1, 1, 1], [0], [0]>} : vector<2x8x64xf32>, vector<2x8x64xf32>, vector<2x8x8xf32> -> vector<2x8x8xf32>
    %cst_10 = arith.constant 1.250000e-01 : f32
    %27 = vector.broadcast %cst_10 : f32 to vector<2x8x8xf32>
    %28 = arith.mulf %26, %27 : vector<2x8x8xf32>
    %cst_11 = arith.constant -1.000000e+09 : f32
    %29 = vector.shape_cast %22 : vector<1x8x8xi1> to vector<1x8x8xi1>
    %30 = vector.broadcast %29 : vector<1x8x8xi1> to vector<2x8x8xi1>
    %31 = vector.broadcast %cst_11 : f32 to vector<2x8x8xf32>
    %32 = arith.select %30, %31, %28 : vector<2x8x8xi1>, vector<2x8x8xf32>
    %cst_12 = arith.constant dense<0xFF800000> : vector<2x8xf32>
    %33 = vector.multi_reduction <maximumf>, %32, %cst_12 [2] : vector<2x8x8xf32> to vector<2x8xf32>
    %34 = vector.shape_cast %33 : vector<2x8xf32> to vector<2x8x1xf32>
    %35 = vector.broadcast %34 : vector<2x8x1xf32> to vector<2x8x8xf32>
    %36 = arith.subf %32, %35 : vector<2x8x8xf32>
    %37 = math.exp %36 : vector<2x8x8xf32>
    %cst_13 = arith.constant dense<0.000000e+00> : vector<2x8xf32>
    %38 = vector.multi_reduction <add>, %37, %cst_13 [2] : vector<2x8x8xf32> to vector<2x8xf32>
    %39 = vector.shape_cast %38 : vector<2x8xf32> to vector<2x8x1xf32>
    %40 = tpu.reciprocal %39 {approx = true} : vector<2x8x1xf32> -> vector<2x8x1xf32>
    %41 = vector.broadcast %40 : vector<2x8x1xf32> to vector<2x8x8xf32>
    %42 = arith.mulf %37, %41 : vector<2x8x8xf32>
    %cst_14 = arith.constant dense<0.000000e+00> : vector<2x8x64xf32>
    %43 = tpu.matmul %42, %25, %cst_14 {dimension_numbers = #tpu.dot_dimension_numbers<[2], [1], [1], [2], [0, 0, 0, 1, 1, 2], [0], [0]>} : vector<2x8x8xf32>, vector<2x8x64xf32>, vector<2x8x64xf32> -> vector<2x8x64xf32>
    %c0_15 = arith.constant 0 : index
    %c0_16 = arith.constant 0 : index
    %c0_17 = arith.constant 0 : index
    %44 = vector.load %arg21[%c0_15, %c0_16, %c0_17] : memref<2x8x512xf32, #tpu.memory_space<vmem>>, vector<2x8x64xf32>
    tpu.vector_store %arg21[%c0_15, %c0_16, %c0_17], %43 {strides = array<i32>} : memref<2x8x512xf32, #tpu.memory_space<vmem>>, vector<2x8x64xf32>,
    %45 = vector.extract_strided_slice %14 {offsets = [0, 0, 64], sizes = [2, 8, 64], strides = [1, 1, 1]} : vector<2x8x512xf32> to vector<2x8x64xf32>
    %46 = vector.extract_strided_slice %16 {offsets = [0, 0, 64], sizes = [2, 8, 64], strides = [1, 1, 1]} : vector<2x8x512xf32> to vector<2x8x64xf32>
    %47 = vector.extract_strided_slice %18 {offsets = [0, 0, 64], sizes = [2, 8, 64], strides = [1, 1, 1]} : vector<2x8x512xf32> to vector<2x8x64xf32>
    %cst_18 = arith.constant dense<0.000000e+00> : vector<2x8x8xf32>
    %48 = tpu.matmul %45, %46, %cst_18 {dimension_numbers = #tpu.dot_dimension_numbers<[2], [2], [1], [1], [0, 0, 0, 1, 1, 1], [0], [0]>} : vector<2x8x64xf32>, vector<2x8x64xf32>, vector<2x8x8xf32> -> vector<2x8x8xf32>
    %cst_19 = arith.constant 1.250000e-01 : f32
    %49 = vector.broadcast %cst_19 : f32 to vector<2x8x8xf32>
    %50 = arith.mulf %48, %49 : vector<2x8x8xf32>
    %cst_20 = arith.constant -1.000000e+09 : f32
    %51 = vector.shape_cast %22 : vector<1x8x8xi1> to vector<1x8x8xi1>
    %52 = vector.broadcast %51 : vector<1x8x8xi1> to vector<2x8x8xi1>
    %53 = vector.broadcast %cst_20 : f32 to vector<2x8x8xf32>
    %54 = arith.select %52, %53, %50 : vector<2x8x8xi1>, vector<2x8x8xf32>
    %cst_21 = arith.constant dense<0xFF800000> : vector<2x8xf32>
    %55 = vector.multi_reduction <maximumf>, %54, %cst_21 [2] : vector<2x8x8xf32> to vector<2x8xf32>
    %56 = vector.shape_cast %55 : vector<2x8xf32> to vector<2x8x1xf32>
    %57 = vector.broadcast %56 : vector<2x8x1xf32> to vector<2x8x8xf32>
    %58 = arith.subf %54, %57 : vector<2x8x8xf32>
    %59 = math.exp %58 : vector<2x8x8xf32>
    %cst_22 = arith.constant dense<0.000000e+00> : vector<2x8xf32>
    %60 = vector.multi_reduction <add>, %59, %cst_22 [2] : vector<2x8x8xf32> to vector<2x8xf32>
    %61 = vector.shape_cast %60 : vector<2x8xf32> to vector<2x8x1xf32>
    %62 = tpu.reciprocal %61 {approx = true} : vector<2x8x1xf32> -> vector<2x8x1xf32>
    %63 = vector.broadcast %62 : vector<2x8x1xf32> to vector<2x8x8xf32>
    %64 = arith.mulf %59, %63 : vector<2x8x8xf32>
    %cst_23 = arith.constant dense<0.000000e+00> : vector<2x8x64xf32>
    %65 = tpu.matmul %64, %47, %cst_23 {dimension_numbers = #tpu.dot_dimension_numbers<[2], [1], [1], [2], [0, 0, 0, 1, 1, 2], [0], [0]>} : vector<2x8x8xf32>, vector<2x8x64xf32>, vector<2x8x64xf32> -> vector<2x8x64xf32>
    %c0_24 = arith.constant 0 : index
    %c0_25 = arith.constant 0 : index
    %c64 = arith.constant 64 : index
    %66 = vector.load %arg21[%c0_24, %c0_25, %c64] : memref<2x8x512xf32, #tpu.memory_space<vmem>>, vector<2x8x64xf32>
    tpu.vector_store %arg21[%c0_24, %c0_25, %c64], %65 {strides = array<i32>} : memref<2x8x512xf32, #tpu.memory_space<vmem>>, vector<2x8x64xf32>,
    %67 = vector.extract_strided_slice %14 {offsets = [0, 0, 128], sizes = [2, 8, 64], strides = [1, 1, 1]} : vector<2x8x512xf32> to vector<2x8x64xf32>
    %68 = vector.extract_strided_slice %16 {offsets = [0, 0, 128], sizes = [2, 8, 64], strides = [1, 1, 1]} : vector<2x8x512xf32> to vector<2x8x64xf32>
    %69 = vector.extract_strided_slice %18 {offsets = [0, 0, 128], sizes = [2, 8, 64], strides = [1, 1, 1]} : vector<2x8x512xf32> to vector<2x8x64xf32>
    %cst_26 = arith.constant dense<0.000000e+00> : vector<2x8x8xf32>
    %70 = tpu.matmul %67, %68, %cst_26 {dimension_numbers = #tpu.dot_dimension_numbers<[2], [2], [1], [1], [0, 0, 0, 1, 1, 1], [0], [0]>} : vector<2x8x64xf32>, vector<2x8x64xf32>, vector<2x8x8xf32> -> vector<2x8x8xf32>
    %cst_27 = arith.constant 1.250000e-01 : f32
    %71 = vector.broadcast %cst_27 : f32 to vector<2x8x8xf32>
    %72 = arith.mulf %70, %71 : vector<2x8x8xf32>
    %cst_28 = arith.constant -1.000000e+09 : f32
    %73 = vector.shape_cast %22 : vector<1x8x8xi1> to vector<1x8x8xi1>
    %74 = vector.broadcast %73 : vector<1x8x8xi1> to vector<2x8x8xi1>
    %75 = vector.broadcast %cst_28 : f32 to vector<2x8x8xf32>
    %76 = arith.select %74, %75, %72 : vector<2x8x8xi1>, vector<2x8x8xf32>
    %cst_29 = arith.constant dense<0xFF800000> : vector<2x8xf32>
    %77 = vector.multi_reduction <maximumf>, %76, %cst_29 [2] : vector<2x8x8xf32> to vector<2x8xf32>
    %78 = vector.shape_cast %77 : vector<2x8xf32> to vector<2x8x1xf32>
    %79 = vector.broadcast %78 : vector<2x8x1xf32> to vector<2x8x8xf32>
    %80 = arith.subf %76, %79 : vector<2x8x8xf32>
    %81 = math.exp %80 : vector<2x8x8xf32>
    %cst_30 = arith.constant dense<0.000000e+00> : vector<2x8xf32>
    %82 = vector.multi_reduction <add>, %81, %cst_30 [2] : vector<2x8x8xf32> to vector<2x8xf32>
    %83 = vector.shape_cast %82 : vector<2x8xf32> to vector<2x8x1xf32>
    %84 = tpu.reciprocal %83 {approx = true} : vector<2x8x1xf32> -> vector<2x8x1xf32>
    %85 = vector.broadcast %84 : vector<2x8x1xf32> to vector<2x8x8xf32>
    %86 = arith.mulf %81, %85 : vector<2x8x8xf32>
    %cst_31 = arith.constant dense<0.000000e+00> : vector<2x8x64xf32>
    %87 = tpu.matmul %86, %69, %cst_31 {dimension_numbers = #tpu.dot_dimension_numbers<[2], [1], [1], [2], [0, 0, 0, 1, 1, 2], [0], [0]>} : vector<2x8x8xf32>, vector<2x8x64xf32>, vector<2x8x64xf32> -> vector<2x8x64xf32>
    %c0_32 = arith.constant 0 : index
    %c0_33 = arith.constant 0 : index
    %c128 = arith.constant 128 : index
    %88 = vector.load %arg21[%c0_32, %c0_33, %c128] : memref<2x8x512xf32, #tpu.memory_space<vmem>>, vector<2x8x64xf32>
    tpu.vector_store %arg21[%c0_32, %c0_33, %c128], %87 {strides = array<i32>} : memref<2x8x512xf32, #tpu.memory_space<vmem>>, vector<2x8x64xf32>,
    %89 = vector.extract_strided_slice %14 {offsets = [0, 0, 192], sizes = [2, 8, 64], strides = [1, 1, 1]} : vector<2x8x512xf32> to vector<2x8x64xf32>
    %90 = vector.extract_strided_slice %16 {offsets = [0, 0, 192], sizes = [2, 8, 64], strides = [1, 1, 1]} : vector<2x8x512xf32> to vector<2x8x64xf32>
    %91 = vector.extract_strided_slice %18 {offsets = [0, 0, 192], sizes = [2, 8, 64], strides = [1, 1, 1]} : vector<2x8x512xf32> to vector<2x8x64xf32>
    %cst_34 = arith.constant dense<0.000000e+00> : vector<2x8x8xf32>
    %92 = tpu.matmul %89, %90, %cst_34 {dimension_numbers = #tpu.dot_dimension_numbers<[2], [2], [1], [1], [0, 0, 0, 1, 1, 1], [0], [0]>} : vector<2x8x64xf32>, vector<2x8x64xf32>, vector<2x8x8xf32> -> vector<2x8x8xf32>
    %cst_35 = arith.constant 1.250000e-01 : f32
    %93 = vector.broadcast %cst_35 : f32 to vector<2x8x8xf32>
    %94 = arith.mulf %92, %93 : vector<2x8x8xf32>
    %cst_36 = arith.constant -1.000000e+09 : f32
    %95 = vector.shape_cast %22 : vector<1x8x8xi1> to vector<1x8x8xi1>
    %96 = vector.broadcast %95 : vector<1x8x8xi1> to vector<2x8x8xi1>
    %97 = vector.broadcast %cst_36 : f32 to vector<2x8x8xf32>
    %98 = arith.select %96, %97, %94 : vector<2x8x8xi1>, vector<2x8x8xf32>
    %cst_37 = arith.constant dense<0xFF800000> : vector<2x8xf32>
    %99 = vector.multi_reduction <maximumf>, %98, %cst_37 [2] : vector<2x8x8xf32> to vector<2x8xf32>
    %100 = vector.shape_cast %99 : vector<2x8xf32> to vector<2x8x1xf32>
    %101 = vector.broadcast %100 : vector<2x8x1xf32> to vector<2x8x8xf32>
    %102 = arith.subf %98, %101 : vector<2x8x8xf32>
    %103 = math.exp %102 : vector<2x8x8xf32>
    %cst_38 = arith.constant dense<0.000000e+00> : vector<2x8xf32>
    %104 = vector.multi_reduction <add>, %103, %cst_38 [2] : vector<2x8x8xf32> to vector<2x8xf32>
    %105 = vector.shape_cast %104 : vector<2x8xf32> to vector<2x8x1xf32>
    %106 = tpu.reciprocal %105 {approx = true} : vector<2x8x1xf32> -> vector<2x8x1xf32>
    %107 = vector.broadcast %106 : vector<2x8x1xf32> to vector<2x8x8xf32>
    %108 = arith.mulf %103, %107 : vector<2x8x8xf32>
    %cst_39 = arith.constant dense<0.000000e+00> : vector<2x8x64xf32>
    %109 = tpu.matmul %108, %91, %cst_39 {dimension_numbers = #tpu.dot_dimension_numbers<[2], [1], [1], [2], [0, 0, 0, 1, 1, 2], [0], [0]>} : vector<2x8x8xf32>, vector<2x8x64xf32>, vector<2x8x64xf32> -> vector<2x8x64xf32>
    %c0_40 = arith.constant 0 : index
    %c0_41 = arith.constant 0 : index
    %c192 = arith.constant 192 : index
    %110 = vector.load %arg21[%c0_40, %c0_41, %c192] : memref<2x8x512xf32, #tpu.memory_space<vmem>>, vector<2x8x64xf32>
    tpu.vector_store %arg21[%c0_40, %c0_41, %c192], %109 {strides = array<i32>} : memref<2x8x512xf32, #tpu.memory_space<vmem>>, vector<2x8x64xf32>,
    %111 = vector.extract_strided_slice %14 {offsets = [0, 0, 256], sizes = [2, 8, 64], strides = [1, 1, 1]} : vector<2x8x512xf32> to vector<2x8x64xf32>
    %112 = vector.extract_strided_slice %16 {offsets = [0, 0, 256], sizes = [2, 8, 64], strides = [1, 1, 1]} : vector<2x8x512xf32> to vector<2x8x64xf32>
    %113 = vector.extract_strided_slice %18 {offsets = [0, 0, 256], sizes = [2, 8, 64], strides = [1, 1, 1]} : vector<2x8x512xf32> to vector<2x8x64xf32>
    %cst_42 = arith.constant dense<0.000000e+00> : vector<2x8x8xf32>
    %114 = tpu.matmul %111, %112, %cst_42 {dimension_numbers = #tpu.dot_dimension_numbers<[2], [2], [1], [1], [0, 0, 0, 1, 1, 1], [0], [0]>} : vector<2x8x64xf32>, vector<2x8x64xf32>, vector<2x8x8xf32> -> vector<2x8x8xf32>
    %cst_43 = arith.constant 1.250000e-01 : f32
    %115 = vector.broadcast %cst_43 : f32 to vector<2x8x8xf32>
    %116 = arith.mulf %114, %115 : vector<2x8x8xf32>
    %cst_44 = arith.constant -1.000000e+09 : f32
    %117 = vector.shape_cast %22 : vector<1x8x8xi1> to vector<1x8x8xi1>
    %118 = vector.broadcast %117 : vector<1x8x8xi1> to vector<2x8x8xi1>
    %119 = vector.broadcast %cst_44 : f32 to vector<2x8x8xf32>
    %120 = arith.select %118, %119, %116 : vector<2x8x8xi1>, vector<2x8x8xf32>
    %cst_45 = arith.constant dense<0xFF800000> : vector<2x8xf32>
    %121 = vector.multi_reduction <maximumf>, %120, %cst_45 [2] : vector<2x8x8xf32> to vector<2x8xf32>
    %122 = vector.shape_cast %121 : vector<2x8xf32> to vector<2x8x1xf32>
    %123 = vector.broadcast %122 : vector<2x8x1xf32> to vector<2x8x8xf32>
    %124 = arith.subf %120, %123 : vector<2x8x8xf32>
    %125 = math.exp %124 : vector<2x8x8xf32>
    %cst_46 = arith.constant dense<0.000000e+00> : vector<2x8xf32>
    %126 = vector.multi_reduction <add>, %125, %cst_46 [2] : vector<2x8x8xf32> to vector<2x8xf32>
    %127 = vector.shape_cast %126 : vector<2x8xf32> to vector<2x8x1xf32>
    %128 = tpu.reciprocal %127 {approx = true} : vector<2x8x1xf32> -> vector<2x8x1xf32>
    %129 = vector.broadcast %128 : vector<2x8x1xf32> to vector<2x8x8xf32>
    %130 = arith.mulf %125, %129 : vector<2x8x8xf32>
    %cst_47 = arith.constant dense<0.000000e+00> : vector<2x8x64xf32>
    %131 = tpu.matmul %130, %113, %cst_47 {dimension_numbers = #tpu.dot_dimension_numbers<[2], [1], [1], [2], [0, 0, 0, 1, 1, 2], [0], [0]>} : vector<2x8x8xf32>, vector<2x8x64xf32>, vector<2x8x64xf32> -> vector<2x8x64xf32>
    %c0_48 = arith.constant 0 : index
    %c0_49 = arith.constant 0 : index
    %c256 = arith.constant 256 : index
    %132 = vector.load %arg21[%c0_48, %c0_49, %c256] : memref<2x8x512xf32, #tpu.memory_space<vmem>>, vector<2x8x64xf32>
    tpu.vector_store %arg21[%c0_48, %c0_49, %c256], %131 {strides = array<i32>} : memref<2x8x512xf32, #tpu.memory_space<vmem>>, vector<2x8x64xf32>,
    %133 = vector.extract_strided_slice %14 {offsets = [0, 0, 320], sizes = [2, 8, 64], strides = [1, 1, 1]} : vector<2x8x512xf32> to vector<2x8x64xf32>
    %134 = vector.extract_strided_slice %16 {offsets = [0, 0, 320], sizes = [2, 8, 64], strides = [1, 1, 1]} : vector<2x8x512xf32> to vector<2x8x64xf32>
    %135 = vector.extract_strided_slice %18 {offsets = [0, 0, 320], sizes = [2, 8, 64], strides = [1, 1, 1]} : vector<2x8x512xf32> to vector<2x8x64xf32>
    %cst_50 = arith.constant dense<0.000000e+00> : vector<2x8x8xf32>
    %136 = tpu.matmul %133, %134, %cst_50 {dimension_numbers = #tpu.dot_dimension_numbers<[2], [2], [1], [1], [0, 0, 0, 1, 1, 1], [0], [0]>} : vector<2x8x64xf32>, vector<2x8x64xf32>, vector<2x8x8xf32> -> vector<2x8x8xf32>
    %cst_51 = arith.constant 1.250000e-01 : f32
    %137 = vector.broadcast %cst_51 : f32 to vector<2x8x8xf32>
    %138 = arith.mulf %136, %137 : vector<2x8x8xf32>
    %cst_52 = arith.constant -1.000000e+09 : f32
    %139 = vector.shape_cast %22 : vector<1x8x8xi1> to vector<1x8x8xi1>
    %140 = vector.broadcast %139 : vector<1x8x8xi1> to vector<2x8x8xi1>
    %141 = vector.broadcast %cst_52 : f32 to vector<2x8x8xf32>
    %142 = arith.select %140, %141, %138 : vector<2x8x8xi1>, vector<2x8x8xf32>
    %cst_53 = arith.constant dense<0xFF800000> : vector<2x8xf32>
    %143 = vector.multi_reduction <maximumf>, %142, %cst_53 [2] : vector<2x8x8xf32> to vector<2x8xf32>
    %144 = vector.shape_cast %143 : vector<2x8xf32> to vector<2x8x1xf32>
    %145 = vector.broadcast %144 : vector<2x8x1xf32> to vector<2x8x8xf32>
    %146 = arith.subf %142, %145 : vector<2x8x8xf32>
    %147 = math.exp %146 : vector<2x8x8xf32>
    %cst_54 = arith.constant dense<0.000000e+00> : vector<2x8xf32>
    %148 = vector.multi_reduction <add>, %147, %cst_54 [2] : vector<2x8x8xf32> to vector<2x8xf32>
    %149 = vector.shape_cast %148 : vector<2x8xf32> to vector<2x8x1xf32>
    %150 = tpu.reciprocal %149 {approx = true} : vector<2x8x1xf32> -> vector<2x8x1xf32>
    %151 = vector.broadcast %150 : vector<2x8x1xf32> to vector<2x8x8xf32>
    %152 = arith.mulf %147, %151 : vector<2x8x8xf32>
    %cst_55 = arith.constant dense<0.000000e+00> : vector<2x8x64xf32>
    %153 = tpu.matmul %152, %135, %cst_55 {dimension_numbers = #tpu.dot_dimension_numbers<[2], [1], [1], [2], [0, 0, 0, 1, 1, 2], [0], [0]>} : vector<2x8x8xf32>, vector<2x8x64xf32>, vector<2x8x64xf32> -> vector<2x8x64xf32>
    %c0_56 = arith.constant 0 : index
    %c0_57 = arith.constant 0 : index
    %c320 = arith.constant 320 : index
    %154 = vector.load %arg21[%c0_56, %c0_57, %c320] : memref<2x8x512xf32, #tpu.memory_space<vmem>>, vector<2x8x64xf32>
    tpu.vector_store %arg21[%c0_56, %c0_57, %c320], %153 {strides = array<i32>} : memref<2x8x512xf32, #tpu.memory_space<vmem>>, vector<2x8x64xf32>,
    %155 = vector.extract_strided_slice %14 {offsets = [0, 0, 384], sizes = [2, 8, 64], strides = [1, 1, 1]} : vector<2x8x512xf32> to vector<2x8x64xf32>
    %156 = vector.extract_strided_slice %16 {offsets = [0, 0, 384], sizes = [2, 8, 64], strides = [1, 1, 1]} : vector<2x8x512xf32> to vector<2x8x64xf32>
    %157 = vector.extract_strided_slice %18 {offsets = [0, 0, 384], sizes = [2, 8, 64], strides = [1, 1, 1]} : vector<2x8x512xf32> to vector<2x8x64xf32>
    %cst_58 = arith.constant dense<0.000000e+00> : vector<2x8x8xf32>
    %158 = tpu.matmul %155, %156, %cst_58 {dimension_numbers = #tpu.dot_dimension_numbers<[2], [2], [1], [1], [0, 0, 0, 1, 1, 1], [0], [0]>} : vector<2x8x64xf32>, vector<2x8x64xf32>, vector<2x8x8xf32> -> vector<2x8x8xf32>
    %cst_59 = arith.constant 1.250000e-01 : f32
    %159 = vector.broadcast %cst_59 : f32 to vector<2x8x8xf32>
    %160 = arith.mulf %158, %159 : vector<2x8x8xf32>
    %cst_60 = arith.constant -1.000000e+09 : f32
    %161 = vector.shape_cast %22 : vector<1x8x8xi1> to vector<1x8x8xi1>
    %162 = vector.broadcast %161 : vector<1x8x8xi1> to vector<2x8x8xi1>
    %163 = vector.broadcast %cst_60 : f32 to vector<2x8x8xf32>
    %164 = arith.select %162, %163, %160 : vector<2x8x8xi1>, vector<2x8x8xf32>
    %cst_61 = arith.constant dense<0xFF800000> : vector<2x8xf32>
    %165 = vector.multi_reduction <maximumf>, %164, %cst_61 [2] : vector<2x8x8xf32> to vector<2x8xf32>
    %166 = vector.shape_cast %165 : vector<2x8xf32> to vector<2x8x1xf32>
    %167 = vector.broadcast %166 : vector<2x8x1xf32> to vector<2x8x8xf32>
    %168 = arith.subf %164, %167 : vector<2x8x8xf32>
    %169 = math.exp %168 : vector<2x8x8xf32>
    %cst_62 = arith.constant dense<0.000000e+00> : vector<2x8xf32>
    %170 = vector.multi_reduction <add>, %169, %cst_62 [2] : vector<2x8x8xf32> to vector<2x8xf32>
    %171 = vector.shape_cast %170 : vector<2x8xf32> to vector<2x8x1xf32>
    %172 = tpu.reciprocal %171 {approx = true} : vector<2x8x1xf32> -> vector<2x8x1xf32>
    %173 = vector.broadcast %172 : vector<2x8x1xf32> to vector<2x8x8xf32>
    %174 = arith.mulf %169, %173 : vector<2x8x8xf32>
    %cst_63 = arith.constant dense<0.000000e+00> : vector<2x8x64xf32>
    %175 = tpu.matmul %174, %157, %cst_63 {dimension_numbers = #tpu.dot_dimension_numbers<[2], [1], [1], [2], [0, 0, 0, 1, 1, 2], [0], [0]>} : vector<2x8x8xf32>, vector<2x8x64xf32>, vector<2x8x64xf32> -> vector<2x8x64xf32>
    %c0_64 = arith.constant 0 : index
    %c0_65 = arith.constant 0 : index
    %c384 = arith.constant 384 : index
    %176 = vector.load %arg21[%c0_64, %c0_65, %c384] : memref<2x8x512xf32, #tpu.memory_space<vmem>>, vector<2x8x64xf32>
    tpu.vector_store %arg21[%c0_64, %c0_65, %c384], %175 {strides = array<i32>} : memref<2x8x512xf32, #tpu.memory_space<vmem>>, vector<2x8x64xf32>,
    %177 = vector.extract_strided_slice %14 {offsets = [0, 0, 448], sizes = [2, 8, 64], strides = [1, 1, 1]} : vector<2x8x512xf32> to vector<2x8x64xf32>
    %178 = vector.extract_strided_slice %16 {offsets = [0, 0, 448], sizes = [2, 8, 64], strides = [1, 1, 1]} : vector<2x8x512xf32> to vector<2x8x64xf32>
    %179 = vector.extract_strided_slice %18 {offsets = [0, 0, 448], sizes = [2, 8, 64], strides = [1, 1, 1]} : vector<2x8x512xf32> to vector<2x8x64xf32>
    %cst_66 = arith.constant dense<0.000000e+00> : vector<2x8x8xf32>
    %180 = tpu.matmul %177, %178, %cst_66 {dimension_numbers = #tpu.dot_dimension_numbers<[2], [2], [1], [1], [0, 0, 0, 1, 1, 1], [0], [0]>} : vector<2x8x64xf32>, vector<2x8x64xf32>, vector<2x8x8xf32> -> vector<2x8x8xf32>
    %cst_67 = arith.constant 1.250000e-01 : f32
    %181 = vector.broadcast %cst_67 : f32 to vector<2x8x8xf32>
    %182 = arith.mulf %180, %181 : vector<2x8x8xf32>
    %cst_68 = arith.constant -1.000000e+09 : f32
    %183 = vector.shape_cast %22 : vector<1x8x8xi1> to vector<1x8x8xi1>
    %184 = vector.broadcast %183 : vector<1x8x8xi1> to vector<2x8x8xi1>
    %185 = vector.broadcast %cst_68 : f32 to vector<2x8x8xf32>
    %186 = arith.select %184, %185, %182 : vector<2x8x8xi1>, vector<2x8x8xf32>
    %cst_69 = arith.constant dense<0xFF800000> : vector<2x8xf32>
    %187 = vector.multi_reduction <maximumf>, %186, %cst_69 [2] : vector<2x8x8xf32> to vector<2x8xf32>
    %188 = vector.shape_cast %187 : vector<2x8xf32> to vector<2x8x1xf32>
    %189 = vector.broadcast %188 : vector<2x8x1xf32> to vector<2x8x8xf32>
    %190 = arith.subf %186, %189 : vector<2x8x8xf32>
    %191 = math.exp %190 : vector<2x8x8xf32>
    %cst_70 = arith.constant dense<0.000000e+00> : vector<2x8xf32>
    %192 = vector.multi_reduction <add>, %191, %cst_70 [2] : vector<2x8x8xf32> to vector<2x8xf32>
    %193 = vector.shape_cast %192 : vector<2x8xf32> to vector<2x8x1xf32>
    %194 = tpu.reciprocal %193 {approx = true} : vector<2x8x1xf32> -> vector<2x8x1xf32>
    %195 = vector.broadcast %194 : vector<2x8x1xf32> to vector<2x8x8xf32>
    %196 = arith.mulf %191, %195 : vector<2x8x8xf32>
    %cst_71 = arith.constant dense<0.000000e+00> : vector<2x8x64xf32>
    %197 = tpu.matmul %196, %179, %cst_71 {dimension_numbers = #tpu.dot_dimension_numbers<[2], [1], [1], [2], [0, 0, 0, 1, 1, 2], [0], [0]>} : vector<2x8x8xf32>, vector<2x8x64xf32>, vector<2x8x64xf32> -> vector<2x8x64xf32>
    %c0_72 = arith.constant 0 : index
    %c0_73 = arith.constant 0 : index
    %c448 = arith.constant 448 : index
    %198 = vector.load %arg21[%c0_72, %c0_73, %c448] : memref<2x8x512xf32, #tpu.memory_space<vmem>>, vector<2x8x64xf32>
    tpu.vector_store %arg21[%c0_72, %c0_73, %c448], %197 {strides = array<i32>} : memref<2x8x512xf32, #tpu.memory_space<vmem>>, vector<2x8x64xf32>,
    %c0_74 = arith.constant 0 : index
    %c0_75 = arith.constant 0 : index
    %c0_76 = arith.constant 0 : index
    %199 = vector.load %arg21[%c0_74, %c0_75, %c0_76] : memref<2x8x512xf32, #tpu.memory_space<vmem>>, vector<2x8x512xf32>
    %200 = vector.shape_cast %199 : vector<2x8x512xf32> to vector<16x512xf32>
    %201 = arith.truncf %200 : vector<16x512xf32> to vector<16x512xbf16>
    %c0_77 = arith.constant 0 : index
    %c0_78 = arith.constant 0 : index
    %c0_79 = arith.constant 0 : index
    %202 = vector.load %arg5[%c0_77, %c0_78, %c0_79] : memref<1x512x512xbf16, #tpu.memory_space<vmem>>, vector<1x512x512xbf16>
    %203 = vector.shape_cast %202 : vector<1x512x512xbf16> to vector<512x512xbf16>
    %cst_80 = arith.constant dense<0.000000e+00> : vector<16x512xf32>
    %204 = tpu.matmul %201, %203, %cst_80 {dimension_numbers = #tpu.dot_dimension_numbers<[1], [0], [0], [1], [0, 0, 1, 1], [], []>} : vector<16x512xbf16>, vector<512x512xbf16>, vector<16x512xf32> -> vector<16x512xf32>
    %c0_81 = arith.constant 0 : index
    %c0_82 = arith.constant 0 : index
    %c0_83 = arith.constant 0 : index
    %205 = vector.load %arg6[%c0_81, %c0_82, %c0_83] : memref<1x1x512xf32, #tpu.memory_space<vmem>>, vector<1x1x512xf32>
    %206 = vector.shape_cast %205 : vector<1x1x512xf32> to vector<1x512xf32>
    %207 = vector.broadcast %206 : vector<1x512xf32> to vector<16x512xf32>
    %208 = arith.addf %204, %207 : vector<16x512xf32>
    %209 = arith.addf %208, %4 : vector<16x512xf32>
    %c0_84 = arith.constant 0 : index
    %c0_85 = arith.constant 0 : index
    %c0_86 = arith.constant 0 : index
    %210 = vector.load %arg7[%c0_84, %c0_85, %c0_86] : memref<1x1x512xf32, #tpu.memory_space<vmem>>, vector<1x1x512xf32>
    %211 = vector.shape_cast %210 : vector<1x1x512xf32> to vector<1x512xf32>
    %c0_87 = arith.constant 0 : index
    %c0_88 = arith.constant 0 : index
    %c0_89 = arith.constant 0 : index
    %212 = vector.load %arg8[%c0_87, %c0_88, %c0_89] : memref<1x1x512xf32, #tpu.memory_space<vmem>>, vector<1x1x512xf32>
    %213 = vector.shape_cast %212 : vector<1x1x512xf32> to vector<1x512xf32>
    %cst_90 = arith.constant dense<0.000000e+00> : vector<16xf32>
    %214 = vector.multi_reduction <add>, %209, %cst_90 [1] : vector<16x512xf32> to vector<16xf32>
    %215 = vector.shape_cast %214 : vector<16xf32> to vector<16x1xf32>
    %cst_91 = arith.constant 5.120000e+02 : f32
    %216 = vector.broadcast %cst_91 : f32 to vector<16x1xf32>
    %217 = arith.divf %215, %216 : vector<16x1xf32>
    %218 = vector.broadcast %217 : vector<16x1xf32> to vector<16x512xf32>
    %219 = arith.subf %209, %218 : vector<16x512xf32>
    %220 = arith.mulf %219, %219 : vector<16x512xf32>
    %cst_92 = arith.constant dense<0.000000e+00> : vector<16xf32>
    %221 = vector.multi_reduction <add>, %220, %cst_92 [1] : vector<16x512xf32> to vector<16xf32>
    %222 = vector.shape_cast %221 : vector<16xf32> to vector<16x1xf32>
    %cst_93 = arith.constant 5.120000e+02 : f32
    %223 = vector.broadcast %cst_93 : f32 to vector<16x1xf32>
    %224 = arith.divf %222, %223 : vector<16x1xf32>
    %225 = vector.broadcast %217 : vector<16x1xf32> to vector<16x512xf32>
    %226 = arith.subf %209, %225 : vector<16x512xf32>
    %cst_94 = arith.constant 9.99999974E-6 : f32
    %227 = vector.broadcast %cst_94 : f32 to vector<16x1xf32>
    %228 = arith.addf %224, %227 : vector<16x1xf32>
    %229 = math.rsqrt %228 : vector<16x1xf32>
    %230 = vector.broadcast %229 : vector<16x1xf32> to vector<16x512xf32>
    %231 = arith.mulf %226, %230 : vector<16x512xf32>
    %232 = vector.broadcast %211 : vector<1x512xf32> to vector<16x512xf32>
    %233 = arith.mulf %231, %232 : vector<16x512xf32>
    %234 = vector.broadcast %213 : vector<1x512xf32> to vector<16x512xf32>
    %235 = arith.addf %233, %234 : vector<16x512xf32>
    %236 = arith.addf %4, %235 : vector<16x512xf32>
    %c0_95 = arith.constant 0 : index
    %c0_96 = arith.constant 0 : index
    %c0_97 = arith.constant 0 : index
    %237 = vector.load %arg9[%c0_95, %c0_96, %c0_97] : memref<1x1x512xf32, #tpu.memory_space<vmem>>, vector<1x1x512xf32>
    %238 = vector.shape_cast %237 : vector<1x1x512xf32> to vector<1x512xf32>
    %c0_98 = arith.constant 0 : index
    %c0_99 = arith.constant 0 : index
    %c0_100 = arith.constant 0 : index
    %239 = vector.load %arg10[%c0_98, %c0_99, %c0_100] : memref<1x1x512xf32, #tpu.memory_space<vmem>>, vector<1x1x512xf32>
    %240 = vector.shape_cast %239 : vector<1x1x512xf32> to vector<1x512xf32>
    %cst_101 = arith.constant dense<0.000000e+00> : vector<16xf32>
    %241 = vector.multi_reduction <add>, %236, %cst_101 [1] : vector<16x512xf32> to vector<16xf32>
    %242 = vector.shape_cast %241 : vector<16xf32> to vector<16x1xf32>
    %cst_102 = arith.constant 5.120000e+02 : f32
    %243 = vector.broadcast %cst_102 : f32 to vector<16x1xf32>
    %244 = arith.divf %242, %243 : vector<16x1xf32>
    %245 = vector.broadcast %244 : vector<16x1xf32> to vector<16x512xf32>
    %246 = arith.subf %236, %245 : vector<16x512xf32>
    %247 = arith.mulf %246, %246 : vector<16x512xf32>
    %cst_103 = arith.constant dense<0.000000e+00> : vector<16xf32>
    %248 = vector.multi_reduction <add>, %247, %cst_103 [1] : vector<16x512xf32> to vector<16xf32>
    %249 = vector.shape_cast %248 : vector<16xf32> to vector<16x1xf32>
    %cst_104 = arith.constant 5.120000e+02 : f32
    %250 = vector.broadcast %cst_104 : f32 to vector<16x1xf32>
    %251 = arith.divf %249, %250 : vector<16x1xf32>
    %252 = vector.broadcast %244 : vector<16x1xf32> to vector<16x512xf32>
    %253 = arith.subf %236, %252 : vector<16x512xf32>
    %cst_105 = arith.constant 9.99999974E-6 : f32
    %254 = vector.broadcast %cst_105 : f32 to vector<16x1xf32>
    %255 = arith.addf %251, %254 : vector<16x1xf32>
    %256 = math.rsqrt %255 : vector<16x1xf32>
    %257 = vector.broadcast %256 : vector<16x1xf32> to vector<16x512xf32>
    %258 = arith.mulf %253, %257 : vector<16x512xf32>
    %259 = vector.broadcast %238 : vector<1x512xf32> to vector<16x512xf32>
    %260 = arith.mulf %258, %259 : vector<16x512xf32>
    %261 = vector.broadcast %240 : vector<1x512xf32> to vector<16x512xf32>
    %262 = arith.addf %260, %261 : vector<16x512xf32>
    %263 = arith.truncf %262 : vector<16x512xf32> to vector<16x512xbf16>
    %c0_106 = arith.constant 0 : index
    %c0_107 = arith.constant 0 : index
    %c0_108 = arith.constant 0 : index
    %264 = vector.load %arg11[%c0_106, %c0_107, %c0_108] : memref<1x512x2048xbf16, #tpu.memory_space<vmem>>, vector<1x512x2048xbf16>
    %265 = vector.shape_cast %264 : vector<1x512x2048xbf16> to vector<512x2048xbf16>
    %cst_109 = arith.constant dense<0.000000e+00> : vector<16x2048xf32>
    %266 = tpu.matmul %263, %265, %cst_109 {dimension_numbers = #tpu.dot_dimension_numbers<[1], [0], [0], [1], [0, 0, 1, 1], [], []>} : vector<16x512xbf16>, vector<512x2048xbf16>, vector<16x2048xf32> -> vector<16x2048xf32>
    %c0_110 = arith.constant 0 : index
    %c0_111 = arith.constant 0 : index
    %c0_112 = arith.constant 0 : index
    %267 = vector.load %arg12[%c0_110, %c0_111, %c0_112] : memref<1x1x2048xf32, #tpu.memory_space<vmem>>, vector<1x1x2048xf32>
    %268 = vector.shape_cast %267 : vector<1x1x2048xf32> to vector<1x2048xf32>
    %269 = vector.broadcast %268 : vector<1x2048xf32> to vector<16x2048xf32>
    %270 = arith.addf %266, %269 : vector<16x2048xf32>
    %cst_113 = arith.constant 0.000000e+00 : f32
    %271 = vector.broadcast %cst_113 : f32 to vector<16x2048xf32>
    %272 = arith.maximumf %270, %271 : vector<16x2048xf32>
    %273 = arith.truncf %272 : vector<16x2048xf32> to vector<16x2048xbf16>
    %c0_114 = arith.constant 0 : index
    %c0_115 = arith.constant 0 : index
    %c0_116 = arith.constant 0 : index
    %274 = vector.load %arg13[%c0_114, %c0_115, %c0_116] : memref<1x2048x512xbf16, #tpu.memory_space<vmem>>, vector<1x2048x512xbf16>
    %275 = vector.shape_cast %274 : vector<1x2048x512xbf16> to vector<2048x512xbf16>
    %cst_117 = arith.constant dense<0.000000e+00> : vector<16x512xf32>
    %276 = tpu.matmul %273, %275, %cst_117 {dimension_numbers = #tpu.dot_dimension_numbers<[1], [0], [0], [1], [0, 0, 1, 1], [], []>} : vector<16x2048xbf16>, vector<2048x512xbf16>, vector<16x512xf32> -> vector<16x512xf32>
    %c0_118 = arith.constant 0 : index
    %c0_119 = arith.constant 0 : index
    %c0_120 = arith.constant 0 : index
    %277 = vector.load %arg14[%c0_118, %c0_119, %c0_120] : memref<1x1x512xf32, #tpu.memory_space<vmem>>, vector<1x1x512xf32>
    %278 = vector.shape_cast %277 : vector<1x1x512xf32> to vector<1x512xf32>
    %279 = vector.broadcast %278 : vector<1x512xf32> to vector<16x512xf32>
    %280 = arith.addf %276, %279 : vector<16x512xf32>
    %281 = arith.addf %280, %262 : vector<16x512xf32>
    %c0_121 = arith.constant 0 : index
    %c0_122 = arith.constant 0 : index
    %c0_123 = arith.constant 0 : index
    %282 = vector.load %arg15[%c0_121, %c0_122, %c0_123] : memref<1x1x512xf32, #tpu.memory_space<vmem>>, vector<1x1x512xf32>
    %283 = vector.shape_cast %282 : vector<1x1x512xf32> to vector<1x512xf32>
    %c0_124 = arith.constant 0 : index
    %c0_125 = arith.constant 0 : index
    %c0_126 = arith.constant 0 : index
    %284 = vector.load %arg16[%c0_124, %c0_125, %c0_126] : memref<1x1x512xf32, #tpu.memory_space<vmem>>, vector<1x1x512xf32>
    %285 = vector.shape_cast %284 : vector<1x1x512xf32> to vector<1x512xf32>
    %cst_127 = arith.constant dense<0.000000e+00> : vector<16xf32>
    %286 = vector.multi_reduction <add>, %281, %cst_127 [1] : vector<16x512xf32> to vector<16xf32>
    %287 = vector.shape_cast %286 : vector<16xf32> to vector<16x1xf32>
    %cst_128 = arith.constant 5.120000e+02 : f32
    %288 = vector.broadcast %cst_128 : f32 to vector<16x1xf32>
    %289 = arith.divf %287, %288 : vector<16x1xf32>
    %290 = vector.broadcast %289 : vector<16x1xf32> to vector<16x512xf32>
    %291 = arith.subf %281, %290 : vector<16x512xf32>
    %292 = arith.mulf %291, %291 : vector<16x512xf32>
    %cst_129 = arith.constant dense<0.000000e+00> : vector<16xf32>
    %293 = vector.multi_reduction <add>, %292, %cst_129 [1] : vector<16x512xf32> to vector<16xf32>
    %294 = vector.shape_cast %293 : vector<16xf32> to vector<16x1xf32>
    %cst_130 = arith.constant 5.120000e+02 : f32
    %295 = vector.broadcast %cst_130 : f32 to vector<16x1xf32>
    %296 = arith.divf %294, %295 : vector<16x1xf32>
    %297 = vector.broadcast %289 : vector<16x1xf32> to vector<16x512xf32>
    %298 = arith.subf %281, %297 : vector<16x512xf32>
    %cst_131 = arith.constant 9.99999974E-6 : f32
    %299 = vector.broadcast %cst_131 : f32 to vector<16x1xf32>
    %300 = arith.addf %296, %299 : vector<16x1xf32>
    %301 = math.rsqrt %300 : vector<16x1xf32>
    %302 = vector.broadcast %301 : vector<16x1xf32> to vector<16x512xf32>
    %303 = arith.mulf %298, %302 : vector<16x512xf32>
    %304 = vector.broadcast %283 : vector<1x512xf32> to vector<16x512xf32>
    %305 = arith.mulf %303, %304 : vector<16x512xf32>
    %306 = vector.broadcast %285 : vector<1x512xf32> to vector<16x512xf32>
    %307 = arith.addf %305, %306 : vector<16x512xf32>
    %308 = arith.addf %262, %307 : vector<16x512xf32>
    %c0_132 = arith.constant 0 : index
    %c0_133 = arith.constant 0 : index
    %c0_134 = arith.constant 0 : index
    %309 = vector.load %arg17[%c0_132, %c0_133, %c0_134] : memref<1x1x512xf32, #tpu.memory_space<vmem>>, vector<1x1x512xf32>
    %310 = vector.shape_cast %309 : vector<1x1x512xf32> to vector<1x512xf32>
    %c0_135 = arith.constant 0 : index
    %c0_136 = arith.constant 0 : index
    %c0_137 = arith.constant 0 : index
    %311 = vector.load %arg18[%c0_135, %c0_136, %c0_137] : memref<1x1x512xf32, #tpu.memory_space<vmem>>, vector<1x1x512xf32>
    %312 = vector.shape_cast %311 : vector<1x1x512xf32> to vector<1x512xf32>
    %cst_138 = arith.constant dense<0.000000e+00> : vector<16xf32>
    %313 = vector.multi_reduction <add>, %308, %cst_138 [1] : vector<16x512xf32> to vector<16xf32>
    %314 = vector.shape_cast %313 : vector<16xf32> to vector<16x1xf32>
    %cst_139 = arith.constant 5.120000e+02 : f32
    %315 = vector.broadcast %cst_139 : f32 to vector<16x1xf32>
    %316 = arith.divf %314, %315 : vector<16x1xf32>
    %317 = vector.broadcast %316 : vector<16x1xf32> to vector<16x512xf32>
    %318 = arith.subf %308, %317 : vector<16x512xf32>
    %319 = arith.mulf %318, %318 : vector<16x512xf32>
    %cst_140 = arith.constant dense<0.000000e+00> : vector<16xf32>
    %320 = vector.multi_reduction <add>, %319, %cst_140 [1] : vector<16x512xf32> to vector<16xf32>
    %321 = vector.shape_cast %320 : vector<16xf32> to vector<16x1xf32>
    %cst_141 = arith.constant 5.120000e+02 : f32
    %322 = vector.broadcast %cst_141 : f32 to vector<16x1xf32>
    %323 = arith.divf %321, %322 : vector<16x1xf32>
    %324 = vector.broadcast %316 : vector<16x1xf32> to vector<16x512xf32>
    %325 = arith.subf %308, %324 : vector<16x512xf32>
    %cst_142 = arith.constant 9.99999974E-6 : f32
    %326 = vector.broadcast %cst_142 : f32 to vector<16x1xf32>
    %327 = arith.addf %323, %326 : vector<16x1xf32>
    %328 = math.rsqrt %327 : vector<16x1xf32>
    %329 = vector.broadcast %328 : vector<16x1xf32> to vector<16x512xf32>
    %330 = arith.mulf %325, %329 : vector<16x512xf32>
    %331 = vector.broadcast %310 : vector<1x512xf32> to vector<16x512xf32>
    %332 = arith.mulf %330, %331 : vector<16x512xf32>
    %333 = vector.broadcast %312 : vector<1x512xf32> to vector<16x512xf32>
    %334 = arith.addf %332, %333 : vector<16x512xf32>
    %335 = vector.shape_cast %334 : vector<16x512xf32> to vector<2x8x512xf32>
    %c0_143 = arith.constant 0 : index
    %c0_144 = arith.constant 0 : index
    %c0_145 = arith.constant 0 : index
    %336 = vector.load %arg20[%c0_143, %c0_144, %c0_145] : memref<2x8x512xf32, #tpu.memory_space<vmem>>, vector<2x8x512xf32>
    tpu.vector_store %arg20[%c0_143, %c0_144, %c0_145], %335 {strides = array<i32>} : memref<2x8x512xf32, #tpu.memory_space<vmem>>, vector<2x8x512xf32>,
    %c5_i32 = arith.constant 5 : i32
    %337 = arith.cmpi eq, %arg1, %c5_i32 : i32
    %338 = arith.extui %337 : i1 to i32
    %c0_i32_146 = arith.constant 0 : i32
    %339 = arith.cmpi ne, %338, %c0_i32_146 : i32
    scf.if %339 {
      %c0_147 = arith.constant 0 : index
      %c0_148 = arith.constant 0 : index
      %c0_149 = arith.constant 0 : index
      %340 = vector.load %arg19[%c0_147, %c0_148, %c0_149] : memref<2x8x512xf32, #tpu.memory_space<vmem>>, vector<2x8x512xf32>
      tpu.vector_store %arg19[%c0_147, %c0_148, %c0_149], %335 {strides = array<i32>} : memref<2x8x512xf32, #tpu.memory_space<vmem>>, vector<2x8x512xf32>,
    } else {
    }
    return
  }
  func.func @transform_0(%arg0: i32, %arg1: i32) -> (i32, i32, i32) {
    %c0_i32 = arith.constant 0 : i32
    %c0_i32_0 = arith.constant 0 : i32
    %c0_i32_1 = arith.constant 0 : i32
    return %arg0, %c0_i32, %c0_i32_0 : i32, i32, i32
  }
  func.func @transform_1(%arg0: i32, %arg1: i32) -> (i32, i32, i32) {
    %c0_i32 = arith.constant 0 : i32
    %c0_i32_0 = arith.constant 0 : i32
    %c0_i32_1 = arith.constant 0 : i32
    return %arg1, %c0_i32, %c0_i32_0 : i32, i32, i32
  }
  func.func @transform_2(%arg0: i32, %arg1: i32) -> (i32, i32, i32) {
    %c0_i32 = arith.constant 0 : i32
    %c0_i32_0 = arith.constant 0 : i32
    %c0_i32_1 = arith.constant 0 : i32
    return %arg1, %c0_i32, %c0_i32_0 : i32, i32, i32
  }
  func.func @transform_3(%arg0: i32, %arg1: i32) -> (i32, i32, i32) {
    %c0_i32 = arith.constant 0 : i32
    %c0_i32_0 = arith.constant 0 : i32
    %c0_i32_1 = arith.constant 0 : i32
    return %arg1, %c0_i32, %c0_i32_0 : i32, i32, i32
  }
  func.func @transform_4(%arg0: i32, %arg1: i32) -> (i32, i32, i32) {
    %c0_i32 = arith.constant 0 : i32
    %c0_i32_0 = arith.constant 0 : i32
    %c0_i32_1 = arith.constant 0 : i32
    return %arg1, %c0_i32, %c0_i32_0 : i32, i32, i32
  }
  func.func @transform_5(%arg0: i32, %arg1: i32) -> (i32, i32, i32) {
    %c0_i32 = arith.constant 0 : i32
    %c0_i32_0 = arith.constant 0 : i32
    %c0_i32_1 = arith.constant 0 : i32
    return %arg1, %c0_i32, %c0_i32_0 : i32, i32, i32
  }
  func.func @transform_6(%arg0: i32, %arg1: i32) -> (i32, i32, i32) {
    %c0_i32 = arith.constant 0 : i32
    %c0_i32_0 = arith.constant 0 : i32
    %c0_i32_1 = arith.constant 0 : i32
    return %arg1, %c0_i32, %c0_i32_0 : i32, i32, i32
  }
  func.func @transform_7(%arg0: i32, %arg1: i32) -> (i32, i32, i32) {
    %c0_i32 = arith.constant 0 : i32
    %c0_i32_0 = arith.constant 0 : i32
    %c0_i32_1 = arith.constant 0 : i32
    return %arg1, %c0_i32, %c0_i32_0 : i32, i32, i32
  }
  func.func @transform_8(%arg0: i32, %arg1: i32) -> (i32, i32, i32) {
    %c0_i32 = arith.constant 0 : i32
    %c0_i32_0 = arith.constant 0 : i32
    %c0_i32_1 = arith.constant 0 : i32
    return %arg1, %c0_i32, %c0_i32_0 : i32, i32, i32
  }
  func.func @transform_9(%arg0: i32, %arg1: i32) -> (i32, i32, i32) {
    %c0_i32 = arith.constant 0 : i32
    %c0_i32_0 = arith.constant 0 : i32
    %c0_i32_1 = arith.constant 0 : i32
    return %arg1, %c0_i32, %c0_i32_0 : i32, i32, i32
  }
  func.func @transform_10(%arg0: i32, %arg1: i32) -> (i32, i32, i32) {
    %c0_i32 = arith.constant 0 : i32
    %c0_i32_0 = arith.constant 0 : i32
    %c0_i32_1 = arith.constant 0 : i32
    return %arg1, %c0_i32, %c0_i32_0 : i32, i32, i32
  }
  func.func @transform_11(%arg0: i32, %arg1: i32) -> (i32, i32, i32) {
    %c0_i32 = arith.constant 0 : i32
    %c0_i32_0 = arith.constant 0 : i32
    %c0_i32_1 = arith.constant 0 : i32
    return %arg1, %c0_i32, %c0_i32_0 : i32, i32, i32
  }
  func.func @transform_12(%arg0: i32, %arg1: i32) -> (i32, i32, i32) {
    %c0_i32 = arith.constant 0 : i32
    %c0_i32_0 = arith.constant 0 : i32
    %c0_i32_1 = arith.constant 0 : i32
    return %arg1, %c0_i32, %c0_i32_0 : i32, i32, i32
  }
  func.func @transform_13(%arg0: i32, %arg1: i32) -> (i32, i32, i32) {
    %c0_i32 = arith.constant 0 : i32
    %c0_i32_0 = arith.constant 0 : i32
    %c0_i32_1 = arith.constant 0 : i32
    return %arg1, %c0_i32, %c0_i32_0 : i32, i32, i32
  }
  func.func @transform_14(%arg0: i32, %arg1: i32) -> (i32, i32, i32) {
    %c0_i32 = arith.constant 0 : i32
    %c0_i32_0 = arith.constant 0 : i32
    %c0_i32_1 = arith.constant 0 : i32
    return %arg1, %c0_i32, %c0_i32_0 : i32, i32, i32
  }
  func.func @transform_15(%arg0: i32, %arg1: i32) -> (i32, i32, i32) {
    %c0_i32 = arith.constant 0 : i32
    %c0_i32_0 = arith.constant 0 : i32
    %c0_i32_1 = arith.constant 0 : i32
    return %arg1, %c0_i32, %c0_i32_0 : i32, i32, i32
  }
  func.func @transform_16(%arg0: i32, %arg1: i32) -> (i32, i32, i32) {
    %c0_i32 = arith.constant 0 : i32
    %c0_i32_0 = arith.constant 0 : i32
    %c0_i32_1 = arith.constant 0 : i32
    return %arg1, %c0_i32, %c0_i32_0 : i32, i32, i32
  }
  func.func @transform_17(%arg0: i32, %arg1: i32) -> (i32, i32, i32) {
    %c0_i32 = arith.constant 0 : i32
    %c0_i32_0 = arith.constant 0 : i32
    %c0_i32_1 = arith.constant 0 : i32
    return %arg0, %c0_i32, %c0_i32_0 : i32, i32, i32
  }
}

</mosaic_0001>

<bundles_post_ra>
// kernel: tpu_custom_call.1
= control target key start
LH: loop header
LB: loop body
LE: loop exit
PB: predicated region body
PF: predicated region fallthrough
CT: control target
= control target key end

     0   :  { %s23571_s0 = inlined_call_operand.hbm [shape: f32[2,8,512], index: 0, kind: input, shape index: {}]   ;;  %s23572_s1 = inlined_call_operand.hbm [shape: bf16[6,512,1536], index: 1, kind: input, shape index: {}]   ;;  %s23573_s2 = inlined_call_operand.hbm [shape: f32[6,1,1536], index: 2, kind: input, shape index: {}]   ;;  %s23574_s3 = inlined_call_operand.hbm [shape: bf16[6,512,512], index: 3, kind: input, shape index: {}]   ;;  %s23575_s4 = inlined_call_operand.hbm [shape: f32[6,1,512], index: 4, kind: input, shape index: {}]   ;;  %s23576_s5 = inlined_call_operand.hbm [shape: f32[6,1,512], index: 5, kind: input, shape index: {}]   ;;  %s23577_s6 = inlined_call_operand.hbm [shape: f32[6,1,512], index: 6, kind: input, shape index: {}]   ;;  %s23578_s7 = inlined_call_operand.hbm [shape: f32[6,1,512], index: 7, kind: input, shape index: {}]   ;;  %s23579_s8 = inlined_call_operand.hbm [shape: f32[6,1,512], index: 8, kind: input, shape index: {}]   ;;  %s23580_s9 = inlined_call_operand.hbm [shape: bf16[6,512,2048], index: 9, kind: input, shape index: {}]   ;;  %s23581_s10 = inlined_call_operand.hbm [shape: f32[6,1,2048], index: 10, kind: input, shape index: {}]   ;;  %s23582_s11 = inlined_call_operand.hbm [shape: bf16[6,2048,512], index: 11, kind: input, shape index: {}]   ;;  %s23583_s12 = inlined_call_operand.hbm [shape: f32[6,1,512], index: 12, kind: input, shape index: {}]   ;;  %s23584_s13 = inlined_call_operand.hbm [shape: f32[6,1,512], index: 13, kind: input, shape index: {}]   ;;  %s23585_s14 = inlined_call_operand.hbm [shape: f32[6,1,512], index: 14, kind: input, shape index: {}]   ;;  %s23586_s15 = inlined_call_operand.hbm [shape: f32[6,1,512], index: 15, kind: input, shape index: {}]   ;;  %s23587_s16 = inlined_call_operand.hbm [shape: f32[6,1,512], index: 16, kind: input, shape index: {}]   ;;  %s23588_s17 = inlined_call_operand.hbm [shape: f32[2,8,512], index: 17, kind: output, shape index: {}]  }
   0x1   :  { %23633 = sst [smem:[#allocation64_spill]] %s23571_s0 }
   0x2   :  { %23634 = sst [smem:[#allocation65_spill]] %s23572_s1 }
   0x3   :  { %23635 = sst [smem:[#allocation66_spill]] %s23574_s3 }
   0x4   :  { %23636 = sst [smem:[#allocation67_spill]] %s23577_s6 }
   0x5   :  { %23637 = sst [smem:[#allocation68_spill]] %s23579_s8 }
   0x6   :  { %23638 = sst [smem:[#allocation69_spill]] %s23581_s10 }
   0x7   :  { %23639 = sst [smem:[#allocation70_spill]] %s23583_s12 }
   0x8   :  { %23640 = sst [smem:[#allocation71_spill]] %s23585_s14 }
   0x9   :  { %23641 = sst [smem:[#allocation72_spill]] %s23587_s16 }
   0xa   :  { %23642 = sst [smem:[#allocation73_spill]] %s23588_s17 }
   0xb   :  { %22 = vsyncpa [#allocation5], 0 }
   0xc   :  { %23 = vsyncpa [#allocation8], 0 }
   0xd   :  { %25 = vsyncpa [#allocation8 + $0x1], 0 }
   0xe   :  { %26 = vsyncpa [#allocation11], 0 }
   0xf   :  { %28 = vsyncpa [#allocation11 + $0x1], 0 }
  0x10   :  { %29 = vsyncpa [#allocation14], 0 }
  0x11   :  { %31 = vsyncpa [#allocation14 + $0x1], 0 }
  0x12   :  { %32 = vsyncpa [#allocation17], 0 }
  0x13   :  { %34 = vsyncpa [#allocation17 + $0x1], 0 }
  0x14   :  { %35 = vsyncpa [#allocation20], 0 }
  0x15   :  { %37 = vsyncpa [#allocation20 + $0x1], 0 }
  0x16   :  { %38 = vsyncpa [#allocation23], 0 }
  0x17   :  { %40 = vsyncpa [#allocation23 + $0x1], 0 }
  0x18   :  { %41 = vsyncpa [#allocation26], 0 }
  0x19   :  { %43 = vsyncpa [#allocation26 + $0x1], 0 }
  0x1a   :  { %44 = vsyncpa [#allocation29], 0 }
  0x1b   :  { %46 = vsyncpa [#allocation29 + $0x1], 0 }
  0x1c   :  { %47 = vsyncpa [#allocation6], 0  ;;  %s20637_s24 = smov 0   ;;  %s20639_s25 = smov 0  }
  0x1d   :  { %s20641_s26 = smov 0   ;;  %s20643_s27 = smov 0  }
  0x1e   :  { %s20645_s28 = smov 0   ;;  %s20647_s29 = smov 0  }
  0x1f LB: > { %23643 = sst [smem:[#allocation42_spill]] %s20498_s25  ;;  %s20666_s0 = sadd.s32 4294967295, %s20514_s29   ;;  %s20514_s29 = sphi %s20647_s29, %s53_s29   ;;  %s20510_s28 = sphi %s20645_s28, %s23720_s28   ;;  %s20506_s27 = sphi %s20643_s27, %s23719_s27   ;;  %s20502_s26 = sphi %s20641_s26, %s23717_s26   ;;  %s20498_s25 = sphi %s20639_s25, %s23716_s25   ;;  %s20494_s24 = sphi %s20637_s24, %s23715_s24  }
  0x20   : > { %23644 = sst [smem:[#allocation43_spill]] %s20502_s26  ;;  %s62_s30 = sadd.s32 1, %s20510_s28 }
  0x21   : > { %23645 = sst [smem:[#allocation44_spill]] %s20506_s27  ;;  %p63_p0 = scmp.ge.s32.totalorder %s62_s30, 6 }
  0x22   : > { %23646 = sst [smem:[#allocation45_spill]] %s20514_s29  ;;  %s98_s18 = sadd.s32 1, %s20502_s26 }
  0x23   : > { %23647 = sst [smem:[#allocation46_spill]] %s20666_s0  ;;  %p105_p1 = scmp.ne.s32.totalorder %s20502_s26, %s20498_s25 }
  0x24   : > { %p106_p2 = scmp.eq.s32.totalorder %s20514_s29, 0  ;;  %s23722_s30 = smov (%p63_p0, %s62_s30), 0 }
  0x25   : > { %23648 = sst [smem:[#allocation47_spill]] %s23722_s30  ;;  %p111_p4 = scmp.ne.s32.totalorder %s20498_s25, %s20494_s24 }
  0x26   : > { %p20675_p3 = por %p106_p2, %p105_p1  ;;  %s95_s1 = ssub.s32 %s20510_s28, %s23722_s30 }
  0x27   : > { %p112_p5 = scmp.eq.s32.totalorder %s20666_s0, 0  ;;  %p96_p6 = scmp.eq.s32.totalorder %s95_s1, 0 }
  0x28   : > { %p16327_p7 = scmp.ge.s32.totalorder %s20514_s29, 1  ;;  %p538_p9 = scmp.lt.s32.totalorder %s20514_s29, 7 }
  0x29   : > { %p20686_p8 = por %p112_p5, %p111_p4  ;;  %s20516_s23 = smov [#allocation4]  }
  0x2a   : > { %s20692_s21 = scalar_select %p96_p6, %s20502_s26, %s98_s18  }
  0x2b   : > { %s23650_s20 = scalar_select %p20686_p8, 1, 0 }
  0x2c   : > { %23652 = sst [smem:[#allocation49_spill]] %s20692_s21  ;;  %p20694_p10 = pnand %p16327_p7, %p538_p9 }
  0x2d   : > { %23651 = sst [smem:[#allocation48_spill]] %s23650_s20  ;;  %s554_s24 = sshll.u32 %s20516_s23, 4  ;;  %s555_s24 = int_to_ptr.vmem [resolvable:$true] %s554_s24 }
  0x2e   : > { %s23653_s22 = scalar_select %p20694_p10, 1, 0 }
  0x2f   : > { %p18264_p11 = pneg %p20694_p10  ;;  %s19973_s1 = scalar_lea.vmem %s555_s24, 1024 }
  0x30   : > { %23654 = sst [smem:[#allocation50_spill]] %s23653_s22  ;;  %p19974_p0 = scmp.ne.s32.totalorder %s555_s24, %s19973_s1 }
  0x31   : > { %p18265_p12 = pnand %p18264_p11, %p112_p5  ;;  %p19981_p4 = scmp.lt.s32.totalorder %s555_s24, %s555_s24 }
  0x32   : > { %p19982_p6 = scmp.lt.s32.totalorder %s19973_s1, %s19973_s1 }
  0x33   : > { %p19964_p13 = pneg %p18265_p12 }
  0x34   : > { %p19983_p8 = por %p19982_p6, %p19981_p4 }
  0x35   : > { %p19976_p1 = pnand %p19974_p0, %p19964_p13 }
  0x37   : > { %p19977_p2 = pneg %p19976_p1 }
  0x39   : > { %p19984_p7 = pnand %p19983_p8, %p19977_p2 }
  0x3b   : > { %19987 = shalt.err (!%p19984_p7)
}
  0x3c   : > { %s20517_s18 = smov 512   ;;  %s20518_s30 = smov 32  }
  0x3d   : > { %s23655_s27 = sld [smem:[#allocation64_spill]]  ;;  %p16329_p9 = scmp.ge.s32.totalorder %s20514_s29, 6 }
  0x3e   : > { %s20707_s23 = sand.u32 (!%p16329_p9), 1, %s20514_s29   ;;  %s20710_s1 = sand.u32 (!%p16329_p9), 1, %s20502_s26  }
  0x3f   : > { %564 = sbr.rel (%p16329_p9) target bundleno = 292 (0x124), region = 20  ;;  %s23656_s17 = sld [smem:[#allocation65_spill]] (!%p16329_p9) }
  0x40   : > { %s18218_s20 = smul.u32 (!%p16329_p9), 3072, %s20710_s1  ;;  %s20519_s26 = smov (!%p16329_p9), [#allocation7]  }
  0x41   : > { %s18219_s25 = smul.u32 (!%p16329_p9), 49152, %s20510_s28  ;;  %s20004_s29 = sshll.u32 (!%p16329_p9), %s20519_s26, 4  ;;  %s20005_s29 = int_to_ptr.vmem [resolvable:$false] %s20004_s29 }
  0x42   : > { %s20006_s14 = scalar_lea.vmem (!%p16329_p9), %s20005_s29, 98304 }
  0x43   : > { %18267 = dma.hbm_to_vmem [thread:$0]  (!%p18265_p12), %s23655_s27, 1024, %s555_s24, [#allocation5], %s20517_s18, %s20517_s18, %s20518_s30  }
  0x44   : > { %s572_s30 = scalar_lea.vmem [#allocation7], %s18218_s20  ;;  %s20718_s24 = sshll.u32 %s20710_s1, 2 }
  0x45   : > { %s578_s27 = scalar_lea.hbm %s23656_s17, %s18219_s25  ;;  %s579_s21 = sshll.u32 %s572_s30, 4  ;;  %s580_s21 = int_to_ptr.vmem [resolvable:$true] %s579_s21 }
  0x46   : > { %s23605_s18 = scalar_lea.sflag [#allocation8], %s20707_s23  ;;  %s20000_s16 = scalar_lea.vmem %s580_s21, 49152 }
  0x47   : > { %p20001_p8 = scmp.ne.s32.totalorder %s580_s21, %s20000_s16  ;;  %p20007_p13 = scmp.lt.s32.totalorder %s580_s21, %s20005_s29 }
  0x48   : > { %p20008_p0 = scmp.lt.s32.totalorder %s20006_s14, %s20000_s16 }
  0x49   : > { %p20002_p11 = pnand %p20001_p8, %p20675_p3 }
  0x4a   : > { %p20009_p1 = por %p20008_p0, %p20007_p13 }
  0x4b   : > { %p20003_p12 = pneg %p20002_p11 }
  0x4d   : > { %p20010_p2 = pnand %p20009_p1, %p20003_p12 }
  0x4f   : > { %20013 = shalt.err (!%p20010_p2)
}
  0x50   : > { %s20520_s25 = smov 768   ;;  %s20521_s0 = smov 48  }
  0x51   : > { %18226 = dma.hbm_to_vmem [thread:$0]  (%p20675_p3), %s578_s27, 49152, %s580_s21, %s23605_s18, %s20520_s25, %s20520_s25, %s20521_s0  }
  0x52   : > { %s16332_s26 = sshll.u32 %s20710_s1, 10  ;;  %s17980_s20 = sshll.u32 %s20510_s28, 14 }
  0x53   : > { %s23657_s3 = sld [smem:[#allocation66_spill]]  ;;  %s612_s16 = scalar_lea.vmem [#allocation10], %s16332_s26 }
  0x54   : > { %s619_s17 = sshll.u32 %s612_s16, 4  ;;  %s20733_s30 = sshll.u32 %s20510_s28, 6  ;;  %s620_s17 = int_to_ptr.vmem [resolvable:$true] %s619_s17 }
  0x55   : > { %s23604_s12 = scalar_lea.sflag [#allocation11], %s20707_s23  ;;  %s20026_s10 = scalar_lea.vmem %s620_s17, 16384 }
  0x56   : > { %p20027_p4 = scmp.ne.s32.totalorder %s620_s17, %s20026_s10  ;;  %s20522_s8 = smov [#allocation10]  }
  0x57   : > { %s20030_s6 = sshll.u32 %s20522_s8, 4  ;;  %s20031_s6 = int_to_ptr.vmem [resolvable:$false] %s20030_s6 }
  0x58   : > { %p20028_p6 = pnand %p20027_p4, %p20675_p3  ;;  %s20032_s27 = scalar_lea.vmem %s20031_s6, 32768 }
  0x59   : > { %s618_s14 = scalar_lea.hbm %s23657_s3, %s17980_s20  ;;  %p20033_p9 = scmp.lt.s32.totalorder %s620_s17, %s20031_s6 }
  0x5a   : > { %p20029_p7 = pneg %p20028_p6  ;;  %p20034_p8 = scmp.lt.s32.totalorder %s20032_s27, %s20026_s10 }
  0x5c   : > { %p20035_p11 = por %p20034_p8, %p20033_p9 }
  0x5e   : > { %p20036_p12 = pnand %p20035_p11, %p20029_p7 }
  0x60   : > { %20039 = shalt.err (!%p20036_p12)
}
  0x61   : > { %s23607_s21 = smov 256   ;;  %s23609_s25 = smov 16  }
  0x62   : > { %18228 = dma.hbm_to_vmem [thread:$0]  (%p20675_p3), %s618_s14, 16384, %s620_s17, %s23604_s12, %s23607_s21, %s23607_s21, %s23609_s25  }
  0x63   : > { %s658_s10 = scalar_lea.hbm %s23576_s5, %s20733_s30  ;;  %s652_s0 = scalar_lea.vmem [#allocation13], %s20718_s24 }
  0x64   : > { %s660_s26 = sshll.u32 %s652_s0, 4  ;;  %s23606_s20 = scalar_lea.sflag [#allocation14], %s20707_s23  ;;  %s661_s26 = int_to_ptr.vmem [resolvable:$true] %s660_s26 }
  0x65   : > { %s20052_s22 = scalar_lea.vmem %s661_s26, 64  ;;  %s20525_s29 = smov [#allocation13]  }
  0x66   : > { %p20053_p13 = scmp.ne.s32.totalorder %s661_s26, %s20052_s22  ;;  %s20056_s16 = sshll.u32 %s20525_s29, 4  ;;  %s20057_s16 = int_to_ptr.vmem [resolvable:$false] %s20056_s16 }
  0x67   : > { %s20058_s27 = scalar_lea.vmem %s20057_s16, 128  ;;  %p20059_p2 = scmp.lt.s32.totalorder %s661_s26, %s20057_s16 }
  0x68   : > { %p20054_p0 = pnand %p20053_p13, %p20675_p3  ;;  %p20060_p4 = scmp.lt.s32.totalorder %s20058_s27, %s20052_s22 }
  0x6a   : > { %p20055_p1 = pneg %p20054_p0  ;;  %p20061_p6 = por %p20060_p4, %p20059_p2 }
  0x6c   : > { %p20062_p7 = pnand %p20061_p6, %p20055_p1 }
  0x6e   : > { %20065 = shalt.err (!%p20062_p7)
}
  0x6f   : > { %18230 = dma.hbm_to_vmem [thread:$0]  (%p20675_p3), %s658_s10, 64, %s661_s26, %s23606_s20  }
  0x70   : > { %s696_s8 = scalar_lea.hbm %s23578_s7, %s20733_s30  ;;  %s690_s6 = scalar_lea.vmem [#allocation16], %s20718_s24 }
  0x71   : > { %s698_s0 = sshll.u32 %s690_s6, 4  ;;  %s16350_s22 = sshll.u32 %s20710_s1, 12  ;;  %s699_s0 = int_to_ptr.vmem [resolvable:$true] %s698_s0 }
  0x72   : > { %s23608_s29 = scalar_lea.sflag [#allocation17], %s20707_s23  ;;  %s20078_s16 = scalar_lea.vmem %s699_s0, 64 }
  0x73   : > { %p20079_p9 = scmp.ne.s32.totalorder %s699_s0, %s20078_s16  ;;  %s20526_s27 = smov [#allocation16]  }
  0x74   : > { %s20082_s12 = sshll.u32 %s20526_s27, 4  ;;  %s20083_s12 = int_to_ptr.vmem [resolvable:$false] %s20082_s12 }
  0x75   : > { %p20080_p8 = pnand %p20079_p9, %p20675_p3  ;;  %s20084_s18 = scalar_lea.vmem %s20083_s12, 128 }
  0x76   : > { %p20085_p12 = scmp.lt.s32.totalorder %s699_s0, %s20083_s12  ;;  %p20086_p13 = scmp.lt.s32.totalorder %s20084_s18, %s20078_s16 }
  0x77   : > { %p20081_p11 = pneg %p20080_p8 }
  0x78   : > { %p20087_p0 = por %p20086_p13, %p20085_p12 }
  0x7a   : > { %p20088_p1 = pnand %p20087_p0, %p20081_p11 }
  0x7c   : > { %20091 = shalt.err (!%p20088_p1)
}
  0x7d   : > { %18232 = dma.hbm_to_vmem [thread:$0]  (%p20675_p3), %s696_s8, 64, %s699_s0, %s23608_s29  }
  0x7e   : > { %s17986_s10 = sshll.u32 %s20510_s28, 16  ;;  %s728_s12 = scalar_lea.vmem [#allocation19], %s16350_s22 }
  0x7f   : > { %s734_s17 = scalar_lea.hbm %s23580_s9, %s17986_s10  ;;  %s735_s18 = sshll.u32 %s728_s12, 4  ;;  %s736_s18 = int_to_ptr.vmem [resolvable:$true] %s735_s18 }
  0x80   : > { %s725_s6 = scalar_lea.sflag [#allocation20], %s20707_s23  ;;  %s20104_s16 = scalar_lea.vmem %s736_s18, 65536 }
  0x81   : > { %p20105_p2 = scmp.ne.s32.totalorder %s736_s18, %s20104_s16  ;;  %s20527_s27 = smov [#allocation19]  }
  0x82   : > { %s20108_s20 = sshll.u32 %s20527_s27, 4  ;;  %s20109_s20 = int_to_ptr.vmem [resolvable:$false] %s20108_s20 }
  0x83   : > { %p20106_p4 = pnand %p20105_p2, %p20675_p3  ;;  %s20110_s21 = scalar_lea.vmem %s20109_s20, 131072 }
  0x84   : > { %p20111_p7 = scmp.lt.s32.totalorder %s736_s18, %s20109_s20  ;;  %p20112_p9 = scmp.lt.s32.totalorder %s20110_s21, %s20104_s16 }
  0x85   : > { %p20107_p6 = pneg %p20106_p4 }
  0x86   : > { %p20113_p8 = por %p20112_p9, %p20111_p7 }
  0x88   : > { %p20114_p11 = pnand %p20113_p8, %p20107_p6 }
  0x8a   : > { %20117 = shalt.err (!%p20114_p11)
}
  0x8b   : > { %s20528_s8 = smov 1024   ;;  %s20529_s0 = smov 64  }
  0x8c   : > { %18234 = dma.hbm_to_vmem [thread:$0]  (%p20675_p3), %s734_s17, 65536, %s736_s18, %s725_s6, %s20528_s8, %s20528_s8, %s20529_s0  }
  0x8d   : > { %s774_s12 = scalar_lea.hbm %s23582_s11, %s17986_s10  ;;  %s768_s20 = scalar_lea.vmem [#allocation22], %s16350_s22 }
  0x8e   : > { %s775_s21 = sshll.u32 %s768_s20, 4  ;;  %s23611_s16 = scalar_lea.sflag [#allocation23], %s20707_s23  ;;  %s776_s21 = int_to_ptr.vmem [resolvable:$true] %s775_s21 }
  0x8f   : > { %s20130_s27 = scalar_lea.vmem %s776_s21, 65536  ;;  %s20530_s29 = smov [#allocation22]  }
  0x90   : > { %p20131_p12 = scmp.ne.s32.totalorder %s776_s21, %s20130_s27  ;;  %s20134_s25 = sshll.u32 %s20530_s29, 4  ;;  %s20135_s25 = int_to_ptr.vmem [resolvable:$false] %s20134_s25 }
  0x91   : > { %s20136_s3 = scalar_lea.vmem %s20135_s25, 131072  ;;  %p20137_p1 = scmp.lt.s32.totalorder %s776_s21, %s20135_s25 }
  0x92   : > { %p20132_p13 = pnand %p20131_p12, %p20675_p3  ;;  %p20138_p2 = scmp.lt.s32.totalorder %s20136_s3, %s20130_s27 }
  0x94   : > { %p20133_p0 = pneg %p20132_p13  ;;  %p20139_p4 = por %p20138_p2, %p20137_p1 }
  0x96   : > { %p20140_p6 = pnand %p20139_p4, %p20133_p0 }
  0x98   : > { %20143 = shalt.err (!%p20140_p6)
}
  0x99   : > { %s23658_s22 = smov 16   ;;  %s23659_s10 = smov 256  }
  0x9a   : > { %18236 = dma.hbm_to_vmem [thread:$0]  (%p20675_p3), %s774_s12, 65536, %s776_s21, %s23611_s16, %s23659_s10, %s23659_s10, %s23658_s22  }
  0x9b   : > { %s814_s25 = scalar_lea.hbm %s23584_s13, %s20733_s30  ;;  %s808_s3 = scalar_lea.vmem [#allocation25], %s20718_s24 }
  0x9c   : > { %s816_s18 = sshll.u32 %s808_s3, 4  ;;  %s23610_s8 = scalar_lea.sflag [#allocation26], %s20707_s23  ;;  %s817_s18 = int_to_ptr.vmem [resolvable:$true] %s816_s18 }
  0x9d   : > { %s20156_s0 = scalar_lea.vmem %s817_s18, 64  ;;  %s20531_s26 = smov [#allocation25]  }
  0x9e   : > { %p20157_p7 = scmp.ne.s32.totalorder %s817_s18, %s20156_s0  ;;  %s20160_s14 = sshll.u32 %s20531_s26, 4  ;;  %s20161_s14 = int_to_ptr.vmem [resolvable:$false] %s20160_s14 }
  0x9f   : > { %s20162_s20 = scalar_lea.vmem %s20161_s14, 128  ;;  %p20163_p11 = scmp.lt.s32.totalorder %s817_s18, %s20161_s14 }
  0xa0   : > { %p20158_p9 = pnand %p20157_p7, %p20675_p3  ;;  %p20164_p12 = scmp.lt.s32.totalorder %s20162_s20, %s20156_s0 }
  0xa2   : > { %p20159_p8 = pneg %p20158_p9  ;;  %p20165_p13 = por %p20164_p12, %p20163_p11 }
  0xa4   : > { %p20166_p0 = pnand %p20165_p13, %p20159_p8 }
  0xa6   : > { %20169 = shalt.err (!%p20166_p0)
}
  0xa7   : > { %18238 = dma.hbm_to_vmem [thread:$0]  (%p20675_p3), %s814_s25, 64, %s817_s18, %s23610_s8  }
  0xa8   : > { %s852_s27 = scalar_lea.hbm %s23586_s15, %s20733_s30  ;;  %s846_s22 = scalar_lea.vmem [#allocation28], %s20718_s24 }
  0xa9   : > { %s854_s10 = sshll.u32 %s846_s22, 4  ;;  %s18220_s29 = smul.u32 12, %s20710_s1  ;;  %s855_s10 = int_to_ptr.vmem [resolvable:$true] %s854_s10 }
  0xaa   : > { %s18221_s17 = smul.u32 192, %s20510_s28  ;;  %s23612_s3 = scalar_lea.sflag [#allocation29], %s20707_s23 }
  0xab   : > { %s20182_s0 = scalar_lea.vmem %s855_s10, 64  ;;  %s20532_s26 = smov [#allocation28]  }
  0xac   : > { %p20183_p1 = scmp.ne.s32.totalorder %s855_s10, %s20182_s0  ;;  %s20186_s14 = sshll.u32 %s20532_s26, 4  ;;  %s20187_s14 = int_to_ptr.vmem [resolvable:$false] %s20186_s14 }
  0xad   : > { %s20188_s20 = scalar_lea.vmem %s20187_s14, 128  ;;  %p20189_p6 = scmp.lt.s32.totalorder %s855_s10, %s20187_s14 }
  0xae   : > { %p20184_p2 = pnand %p20183_p1, %p20675_p3  ;;  %p20190_p7 = scmp.lt.s32.totalorder %s20188_s20, %s20182_s0 }
  0xb0   : > { %p20185_p4 = pneg %p20184_p2  ;;  %p20191_p9 = por %p20190_p7, %p20189_p6 }
  0xb2   : > { %p20192_p8 = pnand %p20191_p9, %p20185_p4 }
  0xb4   : > { %20195 = shalt.err (!%p20192_p8)
}
  0xb5   : > { %18240 = dma.hbm_to_vmem [thread:$0]  (%p20675_p3), %s852_s27, 64, %s855_s10, %s23612_s3  }
  0xb6   : > { %s599_s12 = scalar_lea.hbm %s23573_s2, %s18221_s17  ;;  %s593_s21 = scalar_lea.vmem [#allocation9], %s18220_s29 }
  0xb7   : > { %s601_s22 = sshll.u32 %s593_s21, 4  ;;  %s639_s0 = scalar_lea.hbm %s23575_s4, %s20733_s30  ;;  %s602_s22 = int_to_ptr.vmem [resolvable:$true] %s601_s22 }
  0xb8   : > { %s20208_s20 = scalar_lea.vmem %s602_s22, 192  ;;  %s20533_s8 = smov [#allocation9]  }
  0xb9   : > { %p20209_p11 = scmp.ne.s32.totalorder %s602_s22, %s20208_s20  ;;  %s20212_s16 = sshll.u32 %s20533_s8, 4  ;;  %s20213_s16 = int_to_ptr.vmem [resolvable:$false] %s20212_s16 }
  0xba   : > { %s20214_s27 = scalar_lea.vmem %s20213_s16, 384  ;;  %p20215_p0 = scmp.lt.s32.totalorder %s602_s22, %s20213_s16 }
  0xbb   : > { %p20210_p12 = pnand %p20209_p11, %p20675_p3  ;;  %p20216_p1 = scmp.lt.s32.totalorder %s20214_s27, %s20208_s20 }
  0xbd   : > { %p20211_p13 = pneg %p20210_p12  ;;  %p20217_p2 = por %p20216_p1, %p20215_p0 }
  0xbf   : > { %p20218_p4 = pnand %p20217_p2, %p20211_p13 }
  0xc1   : > { %20221 = shalt.err (!%p20218_p4)
}
  0xc2   : > { %s23660_s10 = scalar_lea.sflag [#allocation8], %s20707_s23  ;;  %s633_s29 = scalar_lea.vmem [#allocation12], %s20718_s24 }
  0xc3   : > { %18227 = dma.hbm_to_vmem [thread:$0]  (%p20675_p3), %s599_s12, 192, %s602_s22, %s23660_s10  }
  0xc4   : > { %s641_s17 = sshll.u32 %s633_s29, 4  ;;  %s23661_s18 = sld [smem:[#allocation67_spill]]  ;;  %s642_s17 = int_to_ptr.vmem [resolvable:$true] %s641_s17 }
  0xc5   : > { %s20234_s16 = scalar_lea.vmem %s642_s17, 64  ;;  %s20534_s26 = smov [#allocation12]  }
  0xc6   : > { %p20235_p6 = scmp.ne.s32.totalorder %s642_s17, %s20234_s16  ;;  %s20238_s14 = sshll.u32 %s20534_s26, 4  ;;  %s20239_s14 = int_to_ptr.vmem [resolvable:$false] %s20238_s14 }
  0xc7   : > { %s20240_s20 = scalar_lea.vmem %s20239_s14, 128  ;;  %p20241_p8 = scmp.lt.s32.totalorder %s642_s17, %s20239_s14 }
  0xc8   : > { %p20236_p7 = pnand %p20235_p6, %p20675_p3  ;;  %p20242_p11 = scmp.lt.s32.totalorder %s20240_s20, %s20234_s16 }
  0xca   : > { %s677_s21 = scalar_lea.hbm %s23661_s18, %s20733_s30  ;;  %p20237_p9 = pneg %p20236_p7 }
  0xcb   : > { %p20243_p12 = por %p20242_p11, %p20241_p8 }
  0xcd   : > { %p20244_p13 = pnand %p20243_p12, %p20237_p9 }
  0xcf   : > { %20247 = shalt.err (!%p20244_p13)
}
  0xd0   : > { %s23662_s12 = scalar_lea.sflag [#allocation11], %s20707_s23  ;;  %s671_s10 = scalar_lea.vmem [#allocation15], %s20718_s24 }
  0xd1   : > { %18229 = dma.hbm_to_vmem [thread:$0]  (%p20675_p3), %s639_s0, 64, %s642_s17, %s23662_s12  }
  0xd2   : > { %s679_s29 = sshll.u32 %s671_s10, 4  ;;  %s23663_s16 = sld [smem:[#allocation68_spill]]  ;;  %s680_s29 = int_to_ptr.vmem [resolvable:$true] %s679_s29 }
  0xd3   : > { %s20260_s14 = scalar_lea.vmem %s680_s29, 64  ;;  %s20535_s20 = smov [#allocation15]  }
  0xd4   : > { %p20261_p0 = scmp.ne.s32.totalorder %s680_s29, %s20260_s14  ;;  %s20264_s22 = sshll.u32 %s20535_s20, 4  ;;  %s20265_s22 = int_to_ptr.vmem [resolvable:$false] %s20264_s22 }
  0xd5   : > { %s20266_s27 = scalar_lea.vmem %s20265_s22, 128  ;;  %p20267_p4 = scmp.lt.s32.totalorder %s680_s29, %s20265_s22 }
  0xd6   : > { %p20262_p1 = pnand %p20261_p0, %p20675_p3  ;;  %p20268_p6 = scmp.lt.s32.totalorder %s20266_s27, %s20260_s14 }
  0xd8   : > { %s715_s26 = scalar_lea.hbm %s23663_s16, %s20733_s30  ;;  %p20263_p2 = pneg %p20262_p1 }
  0xd9   : > { %p20269_p7 = por %p20268_p6, %p20267_p4 }
  0xdb   : > { %p20270_p9 = pnand %p20269_p7, %p20263_p2 }
  0xdd   : > { %20273 = shalt.err (!%p20270_p9)
}
  0xde   : > { %s23664_s0 = scalar_lea.sflag [#allocation14], %s20707_s23  ;;  %s709_s10 = scalar_lea.vmem [#allocation18], %s20718_s24 }
  0xdf   : > { %18231 = dma.hbm_to_vmem [thread:$0]  (%p20675_p3), %s677_s21, 64, %s680_s29, %s23664_s0  }
  0xe0   : > { %s717_s25 = sshll.u32 %s709_s10, 4  ;;  %s16353_s8 = sshll.u32 %s20710_s1, 4  ;;  %s718_s25 = int_to_ptr.vmem [resolvable:$true] %s717_s25 }
  0xe1   : > { %s20286_s14 = scalar_lea.vmem %s718_s25, 64  ;;  %s20536_s20 = smov [#allocation18]  }
  0xe2   : > { %p20287_p8 = scmp.ne.s32.totalorder %s718_s25, %s20286_s14  ;;  %s20290_s22 = sshll.u32 %s20536_s20, 4  ;;  %s20291_s22 = int_to_ptr.vmem [resolvable:$false] %s20290_s22 }
  0xe3   : > { %s20292_s27 = scalar_lea.vmem %s20291_s22, 128  ;;  %p20293_p13 = scmp.lt.s32.totalorder %s718_s25, %s20291_s22 }
  0xe4   : > { %p20288_p11 = pnand %p20287_p8, %p20675_p3  ;;  %p20294_p0 = scmp.lt.s32.totalorder %s20292_s27, %s20286_s14 }
  0xe6   : > { %p20289_p12 = pneg %p20288_p11  ;;  %p20295_p1 = por %p20294_p0, %p20293_p13 }
  0xe8   : > { %p20296_p2 = pnand %p20295_p1, %p20289_p12 }
  0xea   : > { %20299 = shalt.err (!%p20296_p2)
}
  0xeb   : > { %s23665_s21 = scalar_lea.sflag [#allocation17], %s20707_s23  ;;  %s17987_s0 = sshll.u32 %s20510_s28, 8 }
  0xec   : > { %18233 = dma.hbm_to_vmem [thread:$0]  (%p20675_p3), %s715_s26, 64, %s718_s25, %s23665_s21  }
  0xed   : > { %s749_s17 = scalar_lea.vmem [#allocation21], %s16353_s8  ;;  %s23666_s20 = sld [smem:[#allocation69_spill]] }
  0xee   : > { %s757_s12 = sshll.u32 %s749_s17, 4  ;;  %s20537_s3 = smov [#allocation21]   ;;  %s758_s12 = int_to_ptr.vmem [resolvable:$true] %s757_s12 }
  0xef   : > { %s20312_s27 = scalar_lea.vmem %s758_s12, 256  ;;  %s20316_s1 = sshll.u32 %s20537_s3, 4  ;;  %s20317_s1 = int_to_ptr.vmem [resolvable:$false] %s20316_s1 }
  0xf0   : > { %p20313_p4 = scmp.ne.s32.totalorder %s758_s12, %s20312_s27  ;;  %s20318_s29 = scalar_lea.vmem %s20317_s1, 512 }
  0xf1   : > { %p20319_p9 = scmp.lt.s32.totalorder %s758_s12, %s20317_s1  ;;  %p20320_p8 = scmp.lt.s32.totalorder %s20318_s29, %s20312_s27 }
  0xf2   : > { %p20314_p6 = pnand %p20313_p4, %p20675_p3 }
  0xf3   : > { %s755_s22 = scalar_lea.hbm %s23666_s20, %s17987_s0  ;;  %p20321_p11 = por %p20320_p8, %p20319_p9 }
  0xf4   : > { %p20315_p7 = pneg %p20314_p6 }
  0xf6   : > { %p20322_p12 = pnand %p20321_p11, %p20315_p7 }
  0xf8   : > { %20325 = shalt.err (!%p20322_p12)
}
  0xf9   : > { %18235 = dma.hbm_to_vmem [thread:$0]  (%p20675_p3), %s755_s22, 256, %s758_s12, %s725_s6  }
  0xfa   : > { %s23667_s8 = sld [smem:[#allocation70_spill]]  ;;  %s789_s21 = scalar_lea.vmem [#allocation24], %s20718_s24 }
  0xfb   : > { %s797_s0 = sshll.u32 %s789_s21, 4  ;;  %s23668_s14 = sld [smem:[#allocation71_spill]]  ;;  %s798_s0 = int_to_ptr.vmem [resolvable:$true] %s797_s0 }
  0xfc   : > { %s20338_s27 = scalar_lea.vmem %s798_s0, 64  ;;  %s20538_s1 = smov [#allocation24]  }
  0xfd   : > { %p20339_p13 = scmp.ne.s32.totalorder %s798_s0, %s20338_s27  ;;  %s20342_s29 = sshll.u32 %s20538_s1, 4  ;;  %s20343_s29 = int_to_ptr.vmem [resolvable:$false] %s20342_s29 }
  0xfe   : > { %s20344_s6 = scalar_lea.vmem %s20343_s29, 128  ;;  %p20345_p2 = scmp.lt.s32.totalorder %s798_s0, %s20343_s29 }
  0xff   : > { %p20340_p0 = pnand %p20339_p13, %p20675_p3  ;;  %p20346_p4 = scmp.lt.s32.totalorder %s20344_s6, %s20338_s27 }
 0x100   : > { %s795_s3 = scalar_lea.hbm %s23667_s8, %s20733_s30 }
 0x101   : > { %s833_s20 = scalar_lea.hbm %s23668_s14, %s20733_s30  ;;  %p20341_p1 = pneg %p20340_p0 }
 0x102   : > { %p20347_p6 = por %p20346_p4, %p20345_p2 }
 0x104   : > { %p20348_p7 = pnand %p20347_p6, %p20341_p1 }
 0x106   : > { %20351 = shalt.err (!%p20348_p7)
}
 0x107   : > { %s23669_s12 = scalar_lea.sflag [#allocation23], %s20707_s23  ;;  %s827_s22 = scalar_lea.vmem [#allocation27], %s20718_s24 }
 0x108   : > { %18237 = dma.hbm_to_vmem [thread:$0]  (%p20675_p3), %s795_s3, 64, %s798_s0, %s23669_s12  }
 0x109   : > { %s835_s26 = sshll.u32 %s827_s22, 4  ;;  %s23670_s21 = sld [smem:[#allocation72_spill]]  ;;  %s836_s26 = int_to_ptr.vmem [resolvable:$true] %s835_s26 }
 0x10a   : > { %s20364_s10 = scalar_lea.vmem %s836_s26, 64  ;;  %s20539_s27 = smov [#allocation27]  }
 0x10b   : > { %p20365_p9 = scmp.ne.s32.totalorder %s836_s26, %s20364_s10  ;;  %s20368_s1 = sshll.u32 %s20539_s27, 4  ;;  %s20369_s1 = int_to_ptr.vmem [resolvable:$false] %s20368_s1 }
 0x10c   : > { %s20370_s29 = scalar_lea.vmem %s20369_s1, 128  ;;  %p20371_p12 = scmp.lt.s32.totalorder %s836_s26, %s20369_s1 }
 0x10d   : > { %p20366_p8 = pnand %p20365_p9, %p20675_p3  ;;  %p20372_p13 = scmp.lt.s32.totalorder %s20370_s29, %s20364_s10 }
 0x10f   : > { %s871_s17 = scalar_lea.hbm %s23670_s21, %s20733_s30  ;;  %p20367_p11 = pneg %p20366_p8 }
 0x110   : > { %p20373_p0 = por %p20372_p13, %p20371_p12 }
 0x112   : > { %p20374_p1 = pnand %p20373_p0, %p20367_p11 }
 0x114   : > { %20377 = shalt.err (!%p20374_p1)
}
 0x115   : > { %s23671_s3 = scalar_lea.sflag [#allocation26], %s20707_s23  ;;  %s865_s12 = scalar_lea.vmem [#allocation30], %s20718_s24 }
 0x116   : > { %18239 = dma.hbm_to_vmem [thread:$0]  (%p20675_p3), %s833_s20, 64, %s836_s26, %s23671_s3  }
 0x117   : > { %s873_s22 = sshll.u32 %s865_s12, 4  ;;  %s20540_s8 = smov [#allocation30]   ;;  %s874_s22 = int_to_ptr.vmem [resolvable:$true] %s873_s22 }
 0x118   : > { %s20390_s25 = scalar_lea.vmem %s874_s22, 64  ;;  %s20394_s10 = sshll.u32 %s20540_s8, 4  ;;  %s20395_s10 = int_to_ptr.vmem [resolvable:$false] %s20394_s10 }
 0x119   : > { %p20391_p2 = scmp.ne.s32.totalorder %s874_s22, %s20390_s25  ;;  %s20396_s27 = scalar_lea.vmem %s20395_s10, 128 }
 0x11a   : > { %p20397_p7 = scmp.lt.s32.totalorder %s874_s22, %s20395_s10  ;;  %p20398_p9 = scmp.lt.s32.totalorder %s20396_s27, %s20390_s25 }
 0x11b   : > { %p20392_p4 = pnand %p20391_p2, %p20675_p3 }
 0x11c   : > { %p20399_p8 = por %p20398_p9, %p20397_p7 }
 0x11d   : > { %p20393_p6 = pneg %p20392_p4 }
 0x11f   : > { %p20400_p11 = pnand %p20399_p8, %p20393_p6 }
 0x121   : > { %20403 = shalt.err (!%p20400_p11)
}
 0x122   : > { %s23672_s24 = scalar_lea.sflag [#allocation29], %s20707_s23 }
 0x123   : > { %18241 = dma.hbm_to_vmem [thread:$0]  (%p20675_p3), %s871_s17, 64, %s874_s22, %s23672_s24  }
 0x124 PF: > { %882 = sbr.rel (%p20694_p10) target bundleno = 7895 (0x1ed7), region = 88 }
 0x129   : > { %s23674_s29 = sld [smem:[#allocation46_spill]] }
 0x12a   : > { %20453 = dma.done.wait (%p112_p5), [#allocation5], 1024  }
 0x12b   : > { %20455 = vsyncadd (%p112_p5), [#allocation5], 4294966272  ;;  %s23675_s19 = sld [smem:[#allocation42_spill]] }
 0x12c   : > { %s23676_s3 = sld [smem:[#allocation48_spill]] }
 0x12f   : > { %s20942_s23 = sand.u32 1, %s23674_s29  }
 0x130   : > { %s889_s17 = scalar_lea.sflag [#allocation8], %s20942_s23 }
 0x131   : > { %s20945_s0 = sand.u32 1, %s23675_s19  }
 0x132   : > { %s18222_s30 = smul.u32 3072, %s20945_s0  ;;  %p23677_p3 = scmp.ne.s32.totalorder %s23676_s3, 0 }
 0x134   : > { %s20949_s6 = scalar_lea.vmem [#allocation7], %s18222_s30 }
 0x135   : > { %20457 = dma.done.wait (%p23677_p3), %s889_s17, 49344  }
 0x136   : > { %20459 = vsyncadd (%p23677_p3), %s889_s17, 4294917952  ;;  %s18223_s12 = smul.u32 12, %s20945_s0  ;;  %s16376_s22 = sshll.u32 %s20945_s0, 10 }
 0x137   : > { %s907_s8 = scalar_lea.sflag [#allocation11], %s20942_s23  ;;  %s20960_s10 = scalar_lea.vmem [#allocation10], %s16376_s22 }
 0x138   : > { %s20957_s25 = scalar_lea.vmem [#allocation9], %s18223_s12 }
 0x139   : > { %20461 = dma.done.wait (%p23677_p3), %s907_s8, 16448  }
 0x13a   : > { %20463 = vsyncadd (%p23677_p3), %s907_s8, 4294950848  ;;  %s20967_s27 = sshll.u32 %s20945_s0, 2  ;;  %s925_s20 = scalar_lea.sflag [#allocation14], %s20942_s23 }
 0x13b   : > { %s919_s24 = scalar_lea.vmem [#allocation12], %s20967_s27  ;;  %s928_s26 = scalar_lea.vmem [#allocation13], %s20967_s27 }
 0x13c   : > { %20465 = dma.done.wait (%p23677_p3), %s925_s20, 128  }
 0x13d   : > { %20467 = vsyncadd (%p23677_p3), %s925_s20, 4294967168  ;;  %s943_s29 = scalar_lea.sflag [#allocation17], %s20942_s23 }
 0x13e   : > { %20469 = dma.done.wait (%p23677_p3), %s943_s29, 128  }
 0x13f   : > { %20471 = vsyncadd (%p23677_p3), %s943_s29, 4294967168  ;;  %s16382_s30 = sshll.u32 %s20945_s0, 12  ;;  %s961_s12 = scalar_lea.sflag [#allocation20], %s20942_s23 }
 0x140   : > { %s20986_s22 = scalar_lea.vmem [#allocation19], %s16382_s30 }
 0x141   : > { %20473 = dma.done.wait (%p23677_p3), %s961_s12, 65792  }
 0x142   : > { %20475 = vsyncadd (%p23677_p3), %s961_s12, 4294901504  ;;  %s16383_s8 = sshll.u32 %s20945_s0, 4  ;;  %s979_s29 = scalar_lea.sflag [#allocation23], %s20942_s23 }
 0x143   : > { %s20993_s20 = scalar_lea.vmem [#allocation21], %s16383_s8  ;;  %s20996_s19 = scalar_lea.vmem [#allocation22], %s16382_s30 }
 0x144   : > { %20477 = dma.done.wait (%p23677_p3), %s979_s29, 65600  }
 0x145   : > { %20479 = vsyncadd (%p23677_p3), %s979_s29, 4294901696  ;;  %s991_s17 = scalar_lea.vmem [#allocation24], %s20967_s27  ;;  %s997_s12 = scalar_lea.sflag [#allocation26], %s20942_s23 }
 0x146   : > { %20481 = dma.done.wait (%p23677_p3), %s997_s12, 128  }
 0x147   : > { %20483 = vsyncadd (%p23677_p3), %s997_s12, 4294967168  ;;  %s1009_s0 = scalar_lea.vmem [#allocation27], %s20967_s27  ;;  %s1015_s30 = scalar_lea.sflag [#allocation29], %s20942_s23 }
 0x148   : > { %s1018_s8 = scalar_lea.vmem [#allocation28], %s20967_s27 }
 0x149   : > { %20485 = dma.done.wait (%p23677_p3), %s1015_s30, 128  }
 0x14a   : > { %20487 = vsyncadd (%p23677_p3), %s1015_s30, 4294967168  ;;  %s1027_s29 = scalar_lea.vmem [#allocation30], %s20967_s27  ;;  %s23678_s1 = sld [smem:[#allocation44_spill]] }
 0x150   : > { %p16390_p5 = scmp.ne.s32.totalorder %s23678_s1, 0 }
 0x152   : > { %1153 = sbr.rel (%p16390_p5) target bundleno = 348 (0x15c), region = 160 }
 0x157   : > { %v1154_v0 = vld [vmem:[#allocation4] sm:$0xff]  ;;  %v1155_v1 = vld [vmem:[#allocation4 + $0x8] sm:$0xff]  ;;  %v1156_v2 = vld [vmem:[#allocation4 + $0x10] sm:$0xff] }
 0x158   : > { %1162 = vst [vmem:[#allocation2 + $0x30] sm:$0xff] %v1154_v0  ;;  %1163 = vst [vmem:[#allocation2] sm:$0xff] %v1155_v1  ;;  %v1157_v3 = vld [vmem:[#allocation4 + $0x18] sm:$0xff]  ;;  %v1158_v4 = vld [vmem:[#allocation4 + $0x20] sm:$0xff] }
 0x159   : > { %1164 = vst [vmem:[#allocation2 + $0x18] sm:$0xff] %v1156_v2  ;;  %v1159_v5 = vld [vmem:[#allocation4 + $0x28] sm:$0xff]  ;;  %1165 = vst [vmem:[#allocation2 + $0x10] sm:$0xff] %v1157_v3  ;;  %v1160_v6 = vld [vmem:[#allocation4 + $0x30] sm:$0xff] }
 0x15a   : > { %1166 = vst [vmem:[#allocation2 + $0x8] sm:$0xff] %v1158_v4  ;;  %1167 = vst [vmem:[#allocation2 + $0x20] sm:$0xff] %v1159_v5  ;;  %v1161_v7 = vld [vmem:[#allocation4 + $0x38] sm:$0xff] }
 0x15b   : > { %1168 = vst [vmem:[#allocation2 + $0x28] sm:$0xff] %v1160_v6  ;;  %1169 = vst [vmem:[#allocation2 + $0x38] sm:$0xff] %v1161_v7 }
 0x15c PF: > { %v18335_v8 = vld [vmem:[%s20949_s6 + $0x2a4] ss:$48 sps:$4 sm:$0xff]   ;;  %v18339_v10 = vld [vmem:[%s20949_s6 + $0x2a0] ss:$48 sps:$4 sm:$0xff]   ;;  %vm20542_vm0 = vmmov 0   ;;  %vm4071_vm1 = vcmask 523264  }
 0x15d   : > { %v18337_v9 = vld [vmem:[%s20949_s6 + $0x8a4] ss:$48 sps:$4 sm:$0xff]   ;;  %3550 = vmatprep.subr.bf16.mxu0 %v18335_v8  ;;  %v18340_v11 = vld [vmem:[%s20949_s6 + $0x8a0] ss:$48 sps:$4 sm:$0xff]   ;;  %s20543_s3 = smov 64   ;;  %vm4230_vm3 = vcmask 64512  }
 0x15e   : > { %3593 = vmatprep.subr.bf16.mxu1 %v18337_v9  ;;  %v18341_v12 = vld [vmem:[%s20949_s6 + $0x244] ss:$48 sps:$4 sm:$0xff]   ;;  %3551 = vmatpush1.bf16.msra.mxu0 %v18339_v10  ;;  %v18345_v14 = vld [vmem:[%s20949_s6 + $0x240] ss:$48 sps:$4 sm:$0xff]   ;;  %vm4745_vm4 = vcmask 1048064   ;;  %s23683_s23 = scalar_lea.vmem [#allocation15], %s20967_s27 }
 0x15f   : > { %3594 = vmatpush1.bf16.msra.mxu1 %v18340_v11  ;;  %v18343_v13 = vld [vmem:[%s20949_s6 + $0x844] ss:$48 sps:$4 sm:$0xff]   ;;  %3552 = vmatprep.subr.bf16.mxu0 %v18341_v12  ;;  %v18346_v15 = vld [vmem:[%s20949_s6 + $0x840] ss:$48 sps:$4 sm:$0xff]  }
 0x160   : > { %3595 = vmatprep.subr.bf16.mxu1 %v18343_v13  ;;  %v18347_v16 = vld [vmem:[%s20949_s6 + $0x1e4] ss:$48 sps:$4 sm:$0xff]   ;;  %v18351_v18 = vld [vmem:[%s20949_s6 + $0x1e0] ss:$48 sps:$4 sm:$0xff]  }
 0x161   : > { %v18349_v17 = vld [vmem:[%s20949_s6 + $0x7e4] ss:$48 sps:$4 sm:$0xff]   ;;  %v18352_v19 = vld [vmem:[%s20949_s6 + $0x7e0] ss:$48 sps:$4 sm:$0xff]  }
 0x162   : > { %3553 = vmatpush1.bf16.msra.mxu0 %v18345_v14  ;;  %v18353_v20 = vld [vmem:[%s20949_s6 + $0x184] ss:$48 sps:$4 sm:$0xff]   ;;  %v18357_v22 = vld [vmem:[%s20949_s6 + $0x180] ss:$48 sps:$4 sm:$0xff]   ;;  %v1177_v57 = vld [vmem:[#allocation2 + $0x38] sm:$0xff] }
 0x163   : > { %3596 = vmatpush1.bf16.msra.mxu1 %v18346_v15  ;;  %3554 = vmatprep.subr.bf16.mxu0 %v18347_v16  ;;  %v18355_v21 = vld [vmem:[%s20949_s6 + $0x784] ss:$48 sps:$4 sm:$0xff]   ;;  %v18358_v23 = vld [vmem:[%s20949_s6 + $0x780] ss:$48 sps:$4 sm:$0xff]   ;;  %v1174_v15 = vld [vmem:[#allocation2 + $0x8] sm:$0xff] }
 0x164   : > { %3597 = vmatprep.subr.bf16.mxu1 %v18349_v17  ;;  %v18359_v24 = vld [vmem:[%s20949_s6 + $0x124] ss:$48 sps:$4 sm:$0xff]   ;;  %v18363_v26 = vld [vmem:[%s20949_s6 + $0x120] ss:$48 sps:$4 sm:$0xff]   ;;  %v1172_v16 = vld [vmem:[#allocation2 + $0x18] sm:$0xff] }
 0x165   : > { %v18361_v25 = vld [vmem:[%s20949_s6 + $0x724] ss:$48 sps:$4 sm:$0xff]   ;;  %v18364_v27 = vld [vmem:[%s20949_s6 + $0x720] ss:$48 sps:$4 sm:$0xff]   ;;  %v1176_v17 = vld [vmem:[#allocation2 + $0x28] sm:$0xff] }
 0x166   : > { %3555 = vmatpush1.bf16.msra.mxu0 %v18351_v18  ;;  %v18365_v28 = vld [vmem:[%s20949_s6 + $0xc4] ss:$48 sps:$4 sm:$0xff]   ;;  %v18369_v30 = vld [vmem:[%s20949_s6 + $0xc0] ss:$48 sps:$4 sm:$0xff]   ;;  %v18433_v18 = vld [vmem:[%s20949_s6 + $0x2ac] ss:$48 sps:$4 sm:$0xff]  }
 0x167   : > { %3598 = vmatpush1.bf16.msra.mxu1 %v18352_v19  ;;  %3556 = vmatprep.subr.bf16.mxu0 %v18353_v20  ;;  %v18367_v29 = vld [vmem:[%s20949_s6 + $0x6c4] ss:$48 sps:$4 sm:$0xff]   ;;  %v18370_v31 = vld [vmem:[%s20949_s6 + $0x6c0] ss:$48 sps:$4 sm:$0xff]   ;;  %v18436_v19 = vld [vmem:[%s20949_s6 + $0x8ac] ss:$48 sps:$4 sm:$0xff]  }
 0x168   : > { %3599 = vmatprep.subr.bf16.mxu1 %v18355_v21  ;;  %v18371_v32 = vld [vmem:[%s20949_s6 + $0x64] ss:$48 sps:$4 sm:$0xff]   ;;  %v18375_v34 = vld [vmem:[%s20949_s6 + $0x60] ss:$48 sps:$4 sm:$0xff]   ;;  %v21092_v21 = vpack.c.bf16 %v1176_v17, %v1172_v16  ;;  %v18515_v16 = vld [vmem:[%s20949_s6 + $0x368] ss:$48 sps:$4 sm:$0xff]  }
 0x169   : > { %v18373_v33 = vld [vmem:[%s20949_s6 + $0x664] ss:$48 sps:$4 sm:$0xff]   ;;  %v18376_v35 = vld [vmem:[%s20949_s6 + $0x660] ss:$48 sps:$4 sm:$0xff]   ;;  %v18518_v17 = vld [vmem:[%s20949_s6 + $0x968] ss:$48 sps:$4 sm:$0xff]  }
 0x16a   : > { %3557 = vmatpush1.bf16.msra.mxu0 %v18357_v22  ;;  %v18377_v36 = vld [vmem:[%s20949_s6 + $0x4] ss:$48 sps:$4 sm:$0xff]   ;;  %v18381_v38 = vld [vmem:[%s20949_s6] ss:$48 sps:$4 sm:$0xff]   ;;  %v18431_v22 = vld [vmem:[%s20949_s6 + $0x2a8] ss:$48 sps:$4 sm:$0xff]  }
 0x16b   : > { %3600 = vmatpush1.bf16.msra.mxu1 %v18358_v23  ;;  %3558 = vmatprep.subr.bf16.mxu0 %v18359_v24  ;;  %v18379_v37 = vld [vmem:[%s20949_s6 + $0x604] ss:$48 sps:$4 sm:$0xff]   ;;  %v18382_v39 = vld [vmem:[%s20949_s6 + $0x600] ss:$48 sps:$4 sm:$0xff]   ;;  %v18434_v23 = vld [vmem:[%s20949_s6 + $0x8a8] ss:$48 sps:$4 sm:$0xff]  }
 0x16c   : > { %3601 = vmatprep.subr.bf16.mxu1 %v18361_v25  ;;  %v18383_v40 = vld [vmem:[%s20949_s6 + $0x5a4] ss:$48 sps:$4 sm:$0xff]   ;;  %v18387_v42 = vld [vmem:[%s20949_s6 + $0x5a0] ss:$48 sps:$4 sm:$0xff]   ;;  %v18439_v24 = vld [vmem:[%s20949_s6 + $0x24c] ss:$48 sps:$4 sm:$0xff]  }
 0x16d   : > { %v18385_v41 = vld [vmem:[%s20949_s6 + $0xba4] ss:$48 sps:$4 sm:$0xff]   ;;  %v18388_v43 = vld [vmem:[%s20949_s6 + $0xba0] ss:$48 sps:$4 sm:$0xff]   ;;  %v18442_v25 = vld [vmem:[%s20949_s6 + $0x84c] ss:$48 sps:$4 sm:$0xff]  }
 0x16e   : > { %3559 = vmatpush1.bf16.msra.mxu0 %v18363_v26  ;;  %v18389_v44 = vld [vmem:[%s20949_s6 + $0x544] ss:$48 sps:$4 sm:$0xff]   ;;  %v18393_v46 = vld [vmem:[%s20949_s6 + $0x540] ss:$48 sps:$4 sm:$0xff]   ;;  %v18437_v26 = vld [vmem:[%s20949_s6 + $0x248] ss:$48 sps:$4 sm:$0xff]  }
 0x16f   : > { %3602 = vmatpush1.bf16.msra.mxu1 %v18364_v27  ;;  %3560 = vmatprep.subr.bf16.mxu0 %v18365_v28  ;;  %v18391_v45 = vld [vmem:[%s20949_s6 + $0xb44] ss:$48 sps:$4 sm:$0xff]   ;;  %v18394_v47 = vld [vmem:[%s20949_s6 + $0xb40] ss:$48 sps:$4 sm:$0xff]   ;;  %v18440_v27 = vld [vmem:[%s20949_s6 + $0x848] ss:$48 sps:$4 sm:$0xff]  }
 0x170   : > { %3603 = vmatprep.subr.bf16.mxu1 %v18367_v29  ;;  %v18395_v48 = vld [vmem:[%s20949_s6 + $0x4e4] ss:$48 sps:$4 sm:$0xff]   ;;  %v18399_v50 = vld [vmem:[%s20949_s6 + $0x4e0] ss:$48 sps:$4 sm:$0xff]   ;;  %v18445_v28 = vld [vmem:[%s20949_s6 + $0x1ec] ss:$48 sps:$4 sm:$0xff]  }
 0x171   : > { %v18397_v49 = vld [vmem:[%s20949_s6 + $0xae4] ss:$48 sps:$4 sm:$0xff]   ;;  %v18400_v51 = vld [vmem:[%s20949_s6 + $0xae0] ss:$48 sps:$4 sm:$0xff]   ;;  %v18448_v29 = vld [vmem:[%s20949_s6 + $0x7ec] ss:$48 sps:$4 sm:$0xff]  }
 0x172   : > { %3561 = vmatpush1.bf16.msra.mxu0 %v18369_v30  ;;  %v18401_v52 = vld [vmem:[%s20949_s6 + $0x484] ss:$48 sps:$4 sm:$0xff]   ;;  %v18405_v58 = vld [vmem:[%s20949_s6 + $0x480] ss:$48 sps:$4 sm:$0xff]   ;;  %v18443_v30 = vld [vmem:[%s20949_s6 + $0x1e8] ss:$48 sps:$4 sm:$0xff]  }
 0x173   : > { %3604 = vmatpush1.bf16.msra.mxu1 %v18370_v31  ;;  %3562 = vmatprep.subr.bf16.mxu0 %v18371_v32  ;;  %v18403_v53 = vld [vmem:[%s20949_s6 + $0xa84] ss:$48 sps:$4 sm:$0xff]   ;;  %v18406_v59 = vld [vmem:[%s20949_s6 + $0xa80] ss:$48 sps:$4 sm:$0xff]   ;;  %v18446_v31 = vld [vmem:[%s20949_s6 + $0x7e8] ss:$48 sps:$4 sm:$0xff]  }
 0x174   : > { %3605 = vmatprep.subr.bf16.mxu1 %v18373_v33  ;;  %v1171_v54 = vld [vmem:[#allocation2] sm:$0xff]  ;;  %v1173_v56 = vld [vmem:[#allocation2 + $0x10] sm:$0xff]  ;;  %v18451_v32 = vld [vmem:[%s20949_s6 + $0x18c] ss:$48 sps:$4 sm:$0xff]  }
 0x175   : > { %v1175_v55 = vld [vmem:[#allocation2 + $0x20] sm:$0xff]  ;;  %v21069_v62 = vpack.c.bf16 %v1177_v57, %v1173_v56  ;;  %v1170_v14 = vld [vmem:[#allocation2 + $0x30] sm:$0xff]  ;;  %v18454_v33 = vld [vmem:[%s20949_s6 + $0x78c] ss:$48 sps:$4 sm:$0xff]  }
 0x176   : > { %3563 = vmatpush1.bf16.msra.mxu0 %v18375_v34  ;;  %v18407_v60 = vld [vmem:[%s20949_s6 + $0x424] ss:$48 sps:$4 sm:$0xff]   ;;  %v21067_v61 = vpack.c.bf16 %v1175_v55, %v1171_v54  ;;  %v18411_v0 = vld [vmem:[%s20949_s6 + $0x420] ss:$48 sps:$4 sm:$0xff]   ;;  %v21090_v20 = vpack.c.bf16 %v1174_v15, %v1170_v14  ;;  %v18449_v34 = vld [vmem:[%s20949_s6 + $0x188] ss:$48 sps:$4 sm:$0xff]  }
 0x177   : > { %3606 = vmatpush1.bf16.msra.mxu1 %v18376_v35  ;;  %3564 = vmatprep.subr.bf16.mxu0 %v18377_v36  ;;  %v18409_v63 = vld [vmem:[%s20949_s6 + $0xa24] ss:$48 sps:$4 sm:$0xff]   ;;  %v18412_v1 = vld [vmem:[%s20949_s6 + $0xa20] ss:$48 sps:$4 sm:$0xff]   ;;  %v18452_v35 = vld [vmem:[%s20949_s6 + $0x788] ss:$48 sps:$4 sm:$0xff]  }
 0x178   : > { %3607 = vmatprep.subr.bf16.mxu1 %v18379_v37  ;;  %3582 = vmatprep.mubr.bf16.mxu0 %v21067_v61  ;;  %v18413_v2 = vld [vmem:[%s20949_s6 + $0x3c4] ss:$48 sps:$4 sm:$0xff]   ;;  %v18417_v4 = vld [vmem:[%s20949_s6 + $0x3c0] ss:$48 sps:$4 sm:$0xff]   ;;  %v18457_v36 = vld [vmem:[%s20949_s6 + $0x12c] ss:$48 sps:$4 sm:$0xff]  }
 0x179   : > { %3625 = vmatprep.mubr.bf16.mxu1 %v21069_v62  ;;  %v18415_v3 = vld [vmem:[%s20949_s6 + $0x9c4] ss:$48 sps:$4 sm:$0xff]   ;;  %v18418_v5 = vld [vmem:[%s20949_s6 + $0x9c0] ss:$48 sps:$4 sm:$0xff]   ;;  %v18460_v37 = vld [vmem:[%s20949_s6 + $0x72c] ss:$48 sps:$4 sm:$0xff]  }
 0x17a   : > { %3565 = vmatpush1.bf16.msra.mxu0 %v18381_v38  ;;  %v18419_v6 = vld [vmem:[%s20949_s6 + $0x364] ss:$48 sps:$4 sm:$0xff]   ;;  %v18423_v8 = vld [vmem:[%s20949_s6 + $0x360] ss:$48 sps:$4 sm:$0xff]   ;;  %v18455_v38 = vld [vmem:[%s20949_s6 + $0x128] ss:$48 sps:$4 sm:$0xff]  }
 0x17b   : > { %3608 = vmatpush1.bf16.msra.mxu1 %v18382_v39  ;;  %3566 = vmatprep.subr.bf16.mxu0 %v18383_v40  ;;  %v18421_v7 = vld [vmem:[%s20949_s6 + $0x964] ss:$48 sps:$4 sm:$0xff]   ;;  %v18424_v9 = vld [vmem:[%s20949_s6 + $0x960] ss:$48 sps:$4 sm:$0xff]   ;;  %v18458_v39 = vld [vmem:[%s20949_s6 + $0x728] ss:$48 sps:$4 sm:$0xff]  }
 0x17c   : > { %3609 = vmatprep.subr.bf16.mxu1 %v18385_v41  ;;  %v18425_v10 = vld [vmem:[%s20949_s6 + $0x304] ss:$48 sps:$4 sm:$0xff]   ;;  %v18429_v12 = vld [vmem:[%s20949_s6 + $0x300] ss:$48 sps:$4 sm:$0xff]   ;;  %v18463_v40 = vld [vmem:[%s20949_s6 + $0xcc] ss:$48 sps:$4 sm:$0xff]  }
 0x17d   : > { %v18427_v11 = vld [vmem:[%s20949_s6 + $0x904] ss:$48 sps:$4 sm:$0xff]   ;;  %v18430_v13 = vld [vmem:[%s20949_s6 + $0x900] ss:$48 sps:$4 sm:$0xff]   ;;  %v18466_v41 = vld [vmem:[%s20949_s6 + $0x6cc] ss:$48 sps:$4 sm:$0xff]  }
 0x17e   : > { %3567 = vmatpush2.bf16.msra.mxu0 %v18387_v42  ;;  %v18461_v42 = vld [vmem:[%s20949_s6 + $0xc8] ss:$48 sps:$4 sm:$0xff]   ;;  %v18487_v56 = vld [vmem:[%s20949_s6 + $0x54c] ss:$48 sps:$4 sm:$0xff]  }
 0x17f   : > { %3610 = vmatpush2.bf16.msra.mxu1 %v18388_v43  ;;  %3568 = vmatprep.subr.bf16.mxu0 %v18389_v44  ;;  %v18464_v43 = vld [vmem:[%s20949_s6 + $0x6c8] ss:$48 sps:$4 sm:$0xff]   ;;  %v18469_v44 = vld [vmem:[%s20949_s6 + $0x6c] ss:$48 sps:$4 sm:$0xff]  }
 0x180   : > { %3611 = vmatprep.subr.bf16.mxu1 %v18391_v45  ;;  %v18472_v45 = vld [vmem:[%s20949_s6 + $0x66c] ss:$48 sps:$4 sm:$0xff]   ;;  %v18479_v54 = vld [vmem:[%s20949_s6 + $0x5a8] ss:$48 sps:$4 sm:$0xff]  }
 0x181   : > { %v18482_v55 = vld [vmem:[%s20949_s6 + $0xba8] ss:$48 sps:$4 sm:$0xff]   ;;  %v18490_v57 = vld [vmem:[%s20949_s6 + $0xb4c] ss:$48 sps:$4 sm:$0xff]  }
 0x182   : > { %3569 = vmatpush2.bf16.msra.mxu0 %v18393_v46  ;;  %v18467_v46 = vld [vmem:[%s20949_s6 + $0x68] ss:$48 sps:$4 sm:$0xff]   ;;  %v18517_v14 = vld [vmem:[%s20949_s6 + $0x36c] ss:$48 sps:$4 sm:$0xff]  }
 0x183   : > { %3612 = vmatpush2.bf16.msra.mxu1 %v18394_v47  ;;  %3570 = vmatprep.subr.bf16.mxu0 %v18395_v48  ;;  %v18470_v47 = vld [vmem:[%s20949_s6 + $0x668] ss:$48 sps:$4 sm:$0xff]   ;;  %v18475_v48 = vld [vmem:[%s20949_s6 + $0xc] ss:$48 sps:$4 sm:$0xff]  }
 0x184   : > { %3613 = vmatprep.subr.bf16.mxu1 %v18397_v49  ;;  %v18478_v49 = vld [vmem:[%s20949_s6 + $0x60c] ss:$48 sps:$4 sm:$0xff]  }
 0x185   : > { %v18520_v15 = vld [vmem:[%s20949_s6 + $0x96c] ss:$48 sps:$4 sm:$0xff]  }
 0x186   : > { %3571 = vmatpush2.bf16.msra.mxu0 %v18399_v50  ;;  %v18473_v50 = vld [vmem:[%s20949_s6 + $0x8] ss:$48 sps:$4 sm:$0xff]  }
 0x187   : > { %3614 = vmatpush2.bf16.msra.mxu1 %v18400_v51  ;;  %3572 = vmatprep.subr.bf16.mxu0 %v18401_v52  ;;  %v18476_v51 = vld [vmem:[%s20949_s6 + $0x608] ss:$48 sps:$4 sm:$0xff]   ;;  %v18481_v52 = vld [vmem:[%s20949_s6 + $0x5ac] ss:$48 sps:$4 sm:$0xff]  }
 0x188   : > { %3615 = vmatprep.subr.bf16.mxu1 %v18403_v53  ;;  %v18484_v53 = vld [vmem:[%s20949_s6 + $0xbac] ss:$48 sps:$4 sm:$0xff]  }
 0x18a   : > { %3573 = vmatpush2.bf16.msra.mxu0 %v18405_v58  ;;  %v18485_v58 = vld [vmem:[%s20949_s6 + $0x548] ss:$48 sps:$4 sm:$0xff]  }
 0x18b   : > { %3616 = vmatpush2.bf16.msra.mxu1 %v18406_v59  ;;  %3574 = vmatprep.subr.bf16.mxu0 %v18407_v60  ;;  %v18488_v59 = vld [vmem:[%s20949_s6 + $0xb48] ss:$48 sps:$4 sm:$0xff]   ;;  %v18493_v60 = vld [vmem:[%s20949_s6 + $0x4ec] ss:$48 sps:$4 sm:$0xff]  }
 0x18c   : > { %3617 = vmatprep.subr.bf16.mxu1 %v18409_v63  ;;  %v18496_v63 = vld [vmem:[%s20949_s6 + $0xaec] ss:$48 sps:$4 sm:$0xff]  }
 0x18e   : > { %3575 = vmatpush2.bf16.msra.mxu0 %v18411_v0  ;;  %v18491_v0 = vld [vmem:[%s20949_s6 + $0x4e8] ss:$48 sps:$4 sm:$0xff]  }
 0x18f   : > { %3618 = vmatpush2.bf16.msra.mxu1 %v18412_v1  ;;  %3576 = vmatprep.subr.bf16.mxu0 %v18413_v2  ;;  %v18494_v1 = vld [vmem:[%s20949_s6 + $0xae8] ss:$48 sps:$4 sm:$0xff]   ;;  %v18499_v2 = vld [vmem:[%s20949_s6 + $0x48c] ss:$48 sps:$4 sm:$0xff]  }
 0x190   : > { %3619 = vmatprep.subr.bf16.mxu1 %v18415_v3  ;;  %v18502_v3 = vld [vmem:[%s20949_s6 + $0xa8c] ss:$48 sps:$4 sm:$0xff]  }
 0x192   : > { %3577 = vmatpush2.bf16.msra.mxu0 %v18417_v4  ;;  %v18497_v4 = vld [vmem:[%s20949_s6 + $0x488] ss:$48 sps:$4 sm:$0xff]  }
 0x193   : > { %3620 = vmatpush2.bf16.msra.mxu1 %v18418_v5  ;;  %3578 = vmatprep.subr.bf16.mxu0 %v18419_v6  ;;  %v18500_v5 = vld [vmem:[%s20949_s6 + $0xa88] ss:$48 sps:$4 sm:$0xff]   ;;  %v18505_v6 = vld [vmem:[%s20949_s6 + $0x42c] ss:$48 sps:$4 sm:$0xff]  }
 0x194   : > { %3621 = vmatprep.subr.bf16.mxu1 %v18421_v7  ;;  %v18508_v7 = vld [vmem:[%s20949_s6 + $0xa2c] ss:$48 sps:$4 sm:$0xff]  }
 0x196   : > { %3579 = vmatpush2.bf16.msra.mxu0 %v18423_v8  ;;  %v18503_v8 = vld [vmem:[%s20949_s6 + $0x428] ss:$48 sps:$4 sm:$0xff]  }
 0x197   : > { %3622 = vmatpush2.bf16.msra.mxu1 %v18424_v9  ;;  %3580 = vmatprep.subr.bf16.mxu0 %v18425_v10  ;;  %v18506_v9 = vld [vmem:[%s20949_s6 + $0xa28] ss:$48 sps:$4 sm:$0xff]   ;;  %v18511_v10 = vld [vmem:[%s20949_s6 + $0x3cc] ss:$48 sps:$4 sm:$0xff]  }
 0x198   : > { %3623 = vmatprep.subr.bf16.mxu1 %v18427_v11  ;;  %v18514_v11 = vld [vmem:[%s20949_s6 + $0x9cc] ss:$48 sps:$4 sm:$0xff]  }
 0x19a   : > { %3581 = vmatpush2.bf16.msra.mxu0 %v18429_v12  ;;  %v18509_v12 = vld [vmem:[%s20949_s6 + $0x3c8] ss:$48 sps:$4 sm:$0xff]  }
 0x19b   : > { %3624 = vmatpush2.bf16.msra.mxu1 %v18430_v13  ;;  %3636 = vmatprep.subr.bf16.mxu0 %v18433_v18  ;;  %v18512_v13 = vld [vmem:[%s20949_s6 + $0x9c8] ss:$48 sps:$4 sm:$0xff]   ;;  %v18523_v18 = vld [vmem:[%s20949_s6 + $0x30c] ss:$48 sps:$4 sm:$0xff]  }
 0x19c   : > { %3679 = vmatprep.subr.bf16.mxu1 %v18436_v19  ;;  %v18526_v19 = vld [vmem:[%s20949_s6 + $0x90c] ss:$48 sps:$4 sm:$0xff]  }
 0x19d   : > { %3583 = vmatmul.mubr.bf16.vlgmr.msra.gmra.mxu0 %v21090_v20 }
 0x19e   : > { %3626 = vmatmul.mubr.bf16.vlgmr.msra.gmra.mxu1 %v21092_v21  ;;  %3637 = vmatpush1.bf16.msra.mxu0 %v18431_v22  ;;  %v18521_v22 = vld [vmem:[%s20949_s6 + $0x308] ss:$48 sps:$4 sm:$0xff]  }
 0x19f   : > { %3680 = vmatpush1.bf16.msra.mxu1 %v18434_v23  ;;  %3638 = vmatprep.subr.bf16.mxu0 %v18439_v24  ;;  %v18524_v23 = vld [vmem:[%s20949_s6 + $0x908] ss:$48 sps:$4 sm:$0xff]   ;;  %v18529_v24 = vld [vmem:[%s20949_s6 + $0x2b4] ss:$48 sps:$4 sm:$0xff]  }
 0x1a0   : > { %3681 = vmatprep.subr.bf16.mxu1 %v18442_v25  ;;  %3668 = vmatprep.mubr.bf16.mxu0 %v21067_v61  ;;  %v18532_v25 = vld [vmem:[%s20949_s6 + $0x8b4] ss:$48 sps:$4 sm:$0xff]  }
 0x1a1   : > { %3711 = vmatprep.mubr.bf16.mxu1 %v21069_v62 }
 0x1a2   : > { %3639 = vmatpush1.bf16.msra.mxu0 %v18437_v26  ;;  %v18527_v26 = vld [vmem:[%s20949_s6 + $0x2b0] ss:$48 sps:$4 sm:$0xff]  }
 0x1a3   : > { %3682 = vmatpush1.bf16.msra.mxu1 %v18440_v27  ;;  %3640 = vmatprep.subr.bf16.mxu0 %v18445_v28  ;;  %v18530_v27 = vld [vmem:[%s20949_s6 + $0x8b0] ss:$48 sps:$4 sm:$0xff]   ;;  %v18535_v28 = vld [vmem:[%s20949_s6 + $0x254] ss:$48 sps:$4 sm:$0xff]  }
 0x1a4   : > { %3683 = vmatprep.subr.bf16.mxu1 %v18448_v29  ;;  %v18538_v29 = vld [vmem:[%s20949_s6 + $0x854] ss:$48 sps:$4 sm:$0xff]  }
 0x1a6   : > { %3641 = vmatpush1.bf16.msra.mxu0 %v18443_v30  ;;  %v18533_v30 = vld [vmem:[%s20949_s6 + $0x250] ss:$48 sps:$4 sm:$0xff]  }
 0x1a7   : > { %3684 = vmatpush1.bf16.msra.mxu1 %v18446_v31  ;;  %3642 = vmatprep.subr.bf16.mxu0 %v18451_v32  ;;  %v18536_v31 = vld [vmem:[%s20949_s6 + $0x850] ss:$48 sps:$4 sm:$0xff]   ;;  %v18541_v32 = vld [vmem:[%s20949_s6 + $0x1f4] ss:$48 sps:$4 sm:$0xff]  }
 0x1a8   : > { %3685 = vmatprep.subr.bf16.mxu1 %v18454_v33  ;;  %v18544_v33 = vld [vmem:[%s20949_s6 + $0x7f4] ss:$48 sps:$4 sm:$0xff]  }
 0x1aa   : > { %3643 = vmatpush1.bf16.msra.mxu0 %v18449_v34  ;;  %v18539_v34 = vld [vmem:[%s20949_s6 + $0x1f0] ss:$48 sps:$4 sm:$0xff]  }
 0x1ab   : > { %3686 = vmatpush1.bf16.msra.mxu1 %v18452_v35  ;;  %3644 = vmatprep.subr.bf16.mxu0 %v18457_v36  ;;  %v18542_v35 = vld [vmem:[%s20949_s6 + $0x7f0] ss:$48 sps:$4 sm:$0xff]   ;;  %v18547_v36 = vld [vmem:[%s20949_s6 + $0x194] ss:$48 sps:$4 sm:$0xff]  }
 0x1ac   : > { %3687 = vmatprep.subr.bf16.mxu1 %v18460_v37  ;;  %v18550_v37 = vld [vmem:[%s20949_s6 + $0x794] ss:$48 sps:$4 sm:$0xff]  }
 0x1ae   : > { %3645 = vmatpush1.bf16.msra.mxu0 %v18455_v38  ;;  %v18545_v38 = vld [vmem:[%s20949_s6 + $0x190] ss:$48 sps:$4 sm:$0xff]  }
 0x1af   : > { %3688 = vmatpush1.bf16.msra.mxu1 %v18458_v39  ;;  %3646 = vmatprep.subr.bf16.mxu0 %v18463_v40  ;;  %v18548_v39 = vld [vmem:[%s20949_s6 + $0x790] ss:$48 sps:$4 sm:$0xff]   ;;  %v18553_v40 = vld [vmem:[%s20949_s6 + $0x134] ss:$48 sps:$4 sm:$0xff]  }
 0x1b0   : > { %3689 = vmatprep.subr.bf16.mxu1 %v18466_v41  ;;  %v18556_v41 = vld [vmem:[%s20949_s6 + $0x734] ss:$48 sps:$4 sm:$0xff]  }
 0x1b2   : > { %3647 = vmatpush1.bf16.msra.mxu0 %v18461_v42  ;;  %v18551_v42 = vld [vmem:[%s20949_s6 + $0x130] ss:$48 sps:$4 sm:$0xff]  }
 0x1b3   : > { %3690 = vmatpush1.bf16.msra.mxu1 %v18464_v43  ;;  %3648 = vmatprep.subr.bf16.mxu0 %v18469_v44  ;;  %v18554_v43 = vld [vmem:[%s20949_s6 + $0x730] ss:$48 sps:$4 sm:$0xff]   ;;  %v18559_v44 = vld [vmem:[%s20949_s6 + $0xd4] ss:$48 sps:$4 sm:$0xff]  }
 0x1b4   : > { %3691 = vmatprep.subr.bf16.mxu1 %v18472_v45  ;;  %v18562_v45 = vld [vmem:[%s20949_s6 + $0x6d4] ss:$48 sps:$4 sm:$0xff]  }
 0x1b6   : > { %3649 = vmatpush1.bf16.msra.mxu0 %v18467_v46  ;;  %v18557_v46 = vld [vmem:[%s20949_s6 + $0xd0] ss:$48 sps:$4 sm:$0xff]  }
 0x1b7   : > { %3692 = vmatpush1.bf16.msra.mxu1 %v18470_v47  ;;  %3650 = vmatprep.subr.bf16.mxu0 %v18475_v48  ;;  %v18560_v47 = vld [vmem:[%s20949_s6 + $0x6d0] ss:$48 sps:$4 sm:$0xff]   ;;  %v18565_v48 = vld [vmem:[%s20949_s6 + $0x74] ss:$48 sps:$4 sm:$0xff]  }
 0x1b8   : > { %3693 = vmatprep.subr.bf16.mxu1 %v18478_v49  ;;  %v18568_v49 = vld [vmem:[%s20949_s6 + $0x674] ss:$48 sps:$4 sm:$0xff]  }
 0x1ba   : > { %3651 = vmatpush1.bf16.msra.mxu0 %v18473_v50  ;;  %v18563_v50 = vld [vmem:[%s20949_s6 + $0x70] ss:$48 sps:$4 sm:$0xff]  }
 0x1bb   : > { %3694 = vmatpush1.bf16.msra.mxu1 %v18476_v51  ;;  %3652 = vmatprep.subr.bf16.mxu0 %v18481_v52  ;;  %v18566_v51 = vld [vmem:[%s20949_s6 + $0x670] ss:$48 sps:$4 sm:$0xff]   ;;  %v18571_v52 = vld [vmem:[%s20949_s6 + $0x14] ss:$48 sps:$4 sm:$0xff]  }
 0x1bc   : > { %3695 = vmatprep.subr.bf16.mxu1 %v18484_v53  ;;  %v18574_v53 = vld [vmem:[%s20949_s6 + $0x614] ss:$48 sps:$4 sm:$0xff]  }
 0x1be   : > { %3653 = vmatpush2.bf16.msra.mxu0 %v18479_v54  ;;  %v18569_v54 = vld [vmem:[%s20949_s6 + $0x10] ss:$48 sps:$4 sm:$0xff]  }
 0x1bf   : > { %3696 = vmatpush2.bf16.msra.mxu1 %v18482_v55  ;;  %3654 = vmatprep.subr.bf16.mxu0 %v18487_v56  ;;  %v18572_v55 = vld [vmem:[%s20949_s6 + $0x610] ss:$48 sps:$4 sm:$0xff]   ;;  %v18577_v56 = vld [vmem:[%s20949_s6 + $0x5b4] ss:$48 sps:$4 sm:$0xff]  }
 0x1c0   : > { %3697 = vmatprep.subr.bf16.mxu1 %v18490_v57  ;;  %v18580_v57 = vld [vmem:[%s20949_s6 + $0xbb4] ss:$48 sps:$4 sm:$0xff]  }
 0x1c2   : > { %3655 = vmatpush2.bf16.msra.mxu0 %v18485_v58  ;;  %v18575_v58 = vld [vmem:[%s20949_s6 + $0x5b0] ss:$48 sps:$4 sm:$0xff]  }
 0x1c3   : > { %3698 = vmatpush2.bf16.msra.mxu1 %v18488_v59  ;;  %3656 = vmatprep.subr.bf16.mxu0 %v18493_v60  ;;  %v18578_v59 = vld [vmem:[%s20949_s6 + $0xbb0] ss:$48 sps:$4 sm:$0xff]   ;;  %v18583_v60 = vld [vmem:[%s20949_s6 + $0x554] ss:$48 sps:$4 sm:$0xff]  }
 0x1c4   : > { %3699 = vmatprep.subr.bf16.mxu1 %v18496_v63  ;;  %v18586_v63 = vld [vmem:[%s20949_s6 + $0xb54] ss:$48 sps:$4 sm:$0xff]  }
 0x1c6   : > { %3657 = vmatpush2.bf16.msra.mxu0 %v18491_v0  ;;  %v18581_v0 = vld [vmem:[%s20949_s6 + $0x550] ss:$48 sps:$4 sm:$0xff]  }
 0x1c7   : > { %3700 = vmatpush2.bf16.msra.mxu1 %v18494_v1  ;;  %3658 = vmatprep.subr.bf16.mxu0 %v18499_v2  ;;  %v18584_v1 = vld [vmem:[%s20949_s6 + $0xb50] ss:$48 sps:$4 sm:$0xff]   ;;  %v18589_v2 = vld [vmem:[%s20949_s6 + $0x4f4] ss:$48 sps:$4 sm:$0xff]  }
 0x1c8   : > { %3701 = vmatprep.subr.bf16.mxu1 %v18502_v3  ;;  %v18592_v3 = vld [vmem:[%s20949_s6 + $0xaf4] ss:$48 sps:$4 sm:$0xff]  }
 0x1ca   : > { %3659 = vmatpush2.bf16.msra.mxu0 %v18497_v4  ;;  %v18587_v4 = vld [vmem:[%s20949_s6 + $0x4f0] ss:$48 sps:$4 sm:$0xff]  }
 0x1cb   : > { %3702 = vmatpush2.bf16.msra.mxu1 %v18500_v5  ;;  %3660 = vmatprep.subr.bf16.mxu0 %v18505_v6  ;;  %v18590_v5 = vld [vmem:[%s20949_s6 + $0xaf0] ss:$48 sps:$4 sm:$0xff]   ;;  %v18595_v6 = vld [vmem:[%s20949_s6 + $0x494] ss:$48 sps:$4 sm:$0xff]  }
 0x1cc   : > { %3703 = vmatprep.subr.bf16.mxu1 %v18508_v7  ;;  %v18598_v7 = vld [vmem:[%s20949_s6 + $0xa94] ss:$48 sps:$4 sm:$0xff]  }
 0x1ce   : > { %3661 = vmatpush2.bf16.msra.mxu0 %v18503_v8  ;;  %v18593_v8 = vld [vmem:[%s20949_s6 + $0x490] ss:$48 sps:$4 sm:$0xff]  }
 0x1cf   : > { %3704 = vmatpush2.bf16.msra.mxu1 %v18506_v9  ;;  %3662 = vmatprep.subr.bf16.mxu0 %v18511_v10  ;;  %v18596_v9 = vld [vmem:[%s20949_s6 + $0xa90] ss:$48 sps:$4 sm:$0xff]   ;;  %v18601_v10 = vld [vmem:[%s20949_s6 + $0x434] ss:$48 sps:$4 sm:$0xff]  }
 0x1d0   : > { %3705 = vmatprep.subr.bf16.mxu1 %v18514_v11  ;;  %v18604_v11 = vld [vmem:[%s20949_s6 + $0xa34] ss:$48 sps:$4 sm:$0xff]  }
 0x1d2   : > { %3663 = vmatpush2.bf16.msra.mxu0 %v18509_v12  ;;  %v18599_v12 = vld [vmem:[%s20949_s6 + $0x430] ss:$48 sps:$4 sm:$0xff]  }
 0x1d3   : > { %3706 = vmatpush2.bf16.msra.mxu1 %v18512_v13  ;;  %3664 = vmatprep.subr.bf16.mxu0 %v18517_v14  ;;  %v18602_v13 = vld [vmem:[%s20949_s6 + $0xa30] ss:$48 sps:$4 sm:$0xff]   ;;  %v18607_v14 = vld [vmem:[%s20949_s6 + $0x3d4] ss:$48 sps:$4 sm:$0xff]  }
 0x1d4   : > { %3707 = vmatprep.subr.bf16.mxu1 %v18520_v15  ;;  %v18610_v15 = vld [vmem:[%s20949_s6 + $0x9d4] ss:$48 sps:$4 sm:$0xff]  }
 0x1d6   : > { %3665 = vmatpush2.bf16.msra.mxu0 %v18515_v16  ;;  %v18605_v16 = vld [vmem:[%s20949_s6 + $0x3d0] ss:$48 sps:$4 sm:$0xff]  }
 0x1d7   : > { %3708 = vmatpush2.bf16.msra.mxu1 %v18518_v17  ;;  %3666 = vmatprep.subr.bf16.mxu0 %v18523_v18  ;;  %v18608_v17 = vld [vmem:[%s20949_s6 + $0x9d0] ss:$48 sps:$4 sm:$0xff]   ;;  %v18613_v18 = vld [vmem:[%s20949_s6 + $0x374] ss:$48 sps:$4 sm:$0xff]  }
 0x1d8   : > { %3709 = vmatprep.subr.bf16.mxu1 %v18526_v19  ;;  %v18616_v19 = vld [vmem:[%s20949_s6 + $0x974] ss:$48 sps:$4 sm:$0xff]  }
 0x1da   : > { %3667 = vmatpush2.bf16.msra.mxu0 %v18521_v22  ;;  %v18611_v22 = vld [vmem:[%s20949_s6 + $0x370] ss:$48 sps:$4 sm:$0xff]  }
 0x1db   : > { %3710 = vmatpush2.bf16.msra.mxu1 %v18524_v23  ;;  %3722 = vmatprep.subr.bf16.mxu0 %v18529_v24  ;;  %v18614_v23 = vld [vmem:[%s20949_s6 + $0x970] ss:$48 sps:$4 sm:$0xff]   ;;  %v18619_v24 = vld [vmem:[%s20949_s6 + $0x314] ss:$48 sps:$4 sm:$0xff]  }
 0x1dc   : > { %3765 = vmatprep.subr.bf16.mxu1 %v18532_v25  ;;  %v18622_v25 = vld [vmem:[%s20949_s6 + $0x914] ss:$48 sps:$4 sm:$0xff]  }
 0x1dd   : > { %3669 = vmatmul.mubr.bf16.vlgmr.msra.gmra.mxu0 %v21090_v20 }
 0x1de   : > { %3712 = vmatmul.mubr.bf16.vlgmr.msra.gmra.mxu1 %v21092_v21  ;;  %3723 = vmatpush1.bf16.msra.mxu0 %v18527_v26  ;;  %v18617_v26 = vld [vmem:[%s20949_s6 + $0x310] ss:$48 sps:$4 sm:$0xff]  }
 0x1df   : > { %3766 = vmatpush1.bf16.msra.mxu1 %v18530_v27  ;;  %3724 = vmatprep.subr.bf16.mxu0 %v18535_v28  ;;  %v18620_v27 = vld [vmem:[%s20949_s6 + $0x910] ss:$48 sps:$4 sm:$0xff]   ;;  %v18625_v28 = vld [vmem:[%s20949_s6 + $0x2bc] ss:$48 sps:$4 sm:$0xff]  }
 0x1e0   : > { %3767 = vmatprep.subr.bf16.mxu1 %v18538_v29  ;;  %3754 = vmatprep.mubr.bf16.mxu0 %v21067_v61  ;;  %v18628_v29 = vld [vmem:[%s20949_s6 + $0x8bc] ss:$48 sps:$4 sm:$0xff]  }
 0x1e1   : > { %3797 = vmatprep.mubr.bf16.mxu1 %v21069_v62 }
 0x1e2   : > { %3725 = vmatpush1.bf16.msra.mxu0 %v18533_v30  ;;  %v18623_v30 = vld [vmem:[%s20949_s6 + $0x2b8] ss:$48 sps:$4 sm:$0xff]  }
 0x1e3   : > { %3768 = vmatpush1.bf16.msra.mxu1 %v18536_v31  ;;  %3726 = vmatprep.subr.bf16.mxu0 %v18541_v32  ;;  %v18626_v31 = vld [vmem:[%s20949_s6 + $0x8b8] ss:$48 sps:$4 sm:$0xff]   ;;  %v18631_v32 = vld [vmem:[%s20949_s6 + $0x25c] ss:$48 sps:$4 sm:$0xff]  }
 0x1e4   : > { %3769 = vmatprep.subr.bf16.mxu1 %v18544_v33  ;;  %v18634_v33 = vld [vmem:[%s20949_s6 + $0x85c] ss:$48 sps:$4 sm:$0xff]  }
 0x1e6   : > { %3727 = vmatpush1.bf16.msra.mxu0 %v18539_v34  ;;  %v18629_v34 = vld [vmem:[%s20949_s6 + $0x258] ss:$48 sps:$4 sm:$0xff]  }
 0x1e7   : > { %3770 = vmatpush1.bf16.msra.mxu1 %v18542_v35  ;;  %3728 = vmatprep.subr.bf16.mxu0 %v18547_v36  ;;  %v18632_v35 = vld [vmem:[%s20949_s6 + $0x858] ss:$48 sps:$4 sm:$0xff]   ;;  %v18637_v36 = vld [vmem:[%s20949_s6 + $0x1fc] ss:$48 sps:$4 sm:$0xff]  }
 0x1e8   : > { %3771 = vmatprep.subr.bf16.mxu1 %v18550_v37  ;;  %v18640_v37 = vld [vmem:[%s20949_s6 + $0x7fc] ss:$48 sps:$4 sm:$0xff]  }
 0x1ea   : > { %3729 = vmatpush1.bf16.msra.mxu0 %v18545_v38  ;;  %v18635_v38 = vld [vmem:[%s20949_s6 + $0x1f8] ss:$48 sps:$4 sm:$0xff]  }
 0x1eb   : > { %3772 = vmatpush1.bf16.msra.mxu1 %v18548_v39  ;;  %3730 = vmatprep.subr.bf16.mxu0 %v18553_v40  ;;  %v18638_v39 = vld [vmem:[%s20949_s6 + $0x7f8] ss:$48 sps:$4 sm:$0xff]   ;;  %v18643_v40 = vld [vmem:[%s20949_s6 + $0x19c] ss:$48 sps:$4 sm:$0xff]  }
 0x1ec   : > { %3773 = vmatprep.subr.bf16.mxu1 %v18556_v41  ;;  %v18646_v41 = vld [vmem:[%s20949_s6 + $0x79c] ss:$48 sps:$4 sm:$0xff]  }
 0x1ee   : > { %3731 = vmatpush1.bf16.msra.mxu0 %v18551_v42  ;;  %v18641_v42 = vld [vmem:[%s20949_s6 + $0x198] ss:$48 sps:$4 sm:$0xff]  }
 0x1ef   : > { %3774 = vmatpush1.bf16.msra.mxu1 %v18554_v43  ;;  %3732 = vmatprep.subr.bf16.mxu0 %v18559_v44  ;;  %v18644_v43 = vld [vmem:[%s20949_s6 + $0x798] ss:$48 sps:$4 sm:$0xff]   ;;  %v18649_v44 = vld [vmem:[%s20949_s6 + $0x13c] ss:$48 sps:$4 sm:$0xff]  }
 0x1f0   : > { %3775 = vmatprep.subr.bf16.mxu1 %v18562_v45  ;;  %v18652_v45 = vld [vmem:[%s20949_s6 + $0x73c] ss:$48 sps:$4 sm:$0xff]  }
 0x1f2   : > { %3733 = vmatpush1.bf16.msra.mxu0 %v18557_v46  ;;  %v18647_v46 = vld [vmem:[%s20949_s6 + $0x138] ss:$48 sps:$4 sm:$0xff]  }
 0x1f3   : > { %3776 = vmatpush1.bf16.msra.mxu1 %v18560_v47  ;;  %3734 = vmatprep.subr.bf16.mxu0 %v18565_v48  ;;  %v18650_v47 = vld [vmem:[%s20949_s6 + $0x738] ss:$48 sps:$4 sm:$0xff]   ;;  %v18655_v48 = vld [vmem:[%s20949_s6 + $0xdc] ss:$48 sps:$4 sm:$0xff]  }
 0x1f4   : > { %3777 = vmatprep.subr.bf16.mxu1 %v18568_v49  ;;  %v18658_v49 = vld [vmem:[%s20949_s6 + $0x6dc] ss:$48 sps:$4 sm:$0xff]  }
 0x1f6   : > { %3735 = vmatpush1.bf16.msra.mxu0 %v18563_v50  ;;  %v18653_v50 = vld [vmem:[%s20949_s6 + $0xd8] ss:$48 sps:$4 sm:$0xff]  }
 0x1f7   : > { %3778 = vmatpush1.bf16.msra.mxu1 %v18566_v51  ;;  %3736 = vmatprep.subr.bf16.mxu0 %v18571_v52  ;;  %v18656_v51 = vld [vmem:[%s20949_s6 + $0x6d8] ss:$48 sps:$4 sm:$0xff]   ;;  %v18661_v52 = vld [vmem:[%s20949_s6 + $0x7c] ss:$48 sps:$4 sm:$0xff]  }
 0x1f8   : > { %3779 = vmatprep.subr.bf16.mxu1 %v18574_v53  ;;  %v18664_v53 = vld [vmem:[%s20949_s6 + $0x67c] ss:$48 sps:$4 sm:$0xff]  }
 0x1fa   : > { %3737 = vmatpush1.bf16.msra.mxu0 %v18569_v54  ;;  %v18659_v54 = vld [vmem:[%s20949_s6 + $0x78] ss:$48 sps:$4 sm:$0xff]  }
 0x1fb   : > { %3780 = vmatpush1.bf16.msra.mxu1 %v18572_v55  ;;  %3738 = vmatprep.subr.bf16.mxu0 %v18577_v56  ;;  %v18662_v55 = vld [vmem:[%s20949_s6 + $0x678] ss:$48 sps:$4 sm:$0xff]   ;;  %v18667_v56 = vld [vmem:[%s20949_s6 + $0x1c] ss:$48 sps:$4 sm:$0xff]  }
 0x1fc   : > { %3781 = vmatprep.subr.bf16.mxu1 %v18580_v57  ;;  %v18670_v57 = vld [vmem:[%s20949_s6 + $0x61c] ss:$48 sps:$4 sm:$0xff]  }
 0x1fe   : > { %3739 = vmatpush2.bf16.msra.mxu0 %v18575_v58  ;;  %v18665_v58 = vld [vmem:[%s20949_s6 + $0x18] ss:$48 sps:$4 sm:$0xff]  }
 0x1ff   : > { %3782 = vmatpush2.bf16.msra.mxu1 %v18578_v59  ;;  %3740 = vmatprep.subr.bf16.mxu0 %v18583_v60  ;;  %v18668_v59 = vld [vmem:[%s20949_s6 + $0x618] ss:$48 sps:$4 sm:$0xff]   ;;  %v18673_v60 = vld [vmem:[%s20949_s6 + $0x5bc] ss:$48 sps:$4 sm:$0xff]  }
 0x200   : > { %3783 = vmatprep.subr.bf16.mxu1 %v18586_v63  ;;  %v18676_v63 = vld [vmem:[%s20949_s6 + $0xbbc] ss:$48 sps:$4 sm:$0xff]  }
 0x202   : > { %3741 = vmatpush2.bf16.msra.mxu0 %v18581_v0  ;;  %v18671_v0 = vld [vmem:[%s20949_s6 + $0x5b8] ss:$48 sps:$4 sm:$0xff]  }
 0x203   : > { %3784 = vmatpush2.bf16.msra.mxu1 %v18584_v1  ;;  %3742 = vmatprep.subr.bf16.mxu0 %v18589_v2  ;;  %v18674_v1 = vld [vmem:[%s20949_s6 + $0xbb8] ss:$48 sps:$4 sm:$0xff]   ;;  %v18679_v2 = vld [vmem:[%s20949_s6 + $0x55c] ss:$48 sps:$4 sm:$0xff]  }
 0x204   : > { %3785 = vmatprep.subr.bf16.mxu1 %v18592_v3  ;;  %v18682_v3 = vld [vmem:[%s20949_s6 + $0xb5c] ss:$48 sps:$4 sm:$0xff]  }
 0x206   : > { %3743 = vmatpush2.bf16.msra.mxu0 %v18587_v4  ;;  %v18677_v4 = vld [vmem:[%s20949_s6 + $0x558] ss:$48 sps:$4 sm:$0xff]  }
 0x207   : > { %3786 = vmatpush2.bf16.msra.mxu1 %v18590_v5  ;;  %3744 = vmatprep.subr.bf16.mxu0 %v18595_v6  ;;  %v18680_v5 = vld [vmem:[%s20949_s6 + $0xb58] ss:$48 sps:$4 sm:$0xff]   ;;  %v18685_v6 = vld [vmem:[%s20949_s6 + $0x4fc] ss:$48 sps:$4 sm:$0xff]  }
 0x208   : > { %3787 = vmatprep.subr.bf16.mxu1 %v18598_v7  ;;  %v18688_v7 = vld [vmem:[%s20949_s6 + $0xafc] ss:$48 sps:$4 sm:$0xff]  }
 0x20a   : > { %3745 = vmatpush2.bf16.msra.mxu0 %v18593_v8  ;;  %v18683_v8 = vld [vmem:[%s20949_s6 + $0x4f8] ss:$48 sps:$4 sm:$0xff]  }
 0x20b   : > { %3788 = vmatpush2.bf16.msra.mxu1 %v18596_v9  ;;  %3746 = vmatprep.subr.bf16.mxu0 %v18601_v10  ;;  %v18686_v9 = vld [vmem:[%s20949_s6 + $0xaf8] ss:$48 sps:$4 sm:$0xff]   ;;  %v18691_v10 = vld [vmem:[%s20949_s6 + $0x49c] ss:$48 sps:$4 sm:$0xff]  }
 0x20c   : > { %3789 = vmatprep.subr.bf16.mxu1 %v18604_v11  ;;  %v18694_v11 = vld [vmem:[%s20949_s6 + $0xa9c] ss:$48 sps:$4 sm:$0xff]  }
 0x20e   : > { %3747 = vmatpush2.bf16.msra.mxu0 %v18599_v12  ;;  %v18689_v12 = vld [vmem:[%s20949_s6 + $0x498] ss:$48 sps:$4 sm:$0xff]  }
 0x20f   : > { %3790 = vmatpush2.bf16.msra.mxu1 %v18602_v13  ;;  %3748 = vmatprep.subr.bf16.mxu0 %v18607_v14  ;;  %v18692_v13 = vld [vmem:[%s20949_s6 + $0xa98] ss:$48 sps:$4 sm:$0xff]   ;;  %v18697_v14 = vld [vmem:[%s20949_s6 + $0x43c] ss:$48 sps:$4 sm:$0xff]  }
 0x210   : > { %3791 = vmatprep.subr.bf16.mxu1 %v18610_v15  ;;  %v18700_v15 = vld [vmem:[%s20949_s6 + $0xa3c] ss:$48 sps:$4 sm:$0xff]  }
 0x212   : > { %3749 = vmatpush2.bf16.msra.mxu0 %v18605_v16  ;;  %v18695_v16 = vld [vmem:[%s20949_s6 + $0x438] ss:$48 sps:$4 sm:$0xff]  }
 0x213   : > { %3792 = vmatpush2.bf16.msra.mxu1 %v18608_v17  ;;  %3750 = vmatprep.subr.bf16.mxu0 %v18613_v18  ;;  %v18698_v17 = vld [vmem:[%s20949_s6 + $0xa38] ss:$48 sps:$4 sm:$0xff]   ;;  %v18703_v18 = vld [vmem:[%s20949_s6 + $0x3dc] ss:$48 sps:$4 sm:$0xff]  }
 0x214   : > { %3793 = vmatprep.subr.bf16.mxu1 %v18616_v19  ;;  %v18706_v19 = vld [vmem:[%s20949_s6 + $0x9dc] ss:$48 sps:$4 sm:$0xff]  }
 0x216   : > { %3751 = vmatpush2.bf16.msra.mxu0 %v18611_v22  ;;  %v18701_v22 = vld [vmem:[%s20949_s6 + $0x3d8] ss:$48 sps:$4 sm:$0xff]  }
 0x217   : > { %3794 = vmatpush2.bf16.msra.mxu1 %v18614_v23  ;;  %3752 = vmatprep.subr.bf16.mxu0 %v18619_v24  ;;  %v18704_v23 = vld [vmem:[%s20949_s6 + $0x9d8] ss:$48 sps:$4 sm:$0xff]   ;;  %v18709_v24 = vld [vmem:[%s20949_s6 + $0x37c] ss:$48 sps:$4 sm:$0xff]  }
 0x218   : > { %3795 = vmatprep.subr.bf16.mxu1 %v18622_v25  ;;  %v18712_v25 = vld [vmem:[%s20949_s6 + $0x97c] ss:$48 sps:$4 sm:$0xff]  }
 0x21a   : > { %3753 = vmatpush2.bf16.msra.mxu0 %v18617_v26  ;;  %v1570_v26 = vlaneseq }
 0x21b   : > { %3796 = vmatpush2.bf16.msra.mxu1 %v18620_v27  ;;  %3808 = vmatprep.subr.bf16.mxu0 %v18625_v28  ;;  %v18707_v27 = vld [vmem:[%s20949_s6 + $0x378] ss:$48 sps:$4 sm:$0xff]  }
 0x21c   : > { %3851 = vmatprep.subr.bf16.mxu1 %v18628_v29  ;;  %v18710_v28 = vld [vmem:[%s20949_s6 + $0x978] ss:$48 sps:$4 sm:$0xff]   ;;  %v18715_v29 = vld [vmem:[%s20949_s6 + $0x31c] ss:$48 sps:$4 sm:$0xff]  }
 0x21d   : > { %3755 = vmatmul.mubr.bf16.vlgmr.msra.gmra.mxu0 %v21090_v20 }
 0x21e   : > { %3798 = vmatmul.mubr.bf16.vlgmr.msra.gmra.mxu1 %v21092_v21  ;;  %3809 = vmatpush1.bf16.msra.mxu0 %v18623_v30  ;;  %v18718_v30 = vld [vmem:[%s20949_s6 + $0x91c] ss:$48 sps:$4 sm:$0xff]  }
 0x21f   : > { %3852 = vmatpush1.bf16.msra.mxu1 %v18626_v31  ;;  %3810 = vmatprep.subr.bf16.mxu0 %v18631_v32  ;;  %v21295_v31 = vshrl.u32 %v1570_v26, 7  ;;  %v18713_v32 = vld [vmem:[%s20949_s6 + $0x318] ss:$48 sps:$4 sm:$0xff]  }
 0x220   : > { %3853 = vmatprep.subr.bf16.mxu1 %v18634_v33  ;;  %3840 = vmatprep.mubr.bf16.mxu0 %v21067_v61  ;;  %v18716_v33 = vld [vmem:[%s20949_s6 + $0x918] ss:$48 sps:$4 sm:$0xff]  }
 0x221   : > { %3883 = vmatprep.mubr.bf16.mxu1 %v21069_v62 }
 0x222   : > { %3811 = vmatpush1.bf16.msra.mxu0 %v18629_v34  ;;  %v18721_v34 = vld [vmem:[%s20949_s6 + $0x2c4] ss:$48 sps:$4 sm:$0xff]  }
 0x223   : > { %3854 = vmatpush1.bf16.msra.mxu1 %v18632_v35  ;;  %3812 = vmatprep.subr.bf16.mxu0 %v18637_v36  ;;  %v18724_v35 = vld [vmem:[%s20949_s6 + $0x8c4] ss:$48 sps:$4 sm:$0xff]  }
 0x224   : > { %3855 = vmatprep.subr.bf16.mxu1 %v18640_v37  ;;  %v21302_v36 = vld [vmem:[%s20957_s25] sm:$0xff]  ;;  %v21305_v37 = vsub.s32 1, %v21295_v31 }
 0x226   : > { %3813 = vmatpush1.bf16.msra.mxu0 %v18635_v38  ;;  %23679 = vst [vmem:[#allocation51_spill] sm:$0xff] %v21305_v37  ;;  %v18719_v38 = vld [vmem:[%s20949_s6 + $0x2c0] ss:$48 sps:$4 sm:$0xff]  }
 0x227   : > { %3856 = vmatpush1.bf16.msra.mxu1 %v18638_v39  ;;  %3814 = vmatprep.subr.bf16.mxu0 %v18643_v40  ;;  %v18722_v39 = vld [vmem:[%s20949_s6 + $0x8c0] ss:$48 sps:$4 sm:$0xff]   ;;  %v18727_v40 = vld [vmem:[%s20949_s6 + $0x264] ss:$48 sps:$4 sm:$0xff]  }
 0x228   : > { %3857 = vmatprep.subr.bf16.mxu1 %v18646_v41  ;;  %v18730_v41 = vld [vmem:[%s20949_s6 + $0x864] ss:$48 sps:$4 sm:$0xff]  }
 0x22a   : > { %3815 = vmatpush1.bf16.msra.mxu0 %v18641_v42  ;;  %v21313_v42 = vrot.slane %v21302_v36, %v21305_v37 }
 0x22b   : > { %3858 = vmatpush1.bf16.msra.mxu1 %v18644_v43  ;;  %3816 = vmatprep.subr.bf16.mxu0 %v18649_v44  ;;  %v18725_v43 = vld [vmem:[%s20949_s6 + $0x260] ss:$48 sps:$4 sm:$0xff]  }
 0x22c   : > { %3859 = vmatprep.subr.bf16.mxu1 %v18652_v45  ;;  %v18728_v44 = vld [vmem:[%s20949_s6 + $0x860] ss:$48 sps:$4 sm:$0xff]  }
 0x22e   : > { %3817 = vmatpush1.bf16.msra.mxu0 %v18647_v46 }
 0x22f   : > { %3860 = vmatpush1.bf16.msra.mxu1 %v18650_v47  ;;  %3818 = vmatprep.subr.bf16.mxu0 %v18655_v48  ;;  %v18733_v47 = vld [vmem:[%s20949_s6 + $0x204] ss:$48 sps:$4 sm:$0xff]  }
 0x230   : > { %3861 = vmatprep.subr.bf16.mxu1 %v18658_v49  ;;  %v18736_v48 = vld [vmem:[%s20949_s6 + $0x804] ss:$48 sps:$4 sm:$0xff]  }
 0x232   : > { %3819 = vmatpush1.bf16.msra.mxu0 %v18653_v50 }
 0x233   : > { %3862 = vmatpush1.bf16.msra.mxu1 %v18656_v51  ;;  %3820 = vmatprep.subr.bf16.mxu0 %v18661_v52  ;;  %v18731_v51 = vld [vmem:[%s20949_s6 + $0x200] ss:$48 sps:$4 sm:$0xff]  }
 0x234   : > { %3863 = vmatprep.subr.bf16.mxu1 %v18664_v53  ;;  %v18734_v52 = vld [vmem:[%s20949_s6 + $0x800] ss:$48 sps:$4 sm:$0xff]  }
 0x236   : > { %3821 = vmatpush1.bf16.msra.mxu0 %v18659_v54  ;;  %v18739_v54 = vld [vmem:[%s20949_s6 + $0x1a4] ss:$48 sps:$4 sm:$0xff]  }
 0x237   : > { %3864 = vmatpush1.bf16.msra.mxu1 %v18662_v55  ;;  %3822 = vmatprep.subr.bf16.mxu0 %v18667_v56  ;;  %v18742_v55 = vld [vmem:[%s20949_s6 + $0x7a4] ss:$48 sps:$4 sm:$0xff]  }
 0x238   : > { %3865 = vmatprep.subr.bf16.mxu1 %v18670_v57  ;;  %v18737_v57 = vld [vmem:[%s20949_s6 + $0x1a0] ss:$48 sps:$4 sm:$0xff]  }
 0x23a   : > { %3823 = vmatpush1.bf16.msra.mxu0 %v18665_v58  ;;  %v18740_v58 = vld [vmem:[%s20949_s6 + $0x7a0] ss:$48 sps:$4 sm:$0xff]  }
 0x23b   : > { %3866 = vmatpush1.bf16.msra.mxu1 %v18668_v59  ;;  %3824 = vmatprep.subr.bf16.mxu0 %v18673_v60  ;;  %v18745_v59 = vld [vmem:[%s20949_s6 + $0x144] ss:$48 sps:$4 sm:$0xff]  }
 0x23c   : > { %3867 = vmatprep.subr.bf16.mxu1 %v18676_v63  ;;  %v18748_v60 = vld [vmem:[%s20949_s6 + $0x744] ss:$48 sps:$4 sm:$0xff]   ;;  %v18743_v63 = vld [vmem:[%s20949_s6 + $0x140] ss:$48 sps:$4 sm:$0xff]  }
 0x23e   : > { %3825 = vmatpush2.bf16.msra.mxu0 %v18671_v0  ;;  %v18746_v0 = vld [vmem:[%s20949_s6 + $0x740] ss:$48 sps:$4 sm:$0xff]  }
 0x23f   : > { %3868 = vmatpush2.bf16.msra.mxu1 %v18674_v1  ;;  %3826 = vmatprep.subr.bf16.mxu0 %v18679_v2  ;;  %v18751_v1 = vld [vmem:[%s20949_s6 + $0xe4] ss:$48 sps:$4 sm:$0xff]  }
 0x240   : > { %3869 = vmatprep.subr.bf16.mxu1 %v18682_v3  ;;  %v18754_v2 = vld [vmem:[%s20949_s6 + $0x6e4] ss:$48 sps:$4 sm:$0xff]   ;;  %v18749_v3 = vld [vmem:[%s20949_s6 + $0xe0] ss:$48 sps:$4 sm:$0xff]  }
 0x242   : > { %3827 = vmatpush2.bf16.msra.mxu0 %v18677_v4  ;;  %v18752_v4 = vld [vmem:[%s20949_s6 + $0x6e0] ss:$48 sps:$4 sm:$0xff]  }
 0x243   : > { %3870 = vmatpush2.bf16.msra.mxu1 %v18680_v5  ;;  %3828 = vmatprep.subr.bf16.mxu0 %v18685_v6  ;;  %v18757_v5 = vld [vmem:[%s20949_s6 + $0x84] ss:$48 sps:$4 sm:$0xff]  }
 0x244   : > { %3871 = vmatprep.subr.bf16.mxu1 %v18688_v7  ;;  %v18760_v6 = vld [vmem:[%s20949_s6 + $0x684] ss:$48 sps:$4 sm:$0xff]   ;;  %v18755_v7 = vld [vmem:[%s20949_s6 + $0x80] ss:$48 sps:$4 sm:$0xff]  }
 0x246   : > { %3829 = vmatpush2.bf16.msra.mxu0 %v18683_v8  ;;  %v18758_v8 = vld [vmem:[%s20949_s6 + $0x680] ss:$48 sps:$4 sm:$0xff]  }
 0x247   : > { %3872 = vmatpush2.bf16.msra.mxu1 %v18686_v9  ;;  %3830 = vmatprep.subr.bf16.mxu0 %v18691_v10  ;;  %v18763_v9 = vld [vmem:[%s20949_s6 + $0x24] ss:$48 sps:$4 sm:$0xff]  }
 0x248   : > { %3873 = vmatprep.subr.bf16.mxu1 %v18694_v11  ;;  %v18766_v10 = vld [vmem:[%s20949_s6 + $0x624] ss:$48 sps:$4 sm:$0xff]   ;;  %v18761_v11 = vld [vmem:[%s20949_s6 + $0x20] ss:$48 sps:$4 sm:$0xff]  }
 0x24a   : > { %3831 = vmatpush2.bf16.msra.mxu0 %v18689_v12  ;;  %v18764_v12 = vld [vmem:[%s20949_s6 + $0x620] ss:$48 sps:$4 sm:$0xff]  }
 0x24b   : > { %3874 = vmatpush2.bf16.msra.mxu1 %v18692_v13  ;;  %3832 = vmatprep.subr.bf16.mxu0 %v18697_v14  ;;  %v18769_v13 = vld [vmem:[%s20949_s6 + $0x5c4] ss:$48 sps:$4 sm:$0xff]  }
 0x24c   : > { %3875 = vmatprep.subr.bf16.mxu1 %v18700_v15  ;;  %v18772_v14 = vld [vmem:[%s20949_s6 + $0xbc4] ss:$48 sps:$4 sm:$0xff]   ;;  %v18767_v15 = vld [vmem:[%s20949_s6 + $0x5c0] ss:$48 sps:$4 sm:$0xff]  }
 0x24e   : > { %3833 = vmatpush2.bf16.msra.mxu0 %v18695_v16  ;;  %v18770_v16 = vld [vmem:[%s20949_s6 + $0xbc0] ss:$48 sps:$4 sm:$0xff]  }
 0x24f   : > { %3876 = vmatpush2.bf16.msra.mxu1 %v18698_v17  ;;  %3834 = vmatprep.subr.bf16.mxu0 %v18703_v18  ;;  %v18775_v17 = vld [vmem:[%s20949_s6 + $0x564] ss:$48 sps:$4 sm:$0xff]  }
 0x250   : > { %3877 = vmatprep.subr.bf16.mxu1 %v18706_v19  ;;  %v18778_v18 = vld [vmem:[%s20949_s6 + $0xb64] ss:$48 sps:$4 sm:$0xff]   ;;  %v18773_v19 = vld [vmem:[%s20949_s6 + $0x560] ss:$48 sps:$4 sm:$0xff]  }
 0x252   : > { %3835 = vmatpush2.bf16.msra.mxu0 %v18701_v22  ;;  %v18776_v22 = vld [vmem:[%s20949_s6 + $0xb60] ss:$48 sps:$4 sm:$0xff]  }
 0x253   : > { %3878 = vmatpush2.bf16.msra.mxu1 %v18704_v23  ;;  %3836 = vmatprep.subr.bf16.mxu0 %v18709_v24  ;;  %v18781_v23 = vld [vmem:[%s20949_s6 + $0x504] ss:$48 sps:$4 sm:$0xff]  }
 0x254   : > { %3879 = vmatprep.subr.bf16.mxu1 %v18712_v25  ;;  %v18784_v24 = vld [vmem:[%s20949_s6 + $0xb04] ss:$48 sps:$4 sm:$0xff]   ;;  %v18779_v25 = vld [vmem:[%s20949_s6 + $0x500] ss:$48 sps:$4 sm:$0xff]  }
 0x256   : > { %3837 = vmatpush2.bf16.msra.mxu0 %v18707_v27  ;;  %v18782_v27 = vld [vmem:[%s20949_s6 + $0xb00] ss:$48 sps:$4 sm:$0xff]  }
 0x257   : > { %3880 = vmatpush2.bf16.msra.mxu1 %v18710_v28  ;;  %3838 = vmatprep.subr.bf16.mxu0 %v18715_v29  ;;  %v18787_v28 = vld [vmem:[%s20949_s6 + $0x4a4] ss:$48 sps:$4 sm:$0xff]  }
 0x258   : > { %3881 = vmatprep.subr.bf16.mxu1 %v18718_v30  ;;  %v18790_v29 = vld [vmem:[%s20949_s6 + $0xaa4] ss:$48 sps:$4 sm:$0xff]   ;;  %v18785_v30 = vld [vmem:[%s20949_s6 + $0x4a0] ss:$48 sps:$4 sm:$0xff]  }
 0x25a   : > { %3839 = vmatpush2.bf16.msra.mxu0 %v18713_v32  ;;  %v18788_v32 = vld [vmem:[%s20949_s6 + $0xaa0] ss:$48 sps:$4 sm:$0xff]  }
 0x25b   : > { %3882 = vmatpush2.bf16.msra.mxu1 %v18716_v33  ;;  %3894 = vmatprep.subr.bf16.mxu0 %v18721_v34  ;;  %v18793_v33 = vld [vmem:[%s20949_s6 + $0x444] ss:$48 sps:$4 sm:$0xff]  }
 0x25c   : > { %3937 = vmatprep.subr.bf16.mxu1 %v18724_v35  ;;  %v18796_v34 = vld [vmem:[%s20949_s6 + $0xa44] ss:$48 sps:$4 sm:$0xff]   ;;  %v18791_v35 = vld [vmem:[%s20949_s6 + $0x440] ss:$48 sps:$4 sm:$0xff]  }
 0x25d   : > { %v21317_v45 = vpop.f32.mrf.mxu0  ;;  %3841 = vmatmul.mubr.bf16.vlgmr.msra.gmra.mxu0 %v21090_v20 }
 0x25e   : > { %v21319_v46 = vpop.f32.mrf.mxu1  ;;  %3884 = vmatmul.mubr.bf16.vlgmr.msra.gmra.mxu1 %v21092_v21  ;;  %3895 = vmatpush1.bf16.msra.mxu0 %v18719_v38  ;;  %v18794_v38 = vld [vmem:[%s20949_s6 + $0xa40] ss:$48 sps:$4 sm:$0xff]  }
 0x25f   : > { %3938 = vmatpush1.bf16.msra.mxu1 %v18722_v39  ;;  %v3586_v49 = vpop.f32.mrf.mxu0  ;;  %3896 = vmatprep.subr.bf16.mxu0 %v18727_v40  ;;  %v18799_v39 = vld [vmem:[%s20949_s6 + $0x3e4] ss:$48 sps:$4 sm:$0xff]  }
 0x260   : > { %3939 = vmatprep.subr.bf16.mxu1 %v18730_v41  ;;  %v3587_v50 = vadd.f32 %v3586_v49, %v21313_v42  ;;  %3926 = vmatprep.mubr.bf16.mxu0 %v21067_v61  ;;  %v3629_v53 = vpop.f32.mrf.mxu1  ;;  %v18802_v40 = vld [vmem:[%s20949_s6 + $0x9e4] ss:$48 sps:$4 sm:$0xff]   ;;  %v18797_v41 = vld [vmem:[%s20949_s6 + $0x3e0] ss:$48 sps:$4 sm:$0xff]  }
 0x261   : > { %3969 = vmatprep.mubr.bf16.mxu1 %v21069_v62  ;;  %v18806_v49 = vld [vmem:[%s20949_s6 + $0x980] ss:$48 sps:$4 sm:$0xff]  }
 0x262   : > { %v21332_v56 = vadd.f32 %v3629_v53, %v3587_v50  ;;  %3897 = vmatpush1.bf16.msra.mxu0 %v18725_v43  ;;  %v18800_v43 = vld [vmem:[%s20949_s6 + $0x9e0] ss:$48 sps:$4 sm:$0xff]   ;;  %v18811_v50 = vld [vmem:[%s20949_s6 + $0x324] ss:$48 sps:$4 sm:$0xff]  }
 0x263   : > { %3940 = vmatpush1.bf16.msra.mxu1 %v18728_v44  ;;  %3898 = vmatprep.subr.bf16.mxu0 %v18733_v47  ;;  %v18805_v44 = vld [vmem:[%s20949_s6 + $0x384] ss:$48 sps:$4 sm:$0xff]   ;;  %v18812_v53 = vld [vmem:[%s20949_s6 + $0x920] ss:$48 sps:$4 sm:$0xff]  }
 0x264   : > { %3941 = vmatprep.subr.bf16.mxu1 %v18736_v48  ;;  %v18808_v47 = vld [vmem:[%s20949_s6 + $0x984] ss:$48 sps:$4 sm:$0xff]   ;;  %v18803_v48 = vld [vmem:[%s20949_s6 + $0x380] ss:$48 sps:$4 sm:$0xff]  }
 0x266   : > { %3899 = vmatpush1.bf16.msra.mxu0 %v18731_v51  ;;  %v18814_v51 = vld [vmem:[%s20949_s6 + $0x924] ss:$48 sps:$4 sm:$0xff]  }
 0x267   : > { %3942 = vmatpush1.bf16.msra.mxu1 %v18734_v52  ;;  %3900 = vmatprep.subr.bf16.mxu0 %v18739_v54  ;;  %v18809_v52 = vld [vmem:[%s20949_s6 + $0x320] ss:$48 sps:$4 sm:$0xff]   ;;  %v18817_v54 = vld [vmem:[%s20949_s6 + $0x2cc] ss:$48 sps:$4 sm:$0xff]  }
 0x268   : > { %3943 = vmatprep.subr.bf16.mxu1 %v18742_v55  ;;  %v18820_v55 = vld [vmem:[%s20949_s6 + $0x8cc] ss:$48 sps:$4 sm:$0xff]  }
 0x26a   : > { %3901 = vmatpush1.bf16.msra.mxu0 %v18737_v57  ;;  %v21387_v57 = vsub.s32 2, %v21295_v31 }
 0x26b   : > { %3944 = vmatpush1.bf16.msra.mxu1 %v18740_v58  ;;  %3902 = vmatprep.subr.bf16.mxu0 %v18745_v59  ;;  %v21389_v58 = vpop.f32.mrf.mxu0  ;;  %v21391_v59 = vpop.f32.mrf.mxu1 }
 0x26c   : > { %3945 = vmatprep.subr.bf16.mxu1 %v18748_v60  ;;  %v18815_v60 = vld [vmem:[%s20949_s6 + $0x2c8] ss:$48 sps:$4 sm:$0xff]  }
 0x26e   : > { %3903 = vmatpush1.bf16.msra.mxu0 %v18743_v63  ;;  %v21395_v63 = vsub.s32 3, %v21295_v31 }
 0x26f   : > { %3946 = vmatpush1.bf16.msra.mxu1 %v18746_v0  ;;  %3904 = vmatprep.subr.bf16.mxu0 %v18751_v1  ;;  %v18818_v0 = vld [vmem:[%s20949_s6 + $0x8c8] ss:$48 sps:$4 sm:$0xff]   ;;  %v18823_v1 = vld [vmem:[%s20949_s6 + $0x26c] ss:$48 sps:$4 sm:$0xff]  }
 0x270   : > { %3947 = vmatprep.subr.bf16.mxu1 %v18754_v2  ;;  %v18826_v2 = vld [vmem:[%s20949_s6 + $0x86c] ss:$48 sps:$4 sm:$0xff]  }
 0x272   : > { %3905 = vmatpush1.bf16.msra.mxu0 %v18749_v3  ;;  %v1581_v3 = vrot.slane %v21302_v36, %v21387_v57 }
 0x273   : > { %3948 = vmatpush1.bf16.msra.mxu1 %v18752_v4  ;;  %3906 = vmatprep.subr.bf16.mxu0 %v18757_v5  ;;  %v21402_v4 = vpop.f32.mrf.mxu0  ;;  %v21404_v5 = vpop.f32.mrf.mxu1 }
 0x274   : > { %3949 = vmatprep.subr.bf16.mxu1 %v18760_v6  ;;  %v21408_v6 = vrot.slane %v21302_v36, %v21395_v63 }
 0x276   : > { %3907 = vmatpush1.bf16.msra.mxu0 %v18755_v7  ;;  %v18821_v7 = vld [vmem:[%s20949_s6 + $0x268] ss:$48 sps:$4 sm:$0xff]  }
 0x277   : > { %3950 = vmatpush1.bf16.msra.mxu1 %v18758_v8  ;;  %3908 = vmatprep.subr.bf16.mxu0 %v18763_v9  ;;  %v18824_v8 = vld [vmem:[%s20949_s6 + $0x868] ss:$48 sps:$4 sm:$0xff]  }
 0x278   : > { %3951 = vmatprep.subr.bf16.mxu1 %v18766_v10 }
 0x27a   : > { %3909 = vmatpush1.bf16.msra.mxu0 %v18761_v11  ;;  %v18829_v11 = vld [vmem:[%s20949_s6 + $0x20c] ss:$48 sps:$4 sm:$0xff]  }
 0x27b   : > { %3952 = vmatpush1.bf16.msra.mxu1 %v18764_v12  ;;  %3910 = vmatprep.subr.bf16.mxu0 %v18769_v13  ;;  %v18832_v12 = vld [vmem:[%s20949_s6 + $0x80c] ss:$48 sps:$4 sm:$0xff]  }
 0x27c   : > { %3953 = vmatprep.subr.bf16.mxu1 %v18772_v14 }
 0x27e   : > { %3911 = vmatpush2.bf16.msra.mxu0 %v18767_v15 }
 0x27f   : > { %3954 = vmatpush2.bf16.msra.mxu1 %v18770_v16  ;;  %3912 = vmatprep.subr.bf16.mxu0 %v18775_v17  ;;  %v18827_v17 = vld [vmem:[%s20949_s6 + $0x208] ss:$48 sps:$4 sm:$0xff]  }
 0x280   : > { %3955 = vmatprep.subr.bf16.mxu1 %v18778_v18  ;;  %v18830_v18 = vld [vmem:[%s20949_s6 + $0x808] ss:$48 sps:$4 sm:$0xff]  }
 0x282   : > { %3913 = vmatpush2.bf16.msra.mxu0 %v18773_v19 }
 0x283   : > { %3956 = vmatpush2.bf16.msra.mxu1 %v18776_v22  ;;  %3914 = vmatprep.subr.bf16.mxu0 %v18781_v23  ;;  %v18835_v22 = vld [vmem:[%s20949_s6 + $0x1ac] ss:$48 sps:$4 sm:$0xff]  }
 0x284   : > { %3957 = vmatprep.subr.bf16.mxu1 %v18784_v24  ;;  %v18838_v23 = vld [vmem:[%s20949_s6 + $0x7ac] ss:$48 sps:$4 sm:$0xff]  }
 0x286   : > { %3915 = vmatpush2.bf16.msra.mxu0 %v18779_v25 }
 0x287   : > { %3958 = vmatpush2.bf16.msra.mxu1 %v18782_v27  ;;  %3916 = vmatprep.subr.bf16.mxu0 %v18787_v28 }
 0x288   : > { %3959 = vmatprep.subr.bf16.mxu1 %v18790_v29  ;;  %v18841_v29 = vld [vmem:[%s20949_s6 + $0x14c] ss:$48 sps:$4 sm:$0xff]  }
 0x28a   : > { %3917 = vmatpush2.bf16.msra.mxu0 %v18785_v30  ;;  %v18844_v30 = vld [vmem:[%s20949_s6 + $0x74c] ss:$48 sps:$4 sm:$0xff]  }
 0x28b   : > { %3960 = vmatpush2.bf16.msra.mxu1 %v18788_v32  ;;  %3918 = vmatprep.subr.bf16.mxu0 %v18793_v33  ;;  %v18839_v32 = vld [vmem:[%s20949_s6 + $0x148] ss:$48 sps:$4 sm:$0xff]  }
 0x28c   : > { %3961 = vmatprep.subr.bf16.mxu1 %v18796_v34  ;;  %v18842_v33 = vld [vmem:[%s20949_s6 + $0x748] ss:$48 sps:$4 sm:$0xff]   ;;  %v18847_v34 = vld [vmem:[%s20949_s6 + $0xec] ss:$48 sps:$4 sm:$0xff]  }
 0x28e   : > { %3919 = vmatpush2.bf16.msra.mxu0 %v18791_v35  ;;  %v18850_v35 = vld [vmem:[%s20949_s6 + $0x6ec] ss:$48 sps:$4 sm:$0xff]  }
 0x28f   : > { %3962 = vmatpush2.bf16.msra.mxu1 %v18794_v38  ;;  %3920 = vmatprep.subr.bf16.mxu0 %v18799_v39  ;;  %v18845_v38 = vld [vmem:[%s20949_s6 + $0xe8] ss:$48 sps:$4 sm:$0xff]  }
 0x290   : > { %3963 = vmatprep.subr.bf16.mxu1 %v18802_v40  ;;  %v18848_v39 = vld [vmem:[%s20949_s6 + $0x6e8] ss:$48 sps:$4 sm:$0xff]   ;;  %v18853_v40 = vld [vmem:[%s20949_s6 + $0x8c] ss:$48 sps:$4 sm:$0xff]  }
 0x292   : > { %3921 = vmatpush2.bf16.msra.mxu0 %v18797_v41  ;;  %v18856_v41 = vld [vmem:[%s20949_s6 + $0x68c] ss:$48 sps:$4 sm:$0xff]  }
 0x293   : > { %3964 = vmatpush2.bf16.msra.mxu1 %v18800_v43  ;;  %3922 = vmatprep.subr.bf16.mxu0 %v18805_v44  ;;  %v18851_v43 = vld [vmem:[%s20949_s6 + $0x88] ss:$48 sps:$4 sm:$0xff]  }
 0x294   : > { %3965 = vmatprep.subr.bf16.mxu1 %v18808_v47  ;;  %v18854_v44 = vld [vmem:[%s20949_s6 + $0x688] ss:$48 sps:$4 sm:$0xff]   ;;  %v18859_v47 = vld [vmem:[%s20949_s6 + $0x2c] ss:$48 sps:$4 sm:$0xff]  }
 0x296   : > { %3923 = vmatpush2.bf16.msra.mxu0 %v18803_v48  ;;  %v18862_v48 = vld [vmem:[%s20949_s6 + $0x62c] ss:$48 sps:$4 sm:$0xff]  }
 0x297   : > { %3966 = vmatpush2.bf16.msra.mxu1 %v18806_v49  ;;  %3924 = vmatprep.subr.bf16.mxu0 %v18811_v50  ;;  %v18857_v49 = vld [vmem:[%s20949_s6 + $0x28] ss:$48 sps:$4 sm:$0xff]  }
 0x298   : > { %3967 = vmatprep.subr.bf16.mxu1 %v18814_v51  ;;  %v18860_v50 = vld [vmem:[%s20949_s6 + $0x628] ss:$48 sps:$4 sm:$0xff]   ;;  %v18865_v51 = vld [vmem:[%s20949_s6 + $0x5cc] ss:$48 sps:$4 sm:$0xff]  }
 0x29a   : > { %3925 = vmatpush2.bf16.msra.mxu0 %v18809_v52  ;;  %v18868_v52 = vld [vmem:[%s20949_s6 + $0xbcc] ss:$48 sps:$4 sm:$0xff]  }
 0x29b   : > { %3968 = vmatpush2.bf16.msra.mxu1 %v18812_v53  ;;  %3980 = vmatprep.subr.bf16.mxu0 %v18817_v54  ;;  %v18863_v53 = vld [vmem:[%s20949_s6 + $0x5c8] ss:$48 sps:$4 sm:$0xff]  }
 0x29c   : > { %4023 = vmatprep.subr.bf16.mxu1 %v18820_v55  ;;  %v18866_v54 = vld [vmem:[%s20949_s6 + $0xbc8] ss:$48 sps:$4 sm:$0xff]   ;;  %v18871_v55 = vld [vmem:[%s20949_s6 + $0x56c] ss:$48 sps:$4 sm:$0xff]  }
 0x29d   : > { %v3670_v9 = vpop.f32.mrf.mxu0  ;;  %3927 = vmatmul.mubr.bf16.vlgmr.msra.gmra.mxu0 %v21090_v20 }
 0x29e   : > { %v3713_v10 = vpop.f32.mrf.mxu1  ;;  %3970 = vmatmul.mubr.bf16.vlgmr.msra.gmra.mxu1 %v21092_v21  ;;  %v3671_v13 = vadd.f32 %v3670_v9, %v1581_v3  ;;  %3981 = vmatpush1.bf16.msra.mxu0 %v18815_v60  ;;  %v18874_v60 = vld [vmem:[%s20949_s6 + $0xb6c] ss:$48 sps:$4 sm:$0xff]  }
 0x29f   : > { %4024 = vmatpush1.bf16.msra.mxu1 %v18818_v0  ;;  %v3672_v14 = vpop.f32.mrf.mxu0  ;;  %3982 = vmatprep.subr.bf16.mxu0 %v18823_v1  ;;  %v18869_v0 = vld [vmem:[%s20949_s6 + $0x568] ss:$48 sps:$4 sm:$0xff]   ;;  %v18883_v9 = vld [vmem:[%s20949_s6 + $0x4ac] ss:$48 sps:$4 sm:$0xff]  }
 0x2a0   : > { %v3715_v36 = vpop.f32.mrf.mxu1  ;;  %4025 = vmatprep.subr.bf16.mxu1 %v18826_v2  ;;  %v21416_v15 = vadd.f32 %v3713_v10, %v3671_v13  ;;  %v3673_v16 = vadd.f32 %v3672_v14, %v21408_v6  ;;  %4012 = vmatprep.mubr.bf16.mxu0 %v21067_v61  ;;  %v18833_v61 = vld [vmem:[%s20949_s6 + $0x1a8] ss:$48 sps:$4 sm:$0xff]   ;;  %v18877_v2 = vld [vmem:[%s20949_s6 + $0x50c] ss:$48 sps:$4 sm:$0xff]  }
 0x2a1   : > { %4055 = vmatprep.mubr.bf16.mxu1 %v21069_v62  ;;  %v3674_v19 = vpop.f32.mrf.mxu0  ;;  %v18836_v62 = vld [vmem:[%s20949_s6 + $0x7a8] ss:$48 sps:$4 sm:$0xff]   ;;  %v18886_v10 = vld [vmem:[%s20949_s6 + $0xaac] ss:$48 sps:$4 sm:$0xff]  }
 0x2a2   : > { %v21425_v24 = vadd.f32 %v3715_v36, %v3673_v16  ;;  %v3675_v25 = vadd.f32 %v3674_v19, %v1581_v3  ;;  %3983 = vmatpush1.bf16.msra.mxu0 %v18821_v7  ;;  %v3717_v27 = vpop.f32.mrf.mxu1  ;;  %v18872_v1 = vld [vmem:[%s20949_s6 + $0xb68] ss:$48 sps:$4 sm:$0xff]   ;;  %v18880_v3 = vld [vmem:[%s20949_s6 + $0xb0c] ss:$48 sps:$4 sm:$0xff]  }
 0x2a3   : > { %4026 = vmatpush1.bf16.msra.mxu1 %v18824_v8  ;;  %3984 = vmatprep.subr.bf16.mxu0 %v18829_v11  ;;  %v18875_v7 = vld [vmem:[%s20949_s6 + $0x508] ss:$48 sps:$4 sm:$0xff]   ;;  %v18889_v13 = vld [vmem:[%s20949_s6 + $0x44c] ss:$48 sps:$4 sm:$0xff]  }
 0x2a4   : > { %4027 = vmatprep.subr.bf16.mxu1 %v18832_v12  ;;  %v21427_v28 = vadd.f32 %v3717_v27, %v3675_v25  ;;  %v18878_v8 = vld [vmem:[%s20949_s6 + $0xb08] ss:$48 sps:$4 sm:$0xff]   ;;  %v18892_v14 = vld [vmem:[%s20949_s6 + $0xa4c] ss:$48 sps:$4 sm:$0xff]  }
 0x2a5   : > { %v18881_v11 = vld [vmem:[%s20949_s6 + $0x4a8] ss:$48 sps:$4 sm:$0xff]   ;;  %v18904_v25 = vld [vmem:[%s20949_s6 + $0x98c] ss:$48 sps:$4 sm:$0xff]  }
 0x2a6   : > { %3985 = vmatpush1.bf16.msra.mxu0 %v18827_v17  ;;  %v18884_v12 = vld [vmem:[%s20949_s6 + $0xaa8] ss:$48 sps:$4 sm:$0xff]   ;;  %v18895_v17 = vld [vmem:[%s20949_s6 + $0x3ec] ss:$48 sps:$4 sm:$0xff]  }
 0x2a7   : > { %4028 = vmatpush1.bf16.msra.mxu1 %v18830_v18  ;;  %3986 = vmatprep.subr.bf16.mxu0 %v18835_v22  ;;  %v18887_v36 = vld [vmem:[%s20949_s6 + $0x448] ss:$48 sps:$4 sm:$0xff]   ;;  %v18898_v18 = vld [vmem:[%s20949_s6 + $0x9ec] ss:$48 sps:$4 sm:$0xff]  }
 0x2a8   : > { %4029 = vmatprep.subr.bf16.mxu1 %v18838_v23  ;;  %v18890_v16 = vld [vmem:[%s20949_s6 + $0xa48] ss:$48 sps:$4 sm:$0xff]   ;;  %v18901_v23 = vld [vmem:[%s20949_s6 + $0x38c] ss:$48 sps:$4 sm:$0xff]  }
 0x2a9   : > { %v18893_v19 = vld [vmem:[%s20949_s6 + $0x3e8] ss:$48 sps:$4 sm:$0xff]  }
 0x2aa   : > { %3987 = vmatpush1.bf16.msra.mxu0 %v18833_v61  ;;  %v18896_v22 = vld [vmem:[%s20949_s6 + $0x9e8] ss:$48 sps:$4 sm:$0xff]  }
 0x2ab   : > { %4030 = vmatpush1.bf16.msra.mxu1 %v18836_v62  ;;  %3988 = vmatprep.subr.bf16.mxu0 %v18841_v29  ;;  %v18899_v27 = vld [vmem:[%s20949_s6 + $0x388] ss:$48 sps:$4 sm:$0xff]   ;;  %v18907_v62 = vld [vmem:[%s20949_s6 + $0x32c] ss:$48 sps:$4 sm:$0xff]  }
 0x2ac   : > { %4031 = vmatprep.subr.bf16.mxu1 %v18844_v30  ;;  %v18902_v61 = vld [vmem:[%s20949_s6 + $0x988] ss:$48 sps:$4 sm:$0xff]   ;;  %v18910_v29 = vld [vmem:[%s20949_s6 + $0x92c] ss:$48 sps:$4 sm:$0xff]  }
 0x2ad   : > { %v18905_v30 = vld [vmem:[%s20949_s6 + $0x328] ss:$48 sps:$4 sm:$0xff]  }
 0x2ae   : > { %3989 = vmatpush1.bf16.msra.mxu0 %v18839_v32  ;;  %v18908_v32 = vld [vmem:[%s20949_s6 + $0x928] ss:$48 sps:$4 sm:$0xff]   ;;  %s23684_s6 = scalar_lea.vmem [#allocation16], %s20967_s27 }
 0x2af   : > { %4032 = vmatpush1.bf16.msra.mxu1 %v18842_v33  ;;  %3990 = vmatprep.subr.bf16.mxu0 %v18847_v34  ;;  %v21480_v33 = vsub.s32 4, %v21295_v31  ;;  %v21483_v34 = vsub.s32 0, %v21295_v31 }
 0x2b0   : > { %4033 = vmatprep.subr.bf16.mxu1 %v18850_v35  ;;  %v21486_v35 = vsub.s32 5, %v21295_v31 }
 0x2b1   : > { %23680 = vst [vmem:[#allocation52_spill] sm:$0xff] %v21483_v34 }
 0x2b2   : > { %3991 = vmatpush1.bf16.msra.mxu0 %v18845_v38  ;;  %v19951_v38 = vld [vmem:[%s20957_s25] sm:$0xff] }
 0x2b3   : > { %4034 = vmatpush1.bf16.msra.mxu1 %v18848_v39  ;;  %3992 = vmatprep.subr.bf16.mxu0 %v18853_v40  ;;  %v1589_v39 = vrot.slane %v19951_v38, %v21480_v33  ;;  %v1573_v40 = vrot.slane %v19951_v38, %v21483_v34 }
 0x2b4   : > { %4035 = vmatprep.subr.bf16.mxu1 %v18856_v41  ;;  %v21491_v41 = vpop.f32.mrf.mxu0 }
 0x2b6   : > { %3993 = vmatpush1.bf16.msra.mxu0 %v18851_v43  ;;  %v21493_v43 = vpop.f32.mrf.mxu1 }
 0x2b7   : > { %4036 = vmatpush1.bf16.msra.mxu1 %v18854_v44  ;;  %3994 = vmatprep.subr.bf16.mxu0 %v18859_v47  ;;  %v20541_v44 = vmov 0.0   ;;  %v21498_v47 = vrot.slane %v19951_v38, %v21486_v35 }
 0x2b8   : > { %4037 = vmatprep.subr.bf16.mxu1 %v18862_v48 }
 0x2ba   : > { %3995 = vmatpush1.bf16.msra.mxu0 %v18857_v49 }
 0x2bb   : > { %4038 = vmatpush1.bf16.msra.mxu1 %v18860_v50  ;;  %3996 = vmatprep.subr.bf16.mxu0 %v18865_v51  ;;  %v3585_v51 = vadd.f32 %v21317_v45, %v1573_v40 }
 0x2bc   : > { %4039 = vmatprep.subr.bf16.mxu1 %v18868_v52 }
 0x2be   : > { %3997 = vmatpush2.bf16.msra.mxu0 %v18863_v53 }
 0x2bf   : > { %4040 = vmatpush2.bf16.msra.mxu1 %v18866_v54  ;;  %3998 = vmatprep.subr.bf16.mxu0 %v18871_v55 }
 0x2c0   : > { %4041 = vmatprep.subr.bf16.mxu1 %v18874_v60 }
 0x2c2   : > { %3999 = vmatpush2.bf16.msra.mxu0 %v18869_v0  ;;  %v3628_v0 = vadd.f32 %v21319_v46, %v3585_v51  ;;  %v21532_v46 = vsub.s32 6, %v21295_v31 }
 0x2c3   : > { %4042 = vmatpush2.bf16.msra.mxu1 %v18872_v1  ;;  %4000 = vmatprep.subr.bf16.mxu0 %v18877_v2  ;;  %v3589_v1 = vadd.f32 %v21389_v58, %v1573_v40  ;;  %v21535_v58 = vsub.s32 7, %v21295_v31 }
 0x2c4   : > { %4043 = vmatprep.subr.bf16.mxu1 %v18880_v3 }
 0x2c5   : > { %v21521_v3 = vadd.f32 %v21391_v59, %v3589_v1  ;;  %v1597_v59 = vrot.slane %v19951_v38, %v21532_v46 }
 0x2c6   : > { %4001 = vmatpush2.bf16.msra.mxu0 %v18875_v7 }
 0x2c7   : > { %4044 = vmatpush2.bf16.msra.mxu1 %v18878_v8  ;;  %4002 = vmatprep.subr.bf16.mxu0 %v18883_v9  ;;  %v21543_v9 = vrot.slane %v19951_v38, %v21535_v58 }
 0x2c8   : > { %4045 = vmatprep.subr.bf16.mxu1 %v18886_v10 }
 0x2ca   : > { %4003 = vmatpush2.bf16.msra.mxu0 %v18881_v11 }
 0x2cb   : > { %4046 = vmatpush2.bf16.msra.mxu1 %v18884_v12  ;;  %4004 = vmatprep.subr.bf16.mxu0 %v18889_v13 }
 0x2cc   : > { %4047 = vmatprep.subr.bf16.mxu1 %v18892_v14 }
 0x2ce   : > { %4005 = vmatpush2.bf16.msra.mxu0 %v18887_v36 }
 0x2cf   : > { %4048 = vmatpush2.bf16.msra.mxu1 %v18890_v16  ;;  %4006 = vmatprep.subr.bf16.mxu0 %v18895_v17 }
 0x2d0   : > { %4049 = vmatprep.subr.bf16.mxu1 %v18898_v18 }
 0x2d2   : > { %4007 = vmatpush2.bf16.msra.mxu0 %v18893_v19 }
 0x2d3   : > { %4050 = vmatpush2.bf16.msra.mxu1 %v18896_v22  ;;  %4008 = vmatprep.subr.bf16.mxu0 %v18901_v23 }
 0x2d4   : > { %4051 = vmatprep.subr.bf16.mxu1 %v18904_v25  ;;  %v1567_v25 = vld [vmem:[%s20957_s25 + $0x8] sm:$0xf]  ;;  %s23685_s25 = scalar_lea.vmem [#allocation18], %s20967_s27 }
 0x2d6   : > { %4009 = vmatpush2.bf16.msra.mxu0 %v18899_v27  ;;  %v1605_v27 = vrot.slane %v1567_v25, %v21483_v34 }
 0x2d7   : > { %4052 = vmatpush2.bf16.msra.mxu1 %v18902_v61  ;;  %4010 = vmatprep.subr.bf16.mxu0 %v18907_v62 }
 0x2d8   : > { %4053 = vmatprep.subr.bf16.mxu1 %v18910_v29  ;;  %v1609_v29 = vrot.slane %v1567_v25, %v21305_v37 }
 0x2da   : > { %4011 = vmatpush2.bf16.msra.mxu0 %v18905_v30 }
 0x2db   : > { %4054 = vmatpush2.bf16.msra.mxu1 %v18908_v32  ;;  %18058 = vmatprep.subr.mxu0 %v20541_v44 }
 0x2dc   : > { %18063 = vmatprep.subr.mxu1 %v20541_v44 }
 0x2dd   : > { %v3756_v48 = vpop.f32.mrf.mxu0  ;;  %4013 = vmatmul.mubr.bf16.vlgmr.msra.gmra.mxu0 %v21090_v20 }
 0x2de   : > { %v3799_v49 = vpop.f32.mrf.mxu1  ;;  %4056 = vmatmul.mubr.bf16.vlgmr.msra.gmra.mxu1 %v21092_v21  ;;  %v3757_v50 = vadd.f32 %v3756_v48, %v1589_v39  ;;  %18060 = vmatprep.mubr.msk.f32.mxu0 %vm20542_vm0, %v20541_v44 }
 0x2df   : > { %18065 = vmatprep.mubr.msk.f32.mxu1 %vm20542_vm0, %v20541_v44  ;;  %v3758_v52 = vpop.f32.mrf.mxu0 }
 0x2e0   : > { %v3801_v53 = vpop.f32.mrf.mxu1  ;;  %v21507_v54 = vadd.f32 %v3799_v49, %v3757_v50  ;;  %v3759_v55 = vadd.f32 %v3758_v52, %v21498_v47 }
 0x2e1   : > { %v3760_v20 = vpop.f32.mrf.mxu0 }
 0x2e2   : > { %v21510_v60 = vadd.f32 %v3801_v53, %v3759_v55  ;;  %v3761_v21 = vadd.f32 %v3760_v20, %v1589_v39  ;;  %18059 = vmatpush3.xpose.msk.msra.mxu0 %vm4071_vm1, %v21507_v54  ;;  %v3803_v2 = vpop.f32.mrf.mxu1 }
 0x2e3   : > { %18068 = vmatprep.subr.mxu0 %v20541_v44  ;;  %v21538_v7 = vpop.f32.mrf.mxu0 }
 0x2e4   : > { %v3804_v45 = vadd.f32 %v3803_v2, %v3761_v21  ;;  %v21540_v8 = vpop.f32.mrf.mxu1  ;;  %v1613_v2 = vrot.slane %v1567_v25, %v21387_v57 }
 0x2e5   : > { %18061 = vmatmul.mubr.msk.f32.vlgmr.msra.gmra.mxu0 %vm4071_vm1, %v3628_v0 }
 0x2e6   : > { %4481 = vrot.lane.b32.xlu1 %v3804_v45, %s20543_s3  ;;  %18064 = vmatpush3.xpose.msk.msra.mxu1 %vm4071_vm1, %v3804_v45  ;;  %v1617_v45 = vrot.slane %v1567_v25, %v21395_v63 }
 0x2e7   : > { %18073 = vmatprep.subr.mxu1 %v20541_v44  ;;  %18070 = vmatprep.mubr.msk.f32.mxu0 %vm20542_vm0, %v20541_v44 }
 0x2e9   : > { %18066 = vmatmul.mubr.msk.f32.vlgmr.msra.gmra.mxu1 %vm4071_vm1, %v21521_v3 }
 0x2ea   : > { %4401 = vrot.lane.b32.xlu1 %v3628_v0, %s20543_s3  ;;  %18075 = vmatprep.mubr.msk.f32.mxu1 %vm20542_vm0, %v20541_v44 }
 0x31d   : > { %v3842_v10 = vpop.f32.mrf.mxu0 }
 0x31e   : > { %v3885_v11 = vpop.f32.mrf.mxu1  ;;  %v3843_v12 = vadd.f32 %v3842_v10, %v1597_v59 }
 0x31f   : > { %v3844_v13 = vpop.f32.mrf.mxu0 }
 0x320   : > { %v3887_v14 = vpop.f32.mrf.mxu1  ;;  %v3845_v36 = vadd.f32 %v3844_v13, %v21543_v9  ;;  %v21546_v16 = vadd.f32 %v3885_v11, %v3843_v12 }
 0x321   : > { %v3846_v17 = vpop.f32.mrf.mxu0 }
 0x322   : > { %v3847_v18 = vadd.f32 %v3846_v17, %v1597_v59  ;;  %v21548_v19 = vadd.f32 %v3887_v14, %v3845_v36  ;;  %v3889_v22 = vpop.f32.mrf.mxu1  ;;  %v4069_v17 = vand.u32 127, %v1570_v26 }
 0x323   : > { %v21554_v61 = vpop.f32.mrf.mxu0 }
 0x324   : > { %v21550_v23 = vadd.f32 %v3889_v22, %v3847_v18  ;;  %v21556_v62 = vpop.f32.mrf.mxu1  ;;  %vm21581_vm2 = vcmp.gt.s32.totalorder %v4069_v17, %v21295_v31 }
 0x35d   : > { %v3928_v30 = vpop.f32.mrf.mxu0 }
 0x35e   : > { %v3971_v32 = vpop.f32.mrf.mxu1  ;;  %v3929_v38 = vadd.f32 %v3928_v30, %v1605_v27 }
 0x35f   : > { %v3930_v39 = vpop.f32.mrf.mxu0 }
 0x360   : > { %v3973_v40 = vpop.f32.mrf.mxu1  ;;  %v3931_v48 = vadd.f32 %v3930_v39, %v1609_v29  ;;  %v21559_v49 = vadd.f32 %v3971_v32, %v3929_v38 }
 0x361   : > { %v3932_v50 = vpop.f32.mrf.mxu0 }
 0x362   : > { %v3975_v51 = vpop.f32.mrf.mxu1  ;;  %v3933_v52 = vadd.f32 %v3932_v50, %v1605_v27  ;;  %v21561_v53 = vadd.f32 %v3973_v40, %v3931_v48  ;;  %18069 = vmatpush3.msra.mxu0 %v21559_v49 }
 0x363   : > { %v3934_v55 = vpop.f32.mrf.mxu0  ;;  %18078 = vmatprep.subr.mxu0 %v20541_v44 }
 0x364   : > { %v3935_v20 = vadd.f32 %v3934_v55, %v1609_v29  ;;  %v21565_v21 = vadd.f32 %v3975_v51, %v3933_v52  ;;  %v3977_v0 = vpop.f32.mrf.mxu1 }
 0x366   : > { %v21567_v1 = vadd.f32 %v3977_v0, %v3935_v20  ;;  %18074 = vmatpush3.msra.mxu1 %v21565_v21 }
 0x367   : > { %18083 = vmatprep.subr.mxu1 %v20541_v44 }
 0x39d   : > { %v4014_v59 = vpop.f32.mrf.mxu0 }
 0x39e   : > { %v4057_v10 = vpop.f32.mrf.mxu1  ;;  %v4015_v11 = vadd.f32 %v4014_v59, %v1613_v2 }
 0x39f   : > { %v4016_v12 = vpop.f32.mrf.mxu0 }
 0x3a0   : > { %v4059_v13 = vpop.f32.mrf.mxu1  ;;  %v4017_v14 = vadd.f32 %v4016_v12, %v1617_v45  ;;  %v21573_v36 = vadd.f32 %v4057_v10, %v4015_v11 }
 0x3a1   : > { %v4018_v18 = vpop.f32.mrf.mxu0 }
 0x3a2   : > { %v4061_v22 = vpop.f32.mrf.mxu1  ;;  %v4019_v27 = vadd.f32 %v4018_v18, %v1613_v2  ;;  %v21576_v29 = vadd.f32 %v4059_v13, %v4017_v14 }
 0x3a3   : > { %v4020_v30 = vpop.f32.mrf.mxu0 }
 0x3a4   : > { %v4021_v32 = vadd.f32 %v4020_v30, %v1617_v45  ;;  %v21578_v38 = vadd.f32 %v4061_v22, %v4019_v27  ;;  %v4063_v39 = vpop.f32.mrf.mxu1 }
 0x3a5   : > { %v4144_v40 = vpop.f32.mrf.mxu0 }
 0x3a6   : > { %v21585_v48 = vadd.f32 %v4063_v39, %v4021_v32  ;;  %v4224_v50 = vmul.f32 0.125, %v4144_v40 }
 0x3a7   : > { %v18062_v26 = vpop.f32.mrf.mxu0 }
 0x3a8   : > { %v4228_v51 = vsel %vm21581_vm2, -1e+09, %v4224_v50 }
 0x3a9   : > { %v4220_v52 = vpop.f32.mrf.mxu1  ;;  %v4231_v55 = vsel %vm4230_vm3, %v4228_v51, -inf }
 0x3aa   : > { %v4225_v20 = vmul.f32 0.125, %v4220_v52  ;;  %4232 = vmax.xlane.f32.xlu0 %v4231_v55 }
 0x3ab   : > { %v18067_v0 = vpop.f32.mrf.mxu1 }
 0x3ac   : > { %v4229_v31 = vsel %vm21581_vm2, -1e+09, %v4225_v20 }
 0x3ad   : > { %v4234_v2 = vsel %vm4230_vm3, %v4229_v31, -inf }
 0x3ae   : > { %4235 = vmax.xlane.f32.xlu0 %v4234_v2 }
 0x3c4   : > { %4403 = vrot.lane.b32.xlu0 %v21507_v54, %s20543_s3  ;;  %v4482_v54 = vpop.permute.xlu1 %4481 }
 0x3c8   : > { %v4402_v27 = vpop.permute.xlu1 %4401 }
 0x433   : > { %v4233_v45 = vpop.xlane.xlu0 %4232 }
 0x434   : > { %v4237_v59 = vsub.f32 %v4228_v51, %v4233_v45 }
 0x436   : > { %v4239_v10 = vmul.f32 1.442695, %v4237_v59 }
 0x437   : > { %v4236_v11 = vpop.xlane.xlu0 %4235 }
 0x438   : > { %19871 = vpow2.f32 %v4239_v10  ;;  %v4238_v12 = vsub.f32 %v4229_v31, %v4236_v11 }
 0x43a   : > { %v4241_v13 = vmul.f32 1.442695, %v4238_v12 }
 0x43b   : > { %v4404_v50 = vpop.permute.xlu0 %4403 }
 0x43c   : > { %19873 = vpow2.f32 %v4241_v13 }
 0x445   : > { %v19872_v14 = vpop.eup %19871 }
 0x446   : > { %v4243_v17 = vsel %vm4230_vm3, %v19872_v14, 0.0 }
 0x447   : > { %4244 = vadd.xlane.f32.xlu1 %v4243_v17 }
 0x449   : > { %v19874_v18 = vpop.eup %19873 }
 0x44a   : > { %v4246_v22 = vsel %vm4230_vm3, %v19874_v18, 0.0 }
 0x44b   : > { %4247 = vadd.xlane.f32.xlu1 %v4246_v22 }
 0x45c   : > { %4479 = vrot.lane.b32.xlu1 %v21521_v3, %s20543_s3 }
 0x4d0   : > { %v4245_v30 = vpop.xlane.xlu1 %4244 }
 0x4d1   : > { %19875 = vrcp.f32 %v4245_v30 }
 0x4d4   : > { %v4248_v32 = vpop.xlane.xlu1 %4247 }
 0x4d5   : > { %19877 = vrcp.f32 %v4248_v32 }
 0x4d8   : > { %v4480_v3 = vpop.permute.xlu1 %4479 }
 0x4de   : > { %v19876_v39 = vpop.eup %19875 }
 0x4df   : > { %v4251_v40 = vmul.f32 %v19876_v39, %v19872_v14 }
 0x4e1   : > { %18071 = vmatmul.mubr.msk.f32.vlgmr.msra.gmra.mxu0 %vm4230_vm3, %v4251_v40 }
 0x4e2   : > { %v19878_v26 = vpop.eup %19877  ;;  %18079 = vmatpush3.xpose.msk.msra.mxu0 %vm4071_vm1, %v4404_v50  ;;  %18080 = vmatprep.mubr.msk.f32.mxu0 %vm20542_vm0, %v20541_v44 }
 0x4e3   : > { %v4252_v51 = vmul.f32 %v19878_v26, %v19874_v18  ;;  %18088 = vmatprep.subr.mxu0 %v20541_v44 }
 0x4e5   : > { %18076 = vmatmul.mubr.msk.f32.vlgmr.msra.gmra.mxu1 %vm4230_vm3, %v4252_v51  ;;  %18081 = vmatmul.mubr.msk.f32.vlgmr.msra.gmra.mxu0 %vm4071_vm1, %v4402_v27 }
 0x4e6   : > { %18084 = vmatpush3.xpose.msk.msra.mxu1 %vm4071_vm1, %v4482_v54  ;;  %18085 = vmatprep.mubr.msk.f32.mxu1 %vm20542_vm0, %v20541_v44 }
 0x4e7   : > { %18093 = vmatprep.subr.mxu1 %v20541_v44  ;;  %18090 = vmatprep.mubr.msk.f32.mxu0 %vm20542_vm0, %v20541_v44 }
 0x4e9   : > { %18086 = vmatmul.mubr.msk.f32.vlgmr.msra.gmra.mxu1 %vm4071_vm1, %v4480_v3 }
 0x4ea   : > { %18095 = vmatprep.mubr.msk.f32.mxu1 %vm20542_vm0, %v20541_v44 }
 0x5a1   : > { %v4322_v52 = vpop.f32.mrf.mxu0 }
 0x5a2   : > { %4399 = vst.msk [vmem:[#allocation3] sm:$0xff] %vm4071_vm1, %v4322_v52 }
 0x5a3   : > { %v18072_v55 = vpop.f32.mrf.mxu0 }
 0x5a5   : > { %v4395_v20 = vpop.f32.mrf.mxu1  ;;  %v4475_v0 = vpop.f32.mrf.mxu0 }
 0x5a6   : > { %4400 = vst.msk [vmem:[#allocation3 + $0x20] sm:$0xff] %vm4071_vm1, %v4395_v20  ;;  %v4557_v31 = vmul.f32 0.125, %v4475_v0  ;;  %v3763_v0 = vadd.f32 %v21538_v7, %v21498_v47 }
 0x5a7   : > { %v18077_v2 = vpop.f32.mrf.mxu1  ;;  %v18082_v45 = vpop.f32.mrf.mxu0 }
 0x5a8   : > { %v4559_v59 = vsel %vm21581_vm2, -1e+09, %v4557_v31  ;;  %v3806_v45 = vadd.f32 %v21540_v8, %v3763_v0 }
 0x5a9   : > { %v4553_v10 = vpop.f32.mrf.mxu1  ;;  %v4561_v11 = vsel %vm4230_vm3, %v4559_v59, -inf }
 0x5aa   : > { %v4558_v12 = vmul.f32 0.125, %v4553_v10  ;;  %4562 = vmax.xlane.f32.xlu0 %v4561_v11 }
 0x5ab   : > { %v18087_v13 = vpop.f32.mrf.mxu1 }
 0x5ac   : > { %v4560_v14 = vsel %vm21581_vm2, -1e+09, %v4558_v12 }
 0x5ad   : > { %v4564_v17 = vsel %vm4230_vm3, %v4560_v14, -inf }
 0x5ae   : > { %4565 = vmax.xlane.f32.xlu1 %v4564_v17 }
 0x5bf   : > { %4661 = vrot.lane.b32.xlu1 %v21565_v21, %s20543_s3 }
 0x633   : > { %v4563_v18 = vpop.xlane.xlu0 %4562 }
 0x634   : > { %v4567_v22 = vsub.f32 %v4559_v59, %v4563_v18 }
 0x636   : > { %v4569_v54 = vmul.f32 1.442695, %v4567_v22 }
 0x637   : > { %v4566_v27 = vpop.xlane.xlu1 %4565 }
 0x638   : > { %19879 = vpow2.f32 %v4569_v54  ;;  %v4568_v30 = vsub.f32 %v4560_v14, %v4566_v27 }
 0x63a   : > { %v4571_v32 = vmul.f32 1.442695, %v4568_v30 }
 0x63b   : > { %v4662_v39 = vpop.permute.xlu1 %4661 }
 0x63c   : > { %19881 = vpow2.f32 %v4571_v32  ;;  %18094 = vmatpush3.msra.mxu1 %v4662_v39 }
 0x63d   : > { %18103 = vmatprep.subr.mxu1 %v20541_v44 }
 0x645   : > { %v19880_v40 = vpop.eup %19879 }
 0x646   : > { %v4573_v50 = vsel %vm4230_vm3, %v19880_v40, 0.0 }
 0x647   : > { %4574 = vadd.xlane.f32.xlu0 %v4573_v50 }
 0x649   : > { %v19882_v26 = vpop.eup %19881 }
 0x64a   : > { %v4576_v51 = vsel %vm4230_vm3, %v19882_v26, 0.0 }
 0x64b   : > { %4577 = vadd.xlane.f32.xlu0 %v4576_v51 }
 0x661   : > { %4584 = vrot.lane.b32.xlu0 %v21559_v49, %s20543_s3  ;;  %v3591_v49 = vadd.f32 %v21402_v4, %v21313_v42 }
 0x663   : > { %v3634_v47 = vadd.f32 %v21404_v5, %v3591_v49 }
 0x6d0   : > { %v4575_v21 = vpop.xlane.xlu0 %4574 }
 0x6d1   : > { %19883 = vrcp.f32 %v4575_v21 }
 0x6d4   : > { %v4578_v3 = vpop.xlane.xlu0 %4577 }
 0x6d5   : > { %19885 = vrcp.f32 %v4578_v3 }
 0x6d8   : > { %v4585_v52 = vpop.permute.xlu0 %4584 }
 0x6d9   : > { %18089 = vmatpush3.msra.mxu0 %v4585_v52 }
 0x6da   : > { %18098 = vmatprep.subr.mxu0 %v20541_v44 }
 0x6de   : > { %v19884_v55 = vpop.eup %19883 }
 0x6df   : > { %v4581_v20 = vmul.f32 %v19884_v55, %v19880_v40 }
 0x6e1   : > { %18091 = vmatmul.mubr.msk.f32.vlgmr.msra.gmra.mxu0 %vm4230_vm3, %v4581_v20 }
 0x6e2   : > { %v19886_v31 = vpop.eup %19885  ;;  %18099 = vmatpush3.xpose.msk.msra.mxu0 %vm4071_vm1, %v21510_v60  ;;  %18100 = vmatprep.mubr.msk.f32.mxu0 %vm20542_vm0, %v20541_v44 }
 0x6e3   : > { %18108 = vmatprep.subr.mxu0 %v20541_v44  ;;  %v4582_v2 = vmul.f32 %v19886_v31, %v19882_v26 }
 0x6e5   : > { %18096 = vmatmul.mubr.msk.f32.vlgmr.msra.gmra.mxu1 %vm4230_vm3, %v4582_v2  ;;  %18101 = vmatmul.mubr.msk.f32.vlgmr.msra.gmra.mxu0 %vm4071_vm1, %v21332_v56 }
 0x6e6   : > { %18104 = vmatpush3.xpose.msk.msra.mxu1 %vm4071_vm1, %v3806_v45  ;;  %18109 = vmatpush3.msra.mxu0 %v21561_v53 }
 0x6e7   : > { %18105 = vmatprep.mubr.msk.f32.mxu1 %vm20542_vm0, %v20541_v44  ;;  %18113 = vmatprep.subr.mxu1 %v20541_v44 }
 0x6e8   : > { %18110 = vmatprep.mubr.msk.f32.mxu0 %vm20542_vm0, %v20541_v44  ;;  %18118 = vmatprep.subr.mxu0 %v20541_v44 }
 0x6e9   : > { %18106 = vmatmul.mubr.msk.f32.vlgmr.msra.gmra.mxu1 %vm4071_vm1, %v3634_v47 }
 0x6ea   : > { %18114 = vmatpush3.msra.mxu1 %v21567_v1  ;;  %18115 = vmatprep.mubr.msk.f32.mxu1 %vm20542_vm0, %v20541_v44 }
 0x6eb   : > { %18123 = vmatprep.subr.mxu1 %v20541_v44 }
 0x7a1   : > { %v21659_v42 = vpop.f32.mrf.mxu0 }
 0x7a3   : > { %v18092_v4 = vpop.f32.mrf.mxu0 }
 0x7a5   : > { %v21661_v5 = vpop.f32.mrf.mxu1  ;;  %v4820_v7 = vpop.f32.mrf.mxu0 }
 0x7a6   : > { %v4900_v8 = vmul.f32 0.125, %v4820_v7 }
 0x7a7   : > { %v18097_v59 = vpop.f32.mrf.mxu1  ;;  %v18102_v10 = vpop.f32.mrf.mxu0 }
 0x7a8   : > { %v4902_v11 = vsel %vm21581_vm2, -1e+09, %v4900_v8 }
 0x7a9   : > { %v4896_v12 = vpop.f32.mrf.mxu1  ;;  %v4904_v13 = vsel %vm4230_vm3, %v4902_v11, -inf }
 0x7aa   : > { %v4901_v14 = vmul.f32 0.125, %v4896_v12  ;;  %4905 = vmax.xlane.f32.xlu1 %v4904_v13 }
 0x7ab   : > { %v18107_v17 = vpop.f32.mrf.mxu1 }
 0x7ac   : > { %v4903_v18 = vsel %vm21581_vm2, -1e+09, %v4901_v14 }
 0x7ad   : > { %v4907_v22 = vsel %vm4230_vm3, %v4903_v18, -inf }
 0x7ae   : > { %4908 = vmax.xlane.f32.xlu0 %v4907_v22 }
 0x7bb   : > { %5154 = vrot.lane.b32.xlu1 %v3806_v45, %s20543_s3 }
 0x7bf   : > { %5074 = vrot.lane.b32.xlu1 %v21332_v56, %s20543_s3 }
 0x833   : > { %v4906_v54 = vpop.xlane.xlu1 %4905 }
 0x834   : > { %v4910_v27 = vsub.f32 %v4902_v11, %v4906_v54 }
 0x836   : > { %v4912_v30 = vmul.f32 1.442695, %v4910_v27 }
 0x837   : > { %v4909_v32 = vpop.xlane.xlu0 %4908  ;;  %v5155_v56 = vpop.permute.xlu1 %5154 }
 0x838   : > { %19887 = vpow2.f32 %v4912_v30  ;;  %v4911_v39 = vsub.f32 %v4903_v18, %v4909_v32 }
 0x83a   : > { %v4914_v40 = vmul.f32 1.442695, %v4911_v39 }
 0x83b   : > { %v5075_v3 = vpop.permute.xlu1 %5074 }
 0x83c   : > { %19889 = vpow2.f32 %v4914_v40 }
 0x845   : > { %v19888_v50 = vpop.eup %19887 }
 0x846   : > { %v4916_v26 = vsel %vm4230_vm3, %v19888_v50, 0.0 }
 0x847   : > { %4917 = vadd.xlane.f32.xlu0 %v4916_v26 }
 0x849   : > { %v19890_v51 = vpop.eup %19889 }
 0x84a   : > { %v4919_v21 = vsel %vm4230_vm3, %v19890_v51, 0.0 }
 0x84b   : > { %4920 = vadd.xlane.f32.xlu1 %v4919_v21 }
 0x85c   : > { %5152 = vrot.lane.b32.xlu1 %v3634_v47, %s20543_s3 }
 0x85d   : > { %5076 = vrot.lane.b32.xlu0 %v21510_v60, %s20543_s3 }
 0x8d0   : > { %v4918_v52 = vpop.xlane.xlu0 %4917 }
 0x8d1   : > { %19891 = vrcp.f32 %v4918_v52 }
 0x8d4   : > { %v4921_v55 = vpop.xlane.xlu1 %4920  ;;  %v5077_v31 = vpop.permute.xlu0 %5076 }
 0x8d5   : > { %19893 = vrcp.f32 %v4921_v55 }
 0x8d8   : > { %v5153_v60 = vpop.permute.xlu1 %5152 }
 0x8de   : > { %v19892_v20 = vpop.eup %19891 }
 0x8df   : > { %v4924_v0 = vmul.f32 %v19892_v20, %v19888_v50 }
 0x8e1   : > { %18111 = vmatmul.mubr.msk.f32.vlgmr.msra.gmra.mxu0 %vm4230_vm3, %v4924_v0 }
 0x8e2   : > { %v19894_v49 = vpop.eup %19893  ;;  %18119 = vmatpush3.xpose.msk.msra.mxu0 %vm4071_vm1, %v5077_v31  ;;  %18120 = vmatprep.mubr.msk.f32.mxu0 %vm20542_vm0, %v20541_v44 }
 0x8e3   : > { %v4925_v2 = vmul.f32 %v19894_v49, %v19890_v51  ;;  %18128 = vmatprep.subr.mxu0 %v20541_v44 }
 0x8e5   : > { %18116 = vmatmul.mubr.msk.f32.vlgmr.msra.gmra.mxu1 %vm4230_vm3, %v4925_v2  ;;  %18121 = vmatmul.mubr.msk.f32.vlgmr.msra.gmra.mxu0 %vm4071_vm1, %v5075_v3 }
 0x8e6   : > { %18124 = vmatpush3.xpose.msk.msra.mxu1 %vm4071_vm1, %v5155_v56  ;;  %18125 = vmatprep.mubr.msk.f32.mxu1 %vm20542_vm0, %v20541_v44 }
 0x8e7   : > { %18133 = vmatprep.subr.mxu1 %v20541_v44  ;;  %18130 = vmatprep.mubr.msk.f32.mxu0 %vm20542_vm0, %v20541_v44 }
 0x8e9   : > { %18126 = vmatmul.mubr.msk.f32.vlgmr.msra.gmra.mxu1 %vm4071_vm1, %v5153_v60 }
 0x8ea   : > { %18135 = vmatprep.mubr.msk.f32.mxu1 %vm20542_vm0, %v20541_v44 }
 0x9a1   : > { %v4995_v45 = vpop.f32.mrf.mxu0 }
 0x9a2   : > { %5072 = vst.msk [vmem:[#allocation3 + $0x8] sm:$0xff] %vm4071_vm1, %v4995_v45 }
 0x9a3   : > { %v18112_v47 = vpop.f32.mrf.mxu0 }
 0x9a5   : > { %v5068_v4 = vpop.f32.mrf.mxu1  ;;  %v5148_v7 = vpop.f32.mrf.mxu0 }
 0x9a6   : > { %5073 = vst.msk [vmem:[#allocation3 + $0x28] sm:$0xff] %vm4071_vm1, %v5068_v4  ;;  %v5230_v8 = vmul.f32 0.125, %v5148_v7 }
 0x9a7   : > { %v18117_v59 = vpop.f32.mrf.mxu1  ;;  %v18122_v10 = vpop.f32.mrf.mxu0 }
 0x9a8   : > { %v5232_v11 = vsel %vm21581_vm2, -1e+09, %v5230_v8 }
 0x9a9   : > { %v5226_v12 = vpop.f32.mrf.mxu1  ;;  %v5234_v13 = vsel %vm4230_vm3, %v5232_v11, -inf }
 0x9aa   : > { %v5231_v14 = vmul.f32 0.125, %v5226_v12  ;;  %5235 = vmax.xlane.f32.xlu0 %v5234_v13 }
 0x9ab   : > { %v18127_v17 = vpop.f32.mrf.mxu1 }
 0x9ac   : > { %v5233_v18 = vsel %vm21581_vm2, -1e+09, %v5231_v14 }
 0x9ad   : > { %v5237_v22 = vsel %vm4230_vm3, %v5233_v18, -inf }
 0x9ae   : > { %5238 = vmax.xlane.f32.xlu1 %v5237_v22 }
 0x9bf   : > { %5334 = vrot.lane.b32.xlu1 %v21567_v1, %s20543_s3 }
 0xa33   : > { %v5236_v54 = vpop.xlane.xlu0 %5235 }
 0xa34   : > { %v5240_v27 = vsub.f32 %v5232_v11, %v5236_v54 }
 0xa36   : > { %v5242_v30 = vmul.f32 1.442695, %v5240_v27 }
 0xa37   : > { %v5239_v32 = vpop.xlane.xlu1 %5238 }
 0xa38   : > { %19895 = vpow2.f32 %v5242_v30  ;;  %v5241_v39 = vsub.f32 %v5233_v18, %v5239_v32 }
 0xa3a   : > { %v5244_v40 = vmul.f32 1.442695, %v5241_v39 }
 0xa3b   : > { %v5335_v50 = vpop.permute.xlu1 %5334 }
 0xa3c   : > { %19897 = vpow2.f32 %v5244_v40  ;;  %18134 = vmatpush3.msra.mxu1 %v5335_v50 }
 0xa3d   : > { %18143 = vmatprep.subr.mxu1 %v20541_v44 }
 0xa45   : > { %v19896_v26 = vpop.eup %19895 }
 0xa46   : > { %v5246_v51 = vsel %vm4230_vm3, %v19896_v26, 0.0 }
 0xa47   : > { %5247 = vadd.xlane.f32.xlu0 %v5246_v51 }
 0xa49   : > { %v19898_v21 = vpop.eup %19897 }
 0xa4a   : > { %v5249_v56 = vsel %vm4230_vm3, %v19898_v21, 0.0 }
 0xa4b   : > { %5250 = vadd.xlane.f32.xlu0 %v5249_v56 }
 0xa61   : > { %5257 = vrot.lane.b32.xlu0 %v21561_v53, %s20543_s3 }
 0xad0   : > { %v5248_v1 = vpop.xlane.xlu0 %5247 }
 0xad1   : > { %19899 = vrcp.f32 %v5248_v1 }
 0xad4   : > { %v5251_v3 = vpop.xlane.xlu0 %5250 }
 0xad5   : > { %19901 = vrcp.f32 %v5251_v3 }
 0xad8   : > { %v5258_v52 = vpop.permute.xlu0 %5257 }
 0xad9   : > { %18129 = vmatpush3.msra.mxu0 %v5258_v52 }
 0xada   : > { %18138 = vmatprep.subr.mxu0 %v20541_v44 }
 0xade   : > { %v19900_v55 = vpop.eup %19899 }
 0xadf   : > { %v5254_v20 = vmul.f32 %v19900_v55, %v19896_v26 }
 0xae1   : > { %18131 = vmatmul.mubr.msk.f32.vlgmr.msra.gmra.mxu0 %vm4230_vm3, %v5254_v20 }
 0xae2   : > { %v19902_v0 = vpop.eup %19901  ;;  %18139 = vmatpush3.xpose.msk.msra.mxu0 %vm4071_vm1, %v21546_v16  ;;  %18140 = vmatprep.mubr.msk.f32.mxu0 %vm20542_vm0, %v20541_v44 }
 0xae3   : > { %18148 = vmatprep.subr.mxu0 %v20541_v44  ;;  %v5255_v53 = vmul.f32 %v19902_v0, %v19898_v21 }
 0xae5   : > { %18136 = vmatmul.mubr.msk.f32.vlgmr.msra.gmra.mxu1 %vm4230_vm3, %v5255_v53  ;;  %18141 = vmatmul.mubr.msk.f32.vlgmr.msra.gmra.mxu0 %vm4071_vm1, %v21416_v15 }
 0xae6   : > { %18144 = vmatpush3.xpose.msk.msra.mxu1 %vm4071_vm1, %v21550_v23  ;;  %18149 = vmatpush3.msra.mxu0 %v21573_v36 }
 0xae7   : > { %18145 = vmatprep.mubr.msk.f32.mxu1 %vm20542_vm0, %v20541_v44  ;;  %18153 = vmatprep.subr.mxu1 %v20541_v44 }
 0xae8   : > { %18150 = vmatprep.mubr.msk.f32.mxu0 %vm20542_vm0, %v20541_v44  ;;  %18158 = vmatprep.subr.mxu0 %v20541_v44 }
 0xae9   : > { %18146 = vmatmul.mubr.msk.f32.vlgmr.msra.gmra.mxu1 %vm4071_vm1, %v21427_v28 }
 0xaea   : > { %18154 = vmatpush3.msra.mxu1 %v21578_v38  ;;  %18155 = vmatprep.mubr.msk.f32.mxu1 %vm20542_vm0, %v20541_v44 }
 0xaeb   : > { %18163 = vmatprep.subr.mxu1 %v20541_v44 }
 0xba1   : > { %v21733_v31 = vpop.f32.mrf.mxu0 }
 0xba3   : > { %v18132_v49 = vpop.f32.mrf.mxu0 }
 0xba5   : > { %v21735_v2 = vpop.f32.mrf.mxu1  ;;  %v5492_v60 = vpop.f32.mrf.mxu0 }
 0xba6   : > { %v5572_v45 = vmul.f32 0.125, %v5492_v60 }
 0xba7   : > { %v18137_v47 = vpop.f32.mrf.mxu1  ;;  %v18142_v4 = vpop.f32.mrf.mxu0 }
 0xba8   : > { %v5574_v7 = vsel %vm21581_vm2, -1e+09, %v5572_v45 }
 0xba9   : > { %v5568_v8 = vpop.f32.mrf.mxu1  ;;  %v5576_v59 = vsel %vm4230_vm3, %v5574_v7, -inf }
 0xbaa   : > { %v5573_v10 = vmul.f32 0.125, %v5568_v8  ;;  %5577 = vmax.xlane.f32.xlu1 %v5576_v59 }
 0xbab   : > { %v18147_v11 = vpop.f32.mrf.mxu1 }
 0xbac   : > { %v5575_v12 = vsel %vm21581_vm2, -1e+09, %v5573_v10 }
 0xbad   : > { %v5579_v13 = vsel %vm4230_vm3, %v5575_v12, -inf }
 0xbae   : > { %5580 = vmax.xlane.f32.xlu0 %v5579_v13 }
 0xbbb   : > { %5826 = vrot.lane.b32.xlu1 %v21550_v23, %s20543_s3 }
 0xbbf   : > { %5746 = vrot.lane.b32.xlu1 %v21416_v15, %s20543_s3 }
 0xc33   : > { %v5578_v14 = vpop.xlane.xlu1 %5577 }
 0xc34   : > { %v5582_v17 = vsub.f32 %v5574_v7, %v5578_v14 }
 0xc36   : > { %v5584_v18 = vmul.f32 1.442695, %v5582_v17 }
 0xc37   : > { %v5581_v22 = vpop.xlane.xlu0 %5580  ;;  %v5827_v15 = vpop.permute.xlu1 %5826 }
 0xc38   : > { %19903 = vpow2.f32 %v5584_v18  ;;  %v5583_v54 = vsub.f32 %v5575_v12, %v5581_v22 }
 0xc3a   : > { %v5586_v27 = vmul.f32 1.442695, %v5583_v54 }
 0xc3b   : > { %v5747_v23 = vpop.permute.xlu1 %5746 }
 0xc3c   : > { %19905 = vpow2.f32 %v5586_v27 }
 0xc45   : > { %v19904_v30 = vpop.eup %19903 }
 0xc46   : > { %v5588_v32 = vsel %vm4230_vm3, %v19904_v30, 0.0 }
 0xc47   : > { %5589 = vadd.xlane.f32.xlu0 %v5588_v32 }
 0xc49   : > { %v19906_v39 = vpop.eup %19905 }
 0xc4a   : > { %v5591_v40 = vsel %vm4230_vm3, %v19906_v39, 0.0 }
 0xc4b   : > { %5592 = vadd.xlane.f32.xlu1 %v5591_v40 }
 0xc5c   : > { %5824 = vrot.lane.b32.xlu1 %v21427_v28, %s20543_s3 }
 0xc5d   : > { %5748 = vrot.lane.b32.xlu0 %v21546_v16, %s20543_s3 }
 0xcd0   : > { %v5590_v50 = vpop.xlane.xlu0 %5589 }
 0xcd1   : > { %19907 = vrcp.f32 %v5590_v50 }
 0xcd4   : > { %v5593_v26 = vpop.xlane.xlu1 %5592  ;;  %v5749_v56 = vpop.permute.xlu0 %5748 }
 0xcd5   : > { %19909 = vrcp.f32 %v5593_v26 }
 0xcd8   : > { %v5825_v16 = vpop.permute.xlu1 %5824 }
 0xcde   : > { %v19908_v51 = vpop.eup %19907 }
 0xcdf   : > { %v5596_v21 = vmul.f32 %v19908_v51, %v19904_v30 }
 0xce1   : > { %18151 = vmatmul.mubr.msk.f32.vlgmr.msra.gmra.mxu0 %vm4230_vm3, %v5596_v21 }
 0xce2   : > { %v19910_v1 = vpop.eup %19909  ;;  %18159 = vmatpush3.xpose.msk.msra.mxu0 %vm4071_vm1, %v5749_v56  ;;  %18160 = vmatprep.mubr.msk.f32.mxu0 %vm20542_vm0, %v20541_v44 }
 0xce3   : > { %v5597_v28 = vmul.f32 %v19910_v1, %v19906_v39  ;;  %18168 = vmatprep.subr.mxu0 %v20541_v44 }
 0xce5   : > { %18156 = vmatmul.mubr.msk.f32.vlgmr.msra.gmra.mxu1 %vm4230_vm3, %v5597_v28  ;;  %18161 = vmatmul.mubr.msk.f32.vlgmr.msra.gmra.mxu0 %vm4071_vm1, %v5747_v23  ;;  %v3849_v23 = vadd.f32 %v21554_v61, %v21543_v9 }
 0xce6   : > { %18164 = vmatpush3.xpose.msk.msra.mxu1 %vm4071_vm1, %v5827_v15  ;;  %18165 = vmatprep.mubr.msk.f32.mxu1 %vm20542_vm0, %v20541_v44 }
 0xce7   : > { %18173 = vmatprep.subr.mxu1 %v20541_v44  ;;  %18170 = vmatprep.mubr.msk.f32.mxu0 %vm20542_vm0, %v20541_v44  ;;  %v3892_v51 = vadd.f32 %v21556_v62, %v3849_v23 }
 0xce9   : > { %18166 = vmatmul.mubr.msk.f32.vlgmr.msra.gmra.mxu1 %vm4071_vm1, %v5825_v16 }
 0xcea   : > { %18175 = vmatprep.mubr.msk.f32.mxu1 %vm20542_vm0, %v20541_v44 }
 0xda1   : > { %v5667_v3 = vpop.f32.mrf.mxu0 }
 0xda2   : > { %5744 = vst.msk [vmem:[#allocation3 + $0x10] sm:$0xff] %vm4071_vm1, %v5667_v3 }
 0xda3   : > { %v18152_v52 = vpop.f32.mrf.mxu0 }
 0xda5   : > { %v5740_v55 = vpop.f32.mrf.mxu1  ;;  %v5820_v20 = vpop.f32.mrf.mxu0 }
 0xda6   : > { %5745 = vst.msk [vmem:[#allocation3 + $0x30] sm:$0xff] %vm4071_vm1, %v5740_v55  ;;  %v5902_v0 = vmul.f32 0.125, %v5820_v20 }
 0xda7   : > { %v18157_v53 = vpop.f32.mrf.mxu1  ;;  %v18162_v49 = vpop.f32.mrf.mxu0 }
 0xda8   : > { %v5904_v60 = vsel %vm21581_vm2, -1e+09, %v5902_v0 }
 0xda9   : > { %v5898_v45 = vpop.f32.mrf.mxu1  ;;  %v5906_v47 = vsel %vm4230_vm3, %v5904_v60, -inf }
 0xdaa   : > { %v5903_v4 = vmul.f32 0.125, %v5898_v45  ;;  %5907 = vmax.xlane.f32.xlu0 %v5906_v47 }
 0xdab   : > { %v18167_v7 = vpop.f32.mrf.mxu1 }
 0xdac   : > { %v5905_v8 = vsel %vm21581_vm2, -1e+09, %v5903_v4 }
 0xdad   : > { %v5909_v59 = vsel %vm4230_vm3, %v5905_v8, -inf }
 0xdae   : > { %5910 = vmax.xlane.f32.xlu1 %v5909_v59 }
 0xdbf   : > { %6006 = vrot.lane.b32.xlu1 %v21578_v38, %s20543_s3 }
 0xe33   : > { %v5908_v10 = vpop.xlane.xlu0 %5907 }
 0xe34   : > { %v5912_v11 = vsub.f32 %v5904_v60, %v5908_v10 }
 0xe36   : > { %v5914_v12 = vmul.f32 1.442695, %v5912_v11 }
 0xe37   : > { %v5911_v13 = vpop.xlane.xlu1 %5910 }
 0xe38   : > { %19911 = vpow2.f32 %v5914_v12  ;;  %v5913_v14 = vsub.f32 %v5905_v8, %v5911_v13 }
 0xe3a   : > { %v5916_v17 = vmul.f32 1.442695, %v5913_v14 }
 0xe3b   : > { %v6007_v18 = vpop.permute.xlu1 %6006 }
 0xe3c   : > { %19913 = vpow2.f32 %v5916_v17  ;;  %18174 = vmatpush3.msra.mxu1 %v6007_v18 }
 0xe3d   : > { %18183 = vmatprep.subr.mxu1 %v20541_v44 }
 0xe45   : > { %v19912_v22 = vpop.eup %19911 }
 0xe46   : > { %v5918_v54 = vsel %vm4230_vm3, %v19912_v22, 0.0 }
 0xe47   : > { %5919 = vadd.xlane.f32.xlu0 %v5918_v54 }
 0xe49   : > { %v19914_v27 = vpop.eup %19913 }
 0xe4a   : > { %v5921_v30 = vsel %vm4230_vm3, %v19914_v27, 0.0 }
 0xe4b   : > { %5922 = vadd.xlane.f32.xlu0 %v5921_v30 }
 0xe61   : > { %5929 = vrot.lane.b32.xlu0 %v21573_v36, %s20543_s3  ;;  %v3677_v36 = vadd.f32 %v21491_v41, %v21408_v6 }
 0xe63   : > { %v3720_v9 = vadd.f32 %v21493_v43, %v3677_v36 }
 0xed0   : > { %v5920_v38 = vpop.xlane.xlu0 %5919 }
 0xed1   : > { %19915 = vrcp.f32 %v5920_v38 }
 0xed4   : > { %v5923_v32 = vpop.xlane.xlu0 %5922 }
 0xed5   : > { %19917 = vrcp.f32 %v5923_v32 }
 0xed8   : > { %v5930_v39 = vpop.permute.xlu0 %5929 }
 0xed9   : > { %18169 = vmatpush3.msra.mxu0 %v5930_v39 }
 0xeda   : > { %18178 = vmatprep.subr.mxu0 %v20541_v44 }
 0xede   : > { %v19916_v40 = vpop.eup %19915 }
 0xedf   : > { %v5926_v15 = vmul.f32 %v19916_v40, %v19912_v22 }
 0xee1   : > { %18171 = vmatmul.mubr.msk.f32.vlgmr.msra.gmra.mxu0 %vm4230_vm3, %v5926_v15 }
 0xee2   : > { %v19918_v50 = vpop.eup %19917  ;;  %18179 = vmatpush3.xpose.msk.msra.mxu0 %vm4071_vm1, %v21548_v19  ;;  %18180 = vmatprep.mubr.msk.f32.mxu0 %vm20542_vm0, %v20541_v44 }
 0xee3   : > { %18188 = vmatprep.subr.mxu0 %v20541_v44  ;;  %v5927_v26 = vmul.f32 %v19918_v50, %v19914_v27 }
 0xee5   : > { %18176 = vmatmul.mubr.msk.f32.vlgmr.msra.gmra.mxu1 %vm4230_vm3, %v5927_v26  ;;  %18181 = vmatmul.mubr.msk.f32.vlgmr.msra.gmra.mxu0 %vm4071_vm1, %v21425_v24 }
 0xee6   : > { %18184 = vmatpush3.xpose.msk.msra.mxu1 %vm4071_vm1, %v3892_v51  ;;  %18189 = vmatpush3.msra.mxu0 %v21576_v29 }
 0xee7   : > { %18185 = vmatprep.mubr.msk.f32.mxu1 %vm20542_vm0, %v20541_v44  ;;  %18193 = vmatprep.subr.mxu1 %v20541_v44 }
 0xee8   : > { %18190 = vmatprep.mubr.msk.f32.mxu0 %vm20542_vm0, %v20541_v44  ;;  %18198 = vmatprep.subr.mxu0 %v20541_v44 }
 0xee9   : > { %18186 = vmatmul.mubr.msk.f32.vlgmr.msra.gmra.mxu1 %vm4071_vm1, %v3720_v9 }
 0xeea   : > { %18194 = vmatpush3.msra.mxu1 %v21585_v48  ;;  %18195 = vmatprep.mubr.msk.f32.mxu1 %vm20542_vm0, %v20541_v44 }
 0xeeb   : > { %18203 = vmatprep.subr.mxu1 %v20541_v44 }
 0xfa1   : > { %v21813_v6 = vpop.f32.mrf.mxu0 }
 0xfa3   : > { %v18172_v41 = vpop.f32.mrf.mxu0 }
 0xfa5   : > { %v21815_v43 = vpop.f32.mrf.mxu1  ;;  %v6164_v61 = vpop.f32.mrf.mxu0 }
 0xfa6   : > { %v6244_v62 = vmul.f32 0.125, %v6164_v61 }
 0xfa7   : > { %v18177_v21 = vpop.f32.mrf.mxu1  ;;  %v18182_v56 = vpop.f32.mrf.mxu0 }
 0xfa8   : > { %v6246_v1 = vsel %vm21581_vm2, -1e+09, %v6244_v62 }
 0xfa9   : > { %v6240_v28 = vpop.f32.mrf.mxu1  ;;  %v6248_v16 = vsel %vm4230_vm3, %v6246_v1, -inf }
 0xfaa   : > { %v6245_v3 = vmul.f32 0.125, %v6240_v28  ;;  %6249 = vmax.xlane.f32.xlu1 %v6248_v16 }
 0xfab   : > { %v18187_v52 = vpop.f32.mrf.mxu1 }
 0xfac   : > { %v6247_v55 = vsel %vm21581_vm2, -1e+09, %v6245_v3 }
 0xfad   : > { %v6251_v20 = vsel %vm4230_vm3, %v6247_v55, -inf }
 0xfae   : > { %6252 = vmax.xlane.f32.xlu0 %v6251_v20 }
 0xfbb   : > { %6498 = vrot.lane.b32.xlu1 %v3892_v51, %s20543_s3 }
 0xfbf   : > { %6418 = vrot.lane.b32.xlu1 %v21425_v24, %s20543_s3 }
0x1033   : > { %v6250_v0 = vpop.xlane.xlu1 %6249 }
0x1034   : > { %v6254_v53 = vsub.f32 %v6246_v1, %v6250_v0 }
0x1036   : > { %v6256_v49 = vmul.f32 1.442695, %v6254_v53 }
0x1037   : > { %v6253_v60 = vpop.xlane.xlu0 %6252  ;;  %v6499_v24 = vpop.permute.xlu1 %6498 }
0x1038   : > { %19919 = vpow2.f32 %v6256_v49  ;;  %v6255_v45 = vsub.f32 %v6247_v55, %v6253_v60  ;;  %v18913_v55 = vld [vmem:[%s20960_s10 + $0xe4] ss:$16 sps:$4 sm:$0xff]  }
0x103a   : > { %v6258_v47 = vmul.f32 1.442695, %v6255_v45  ;;  %v18916_v45 = vld [vmem:[%s20960_s10 + $0xc4] ss:$16 sps:$4 sm:$0xff]  }
0x103b   : > { %v6419_v10 = vpop.permute.xlu1 %6418 }
0x103c   : > { %19921 = vpow2.f32 %v6258_v47 }
0x1045   : > { %v19920_v4 = vpop.eup %19919 }
0x1046   : > { %v6260_v7 = vsel %vm4230_vm3, %v19920_v4, 0.0 }
0x1047   : > { %6261 = vadd.xlane.f32.xlu0 %v6260_v7  ;;  %v18914_v7 = vld [vmem:[%s20960_s10 + $0xc0] ss:$16 sps:$4 sm:$0xff]  }
0x1049   : > { %v19922_v8 = vpop.eup %19921 }
0x104a   : > { %v6263_v59 = vsel %vm4230_vm3, %v19922_v8, 0.0 }
0x104b   : > { %6264 = vadd.xlane.f32.xlu1 %v6263_v59  ;;  %v18919_v59 = vld [vmem:[%s20960_s10 + $0xa4] ss:$16 sps:$4 sm:$0xff]  }
0x105c   : > { %6496 = vrot.lane.b32.xlu1 %v3720_v9, %s20543_s3 }
0x105d   : > { %6420 = vrot.lane.b32.xlu0 %v21548_v19, %s20543_s3 }
0x10d0   : > { %v6262_v11 = vpop.xlane.xlu0 %6261 }
0x10d1   : > { %19923 = vrcp.f32 %v6262_v11  ;;  %v18920_v11 = vld [vmem:[%s20960_s10 + $0x80] ss:$16 sps:$4 sm:$0xff]  }
0x10d4   : > { %v6265_v12 = vpop.xlane.xlu1 %6264  ;;  %v6421_v17 = vpop.permute.xlu0 %6420 }
0x10d5   : > { %19925 = vrcp.f32 %v6265_v12  ;;  %v18925_v12 = vld [vmem:[%s20960_s10 + $0x64] ss:$16 sps:$4 sm:$0xff]  }
0x10d8   : > { %v6497_v19 = vpop.permute.xlu1 %6496 }
0x10de   : > { %v19924_v13 = vpop.eup %19923 }
0x10df   : > { %v6268_v14 = vmul.f32 %v19924_v13, %v19920_v4  ;;  %v18923_v13 = vld [vmem:[%s20960_s10 + $0x60] ss:$16 sps:$4 sm:$0xff]  }
0x10e1   : > { %18191 = vmatmul.mubr.msk.f32.vlgmr.msra.gmra.mxu0 %vm4230_vm3, %v6268_v14  ;;  %v18928_v14 = vld [vmem:[%s20960_s10 + $0x44] ss:$16 sps:$4 sm:$0xff]  }
0x10e2   : > { %v19926_v18 = vpop.eup %19925  ;;  %18199 = vmatpush3.xpose.msk.msra.mxu0 %vm4071_vm1, %v6421_v17  ;;  %18200 = vmatprep.mubr.msk.f32.mxu0 %vm20542_vm0, %v20541_v44  ;;  %v18926_v17 = vld [vmem:[%s20960_s10 + $0x40] ss:$16 sps:$4 sm:$0xff]  }
0x10e3   : > { %v6269_v22 = vmul.f32 %v19926_v18, %v19922_v8  ;;  %18208 = vmatprep.subr.mxu0 %v20541_v44  ;;  %v18931_v18 = vld [vmem:[%s20960_s10 + $0x24] ss:$16 sps:$4 sm:$0xff]  }
0x10e5   : > { %18196 = vmatmul.mubr.msk.f32.vlgmr.msra.gmra.mxu1 %vm4230_vm3, %v6269_v22  ;;  %18201 = vmatmul.mubr.msk.f32.vlgmr.msra.gmra.mxu0 %vm4071_vm1, %v6419_v10  ;;  %v18922_v10 = vld [vmem:[%s20960_s10 + $0x84] ss:$16 sps:$4 sm:$0xff]   ;;  %v18929_v22 = vld [vmem:[%s20960_s10 + $0x20] ss:$16 sps:$4 sm:$0xff]  }
0x10e6   : > { %18204 = vmatpush3.xpose.msk.msra.mxu1 %vm4071_vm1, %v6499_v24  ;;  %18205 = vmatprep.mubr.msk.f32.mxu1 %vm20542_vm0, %v20541_v44  ;;  %v18917_v24 = vld [vmem:[%s20960_s10 + $0xa0] ss:$16 sps:$4 sm:$0xff]  }
0x10e7   : > { %18213 = vmatprep.subr.mxu1 %v20541_v44  ;;  %18210 = vmatprep.mubr.msk.f32.mxu0 %vm20542_vm0, %v20541_v44 }
0x10e9   : > { %18206 = vmatmul.mubr.msk.f32.vlgmr.msra.gmra.mxu1 %vm4071_vm1, %v6497_v19  ;;  %v18934_v19 = vld [vmem:[%s20960_s10 + $0x4] ss:$16 sps:$4 sm:$0xff]  }
0x10ea   : > { %18215 = vmatprep.mubr.msk.f32.mxu1 %vm20542_vm0, %v20541_v44 }
0x11a1   : > { %v6339_v54 = vpop.f32.mrf.mxu0 }
0x11a2   : > { %6416 = vst.msk [vmem:[#allocation3 + $0x18] sm:$0xff] %vm4071_vm1, %v6339_v54  ;;  %v18932_v54 = vld [vmem:[%s20960_s10] ss:$16 sps:$4 sm:$0xff]  }
0x11a3   : > { %v18192_v27 = vpop.f32.mrf.mxu0 }
0x11a4   : > { %v18937_v27 = vld [vmem:[%s20960_s10 + $0x1e4] ss:$16 sps:$4 sm:$0xff]  }
0x11a5   : > { %v6412_v30 = vpop.f32.mrf.mxu1  ;;  %v6492_v38 = vpop.f32.mrf.mxu0 }
0x11a6   : > { %6417 = vst.msk [vmem:[#allocation3 + $0x38] sm:$0xff] %vm4071_vm1, %v6412_v30  ;;  %v6574_v32 = vmul.f32 0.125, %v6492_v38  ;;  %v18935_v30 = vld [vmem:[%s20960_s10 + $0x1e0] ss:$16 sps:$4 sm:$0xff]   ;;  %v18940_v38 = vld [vmem:[%s20960_s10 + $0x1c4] ss:$16 sps:$4 sm:$0xff]  }
0x11a7   : > { %v18197_v39 = vpop.f32.mrf.mxu1  ;;  %v18202_v40 = vpop.f32.mrf.mxu0 }
0x11a8   : > { %v6576_v15 = vsel %vm21581_vm2, -1e+09, %v6574_v32  ;;  %v18938_v32 = vld [vmem:[%s20960_s10 + $0x1c0] ss:$16 sps:$4 sm:$0xff]   ;;  %v18943_v39 = vld [vmem:[%s20960_s10 + $0x1a4] ss:$16 sps:$4 sm:$0xff]  }
0x11a9   : > { %v6570_v23 = vpop.f32.mrf.mxu1  ;;  %v6578_v50 = vsel %vm4230_vm3, %v6576_v15, -inf  ;;  %v18941_v40 = vld [vmem:[%s20960_s10 + $0x1a0] ss:$16 sps:$4 sm:$0xff]  }
0x11aa   : > { %v6575_v36 = vmul.f32 0.125, %v6570_v23  ;;  %6579 = vmax.xlane.f32.xlu0 %v6578_v50  ;;  %v18944_v23 = vld [vmem:[%s20960_s10 + $0x180] ss:$16 sps:$4 sm:$0xff]   ;;  %v18949_v50 = vld [vmem:[%s20960_s10 + $0x164] ss:$16 sps:$4 sm:$0xff]  }
0x11ab   : > { %v18207_v44 = vpop.f32.mrf.mxu1 }
0x11ac   : > { %v6577_v26 = vsel %vm21581_vm2, -1e+09, %v6575_v36  ;;  %v18947_v36 = vld [vmem:[%s20960_s10 + $0x160] ss:$16 sps:$4 sm:$0xff]   ;;  %v18952_v44 = vld [vmem:[%s20960_s10 + $0x144] ss:$16 sps:$4 sm:$0xff]  }
0x11ad   : > { %v6581_v51 = vsel %vm4230_vm3, %v6577_v26, -inf }
0x11ae   : > { %6582 = vmax.xlane.f32.xlu1 %v6581_v51  ;;  %v18955_v51 = vld [vmem:[%s20960_s10 + $0x124] ss:$16 sps:$4 sm:$0xff]  }
0x11bf   : > { %6678 = vrot.lane.b32.xlu1 %v21585_v48, %s20543_s3 }
0x11c3   : > { %5412 = vrot.lane.b32.xlu1 %v21733_v31, %s20543_s3 }
0x11c7   : > { %5414 = vrot.lane.b32.xlu1 %v21735_v2, %s20543_s3 }
0x11cb   : > { %4741 = vrot.lane.b32.xlu1 %v21661_v5, %s20543_s3 }
0x1233   : > { %v6580_v9 = vpop.xlane.xlu0 %6579 }
0x1234   : > { %v6584_v41 = vsub.f32 %v6576_v15, %v6580_v9  ;;  %v18946_v15 = vld [vmem:[%s20960_s10 + $0x184] ss:$16 sps:$4 sm:$0xff]   ;;  %v18953_v9 = vld [vmem:[%s20960_s10 + $0x120] ss:$16 sps:$4 sm:$0xff]  }
0x1236   : > { %v6586_v61 = vmul.f32 1.442695, %v6584_v41  ;;  %v18958_v41 = vld [vmem:[%s20960_s10 + $0x104] ss:$16 sps:$4 sm:$0xff]  }
0x1237   : > { %v6583_v25 = vpop.xlane.xlu1 %6582 }
0x1238   : > { %19927 = vpow2.f32 %v6586_v61  ;;  %v6585_v62 = vsub.f32 %v6577_v26, %v6583_v25  ;;  %v18950_v26 = vld [vmem:[%s20960_s10 + $0x140] ss:$16 sps:$4 sm:$0xff]   ;;  %v18961_v25 = vld [vmem:[%s20960_s10 + $0xec] ss:$16 sps:$4 sm:$0xff]  }
0x1239   : > { %v18956_v61 = vld [vmem:[%s20960_s10 + $0x100] ss:$16 sps:$4 sm:$0xff]  }
0x123a   : > { %v6588_v21 = vmul.f32 1.442695, %v6585_v62 }
0x123b   : > { %v6679_v56 = vpop.permute.xlu1 %6678 }
0x123c   : > { %19929 = vpow2.f32 %v6588_v21  ;;  %18214 = vmatpush3.msra.mxu1 %v6679_v56  ;;  %v18959_v56 = vld [vmem:[%s20960_s10 + $0xe8] ss:$16 sps:$4 sm:$0xff]  }
0x123f   : > { %v5413_v48 = vpop.permute.xlu1 %5412 }
0x1240   : > { %5418 = vst.msk [vmem:[#allocation3 + $0x8] sm:$0xff] %vm4745_vm4, %v5413_v48 }
0x1243   : > { %v5415_v31 = vpop.permute.xlu1 %5414 }
0x1244   : > { %5419 = vst.msk [vmem:[#allocation3 + $0x28] sm:$0xff] %vm4745_vm4, %v5415_v31  ;;  %v18964_v31 = vld [vmem:[%s20960_s10 + $0xcc] ss:$16 sps:$4 sm:$0xff]  }
0x1245   : > { %v19928_v2 = vpop.eup %19927 }
0x1246   : > { %v6590_v5 = vsel %vm4230_vm3, %v19928_v2, 0.0 }
0x1247   : > { %v4742_v1 = vpop.permute.xlu1 %4741  ;;  %6591 = vadd.xlane.f32.xlu0 %v6590_v5  ;;  %v18967_v5 = vld [vmem:[%s20960_s10 + $0xac] ss:$16 sps:$4 sm:$0xff]  }
0x1248   : > { %4747 = vst.msk [vmem:[#allocation3 + $0x20] sm:$0xff] %vm4745_vm4, %v4742_v1  ;;  %v18965_v1 = vld [vmem:[%s20960_s10 + $0xa8] ss:$16 sps:$4 sm:$0xff]  }
0x1249   : > { %v19930_v28 = vpop.eup %19929 }
0x124a   : > { %v6593_v16 = vsel %vm4230_vm3, %v19930_v28, 0.0 }
0x124b   : > { %6594 = vadd.xlane.f32.xlu0 %v6593_v16  ;;  %v6769_v53 = vld [vmem:[#allocation3 + $0x28] sm:$0xff]  ;;  %v18968_v16 = vld [vmem:[%s20960_s10 + $0x88] ss:$16 sps:$4 sm:$0xff]  }
0x124f   : > { %v6768_v21 = vld [vmem:[#allocation3 + $0x20] sm:$0xff] }
0x1261   : > { %6601 = vrot.lane.b32.xlu0 %v21576_v29, %s20543_s3  ;;  %v18911_v29 = vld [vmem:[%s20960_s10 + $0xe0] ss:$16 sps:$4 sm:$0xff]  }
0x1265   : > { %4739 = vrot.lane.b32.xlu0 %v21659_v42, %s20543_s3  ;;  %v6765_v42 = vld [vmem:[#allocation3 + $0x8] sm:$0xff] }
0x1266   : > { %v21876_v47 = vpack.c.bf16 %v6769_v53, %v6765_v42  ;;  %v18977_v53 = vld [vmem:[%s20960_s10 + $0x28] ss:$16 sps:$4 sm:$0xff]  }
0x1267   : > { %v18983_v42 = vld [vmem:[%s20960_s10 + $0x1e8] ss:$16 sps:$4 sm:$0xff]  }
0x12d0   : > { %v6592_v3 = vpop.xlane.xlu0 %6591 }
0x12d1   : > { %19931 = vrcp.f32 %v6592_v3  ;;  %v18973_v3 = vld [vmem:[%s20960_s10 + $0x6c] ss:$16 sps:$4 sm:$0xff]  }
0x12d4   : > { %v6595_v52 = vpop.xlane.xlu0 %6594 }
0x12d5   : > { %19933 = vrcp.f32 %v6595_v52  ;;  %v18971_v52 = vld [vmem:[%s20960_s10 + $0x68] ss:$16 sps:$4 sm:$0xff]  }
0x12d8   : > { %v6602_v20 = vpop.permute.xlu0 %6601 }
0x12d9   : > { %18209 = vmatpush3.msra.mxu0 %v6602_v20  ;;  %v18974_v20 = vld [vmem:[%s20960_s10 + $0x48] ss:$16 sps:$4 sm:$0xff]  }
0x12da   : > { %7566 = vmatprep.subr.bf16.mxu0 %v18913_v55  ;;  %v18976_v55 = vld [vmem:[%s20960_s10 + $0x4c] ss:$16 sps:$4 sm:$0xff]  }
0x12dc   : > { %v4740_v0 = vpop.permute.xlu0 %4739 }
0x12dd   : > { %4746 = vst.msk [vmem:[#allocation3] sm:$0xff] %vm4745_vm4, %v4740_v0  ;;  %v18979_v0 = vld [vmem:[%s20960_s10 + $0x2c] ss:$16 sps:$4 sm:$0xff]  }
0x12de   : > { %v19932_v49 = vpop.eup %19931 }
0x12df   : > { %v6598_v60 = vmul.f32 %v19932_v49, %v19928_v2  ;;  %v18962_v2 = vld [vmem:[%s20960_s10 + $0xc8] ss:$16 sps:$4 sm:$0xff]   ;;  %v18982_v49 = vld [vmem:[%s20960_s10 + $0xc] ss:$16 sps:$4 sm:$0xff]  }
0x12e1   : > { %18211 = vmatmul.mubr.msk.f32.vlgmr.msra.gmra.mxu0 %vm4230_vm3, %v6598_v60  ;;  %v18985_v60 = vld [vmem:[%s20960_s10 + $0x1ec] ss:$16 sps:$4 sm:$0xff]  }
0x12e2   : > { %v19934_v4 = vpop.eup %19933  ;;  %7567 = vmatpush1.bf16.msra.mxu0 %v18911_v29  ;;  %7598 = vmatprep.mubr.bf16.mxu0 %v21876_v47  ;;  %v18980_v29 = vld [vmem:[%s20960_s10 + $0x8] ss:$16 sps:$4 sm:$0xff]  }
0x12e3   : > { %7568 = vmatprep.subr.bf16.mxu0 %v18916_v45  ;;  %v6599_v8 = vmul.f32 %v19934_v4, %v19930_v28  ;;  %v18970_v28 = vld [vmem:[%s20960_s10 + $0x8c] ss:$16 sps:$4 sm:$0xff]  }
0x12e4   : > { %v6764_v62 = vld [vmem:[#allocation3] sm:$0xff] }
0x12e5   : > { %18216 = vmatmul.mubr.msk.f32.vlgmr.msra.gmra.mxu1 %vm4230_vm3, %v6599_v8  ;;  %v21912_v48 = vpack.c.bf16 %v6768_v21, %v6764_v62  ;;  %v18988_v45 = vld [vmem:[%s20960_s10 + $0x1cc] ss:$16 sps:$4 sm:$0xff]   ;;  %v19039_v62 = vld [vmem:[%s20960_s10 + $0x3a4] ss:$16 sps:$4 sm:$0xff]   ;;  %v19037_v21 = vld [vmem:[%s20960_s10 + $0x3a0] ss:$16 sps:$4 sm:$0xff]  }
0x12e6   : > { %7569 = vmatpush1.bf16.msra.mxu0 %v18914_v7  ;;  %v18991_v4 = vld [vmem:[%s20960_s10 + $0x1ac] ss:$16 sps:$4 sm:$0xff]   ;;  %v18989_v7 = vld [vmem:[%s20960_s10 + $0x1a8] ss:$16 sps:$4 sm:$0xff]  }
0x12e7   : > { %7570 = vmatprep.subr.bf16.mxu0 %v18919_v59  ;;  %v18994_v8 = vld [vmem:[%s20960_s10 + $0x18c] ss:$16 sps:$4 sm:$0xff]   ;;  %v18992_v59 = vld [vmem:[%s20960_s10 + $0x188] ss:$16 sps:$4 sm:$0xff]  }
0x12ea   : > { %7571 = vmatpush1.bf16.msra.mxu0 %v18917_v24  ;;  %v18997_v24 = vld [vmem:[%s20960_s10 + $0x16c] ss:$16 sps:$4 sm:$0xff]  }
0x12eb   : > { %7572 = vmatprep.subr.bf16.mxu0 %v18922_v10  ;;  %v18995_v10 = vld [vmem:[%s20960_s10 + $0x168] ss:$16 sps:$4 sm:$0xff]  }
0x12ee   : > { %7573 = vmatpush1.bf16.msra.mxu0 %v18920_v11  ;;  %v19000_v11 = vld [vmem:[%s20960_s10 + $0x14c] ss:$16 sps:$4 sm:$0xff]  }
0x12ef   : > { %7574 = vmatprep.subr.bf16.mxu0 %v18925_v12  ;;  %v18998_v12 = vld [vmem:[%s20960_s10 + $0x148] ss:$16 sps:$4 sm:$0xff]  }
0x12f2   : > { %7575 = vmatpush1.bf16.msra.mxu0 %v18923_v13  ;;  %v19003_v13 = vld [vmem:[%s20960_s10 + $0x12c] ss:$16 sps:$4 sm:$0xff]  }
0x12f3   : > { %7576 = vmatprep.subr.bf16.mxu0 %v18928_v14  ;;  %v19001_v14 = vld [vmem:[%s20960_s10 + $0x128] ss:$16 sps:$4 sm:$0xff]  }
0x12f6   : > { %7577 = vmatpush1.bf16.msra.mxu0 %v18926_v17  ;;  %v19006_v17 = vld [vmem:[%s20960_s10 + $0x10c] ss:$16 sps:$4 sm:$0xff]  }
0x12f7   : > { %7578 = vmatprep.subr.bf16.mxu0 %v18931_v18  ;;  %v19004_v18 = vld [vmem:[%s20960_s10 + $0x108] ss:$16 sps:$4 sm:$0xff]  }
0x12fa   : > { %7579 = vmatpush1.bf16.msra.mxu0 %v18929_v22  ;;  %v19009_v22 = vld [vmem:[%s20960_s10 + $0x2e4] ss:$16 sps:$4 sm:$0xff]  }
0x12fb   : > { %7580 = vmatprep.subr.bf16.mxu0 %v18934_v19  ;;  %v19007_v19 = vld [vmem:[%s20960_s10 + $0x2e0] ss:$16 sps:$4 sm:$0xff]   ;;  %7609 = vmatprep.subr.bf16.mxu1 %v19009_v22  ;;  %v19072_v22 = vld [vmem:[%s20960_s10 + $0x24c] ss:$16 sps:$4 sm:$0xff]  }
0x12fc   : > { %7610 = vmatpush1.bf16.msra.mxu1 %v19007_v19  ;;  %v19070_v19 = vld [vmem:[%s20960_s10 + $0x248] ss:$16 sps:$4 sm:$0xff]  }
0x12fe   : > { %7581 = vmatpush1.bf16.msra.mxu0 %v18932_v54  ;;  %v19010_v54 = vld [vmem:[%s20960_s10 + $0x2c0] ss:$16 sps:$4 sm:$0xff]  }
0x12ff   : > { %7582 = vmatprep.subr.bf16.mxu0 %v18937_v27  ;;  %v19012_v27 = vld [vmem:[%s20960_s10 + $0x2c4] ss:$16 sps:$4 sm:$0xff]  }
0x1300   : > { %7611 = vmatprep.subr.bf16.mxu1 %v19012_v27  ;;  %v19073_v27 = vld [vmem:[%s20960_s10 + $0x228] ss:$16 sps:$4 sm:$0xff]  }
0x1301   : > { %7612 = vmatpush1.bf16.msra.mxu1 %v19010_v54  ;;  %v19075_v54 = vld [vmem:[%s20960_s10 + $0x22c] ss:$16 sps:$4 sm:$0xff]  }
0x1302   : > { %7583 = vmatpush2.bf16.msra.mxu0 %v18935_v30  ;;  %v19015_v30 = vld [vmem:[%s20960_s10 + $0x2a4] ss:$16 sps:$4 sm:$0xff]  }
0x1303   : > { %7584 = vmatprep.subr.bf16.mxu0 %v18940_v38  ;;  %v19013_v38 = vld [vmem:[%s20960_s10 + $0x2a0] ss:$16 sps:$4 sm:$0xff]   ;;  %7613 = vmatprep.subr.bf16.mxu1 %v19015_v30  ;;  %v19078_v30 = vld [vmem:[%s20960_s10 + $0x20c] ss:$16 sps:$4 sm:$0xff]  }
0x1305   : > { %7614 = vmatpush1.bf16.msra.mxu1 %v19013_v38  ;;  %v19076_v38 = vld [vmem:[%s20960_s10 + $0x208] ss:$16 sps:$4 sm:$0xff]  }
0x1306   : > { %7585 = vmatpush2.bf16.msra.mxu0 %v18938_v32  ;;  %v19018_v32 = vld [vmem:[%s20960_s10 + $0x284] ss:$16 sps:$4 sm:$0xff]  }
0x1307   : > { %7586 = vmatprep.subr.bf16.mxu0 %v18943_v39  ;;  %v19016_v39 = vld [vmem:[%s20960_s10 + $0x280] ss:$16 sps:$4 sm:$0xff]   ;;  %7615 = vmatprep.subr.bf16.mxu1 %v19018_v32  ;;  %v19081_v32 = vld [vmem:[%s20960_s10 + $0x3ec] ss:$16 sps:$4 sm:$0xff]  }
0x1309   : > { %7616 = vmatpush1.bf16.msra.mxu1 %v19016_v39  ;;  %v19079_v39 = vld [vmem:[%s20960_s10 + $0x3e8] ss:$16 sps:$4 sm:$0xff]  }
0x130a   : > { %7587 = vmatpush2.bf16.msra.mxu0 %v18941_v40  ;;  %v19021_v40 = vld [vmem:[%s20960_s10 + $0x264] ss:$16 sps:$4 sm:$0xff]  }
0x130b   : > { %7588 = vmatprep.subr.bf16.mxu0 %v18946_v15  ;;  %v19019_v15 = vld [vmem:[%s20960_s10 + $0x260] ss:$16 sps:$4 sm:$0xff]   ;;  %7617 = vmatprep.subr.bf16.mxu1 %v19021_v40  ;;  %v19084_v40 = vld [vmem:[%s20960_s10 + $0x3cc] ss:$16 sps:$4 sm:$0xff]  }
0x130d   : > { %7618 = vmatpush1.bf16.msra.mxu1 %v19019_v15  ;;  %v19082_v15 = vld [vmem:[%s20960_s10 + $0x3c8] ss:$16 sps:$4 sm:$0xff]  }
0x130e   : > { %7589 = vmatpush2.bf16.msra.mxu0 %v18944_v23  ;;  %v19024_v23 = vld [vmem:[%s20960_s10 + $0x244] ss:$16 sps:$4 sm:$0xff]  }
0x130f   : > { %7590 = vmatprep.subr.bf16.mxu0 %v18949_v50  ;;  %v19022_v50 = vld [vmem:[%s20960_s10 + $0x240] ss:$16 sps:$4 sm:$0xff]   ;;  %7619 = vmatprep.subr.bf16.mxu1 %v19024_v23  ;;  %v19087_v23 = vld [vmem:[%s20960_s10 + $0x3ac] ss:$16 sps:$4 sm:$0xff]  }
0x1311   : > { %7620 = vmatpush1.bf16.msra.mxu1 %v19022_v50  ;;  %v19085_v50 = vld [vmem:[%s20960_s10 + $0x3a8] ss:$16 sps:$4 sm:$0xff]  }
0x1312   : > { %7591 = vmatpush2.bf16.msra.mxu0 %v18947_v36  ;;  %v19027_v36 = vld [vmem:[%s20960_s10 + $0x224] ss:$16 sps:$4 sm:$0xff]  }
0x1313   : > { %7592 = vmatprep.subr.bf16.mxu0 %v18952_v44  ;;  %v19025_v44 = vld [vmem:[%s20960_s10 + $0x220] ss:$16 sps:$4 sm:$0xff]   ;;  %7621 = vmatprep.subr.bf16.mxu1 %v19027_v36  ;;  %v19090_v36 = vld [vmem:[%s20960_s10 + $0x38c] ss:$16 sps:$4 sm:$0xff]  }
0x1315   : > { %7622 = vmatpush1.bf16.msra.mxu1 %v19025_v44  ;;  %v19088_v44 = vld [vmem:[%s20960_s10 + $0x388] ss:$16 sps:$4 sm:$0xff]  }
0x1316   : > { %7593 = vmatpush2.bf16.msra.mxu0 %v18950_v26  ;;  %v19030_v26 = vld [vmem:[%s20960_s10 + $0x204] ss:$16 sps:$4 sm:$0xff]  }
0x1317   : > { %7594 = vmatprep.subr.bf16.mxu0 %v18955_v51  ;;  %v19028_v51 = vld [vmem:[%s20960_s10 + $0x200] ss:$16 sps:$4 sm:$0xff]   ;;  %7623 = vmatprep.subr.bf16.mxu1 %v19030_v26  ;;  %v19093_v26 = vld [vmem:[%s20960_s10 + $0x36c] ss:$16 sps:$4 sm:$0xff]  }
0x1319   : > { %7624 = vmatpush1.bf16.msra.mxu1 %v19028_v51  ;;  %v19091_v51 = vld [vmem:[%s20960_s10 + $0x368] ss:$16 sps:$4 sm:$0xff]  }
0x131a   : > { %7595 = vmatpush2.bf16.msra.mxu0 %v18953_v9  ;;  %v19033_v9 = vld [vmem:[%s20960_s10 + $0x3e4] ss:$16 sps:$4 sm:$0xff]  }
0x131b   : > { %7596 = vmatprep.subr.bf16.mxu0 %v18958_v41  ;;  %v19031_v41 = vld [vmem:[%s20960_s10 + $0x3e0] ss:$16 sps:$4 sm:$0xff]   ;;  %7625 = vmatprep.subr.bf16.mxu1 %v19033_v9  ;;  %v19096_v9 = vld [vmem:[%s20960_s10 + $0x34c] ss:$16 sps:$4 sm:$0xff]  }
0x131d   : > { %7626 = vmatpush2.bf16.msra.mxu1 %v19031_v41  ;;  %v19094_v41 = vld [vmem:[%s20960_s10 + $0x348] ss:$16 sps:$4 sm:$0xff]  }
0x131e   : > { %7597 = vmatpush2.bf16.msra.mxu0 %v18956_v61  ;;  %v19036_v61 = vld [vmem:[%s20960_s10 + $0x3c4] ss:$16 sps:$4 sm:$0xff]  }
0x131f   : > { %7652 = vmatprep.subr.bf16.mxu0 %v18961_v25  ;;  %v19034_v25 = vld [vmem:[%s20960_s10 + $0x3c0] ss:$16 sps:$4 sm:$0xff]   ;;  %7627 = vmatprep.subr.bf16.mxu1 %v19036_v61  ;;  %v19099_v61 = vld [vmem:[%s20960_s10 + $0x32c] ss:$16 sps:$4 sm:$0xff]  }
0x1321   : > { %7599 = vmatmul.mubr.bf16.vlgmr.msra.gmra.mxu0 %v21912_v48  ;;  %7628 = vmatpush2.bf16.msra.mxu1 %v19034_v25  ;;  %v19097_v25 = vld [vmem:[%s20960_s10 + $0x328] ss:$16 sps:$4 sm:$0xff]  }
0x1322   : > { %7653 = vmatpush1.bf16.msra.mxu0 %v18959_v56  ;;  %7684 = vmatprep.mubr.bf16.mxu0 %v21876_v47  ;;  %v18986_v47 = vld [vmem:[%s20960_s10 + $0x1c8] ss:$16 sps:$4 sm:$0xff]   ;;  %v19042_v56 = vld [vmem:[%s20960_s10 + $0x384] ss:$16 sps:$4 sm:$0xff]  }
0x1323   : > { %7654 = vmatprep.subr.bf16.mxu0 %v18964_v31  ;;  %7629 = vmatprep.subr.bf16.mxu1 %v19039_v62  ;;  %v19043_v31 = vld [vmem:[%s20960_s10 + $0x360] ss:$16 sps:$4 sm:$0xff]   ;;  %v19102_v62 = vld [vmem:[%s20960_s10 + $0x30c] ss:$16 sps:$4 sm:$0xff]  }
0x1325   : > { %7630 = vmatpush2.bf16.msra.mxu1 %v19037_v21  ;;  %v19100_v21 = vld [vmem:[%s20960_s10 + $0x308] ss:$16 sps:$4 sm:$0xff]  }
0x1326   : > { %7655 = vmatpush1.bf16.msra.mxu0 %v18962_v2  ;;  %7631 = vmatprep.subr.bf16.mxu1 %v19042_v56  ;;  %v19045_v2 = vld [vmem:[%s20960_s10 + $0x364] ss:$16 sps:$4 sm:$0xff]  }
0x1327   : > { %7656 = vmatprep.subr.bf16.mxu0 %v18967_v5  ;;  %v19046_v5 = vld [vmem:[%s20960_s10 + $0x340] ss:$16 sps:$4 sm:$0xff]  }
0x132a   : > { %7657 = vmatpush1.bf16.msra.mxu0 %v18965_v1  ;;  %v19048_v1 = vld [vmem:[%s20960_s10 + $0x344] ss:$16 sps:$4 sm:$0xff]  }
0x132b   : > { %7658 = vmatprep.subr.bf16.mxu0 %v18970_v28  ;;  %v19049_v28 = vld [vmem:[%s20960_s10 + $0x320] ss:$16 sps:$4 sm:$0xff]  }
0x132e   : > { %7659 = vmatpush1.bf16.msra.mxu0 %v18968_v16  ;;  %v19051_v16 = vld [vmem:[%s20960_s10 + $0x324] ss:$16 sps:$4 sm:$0xff]  }
0x132f   : > { %7660 = vmatprep.subr.bf16.mxu0 %v18973_v3 }
0x1332   : > { %7661 = vmatpush1.bf16.msra.mxu0 %v18971_v52  ;;  %v19054_v52 = vld [vmem:[%s20960_s10 + $0x304] ss:$16 sps:$4 sm:$0xff]  }
0x1333   : > { %7662 = vmatprep.subr.bf16.mxu0 %v18976_v55  ;;  %v19052_v55 = vld [vmem:[%s20960_s10 + $0x300] ss:$16 sps:$4 sm:$0xff]  }
0x1336   : > { %7663 = vmatpush1.bf16.msra.mxu0 %v18974_v20 }
0x1337   : > { %7664 = vmatprep.subr.bf16.mxu0 %v18979_v0 }
0x133a   : > { %7665 = vmatpush1.bf16.msra.mxu0 %v18977_v53  ;;  %v19057_v53 = vld [vmem:[%s20960_s10 + $0x2ec] ss:$16 sps:$4 sm:$0xff]  }
0x133b   : > { %7666 = vmatprep.subr.bf16.mxu0 %v18982_v49 }
0x133e   : > { %7667 = vmatpush1.bf16.msra.mxu0 %v18980_v29 }
0x133f   : > { %7668 = vmatprep.subr.bf16.mxu0 %v18985_v60 }
0x1342   : > { %7669 = vmatpush2.bf16.msra.mxu0 %v18983_v42 }
0x1343   : > { %7670 = vmatprep.subr.bf16.mxu0 %v18988_v45 }
0x1346   : > { %7671 = vmatpush2.bf16.msra.mxu0 %v18986_v47 }
0x1347   : > { %7672 = vmatprep.subr.bf16.mxu0 %v18991_v4 }
0x134a   : > { %7673 = vmatpush2.bf16.msra.mxu0 %v18989_v7 }
0x134b   : > { %7674 = vmatprep.subr.bf16.mxu0 %v18994_v8 }
0x134e   : > { %7675 = vmatpush2.bf16.msra.mxu0 %v18992_v59 }
0x134f   : > { %7676 = vmatprep.subr.bf16.mxu0 %v18997_v24  ;;  %v19060_v24 = vld [vmem:[%s20960_s10 + $0x2cc] ss:$16 sps:$4 sm:$0xff]  }
0x1352   : > { %7677 = vmatpush2.bf16.msra.mxu0 %v18995_v10  ;;  %v19058_v10 = vld [vmem:[%s20960_s10 + $0x2c8] ss:$16 sps:$4 sm:$0xff]  }
0x1353   : > { %7678 = vmatprep.subr.bf16.mxu0 %v19000_v11  ;;  %v19063_v11 = vld [vmem:[%s20960_s10 + $0x2ac] ss:$16 sps:$4 sm:$0xff]  }
0x1356   : > { %7679 = vmatpush2.bf16.msra.mxu0 %v18998_v12  ;;  %v19061_v12 = vld [vmem:[%s20960_s10 + $0x2a8] ss:$16 sps:$4 sm:$0xff]  }
0x1357   : > { %7680 = vmatprep.subr.bf16.mxu0 %v19003_v13  ;;  %v19066_v13 = vld [vmem:[%s20960_s10 + $0x28c] ss:$16 sps:$4 sm:$0xff]  }
0x135a   : > { %7681 = vmatpush2.bf16.msra.mxu0 %v19001_v14  ;;  %v19064_v14 = vld [vmem:[%s20960_s10 + $0x288] ss:$16 sps:$4 sm:$0xff]  }
0x135b   : > { %7682 = vmatprep.subr.bf16.mxu0 %v19006_v17  ;;  %v19069_v17 = vld [vmem:[%s20960_s10 + $0x26c] ss:$16 sps:$4 sm:$0xff]  }
0x135e   : > { %7683 = vmatpush2.bf16.msra.mxu0 %v19004_v18  ;;  %v19067_v18 = vld [vmem:[%s20960_s10 + $0x268] ss:$16 sps:$4 sm:$0xff]  }
0x1361   : > { %7685 = vmatmul.mubr.bf16.vlgmr.msra.gmra.mxu0 %v21912_v48  ;;  %v19040_v48 = vld [vmem:[%s20960_s10 + $0x380] ss:$16 sps:$4 sm:$0xff]  }
0x1362   : > { %7632 = vmatpush2.bf16.msra.mxu1 %v19040_v48 }
0x1363   : > { %7633 = vmatprep.subr.bf16.mxu1 %v19045_v2 }
0x1366   : > { %7634 = vmatpush2.bf16.msra.mxu1 %v19043_v31 }
0x1367   : > { %7635 = vmatprep.subr.bf16.mxu1 %v19048_v1  ;;  %v6904_v1 = vld [vmem:[%s919_s24] sm:$0xf] }
0x136a   : > { %7636 = vmatpush2.bf16.msra.mxu1 %v19046_v5 }
0x136b   : > { %7637 = vmatprep.subr.bf16.mxu1 %v19051_v16  ;;  %v6913_v16 = vrot.slane %v6904_v1, %v21305_v37 }
0x136e   : > { %7638 = vmatpush2.bf16.msra.mxu1 %v19049_v28 }
0x136f   : > { %7639 = vmatprep.subr.bf16.mxu1 %v19054_v52  ;;  %v6909_v52 = vrot.slane %v6904_v1, %v21483_v34 }
0x1372   : > { %7640 = vmatpush2.bf16.msra.mxu1 %v19052_v55 }
0x1373   : > { %7695 = vmatprep.subr.bf16.mxu1 %v19057_v53 }
0x13a1   : > { %v6673_v3 = vpop.f32.mrf.mxu0 }
0x13a2   : > { %6756 = vrot.lane.b32.xlu0 %v6673_v3, %s20543_s3 }
0x13a3   : > { %v18212_v20 = vpop.f32.mrf.mxu0 }
0x13a5   : > { %v6750_v0 = vpop.f32.mrf.mxu1 }
0x13a6   : > { %6758 = vrot.lane.b32.xlu1 %v6750_v0, %s20543_s3  ;;  %6084 = vrot.lane.b32.xlu0 %v21813_v6, %s20543_s3 }
0x13a7   : > { %v18217_v49 = vpop.f32.mrf.mxu1 }
0x13a8   : > { %v6917_v49 = vrot.slane %v6904_v1, %v21387_v57 }
0x13aa   : > { %6086 = vrot.lane.b32.xlu1 %v21815_v43, %s20543_s3  ;;  %v19055_v43 = vld [vmem:[%s20960_s10 + $0x2e8] ss:$16 sps:$4 sm:$0xff]   ;;  %s23708_s10 = scalar_lea.vmem [#allocation25], %s20967_s27  ;;  %s23711_s27 = sld [smem:[#allocation44_spill]] }
0x13b0   : > { %p17975_p10 = scmp.ne.s32.totalorder %s23711_s27, 5 }
0x13e1   : > { %v7600_v56 = vpop.f32.mrf.mxu0 }
0x13e2   : > { %v7601_v53 = vadd.f32 %v7600_v56, %v6909_v52 }
0x13e3   : > { %v7602_v48 = vpop.f32.mrf.mxu0 }
0x13e4   : > { %v7603_v20 = vadd.f32 %v7602_v48, %v6913_v16 }
0x13e5   : > { %v7604_v31 = vpop.f32.mrf.mxu0 }
0x13e7   : > { %v7606_v5 = vpop.f32.mrf.mxu0 }
0x1414   : > { %v6757_v29 = vpop.permute.xlu0 %6756 }
0x1415   : > { %6762 = vst.msk [vmem:[#allocation3 + $0x18] sm:$0xff] %vm4745_vm4, %v6757_v29 }
0x1418   : > { %v6759_v60 = vpop.permute.xlu1 %6758  ;;  %v6085_v42 = vpop.permute.xlu0 %6084 }
0x1419   : > { %6763 = vst.msk [vmem:[#allocation3 + $0x38] sm:$0xff] %vm4745_vm4, %v6759_v60  ;;  %6090 = vst.msk [vmem:[#allocation3 + $0x10] sm:$0xff] %vm4745_vm4, %v6085_v42  ;;  %v7607_v42 = vadd.f32 %v7606_v5, %v6913_v16 }
0x141c   : > { %v6087_v45 = vpop.permute.xlu1 %6086  ;;  %v6767_v6 = vld [vmem:[#allocation3 + $0x18] sm:$0xff] }
0x141d   : > { %6091 = vst.msk [vmem:[#allocation3 + $0x30] sm:$0xff] %vm4745_vm4, %v6087_v45  ;;  %v6921_v45 = vrot.slane %v6904_v1, %v21395_v63 }
0x1420   : > { %v6771_v47 = vld [vmem:[#allocation3 + $0x38] sm:$0xff]  ;;  %v6766_v7 = vld [vmem:[#allocation3 + $0x10] sm:$0xff] }
0x1421   : > { %v6775_v4 = vpack.c.bf16 %v6771_v47, %v6767_v6  ;;  %v7686_v3 = vpop.f32.mrf.mxu0 }
0x1423   : > { %7641 = vmatprep.mubr.bf16.mxu1 %v6775_v4  ;;  %v7688_v0 = vpop.f32.mrf.mxu0 }
0x1424   : > { %v6770_v8 = vld [vmem:[#allocation3 + $0x30] sm:$0xff] }
0x1425   : > { %v21991_v59 = vpack.c.bf16 %v6770_v8, %v6766_v7  ;;  %v7690_v6 = vpop.f32.mrf.mxu0  ;;  %v22031_v7 = vld [vmem:[#allocation2] sm:$0xff] }
0x1427   : > { %7642 = vmatmul.mubr.bf16.vlgmr.msra.gmra.mxu1 %v21991_v59 }
0x1428   : > { %7696 = vmatpush1.bf16.msra.mxu1 %v19055_v43  ;;  %7727 = vmatprep.mubr.bf16.mxu1 %v6775_v4  ;;  %v7605_v4 = vadd.f32 %v7604_v31, %v6909_v52  ;;  %v7687_v43 = vadd.f32 %v7686_v3, %v6917_v49 }
0x1429   : > { %7697 = vmatprep.subr.bf16.mxu1 %v19060_v24 }
0x142c   : > { %7698 = vmatpush1.bf16.msra.mxu1 %v19058_v10  ;;  %v7689_v10 = vadd.f32 %v7688_v0, %v6921_v45 }
0x142d   : > { %7699 = vmatprep.subr.bf16.mxu1 %v19063_v11  ;;  %v7692_v11 = vpop.f32.mrf.mxu0 }
0x1430   : > { %7700 = vmatpush1.bf16.msra.mxu1 %v19061_v12  ;;  %v22034_v12 = vld [vmem:[#allocation2 + $0x30] sm:$0xff] }
0x1431   : > { %7701 = vmatprep.subr.bf16.mxu1 %v19066_v13 }
0x1434   : > { %7702 = vmatpush1.bf16.msra.mxu1 %v19064_v14 }
0x1435   : > { %7703 = vmatprep.subr.bf16.mxu1 %v19069_v17 }
0x1438   : > { %7704 = vmatpush1.bf16.msra.mxu1 %v19067_v18  ;;  %v7691_v18 = vadd.f32 %v7690_v6, %v6917_v49 }
0x1439   : > { %7705 = vmatprep.subr.bf16.mxu1 %v19072_v22 }
0x143c   : > { %7706 = vmatpush1.bf16.msra.mxu1 %v19070_v19 }
0x143d   : > { %7707 = vmatprep.subr.bf16.mxu1 %v19075_v54  ;;  %v22037_v54 = vld [vmem:[#allocation2 + $0x20] sm:$0xff] }
0x1440   : > { %7708 = vmatpush1.bf16.msra.mxu1 %v19073_v27 }
0x1441   : > { %7709 = vmatprep.subr.bf16.mxu1 %v19078_v30  ;;  %v22040_v30 = vld [vmem:[#allocation2 + $0x18] sm:$0xff] }
0x1444   : > { %7710 = vmatpush1.bf16.msra.mxu1 %v19076_v38 }
0x1445   : > { %7711 = vmatprep.subr.bf16.mxu1 %v19081_v32 }
0x1448   : > { %7712 = vmatpush2.bf16.msra.mxu1 %v19079_v39  ;;  %v7693_v39 = vadd.f32 %v7692_v11, %v6921_v45 }
0x1449   : > { %7713 = vmatprep.subr.bf16.mxu1 %v19084_v40 }
0x144c   : > { %7714 = vmatpush2.bf16.msra.mxu1 %v19082_v15  ;;  %v22043_v15 = vld [vmem:[#allocation2 + $0x8] sm:$0xff] }
0x144d   : > { %7715 = vmatprep.subr.bf16.mxu1 %v19087_v23 }
0x1450   : > { %7716 = vmatpush2.bf16.msra.mxu1 %v19085_v50  ;;  %v22046_v50 = vld [vmem:[#allocation2 + $0x10] sm:$0xff] }
0x1451   : > { %7717 = vmatprep.subr.bf16.mxu1 %v19090_v36 }
0x1454   : > { %7718 = vmatpush2.bf16.msra.mxu1 %v19088_v44 }
0x1455   : > { %7719 = vmatprep.subr.bf16.mxu1 %v19093_v26 }
0x1458   : > { %7720 = vmatpush2.bf16.msra.mxu1 %v19091_v51 }
0x1459   : > { %7721 = vmatprep.subr.bf16.mxu1 %v19096_v9 }
0x145c   : > { %7722 = vmatpush2.bf16.msra.mxu1 %v19094_v41  ;;  %v22049_v41 = vld [vmem:[#allocation2 + $0x28] sm:$0xff] }
0x145d   : > { %7723 = vmatprep.subr.bf16.mxu1 %v19099_v61 }
0x1460   : > { %7724 = vmatpush2.bf16.msra.mxu1 %v19097_v25 }
0x1461   : > { %7725 = vmatprep.subr.bf16.mxu1 %v19102_v62 }
0x1464   : > { %7726 = vmatpush2.bf16.msra.mxu1 %v19100_v21  ;;  %v22052_v21 = vld [vmem:[#allocation2 + $0x38] sm:$0xff] }
0x1467   : > { %7728 = vmatmul.mubr.bf16.vlgmr.msra.gmra.mxu1 %v21991_v59 }
0x14e7   : > { %v7643_v2 = vpop.f32.mrf.mxu1 }
0x14e8   : > { %v7644_v47 = vadd.f32 %v7643_v2, %v7601_v53 }
0x14e9   : > { %v7645_v28 = vpop.f32.mrf.mxu1 }
0x14ea   : > { %v7646_v29 = vadd.f32 %v7645_v28, %v7603_v20  ;;  %v7738_v13 = vadd.f32 %v22034_v12, %v7644_v47 }
0x14eb   : > { %v7647_v55 = vpop.f32.mrf.mxu1 }
0x14ec   : > { %v7739_v8 = vadd.f32 %v22031_v7, %v7646_v29  ;;  %v7648_v14 = vadd.f32 %v7647_v55, %v7605_v4 }
0x14ed   : > { %v7649_v60 = vpop.f32.mrf.mxu1 }
0x14ee   : > { %v7650_v59 = vadd.f32 %v7649_v60, %v7607_v42  ;;  %v7748_v19 = vadd.f32 %v7739_v8, %v7738_v13  ;;  %v7742_v23 = vadd.f32 %v22043_v15, %v7648_v14 }
0x14f0   : > { %v7743_v27 = vadd.f32 %v22037_v54, %v7650_v59 }
0x14f2   : > { %v7753_v9 = vadd.f32 %v7743_v27, %v7742_v23 }
0x1527   : > { %v7729_v24 = vpop.f32.mrf.mxu1 }
0x1528   : > { %v7730_v17 = vadd.f32 %v7729_v24, %v7687_v43 }
0x1529   : > { %v7731_v22 = vpop.f32.mrf.mxu1 }
0x152a   : > { %v7740_v38 = vadd.f32 %v22040_v30, %v7730_v17  ;;  %v7732_v32 = vadd.f32 %v7731_v22, %v7689_v10 }
0x152b   : > { %v7733_v40 = vpop.f32.mrf.mxu1 }
0x152c   : > { %v7741_v36 = vadd.f32 %v22046_v50, %v7732_v32  ;;  %v7734_v44 = vadd.f32 %v7733_v40, %v7691_v18  ;;  %v7749_v26 = vadd.f32 %v7748_v19, %v7740_v38  ;;  %v7747_v32 = vld [vmem:[%s23683_s23] sm:$0xf] }
0x152d   : > { %v7735_v51 = vpop.f32.mrf.mxu1 }
0x152e   : > { %v7744_v61 = vadd.f32 %v22049_v41, %v7734_v44  ;;  %v7736_v25 = vadd.f32 %v7735_v51, %v7693_v39  ;;  %v7750_v62 = vadd.f32 %v7749_v26, %v7741_v36  ;;  %v7834_v26 = vrot.slane %v7747_v32, %v21483_v34 }
0x152f   : > { %v7838_v51 = vrot.slane %v7747_v32, %v21305_v37 }
0x1530   : > { %v7745_v56 = vadd.f32 %v22052_v21, %v7736_v25  ;;  %7751 = vadd.xlane.f32.xlu0 %v7750_v62  ;;  %v7754_v48 = vadd.f32 %v7753_v9, %v7744_v61  ;;  %v7842_v9 = vrot.slane %v7747_v32, %v21387_v57 }
0x1532   : > { %v7755_v31 = vadd.f32 %v7754_v48, %v7745_v56  ;;  %v7846_v48 = vrot.slane %v7747_v32, %v21395_v63  ;;  %v8079_v32 = vld [vmem:[%s20986_s22 + $0x300] sm:$0xff] }
0x1534   : > { %7756 = vadd.xlane.f32.xlu1 %v7755_v31 }
0x15b9   : > { %v7752_v2 = vpop.xlane.xlu0 %7751 }
0x15ba   : > { %v7759_v5 = vmul.f32 0.001953125, %v7752_v2 }
0x15bc   : > { %v7761_v1 = vsub.f32 %v7738_v13, %v7759_v5  ;;  %v7762_v28 = vsub.f32 %v7739_v8, %v7759_v5  ;;  %v7763_v16 = vsub.f32 %v7740_v38, %v7759_v5  ;;  %v7764_v52 = vsub.f32 %v7741_v36, %v7759_v5  ;;  %v7746_v38 = vld [vmem:[%s928_s26] sm:$0xf] }
0x15bd   : > { %v7757_v3 = vpop.xlane.xlu1 %7756  ;;  %v7805_v39 = vrot.slane %v7746_v38, %v21483_v34  ;;  %v7809_v40 = vrot.slane %v7746_v38, %v21305_v37  ;;  %v7817_v36 = vrot.slane %v7746_v38, %v21395_v63 }
0x15be   : > { %v7760_v55 = vmul.f32 0.001953125, %v7757_v3  ;;  %v7769_v20 = vmul.f32 %v7761_v1, %v7761_v1  ;;  %v7770_v0 = vmul.f32 %v7762_v28, %v7762_v28  ;;  %v7771_v53 = vmul.f32 %v7763_v16, %v7763_v16 }
0x15bf   : > { %v7772_v45 = vmul.f32 %v7764_v52, %v7764_v52 }
0x15c0   : > { %v7765_v49 = vsub.f32 %v7742_v23, %v7760_v55  ;;  %v7766_v29 = vsub.f32 %v7743_v27, %v7760_v55  ;;  %v7777_v60 = vadd.f32 %v7770_v0, %v7769_v20  ;;  %v7767_v42 = vsub.f32 %v7744_v61, %v7760_v55 }
0x15c1   : > { %v7768_v47 = vsub.f32 %v7745_v56, %v7760_v55  ;;  %v7813_v23 = vrot.slane %v7746_v38, %v21387_v57  ;;  %v8359_v38 = vld [vmem:[%s20986_s22 + $0xbc0] sm:$0xff] }
0x15c2   : > { %v7778_v6 = vadd.f32 %v7777_v60, %v7771_v53  ;;  %v7773_v4 = vmul.f32 %v7765_v49, %v7765_v49  ;;  %v7774_v43 = vmul.f32 %v7766_v29, %v7766_v29  ;;  %v7775_v24 = vmul.f32 %v7767_v42, %v7767_v42 }
0x15c3   : > { %v7776_v10 = vmul.f32 %v7768_v47, %v7768_v47 }
0x15c4   : > { %v7779_v59 = vadd.f32 %v7778_v6, %v7772_v45  ;;  %v7782_v8 = vadd.f32 %v7774_v43, %v7773_v4 }
0x15c6   : > { %7780 = vadd.xlane.f32.xlu0 %v7779_v59  ;;  %v7783_v11 = vadd.f32 %v7782_v8, %v7775_v24 }
0x15c8   : > { %v7784_v13 = vadd.f32 %v7783_v11, %v7776_v10 }
0x15ca   : > { %7785 = vadd.xlane.f32.xlu0 %v7784_v13 }
0x164f   : > { %v7781_v14 = vpop.xlane.xlu0 %7780 }
0x1650   : > { %v7787_v17 = vmul.f32 0.001953125, %v7781_v14 }
0x1652   : > { %v7789_v18 = vadd.f32 1e-05, %v7787_v17 }
0x1653   : > { %v7786_v22 = vpop.xlane.xlu0 %7785 }
0x1654   : > { %19935 = vrsqrt.f32 %v7789_v18  ;;  %v7788_v19 = vmul.f32 0.001953125, %v7786_v22  ;;  %v8095_v18 = vld [vmem:[%s20986_s22 + $0x380] sm:$0xff] }
0x1655   : > { %v8103_v22 = vld [vmem:[%s20986_s22 + $0x3c0] sm:$0xff] }
0x1656   : > { %v7790_v27 = vadd.f32 1e-05, %v7788_v19  ;;  %v17063_v19 = vcombine.low %v8095_v18, %v8103_v22 }
0x1658   : > { %19937 = vrsqrt.f32 %v7790_v27  ;;  %v17064_v27 = vcombine.high %v8095_v18, %v8103_v22  ;;  %v8255_v18 = vld [vmem:[%s20986_s22 + $0x880] sm:$0xff] }
0x1659   : > { %v8263_v22 = vld [vmem:[%s20986_s22 + $0x8c0] sm:$0xff] }
0x165a   : > { %11139 = vmatprep.subr.bf16.mxu0 %v17064_v27 }
0x165b   : > { %11140 = vmatpush1.bf16.msra.mxu0 %v17063_v19 }
0x1661   : > { %v19936_v44 = vpop.eup %19935 }
0x1662   : > { %v7793_v61 = vmul.f32 %v19936_v44, %v7761_v1  ;;  %v7794_v25 = vmul.f32 %v19936_v44, %v7762_v28  ;;  %v7795_v62 = vmul.f32 %v19936_v44, %v7763_v16  ;;  %v7796_v56 = vmul.f32 %v19936_v44, %v7764_v52  ;;  %v8343_v44 = vld [vmem:[%s20986_s22 + $0xb40] sm:$0xff] }
0x1664   : > { %v7822_v31 = vmul.f32 %v7805_v39, %v7793_v61  ;;  %v7823_v2 = vmul.f32 %v7809_v40, %v7794_v25  ;;  %v7824_v5 = vmul.f32 %v7813_v23, %v7795_v62  ;;  %v7825_v3 = vmul.f32 %v7817_v36, %v7796_v56  ;;  %v8319_v61 = vld [vmem:[%s20986_s22 + $0xa80] sm:$0xff] }
0x1665   : > { %v19938_v55 = vpop.eup %19937  ;;  %v8327_v25 = vld [vmem:[%s20986_s22 + $0xac0] sm:$0xff] }
0x1666   : > { %v7851_v20 = vadd.f32 %v7834_v26, %v7822_v31  ;;  %v7852_v0 = vadd.f32 %v7838_v51, %v7823_v2  ;;  %v7853_v53 = vadd.f32 %v7842_v9, %v7824_v5  ;;  %v7797_v60 = vmul.f32 %v19938_v55, %v7765_v49  ;;  %v8047_v2 = vld [vmem:[%s20986_s22 + $0x200] sm:$0xff] }
0x1667   : > { %v7798_v45 = vmul.f32 %v19938_v55, %v7766_v29  ;;  %v7799_v6 = vmul.f32 %v19938_v55, %v7767_v42  ;;  %v7800_v4 = vmul.f32 %v19938_v55, %v7768_v47  ;;  %v7854_v43 = vadd.f32 %v7846_v48, %v7825_v3  ;;  %v8055_v5 = vld [vmem:[%s20986_s22 + $0x240] sm:$0xff] }
0x1668   : > { %v22068_v1 = vadd.f32 %v22034_v12, %v7851_v20  ;;  %v22071_v28 = vadd.f32 %v22031_v7, %v7852_v0  ;;  %v7826_v16 = vmul.f32 %v7805_v39, %v7797_v60  ;;  %v22074_v8 = vadd.f32 %v22040_v30, %v7853_v53  ;;  %v8087_v39 = vld [vmem:[%s20986_s22 + $0x340] sm:$0xff] }
0x1669   : > { %v7827_v52 = vmul.f32 %v7809_v40, %v7798_v45  ;;  %v7828_v59 = vmul.f32 %v7813_v23, %v7799_v6  ;;  %v7829_v24 = vmul.f32 %v7817_v36, %v7800_v4  ;;  %v22079_v12 = vadd.f32 %v22046_v50, %v7854_v43  ;;  %v8335_v36 = vld [vmem:[%s20986_s22 + $0xb00] sm:$0xff] }
0x166a   : > { %v7869_v49 = vadd.f32 %v22071_v28, %v22068_v1  ;;  %v7855_v29 = vadd.f32 %v7834_v26, %v7826_v16  ;;  %v17048_v23 = vcombine.high %v8079_v32, %v8087_v39  ;;  %v8063_v26 = vld [vmem:[%s20986_s22 + $0x280] sm:$0xff]  ;;  %v17047_v62 = vcombine.low %v8079_v32, %v8087_v39 }
0x166b   : > { %v7856_v42 = vadd.f32 %v7838_v51, %v7827_v52  ;;  %v7857_v47 = vadd.f32 %v7842_v9, %v7828_v59  ;;  %v7858_v10 = vadd.f32 %v7846_v48, %v7829_v24  ;;  %v17304_v51 = vcombine.high %v8335_v36, %v8343_v44  ;;  %v8071_v9 = vld [vmem:[%s20986_s22 + $0x2c0] sm:$0xff] }
0x166c   : > { %v7870_v7 = vadd.f32 %v7869_v49, %v22074_v8  ;;  %v22083_v11 = vadd.f32 %v22043_v15, %v7855_v29  ;;  %11141 = vmatprep.subr.bf16.mxu0 %v17048_v23  ;;  %v17303_v56 = vcombine.low %v8335_v36, %v8343_v44  ;;  %v17032_v48 = vcombine.high %v8063_v26, %v8071_v9  ;;  %v8303_v3 = vld [vmem:[%s20986_s22 + $0xa00] sm:$0xff] }
0x166d   : > { %v22086_v30 = vadd.f32 %v22037_v54, %v7856_v42  ;;  %v22090_v14 = vadd.f32 %v22049_v41, %v7857_v47  ;;  %v22095_v17 = vadd.f32 %v22052_v21, %v7858_v10  ;;  %v8351_v41 = vld [vmem:[%s20986_s22 + $0xb80] sm:$0xff]  ;;  %v17288_v31 = vcombine.high %v8319_v61, %v8327_v25  ;;  %11142 = vmatpush1.bf16.msra.mxu0 %v17047_v62 }
0x166e   : > { %v7871_v13 = vadd.f32 %v7870_v7, %v22079_v12  ;;  %v17319_v21 = vcombine.low %v8351_v41, %v8359_v38  ;;  %v17320_v40 = vcombine.high %v8351_v41, %v8359_v38  ;;  %v8311_v55 = vld [vmem:[%s20986_s22 + $0xa40] sm:$0xff]  ;;  %v17031_v20 = vcombine.low %v8063_v26, %v8071_v9  ;;  %11143 = vmatprep.subr.bf16.mxu0 %v17032_v48 }
0x166f   : > { %v7874_v50 = vadd.f32 %v22086_v30, %v22083_v11  ;;  %v17287_v0 = vcombine.low %v8319_v61, %v8327_v25  ;;  %v17016_v53 = vcombine.high %v8047_v2, %v8055_v5  ;;  %v17272_v60 = vcombine.high %v8303_v3, %v8311_v55  ;;  %v8031_v45 = vld [vmem:[%s20986_s22 + $0x180] sm:$0xff] }
0x1670   : > { %7872 = vadd.xlane.f32.xlu0 %v7871_v13  ;;  %11182 = vmatprep.subr.bf16.mxu1 %v17320_v40  ;;  %v8039_v6 = vld [vmem:[%s20986_s22 + $0x1c0] sm:$0xff]  ;;  %v17015_v16 = vcombine.low %v8047_v2, %v8055_v5  ;;  %v17271_v52 = vcombine.low %v8303_v3, %v8311_v55  ;;  %v17224_v38 = vcombine.high %v8255_v18, %v8263_v22 }
0x1671   : > { %v7875_v15 = vadd.f32 %v7874_v50, %v22090_v14  ;;  %11183 = vmatpush1.bf16.msra.mxu1 %v17319_v21  ;;  %v8287_v4 = vld [vmem:[%s20986_s22 + $0x980] sm:$0xff]  ;;  %11144 = vmatpush1.bf16.msra.mxu0 %v17031_v20  ;;  %v17000_v59 = vcombine.high %v8031_v45, %v8039_v6  ;;  %v16999_v7 = vcombine.low %v8031_v45, %v8039_v6 }
0x1672   : > { %11184 = vmatprep.subr.bf16.mxu1 %v17304_v51  ;;  %v8295_v43 = vld [vmem:[%s20986_s22 + $0x9c0] sm:$0xff]  ;;  %11145 = vmatprep.subr.bf16.mxu0 %v17016_v53  ;;  %v17223_v36 = vcombine.low %v8255_v18, %v8263_v22 }
0x1673   : > { %v7876_v54 = vadd.f32 %v7875_v15, %v22095_v17  ;;  %v17256_v24 = vcombine.high %v8287_v4, %v8295_v43  ;;  %v8015_v49 = vld [vmem:[%s20986_s22 + $0x100] sm:$0xff]  ;;  %v17255_v10 = vcombine.low %v8287_v4, %v8295_v43 }
0x1674   : > { %v8023_v29 = vld [vmem:[%s20986_s22 + $0x140] sm:$0xff] }
0x1675   : > { %7877 = vadd.xlane.f32.xlu1 %v7876_v54  ;;  %11185 = vmatpush1.bf16.msra.mxu1 %v17303_v56  ;;  %v8271_v42 = vld [vmem:[%s20986_s22 + $0x900] sm:$0xff]  ;;  %v16984_v13 = vcombine.high %v8015_v49, %v8023_v29  ;;  %v16983_v41 = vcombine.low %v8015_v49, %v8023_v29 }
0x1676   : > { %11186 = vmatprep.subr.bf16.mxu1 %v17288_v31  ;;  %v8279_v47 = vld [vmem:[%s20986_s22 + $0x940] sm:$0xff]  ;;  %11146 = vmatpush1.bf16.msra.mxu0 %v17015_v16 }
0x1677   : > { %11147 = vmatprep.subr.bf16.mxu0 %v17000_v59  ;;  %v17240_v50 = vcombine.high %v8271_v42, %v8279_v47  ;;  %v7999_v15 = vld [vmem:[%s20986_s22 + $0x80] sm:$0xff]  ;;  %v17239_v19 = vcombine.low %v8271_v42, %v8279_v47 }
0x1678   : > { %v8007_v54 = vld [vmem:[%s20986_s22 + $0xc0] sm:$0xff] }
0x1679   : > { %11187 = vmatpush1.bf16.msra.mxu1 %v17287_v0  ;;  %v16968_v27 = vcombine.high %v7999_v15, %v8007_v54  ;;  %v7983_v32 = vld [vmem:[%s20986_s22] sm:$0xff]  ;;  %v16967_v23 = vcombine.low %v7999_v15, %v8007_v54 }
0x167a   : > { %11188 = vmatprep.subr.bf16.mxu1 %v17272_v60  ;;  %11148 = vmatpush1.bf16.msra.mxu0 %v16999_v7  ;;  %v7991_v39 = vld [vmem:[%s20986_s22 + $0x40] sm:$0xff] }
0x167b   : > { %11149 = vmatprep.subr.bf16.mxu0 %v16984_v13  ;;  %v8239_v21 = vld [vmem:[%s20986_s22 + $0x800] sm:$0xff]  ;;  %v16952_v44 = vcombine.high %v7983_v32, %v7991_v39  ;;  %v16951_v62 = vcombine.low %v7983_v32, %v7991_v39 }
0x167c   : > { %v8247_v40 = vld [vmem:[%s20986_s22 + $0x840] sm:$0xff] }
0x167d   : > { %11189 = vmatpush1.bf16.msra.mxu1 %v17271_v52  ;;  %v17208_v26 = vcombine.high %v8239_v21, %v8247_v40  ;;  %v8223_v51 = vld [vmem:[%s20986_s22 + $0x780] sm:$0xff]  ;;  %v17207_v56 = vcombine.low %v8239_v21, %v8247_v40 }
0x167e   : > { %11190 = vmatprep.subr.bf16.mxu1 %v17256_v24  ;;  %11150 = vmatpush1.bf16.msra.mxu0 %v16983_v41  ;;  %v8231_v9 = vld [vmem:[%s20986_s22 + $0x7c0] sm:$0xff] }
0x167f   : > { %11151 = vmatprep.subr.bf16.mxu0 %v16968_v27  ;;  %v8479_v61 = vld [vmem:[%s20986_s22 + $0xf80] sm:$0xff]  ;;  %v17192_v48 = vcombine.high %v8223_v51, %v8231_v9  ;;  %v17191_v2 = vcombine.low %v8223_v51, %v8231_v9 }
0x1680   : > { %v8487_v25 = vld [vmem:[%s20986_s22 + $0xfc0] sm:$0xff] }
0x1681   : > { %11191 = vmatpush1.bf16.msra.mxu1 %v17255_v10  ;;  %v17448_v31 = vcombine.high %v8479_v61, %v8487_v25  ;;  %v17447_v5 = vcombine.low %v8479_v61, %v8487_v25  ;;  %v8207_v7 = vld [vmem:[%s20986_s22 + $0x700] sm:$0xff] }
0x1682   : > { %11192 = vmatprep.subr.bf16.mxu1 %v17240_v50  ;;  %11152 = vmatpush1.bf16.msra.mxu0 %v16967_v23  ;;  %v8215_v10 = vld [vmem:[%s20986_s22 + $0x740] sm:$0xff] }
0x1683   : > { %11153 = vmatprep.subr.bf16.mxu0 %v16952_v44  ;;  %v8463_v13 = vld [vmem:[%s20986_s22 + $0xf00] sm:$0xff]  ;;  %v17176_v50 = vcombine.high %v8207_v7, %v8215_v10  ;;  %v17175_v54 = vcombine.low %v8207_v7, %v8215_v10 }
0x1684   : > { %v8471_v15 = vld [vmem:[%s20986_s22 + $0xf40] sm:$0xff] }
0x1685   : > { %11193 = vmatpush1.bf16.msra.mxu1 %v17239_v19  ;;  %v17431_v18 = vcombine.low %v8463_v13, %v8471_v15  ;;  %v17432_v22 = vcombine.high %v8463_v13, %v8471_v15  ;;  %v8191_v41 = vld [vmem:[%s20986_s22 + $0x680] sm:$0xff] }
0x1686   : > { %11194 = vmatprep.subr.bf16.mxu1 %v17224_v38  ;;  %11154 = vmatpush1.bf16.msra.mxu0 %v16951_v62  ;;  %v8199_v19 = vld [vmem:[%s20986_s22 + $0x6c0] sm:$0xff] }
0x1687   : > { %11155 = vmatprep.subr.bf16.mxu0 %v17192_v48  ;;  %v8447_v27 = vld [vmem:[%s20986_s22 + $0xe80] sm:$0xff]  ;;  %v17160_v38 = vcombine.high %v8191_v41, %v8199_v19  ;;  %v17159_v39 = vcombine.low %v8191_v41, %v8199_v19  ;;  %v22204_v41 = vld [vmem:[%s20986_s22 + $0x388] sm:$0xff] }
0x1688   : > { %v8455_v32 = vld [vmem:[%s20986_s22 + $0xec0] sm:$0xff]  ;;  %v22207_v19 = vld [vmem:[%s20986_s22 + $0x3c8] sm:$0xff] }
0x1689   : > { %11195 = vmatpush1.bf16.msra.mxu1 %v17223_v36  ;;  %v17415_v21 = vcombine.low %v8447_v27, %v8455_v32  ;;  %v17416_v40 = vcombine.high %v8447_v27, %v8455_v32  ;;  %v8175_v23 = vld [vmem:[%s20986_s22 + $0x600] sm:$0xff]  ;;  %v22210_v27 = vld [vmem:[%s20986_s22 + $0xb88] sm:$0xff] }
0x168a   : > { %11196 = vmatprep.subr.bf16.mxu1 %v17208_v26  ;;  %11156 = vmatpush2.bf16.msra.mxu0 %v17191_v2  ;;  %v8183_v36 = vld [vmem:[%s20986_s22 + $0x640] sm:$0xff]  ;;  %v22215_v32 = vld [vmem:[%s20986_s22 + $0xbc8] sm:$0xff] }
0x168b   : > { %11157 = vmatprep.subr.bf16.mxu0 %v17176_v50  ;;  %v8431_v44 = vld [vmem:[%s20986_s22 + $0xe00] sm:$0xff]  ;;  %v17143_v26 = vcombine.low %v8175_v23, %v8183_v36  ;;  %v17144_v51 = vcombine.high %v8175_v23, %v8183_v36 }
0x168c   : > { %v8439_v9 = vld [vmem:[%s20986_s22 + $0xe40] sm:$0xff] }
0x168d   : > { %11197 = vmatpush1.bf16.msra.mxu1 %v17207_v56  ;;  %v8159_v61 = vld [vmem:[%s20986_s22 + $0x580] sm:$0xff]  ;;  %v17399_v62 = vcombine.low %v8431_v44, %v8439_v9  ;;  %v17400_v56 = vcombine.high %v8431_v44, %v8439_v9 }
0x168e   : > { %11198 = vmatprep.subr.bf16.mxu1 %v17448_v31  ;;  %11158 = vmatpush2.bf16.msra.mxu0 %v17175_v54  ;;  %v8167_v25 = vld [vmem:[%s20986_s22 + $0x5c0] sm:$0xff] }
0x168f   : > { %11159 = vmatprep.subr.bf16.mxu0 %v17160_v38  ;;  %v17128_v48 = vcombine.high %v8159_v61, %v8167_v25  ;;  %v8415_v31 = vld [vmem:[%s20986_s22 + $0xd80] sm:$0xff]  ;;  %v17066_v38 = vcombine.high %v22204_v41, %v22207_v19 }
0x1690   : > { %v8423_v2 = vld [vmem:[%s20986_s22 + $0xdc0] sm:$0xff] }
0x1691   : > { %11199 = vmatpush2.bf16.msra.mxu1 %v17447_v5  ;;  %v8143_v5 = vld [vmem:[%s20986_s22 + $0x500] sm:$0xff] }
0x1692   : > { %11200 = vmatprep.subr.bf16.mxu1 %v17432_v22  ;;  %11160 = vmatpush2.bf16.msra.mxu0 %v17159_v39  ;;  %v8367_v7 = vld [vmem:[%s20986_s22 + $0xc00] sm:$0xff]  ;;  %v17065_v39 = vcombine.low %v22204_v41, %v22207_v19  ;;  %v8056_v41 = vld [vmem:[%s20986_s22 + $0x248] sm:$0xff] }
0x1693   : > { %11161 = vmatprep.subr.bf16.mxu0 %v17144_v51  ;;  %v8375_v10 = vld [vmem:[%s20986_s22 + $0xc40] sm:$0xff]  ;;  %v8304_v19 = vld [vmem:[%s20986_s22 + $0xa08] sm:$0xff] }
0x1694   : > { %v17336_v54 = vcombine.high %v8367_v7, %v8375_v10  ;;  %v17335_v22 = vcombine.low %v8367_v7, %v8375_v10 }
0x1695   : > { %11201 = vmatpush2.bf16.msra.mxu1 %v17431_v18 }
0x1696   : > { %11202 = vmatprep.subr.bf16.mxu1 %v17416_v40  ;;  %11162 = vmatpush2.bf16.msra.mxu0 %v17143_v26  ;;  %v17322_v40 = vcombine.high %v22210_v27, %v22215_v32 }
0x1697   : > { %11163 = vmatprep.subr.bf16.mxu0 %v17128_v48 }
0x1699   : > { %11203 = vmatpush2.bf16.msra.mxu1 %v17415_v21  ;;  %v17321_v21 = vcombine.low %v22210_v27, %v22215_v32 }
0x169a   : > { %11204 = vmatprep.subr.bf16.mxu1 %v17400_v56 }
0x169d   : > { %11205 = vmatpush2.bf16.msra.mxu1 %v17399_v62 }
0x16f9   : > { %v7873_v3 = vpop.xlane.xlu0 %7872 }
0x16fa   : > { %v7879_v55 = vmul.f32 0.001953125, %v7873_v3  ;;  %v17384_v3 = vcombine.high %v8415_v31, %v8423_v2 }
0x16fc   : > { %v22136_v20 = vsub.f32 %v22068_v1, %v7879_v55  ;;  %v22139_v0 = vsub.f32 %v22071_v28, %v7879_v55  ;;  %v22142_v53 = vsub.f32 %v22074_v8, %v7879_v55  ;;  %v22145_v45 = vsub.f32 %v22079_v12, %v7879_v55  ;;  %v8151_v55 = vld [vmem:[%s20986_s22 + $0x540] sm:$0xff]  ;;  %11206 = vmatprep.subr.bf16.mxu1 %v17384_v3 }
0x16fe   : > { %v7878_v60 = vpop.xlane.xlu1 %7877  ;;  %v7889_v6 = vmul.f32 %v22136_v20, %v22136_v20  ;;  %v7890_v4 = vmul.f32 %v22139_v0, %v22139_v0  ;;  %v7891_v1 = vmul.f32 %v22142_v53, %v22142_v53  ;;  %v7892_v52 = vmul.f32 %v22145_v45, %v22145_v45 }
0x16ff   : > { %v7880_v43 = vmul.f32 0.001953125, %v7878_v60  ;;  %v8399_v60 = vld [vmem:[%s20986_s22 + $0xd00] sm:$0xff] }
0x1700   : > { %v7897_v16 = vadd.f32 %v7890_v4, %v7889_v6  ;;  %v8407_v6 = vld [vmem:[%s20986_s22 + $0xd40] sm:$0xff]  ;;  %v17127_v4 = vcombine.low %v8159_v61, %v8167_v25  ;;  %v7867_v61 = vld [vmem:[%s23684_s6] sm:$0xf] }
0x1701   : > { %v22154_v28 = vsub.f32 %v22083_v11, %v7880_v43  ;;  %v22157_v8 = vsub.f32 %v22086_v30, %v7880_v43  ;;  %v22160_v12 = vsub.f32 %v22090_v14, %v7880_v43  ;;  %v22165_v24 = vsub.f32 %v22095_v17, %v7880_v43 }
0x1702   : > { %v7898_v59 = vadd.f32 %v7897_v16, %v7891_v1  ;;  %v17383_v43 = vcombine.low %v8415_v31, %v8423_v2  ;;  %v17112_v1 = vcombine.high %v8143_v5, %v8151_v55  ;;  %v17368_v16 = vcombine.high %v8399_v60, %v8407_v6  ;;  %11164 = vmatpush2.bf16.msra.mxu0 %v17127_v4  ;;  %v7868_v2 = vld [vmem:[%s23685_s25] sm:$0xf] }
0x1703   : > { %v7893_v11 = vmul.f32 %v22154_v28, %v22154_v28  ;;  %v7894_v30 = vmul.f32 %v22157_v8, %v22157_v8  ;;  %v7895_v14 = vmul.f32 %v22160_v12, %v22160_v12  ;;  %v7896_v42 = vmul.f32 %v22165_v24, %v22165_v24 }
0x1704   : > { %v7899_v49 = vadd.f32 %v7898_v59, %v7892_v52  ;;  %v8127_v52 = vld [vmem:[%s20986_s22 + $0x480] sm:$0xff]  ;;  %11207 = vmatpush2.bf16.msra.mxu1 %v17383_v43  ;;  %11165 = vmatprep.subr.bf16.mxu0 %v17112_v1  ;;  %v7929_v62 = vrot.slane %v7867_v61, %v21305_v37  ;;  %v7937_v56 = vrot.slane %v7867_v61, %v21395_v63 }
0x1705   : > { %v7902_v29 = vadd.f32 %v7894_v30, %v7893_v11  ;;  %v8135_v59 = vld [vmem:[%s20986_s22 + $0x4c0] sm:$0xff]  ;;  %11208 = vmatprep.subr.bf16.mxu1 %v17368_v16  ;;  %v7925_v48 = vrot.slane %v7867_v61, %v21483_v34  ;;  %v7933_v31 = vrot.slane %v7867_v61, %v21387_v57  ;;  %v7966_v4 = vrot.slane %v7868_v2, %v21395_v63 }
0x1706   : > { %7900 = vadd.xlane.f32.xlu0 %v7899_v49  ;;  %v8383_v11 = vld [vmem:[%s20986_s22 + $0xc80] sm:$0xff]  ;;  %v17111_v49 = vcombine.low %v8143_v5, %v8151_v55  ;;  %v17095_v13 = vcombine.low %v8127_v52, %v8135_v59  ;;  %v7954_v43 = vrot.slane %v7868_v2, %v21483_v34  ;;  %v7962_v1 = vrot.slane %v7868_v2, %v21387_v57 }
0x1707   : > { %v7903_v47 = vadd.f32 %v7902_v29, %v7895_v14  ;;  %v8391_v30 = vld [vmem:[%s20986_s22 + $0xcc0] sm:$0xff]  ;;  %v17367_v14 = vcombine.low %v8399_v60, %v8407_v6  ;;  %v17096_v29 = vcombine.high %v8127_v52, %v8135_v59  ;;  %v7958_v6 = vrot.slane %v7868_v2, %v21305_v37  ;;  %v8032_v2 = vld [vmem:[%s20986_s22 + $0x188] sm:$0xff] }
0x1708   : > { %11166 = vmatpush2.bf16.msra.mxu0 %v17111_v49  ;;  %v17351_v50 = vcombine.low %v8383_v11, %v8391_v30 }
0x1709   : > { %v7904_v17 = vadd.f32 %v7903_v47, %v7896_v42  ;;  %v17352_v42 = vcombine.high %v8383_v11, %v8391_v30  ;;  %v8111_v47 = vld [vmem:[%s20986_s22 + $0x400] sm:$0xff]  ;;  %11209 = vmatpush2.bf16.msra.mxu1 %v17367_v14  ;;  %11167 = vmatprep.subr.bf16.mxu0 %v17096_v29 }
0x170b   : > { %7905 = vadd.xlane.f32.xlu1 %v7904_v17  ;;  %v8119_v17 = vld [vmem:[%s20986_s22 + $0x440] sm:$0xff]  ;;  %11210 = vmatprep.subr.bf16.mxu1 %v17352_v42 }
0x170c   : > { %v17080_v15 = vcombine.high %v8111_v47, %v8119_v17  ;;  %11168 = vmatpush2.bf16.msra.mxu0 %v17095_v13  ;;  %v17079_v18 = vcombine.low %v8111_v47, %v8119_v17  ;;  %v8080_v13 = vld [vmem:[%s20986_s22 + $0x308] sm:$0xff] }
0x170d   : > { %11211 = vmatpush2.bf16.msra.mxu1 %v17351_v50  ;;  %v8088_v50 = vld [vmem:[%s20986_s22 + $0x348] sm:$0xff] }
0x170e   : > { %11169 = vmatprep.subr.bf16.mxu0 %v17080_v15  ;;  %11212 = vmatprep.subr.bf16.mxu1 %v17336_v54  ;;  %v8336_v15 = vld [vmem:[%s20986_s22 + $0xb08] sm:$0xff]  ;;  %v17049_v61 = vcombine.low %v8080_v13, %v8088_v50 }
0x170f   : > { %v8344_v54 = vld [vmem:[%s20986_s22 + $0xb48] sm:$0xff] }
0x1710   : > { %11170 = vmatpush2.bf16.msra.mxu0 %v17079_v18 }
0x1711   : > { %11213 = vmatpush2.bf16.msra.mxu1 %v17335_v22  ;;  %11225 = vmatprep.subr.bf16.mxu0 %v17066_v38 }
0x1712   : > { %11268 = vmatprep.subr.bf16.mxu1 %v17322_v40 }
0x178f   : > { %v7901_v23 = vpop.xlane.xlu0 %7900 }
0x1790   : > { %v7907_v36 = vmul.f32 0.001953125, %v7901_v23  ;;  %v8064_v23 = vld [vmem:[%s20986_s22 + $0x288] sm:$0xff] }
0x1792   : > { %v7909_v44 = vadd.f32 1e-05, %v7907_v36  ;;  %v17050_v36 = vcombine.high %v8080_v13, %v8088_v50 }
0x1794   : > { %19939 = vrsqrt.f32 %v7909_v44  ;;  %v7906_v26 = vpop.xlane.xlu1 %7905  ;;  %v17306_v44 = vcombine.high %v8336_v15, %v8344_v54 }
0x1795   : > { %v7908_v51 = vmul.f32 0.001953125, %v7906_v26  ;;  %v8072_v26 = vld [vmem:[%s20986_s22 + $0x2c8] sm:$0xff] }
0x1796   : > { %v17033_v27 = vcombine.low %v8064_v23, %v8072_v26 }
0x1797   : > { %v7910_v9 = vadd.f32 1e-05, %v7908_v51  ;;  %v8320_v51 = vld [vmem:[%s20986_s22 + $0xa88] sm:$0xff] }
0x1799   : > { %19941 = vrsqrt.f32 %v7910_v9  ;;  %v8328_v9 = vld [vmem:[%s20986_s22 + $0xac8] sm:$0xff] }
0x179a   : > { %v17289_v32 = vcombine.low %v8320_v51, %v8328_v9 }
0x17a1   : > { %v19940_v25 = vpop.eup %19939 }
0x17a2   : > { %v7914_v5 = vmul.f32 %v19940_v25, %v22139_v0  ;;  %v7916_v3 = vmul.f32 %v19940_v25, %v22145_v45  ;;  %v7913_v55 = vmul.f32 %v19940_v25, %v22136_v20  ;;  %v7915_v60 = vmul.f32 %v19940_v25, %v22142_v53 }
0x17a3   : > { %v17305_v25 = vcombine.low %v8336_v15, %v8344_v54  ;;  %v7984_v15 = vld [vmem:[%s20986_s22 + $0x8] sm:$0xff] }
0x17a4   : > { %v7943_v52 = vmul.f32 %v7929_v62, %v7914_v5  ;;  %v7945_v59 = vmul.f32 %v7937_v56, %v7916_v3  ;;  %v7942_v11 = vmul.f32 %v7925_v48, %v7913_v55  ;;  %v7944_v30 = vmul.f32 %v7933_v31, %v7915_v60  ;;  %v8040_v5 = vld [vmem:[%s20986_s22 + $0x1c8] sm:$0xff] }
0x17a5   : > { %v8288_v3 = vld [vmem:[%s20986_s22 + $0x988] sm:$0xff] }
0x17a6   : > { %v19942_v16 = vpop.eup %19941  ;;  %v22243_v47 = vadd.f32 %v7958_v6, %v7943_v52  ;;  %v22245_v17 = vadd.f32 %v7966_v4, %v7945_v59  ;;  %v22249_v7 = vadd.f32 %v7962_v1, %v7944_v30  ;;  %v8296_v55 = vld [vmem:[%s20986_s22 + $0x9c8] sm:$0xff] }
0x17a7   : > { %v7918_v0 = vmul.f32 %v19942_v16, %v22157_v8  ;;  %v7920_v20 = vmul.f32 %v19942_v16, %v22165_v24  ;;  %v7917_v53 = vmul.f32 %v19942_v16, %v22154_v28  ;;  %v7919_v45 = vmul.f32 %v19942_v16, %v22160_v12  ;;  %v8024_v16 = vld [vmem:[%s20986_s22 + $0x148] sm:$0xff] }
0x17a8   : > { %23686 = vst [vmem:[#allocation53_spill] sm:$0xff] %v22243_v47  ;;  %23687 = vst [vmem:[#allocation54_spill] sm:$0xff] %v22245_v17  ;;  %v22247_v8 = vadd.f32 %v7954_v43, %v7942_v11  ;;  %v8272_v52 = vld [vmem:[%s20986_s22 + $0x908] sm:$0xff]  ;;  %v17001_v11 = vcombine.low %v8032_v2, %v8040_v5  ;;  %v17257_v30 = vcombine.low %v8288_v3, %v8296_v55 }
0x17a9   : > { %v7947_v49 = vmul.f32 %v7929_v62, %v7918_v0  ;;  %v7949_v14 = vmul.f32 %v7937_v56, %v7920_v20  ;;  %v7946_v29 = vmul.f32 %v7925_v48, %v7917_v53  ;;  %v7948_v42 = vmul.f32 %v7933_v31, %v7919_v45  ;;  %23689 = vst [vmem:[#allocation56_spill] sm:$0xff] %v22249_v7  ;;  %v8048_v48 = vld [vmem:[%s20986_s22 + $0x208] sm:$0xff] }
0x17aa   : > { %23688 = vst [vmem:[#allocation55_spill] sm:$0xff] %v22247_v8  ;;  %v17034_v62 = vcombine.high %v8064_v23, %v8072_v26  ;;  %v17290_v56 = vcombine.high %v8320_v51, %v8328_v9  ;;  %v17017_v60 = vcombine.low %v8048_v48, %v8056_v41  ;;  %v8280_v59 = vld [vmem:[%s20986_s22 + $0x948] sm:$0xff] }
0x17ab   : > { %v22251_v24 = vadd.f32 %v7958_v6, %v7947_v49  ;;  %v22253_v28 = vadd.f32 %v7966_v4, %v7949_v14  ;;  %v22255_v12 = vadd.f32 %v7954_v43, %v7946_v29  ;;  %v22257_v10 = vadd.f32 %v7962_v1, %v7948_v42  ;;  %v8016_v1 = vld [vmem:[%s20986_s22 + $0x108] sm:$0xff] }
0x17ac   : > { %v17002_v4 = vcombine.high %v8032_v2, %v8040_v5  ;;  %v17258_v43 = vcombine.high %v8288_v3, %v8296_v55  ;;  %v16986_v0 = vcombine.high %v8016_v1, %v8024_v16  ;;  %v17242_v20 = vcombine.high %v8272_v52, %v8280_v59  ;;  %v8000_v53 = vld [vmem:[%s20986_s22 + $0x88] sm:$0xff] }
0x17ad   : > { %23690 = vst [vmem:[#allocation57_spill] sm:$0xff] %v22251_v24  ;;  %23691 = vst [vmem:[#allocation58_spill] sm:$0xff] %v22253_v28  ;;  %v22265_v18 = vpack.c.bf16 %v22251_v24, %v22243_v47  ;;  %v22269_v22 = vpack.c.bf16 %v22253_v28, %v22245_v17  ;;  %v22273_v38 = vpack.c.bf16 %v22255_v12, %v22247_v8  ;;  %v8008_v45 = vld [vmem:[%s20986_s22 + $0xc8] sm:$0xff] }
0x17ae   : > { %23692 = vst [vmem:[#allocation59_spill] sm:$0xff] %v22255_v12  ;;  %23693 = vst [vmem:[#allocation60_spill] sm:$0xff] %v22257_v10  ;;  %v22277_v40 = vpack.c.bf16 %v22257_v10, %v22249_v7  ;;  %v8256_v49 = vld [vmem:[%s20986_s22 + $0x888] sm:$0xff]  ;;  %v16985_v29 = vcombine.low %v8016_v1, %v8024_v16  ;;  %v17241_v42 = vcombine.low %v8272_v52, %v8280_v59 }
0x17af   : > { %11171 = vmatprep.mubr.bf16.mxu0 %v22265_v18  ;;  %11214 = vmatprep.mubr.bf16.mxu1 %v22269_v22  ;;  %v8264_v14 = vld [vmem:[%s20986_s22 + $0x8c8] sm:$0xff]  ;;  %v16970_v13 = vcombine.high %v8000_v53, %v8008_v45 }
0x17b0   : > { %11172 = vmatmul.mubr.bf16.vlgmr.msra.gmra.mxu0 %v22273_v38  ;;  %11215 = vmatmul.mubr.bf16.vlgmr.msra.gmra.mxu1 %v22277_v40  ;;  %v17226_v50 = vcombine.high %v8256_v49, %v8264_v14  ;;  %v7992_v54 = vld [vmem:[%s20986_s22 + $0x48] sm:$0xff]  ;;  %v17225_v26 = vcombine.low %v8256_v49, %v8264_v14 }
0x17b1   : > { %11226 = vmatpush1.bf16.msra.mxu0 %v17065_v39  ;;  %11269 = vmatpush1.bf16.msra.mxu1 %v17321_v21  ;;  %v8312_v39 = vld [vmem:[%s20986_s22 + $0xa48] sm:$0xff]  ;;  %v17018_v21 = vcombine.high %v8048_v48, %v8056_v41  ;;  %v16954_v51 = vcombine.high %v7984_v15, %v7992_v54  ;;  %v16953_v48 = vcombine.low %v7984_v15, %v7992_v54 }
0x17b2   : > { %11257 = vmatprep.mubr.bf16.mxu0 %v22265_v18  ;;  %11300 = vmatprep.mubr.bf16.mxu1 %v22269_v22  ;;  %v17274_v31 = vcombine.high %v8304_v19, %v8312_v39  ;;  %v17273_v6 = vcombine.low %v8304_v19, %v8312_v39  ;;  %v8240_v23 = vld [vmem:[%s20986_s22 + $0x808] sm:$0xff] }
0x17b3   : > { %11227 = vmatprep.subr.bf16.mxu0 %v17050_v36  ;;  %11270 = vmatprep.subr.bf16.mxu1 %v17306_v44  ;;  %v8248_v36 = vld [vmem:[%s20986_s22 + $0x848] sm:$0xff]  ;;  %v16969_v44 = vcombine.low %v8000_v53, %v8008_v45 }
0x17b4   : > { %v17210_v9 = vcombine.high %v8240_v23, %v8248_v36  ;;  %v17209_v41 = vcombine.low %v8240_v23, %v8248_v36 }
0x17b5   : > { %11228 = vmatpush1.bf16.msra.mxu0 %v17049_v61  ;;  %11271 = vmatpush1.bf16.msra.mxu1 %v17305_v25  ;;  %v8224_v61 = vld [vmem:[%s20986_s22 + $0x788] sm:$0xff] }
0x17b6   : > { %11229 = vmatprep.subr.bf16.mxu0 %v17034_v62  ;;  %11272 = vmatprep.subr.bf16.mxu1 %v17290_v56  ;;  %v8232_v25 = vld [vmem:[%s20986_s22 + $0x7c8] sm:$0xff] }
0x17b7   : > { %v8480_v62 = vld [vmem:[%s20986_s22 + $0xf88] sm:$0xff]  ;;  %v17194_v19 = vcombine.high %v8224_v61, %v8232_v25  ;;  %v17193_v2 = vcombine.low %v8224_v61, %v8232_v25 }
0x17b8   : > { %v8488_v56 = vld [vmem:[%s20986_s22 + $0xfc8] sm:$0xff] }
0x17b9   : > { %11230 = vmatpush1.bf16.msra.mxu0 %v17033_v27  ;;  %11273 = vmatpush1.bf16.msra.mxu1 %v17289_v32  ;;  %v17450_v39 = vcombine.high %v8480_v62, %v8488_v56  ;;  %v8208_v27 = vld [vmem:[%s20986_s22 + $0x708] sm:$0xff]  ;;  %v17449_v5 = vcombine.low %v8480_v62, %v8488_v56 }
0x17ba   : > { %11231 = vmatprep.subr.bf16.mxu0 %v17018_v21  ;;  %11274 = vmatprep.subr.bf16.mxu1 %v17274_v31  ;;  %v8216_v32 = vld [vmem:[%s20986_s22 + $0x748] sm:$0xff] }
0x17bb   : > { %v8464_v21 = vld [vmem:[%s20986_s22 + $0xf08] sm:$0xff]  ;;  %v17178_v3 = vcombine.high %v8208_v27, %v8216_v32  ;;  %v17177_v1 = vcombine.low %v8208_v27, %v8216_v32 }
0x17bc   : > { %v8472_v31 = vld [vmem:[%s20986_s22 + $0xf48] sm:$0xff] }
0x17bd   : > { %11232 = vmatpush1.bf16.msra.mxu0 %v17017_v60  ;;  %11275 = vmatpush1.bf16.msra.mxu1 %v17273_v6  ;;  %v17434_v55 = vcombine.high %v8464_v21, %v8472_v31  ;;  %v8192_v60 = vld [vmem:[%s20986_s22 + $0x688] sm:$0xff]  ;;  %v17433_v16 = vcombine.low %v8464_v21, %v8472_v31 }
0x17be   : > { %11233 = vmatprep.subr.bf16.mxu0 %v17002_v4  ;;  %11276 = vmatprep.subr.bf16.mxu1 %v17258_v43  ;;  %v8200_v6 = vld [vmem:[%s20986_s22 + $0x6c8] sm:$0xff] }
0x17bf   : > { %v8448_v4 = vld [vmem:[%s20986_s22 + $0xe88] sm:$0xff]  ;;  %v17162_v52 = vcombine.high %v8192_v60, %v8200_v6  ;;  %v17161_v53 = vcombine.low %v8192_v60, %v8200_v6 }
0x17c0   : > { %v8456_v43 = vld [vmem:[%s20986_s22 + $0xec8] sm:$0xff] }
0x17c1   : > { %11234 = vmatpush1.bf16.msra.mxu0 %v17001_v11  ;;  %11277 = vmatpush1.bf16.msra.mxu1 %v17257_v30  ;;  %v17418_v59 = vcombine.high %v8448_v4, %v8456_v43  ;;  %v8176_v11 = vld [vmem:[%s20986_s22 + $0x608] sm:$0xff]  ;;  %v17417_v45 = vcombine.low %v8448_v4, %v8456_v43 }
0x17c2   : > { %11235 = vmatprep.subr.bf16.mxu0 %v16986_v0  ;;  %11278 = vmatprep.subr.bf16.mxu1 %v17242_v20  ;;  %v8184_v30 = vld [vmem:[%s20986_s22 + $0x648] sm:$0xff] }
0x17c3   : > { %v8432_v0 = vld [vmem:[%s20986_s22 + $0xe08] sm:$0xff]  ;;  %v17146_v49 = vcombine.high %v8176_v11, %v8184_v30  ;;  %v17145_v15 = vcombine.low %v8176_v11, %v8184_v30 }
0x17c4   : > { %v8440_v20 = vld [vmem:[%s20986_s22 + $0xe48] sm:$0xff] }
0x17c5   : > { %11236 = vmatpush1.bf16.msra.mxu0 %v16985_v29  ;;  %11279 = vmatpush1.bf16.msra.mxu1 %v17241_v42  ;;  %v17402_v14 = vcombine.high %v8432_v0, %v8440_v20  ;;  %v8160_v29 = vld [vmem:[%s20986_s22 + $0x588] sm:$0xff]  ;;  %v17401_v54 = vcombine.low %v8432_v0, %v8440_v20 }
0x17c6   : > { %11237 = vmatprep.subr.bf16.mxu0 %v16970_v13  ;;  %11280 = vmatprep.subr.bf16.mxu1 %v17226_v50  ;;  %v8168_v42 = vld [vmem:[%s20986_s22 + $0x5c8] sm:$0xff] }
0x17c7   : > { %v8416_v13 = vld [vmem:[%s20986_s22 + $0xd88] sm:$0xff]  ;;  %v17130_v23 = vcombine.high %v8160_v29, %v8168_v42  ;;  %v17129_v61 = vcombine.low %v8160_v29, %v8168_v42 }
0x17c8   : > { %v8424_v50 = vld [vmem:[%s20986_s22 + $0xdc8] sm:$0xff] }
0x17c9   : > { %11238 = vmatpush1.bf16.msra.mxu0 %v16969_v44  ;;  %11281 = vmatpush1.bf16.msra.mxu1 %v17225_v26  ;;  %v17386_v36 = vcombine.high %v8416_v13, %v8424_v50  ;;  %v8144_v44 = vld [vmem:[%s20986_s22 + $0x508] sm:$0xff]  ;;  %v17385_v25 = vcombine.low %v8416_v13, %v8424_v50 }
0x17ca   : > { %11239 = vmatprep.subr.bf16.mxu0 %v16954_v51  ;;  %11282 = vmatprep.subr.bf16.mxu1 %v17210_v9  ;;  %v8152_v26 = vld [vmem:[%s20986_s22 + $0x548] sm:$0xff] }
0x17cb   : > { %v8400_v51 = vld [vmem:[%s20986_s22 + $0xd08] sm:$0xff]  ;;  %v17114_v62 = vcombine.high %v8144_v44, %v8152_v26  ;;  %v17113_v27 = vcombine.low %v8144_v44, %v8152_v26 }
0x17cc   : > { %v8408_v9 = vld [vmem:[%s20986_s22 + $0xd48] sm:$0xff] }
0x17cd   : > { %11240 = vmatpush1.bf16.msra.mxu0 %v16953_v48  ;;  %11283 = vmatpush1.bf16.msra.mxu1 %v17209_v41  ;;  %v17370_v56 = vcombine.high %v8400_v51, %v8408_v9  ;;  %v8128_v48 = vld [vmem:[%s20986_s22 + $0x488] sm:$0xff]  ;;  %v17369_v32 = vcombine.low %v8400_v51, %v8408_v9 }
0x17ce   : > { %11241 = vmatprep.subr.bf16.mxu0 %v17194_v19  ;;  %11284 = vmatprep.subr.bf16.mxu1 %v17450_v39  ;;  %v8136_v41 = vld [vmem:[%s20986_s22 + $0x4c8] sm:$0xff] }
0x17cf   : > { %v8384_v19 = vld [vmem:[%s20986_s22 + $0xc88] sm:$0xff]  ;;  %v17098_v21 = vcombine.high %v8128_v48, %v8136_v41  ;;  %v17097_v60 = vcombine.low %v8128_v48, %v8136_v41 }
0x17d0   : > { %v8392_v39 = vld [vmem:[%s20986_s22 + $0xcc8] sm:$0xff] }
0x17d1   : > { %11242 = vmatpush2.bf16.msra.mxu0 %v17193_v2  ;;  %11285 = vmatpush2.bf16.msra.mxu1 %v17449_v5  ;;  %v17354_v31 = vcombine.high %v8384_v19, %v8392_v39  ;;  %v8112_v2 = vld [vmem:[%s20986_s22 + $0x408] sm:$0xff]  ;;  %v17353_v6 = vcombine.low %v8384_v19, %v8392_v39 }
0x17d2   : > { %11243 = vmatprep.subr.bf16.mxu0 %v17178_v3  ;;  %11286 = vmatprep.subr.bf16.mxu1 %v17434_v55  ;;  %v8120_v5 = vld [vmem:[%s20986_s22 + $0x448] sm:$0xff] }
0x17d3   : > { %v8368_v3 = vld [vmem:[%s20986_s22 + $0xc08] sm:$0xff]  ;;  %v17082_v4 = vcombine.high %v8112_v2, %v8120_v5  ;;  %v17081_v11 = vcombine.low %v8112_v2, %v8120_v5 }
0x17d4   : > { %v8376_v55 = vld [vmem:[%s20986_s22 + $0xc48] sm:$0xff] }
0x17d5   : > { %11244 = vmatpush2.bf16.msra.mxu0 %v17177_v1  ;;  %11287 = vmatpush2.bf16.msra.mxu1 %v17433_v16  ;;  %v17338_v43 = vcombine.high %v8368_v3, %v8376_v55  ;;  %v8097_v1 = vld [vmem:[%s20986_s22 + $0x390] sm:$0xff]  ;;  %v17337_v30 = vcombine.low %v8368_v3, %v8376_v55 }
0x17d6   : > { %11245 = vmatprep.subr.bf16.mxu0 %v17162_v52  ;;  %11288 = vmatprep.subr.bf16.mxu1 %v17418_v59  ;;  %v8105_v16 = vld [vmem:[%s20986_s22 + $0x3d0] sm:$0xff] }
0x17d7   : > { %v8353_v52 = vld [vmem:[%s20986_s22 + $0xb90] sm:$0xff]  ;;  %v17068_v0 = vcombine.high %v8097_v1, %v8105_v16  ;;  %v17067_v29 = vcombine.low %v8097_v1, %v8105_v16 }
0x17d8   : > { %v8361_v59 = vld [vmem:[%s20986_s22 + $0xbd0] sm:$0xff] }
0x17d9   : > { %11246 = vmatpush2.bf16.msra.mxu0 %v17161_v53  ;;  %11289 = vmatpush2.bf16.msra.mxu1 %v17417_v45  ;;  %v17324_v20 = vcombine.high %v8353_v52, %v8361_v59  ;;  %v8081_v53 = vld [vmem:[%s20986_s22 + $0x310] sm:$0xff]  ;;  %v17323_v42 = vcombine.low %v8353_v52, %v8361_v59 }
0x17da   : > { %11247 = vmatprep.subr.bf16.mxu0 %v17146_v49  ;;  %11290 = vmatprep.subr.bf16.mxu1 %v17402_v14  ;;  %v8089_v45 = vld [vmem:[%s20986_s22 + $0x350] sm:$0xff] }
0x17db   : > { %v8337_v49 = vld [vmem:[%s20986_s22 + $0xb10] sm:$0xff]  ;;  %v17052_v13 = vcombine.high %v8081_v53, %v8089_v45  ;;  %v17051_v44 = vcombine.low %v8081_v53, %v8089_v45 }
0x17dc   : > { %v8345_v14 = vld [vmem:[%s20986_s22 + $0xb50] sm:$0xff] }
0x17dd   : > { %11248 = vmatpush2.bf16.msra.mxu0 %v17145_v15  ;;  %11291 = vmatpush2.bf16.msra.mxu1 %v17401_v54  ;;  %v17308_v50 = vcombine.high %v8337_v49, %v8345_v14  ;;  %v8065_v15 = vld [vmem:[%s20986_s22 + $0x290] sm:$0xff]  ;;  %v17307_v26 = vcombine.low %v8337_v49, %v8345_v14 }
0x17de   : > { %11249 = vmatprep.subr.bf16.mxu0 %v17130_v23  ;;  %11292 = vmatprep.subr.bf16.mxu1 %v17386_v36  ;;  %v8073_v54 = vld [vmem:[%s20986_s22 + $0x2d0] sm:$0xff] }
0x17df   : > { %v8321_v23 = vld [vmem:[%s20986_s22 + $0xa90] sm:$0xff]  ;;  %v17036_v51 = vcombine.high %v8065_v15, %v8073_v54  ;;  %v17035_v48 = vcombine.low %v8065_v15, %v8073_v54 }
0x17e0   : > { %v8329_v36 = vld [vmem:[%s20986_s22 + $0xad0] sm:$0xff] }
0x17e1   : > { %11250 = vmatpush2.bf16.msra.mxu0 %v17129_v61  ;;  %11293 = vmatpush2.bf16.msra.mxu1 %v17385_v25  ;;  %v17292_v9 = vcombine.high %v8321_v23, %v8329_v36  ;;  %v8049_v61 = vld [vmem:[%s20986_s22 + $0x210] sm:$0xff]  ;;  %v17291_v41 = vcombine.low %v8321_v23, %v8329_v36 }
0x17e2   : > { %11251 = vmatprep.subr.bf16.mxu0 %v17114_v62  ;;  %11294 = vmatprep.subr.bf16.mxu1 %v17370_v56  ;;  %v8057_v25 = vld [vmem:[%s20986_s22 + $0x250] sm:$0xff] }
0x17e3   : > { %v8305_v62 = vld [vmem:[%s20986_s22 + $0xa10] sm:$0xff]  ;;  %v17020_v19 = vcombine.high %v8049_v61, %v8057_v25  ;;  %v17019_v2 = vcombine.low %v8049_v61, %v8057_v25 }
0x17e4   : > { %v8313_v56 = vld [vmem:[%s20986_s22 + $0xa50] sm:$0xff] }
0x17e5   : > { %11252 = vmatpush2.bf16.msra.mxu0 %v17113_v27  ;;  %11295 = vmatpush2.bf16.msra.mxu1 %v17369_v32  ;;  %v17276_v39 = vcombine.high %v8305_v62, %v8313_v56  ;;  %v8033_v27 = vld [vmem:[%s20986_s22 + $0x190] sm:$0xff]  ;;  %v17275_v5 = vcombine.low %v8305_v62, %v8313_v56 }
0x17e6   : > { %11253 = vmatprep.subr.bf16.mxu0 %v17098_v21  ;;  %11296 = vmatprep.subr.bf16.mxu1 %v17354_v31  ;;  %v8041_v32 = vld [vmem:[%s20986_s22 + $0x1d0] sm:$0xff] }
0x17e7   : > { %v8289_v21 = vld [vmem:[%s20986_s22 + $0x990] sm:$0xff]  ;;  %v17004_v3 = vcombine.high %v8033_v27, %v8041_v32  ;;  %v17003_v1 = vcombine.low %v8033_v27, %v8041_v32 }
0x17e8   : > { %v8297_v31 = vld [vmem:[%s20986_s22 + $0x9d0] sm:$0xff] }
0x17e9   : > { %11254 = vmatpush2.bf16.msra.mxu0 %v17097_v60  ;;  %11297 = vmatpush2.bf16.msra.mxu1 %v17353_v6  ;;  %v17260_v55 = vcombine.high %v8289_v21, %v8297_v31  ;;  %v8017_v60 = vld [vmem:[%s20986_s22 + $0x110] sm:$0xff]  ;;  %v17259_v16 = vcombine.low %v8289_v21, %v8297_v31 }
0x17ea   : > { %11255 = vmatprep.subr.bf16.mxu0 %v17082_v4  ;;  %11298 = vmatprep.subr.bf16.mxu1 %v17338_v43  ;;  %v8025_v6 = vld [vmem:[%s20986_s22 + $0x150] sm:$0xff] }
0x17eb   : > { %v8273_v4 = vld [vmem:[%s20986_s22 + $0x910] sm:$0xff]  ;;  %v16988_v52 = vcombine.high %v8017_v60, %v8025_v6  ;;  %v16987_v53 = vcombine.low %v8017_v60, %v8025_v6 }
0x17ec   : > { %v8281_v43 = vld [vmem:[%s20986_s22 + $0x950] sm:$0xff] }
0x17ed   : > { %11256 = vmatpush2.bf16.msra.mxu0 %v17081_v11  ;;  %11299 = vmatpush2.bf16.msra.mxu1 %v17337_v30  ;;  %v17244_v59 = vcombine.high %v8273_v4, %v8281_v43  ;;  %v8001_v11 = vld [vmem:[%s20986_s22 + $0x90] sm:$0xff]  ;;  %v17243_v45 = vcombine.low %v8273_v4, %v8281_v43 }
0x17ee   : > { %11311 = vmatprep.subr.bf16.mxu0 %v17068_v0  ;;  %11354 = vmatprep.subr.bf16.mxu1 %v17324_v20  ;;  %v8009_v30 = vld [vmem:[%s20986_s22 + $0xd0] sm:$0xff] }
0x17ef   : > { %v8257_v0 = vld [vmem:[%s20986_s22 + $0x890] sm:$0xff]  ;;  %v16972_v49 = vcombine.high %v8001_v11, %v8009_v30  ;;  %v16971_v15 = vcombine.low %v8001_v11, %v8009_v30 }
0x17f0   : > { %11258 = vmatmul.mubr.bf16.vlgmr.msra.gmra.mxu0 %v22273_v38  ;;  %11301 = vmatmul.mubr.bf16.vlgmr.msra.gmra.mxu1 %v22277_v40  ;;  %v8265_v20 = vld [vmem:[%s20986_s22 + $0x8d0] sm:$0xff] }
0x17f1   : > { %11312 = vmatpush1.bf16.msra.mxu0 %v17067_v29  ;;  %11343 = vmatprep.mubr.bf16.mxu0 %v22265_v18  ;;  %v17228_v14 = vcombine.high %v8257_v0, %v8265_v20  ;;  %v7985_v29 = vld [vmem:[%s20986_s22 + $0x10] sm:$0xff]  ;;  %v17227_v54 = vcombine.low %v8257_v0, %v8265_v20 }
0x17f2   : > { %11355 = vmatpush1.bf16.msra.mxu1 %v17323_v42  ;;  %11386 = vmatprep.mubr.bf16.mxu1 %v22269_v22  ;;  %v7993_v42 = vld [vmem:[%s20986_s22 + $0x50] sm:$0xff] }
0x17f3   : > { %11313 = vmatprep.subr.bf16.mxu0 %v17052_v13  ;;  %11356 = vmatprep.subr.bf16.mxu1 %v17308_v50  ;;  %v8241_v13 = vld [vmem:[%s20986_s22 + $0x810] sm:$0xff]  ;;  %v16956_v23 = vcombine.high %v7985_v29, %v7993_v42  ;;  %v16955_v61 = vcombine.low %v7985_v29, %v7993_v42 }
0x17f4   : > { %v8249_v50 = vld [vmem:[%s20986_s22 + $0x850] sm:$0xff] }
0x17f5   : > { %11314 = vmatpush1.bf16.msra.mxu0 %v17051_v44  ;;  %v17212_v36 = vcombine.high %v8241_v13, %v8249_v50  ;;  %v8225_v44 = vld [vmem:[%s20986_s22 + $0x790] sm:$0xff]  ;;  %v17211_v25 = vcombine.low %v8241_v13, %v8249_v50 }
0x17f6   : > { %11357 = vmatpush1.bf16.msra.mxu1 %v17307_v26  ;;  %11315 = vmatprep.subr.bf16.mxu0 %v17036_v51  ;;  %v8233_v26 = vld [vmem:[%s20986_s22 + $0x7d0] sm:$0xff] }
0x17f7   : > { %11358 = vmatprep.subr.bf16.mxu1 %v17292_v9  ;;  %v8481_v51 = vld [vmem:[%s20986_s22 + $0xf90] sm:$0xff]  ;;  %v17196_v62 = vcombine.high %v8225_v44, %v8233_v26  ;;  %v17195_v27 = vcombine.low %v8225_v44, %v8233_v26 }
0x17f8   : > { %v8489_v9 = vld [vmem:[%s20986_s22 + $0xfd0] sm:$0xff] }
0x17f9   : > { %11316 = vmatpush1.bf16.msra.mxu0 %v17035_v48  ;;  %v17452_v56 = vcombine.high %v8481_v51, %v8489_v9  ;;  %v8209_v48 = vld [vmem:[%s20986_s22 + $0x710] sm:$0xff]  ;;  %v17451_v32 = vcombine.low %v8481_v51, %v8489_v9 }
0x17fa   : > { %11359 = vmatpush1.bf16.msra.mxu1 %v17291_v41  ;;  %11317 = vmatprep.subr.bf16.mxu0 %v17020_v19  ;;  %v8217_v41 = vld [vmem:[%s20986_s22 + $0x750] sm:$0xff] }
0x17fb   : > { %11360 = vmatprep.subr.bf16.mxu1 %v17276_v39  ;;  %v8465_v19 = vld [vmem:[%s20986_s22 + $0xf10] sm:$0xff]  ;;  %v17180_v21 = vcombine.high %v8209_v48, %v8217_v41  ;;  %v17179_v60 = vcombine.low %v8209_v48, %v8217_v41 }
0x17fc   : > { %v8473_v39 = vld [vmem:[%s20986_s22 + $0xf50] sm:$0xff] }
0x17fd   : > { %11318 = vmatpush1.bf16.msra.mxu0 %v17019_v2  ;;  %v17436_v31 = vcombine.high %v8465_v19, %v8473_v39  ;;  %v8193_v2 = vld [vmem:[%s20986_s22 + $0x690] sm:$0xff]  ;;  %v17435_v6 = vcombine.low %v8465_v19, %v8473_v39 }
0x17fe   : > { %11361 = vmatpush1.bf16.msra.mxu1 %v17275_v5  ;;  %11319 = vmatprep.subr.bf16.mxu0 %v17004_v3  ;;  %v8201_v5 = vld [vmem:[%s20986_s22 + $0x6d0] sm:$0xff] }
0x17ff   : > { %11362 = vmatprep.subr.bf16.mxu1 %v17260_v55  ;;  %v8449_v3 = vld [vmem:[%s20986_s22 + $0xe90] sm:$0xff]  ;;  %v17164_v4 = vcombine.high %v8193_v2, %v8201_v5  ;;  %v17163_v11 = vcombine.low %v8193_v2, %v8201_v5 }
0x1800   : > { %v8457_v55 = vld [vmem:[%s20986_s22 + $0xed0] sm:$0xff] }
0x1801   : > { %11320 = vmatpush1.bf16.msra.mxu0 %v17003_v1  ;;  %v17420_v43 = vcombine.high %v8449_v3, %v8457_v55  ;;  %v8177_v1 = vld [vmem:[%s20986_s22 + $0x610] sm:$0xff]  ;;  %v17419_v30 = vcombine.low %v8449_v3, %v8457_v55 }
0x1802   : > { %11363 = vmatpush1.bf16.msra.mxu1 %v17259_v16  ;;  %11321 = vmatprep.subr.bf16.mxu0 %v16988_v52  ;;  %v8185_v16 = vld [vmem:[%s20986_s22 + $0x650] sm:$0xff] }
0x1803   : > { %11364 = vmatprep.subr.bf16.mxu1 %v17244_v59  ;;  %v8433_v52 = vld [vmem:[%s20986_s22 + $0xe10] sm:$0xff]  ;;  %v17148_v0 = vcombine.high %v8177_v1, %v8185_v16  ;;  %v17147_v29 = vcombine.low %v8177_v1, %v8185_v16 }
0x1804   : > { %v8441_v59 = vld [vmem:[%s20986_s22 + $0xe50] sm:$0xff] }
0x1805   : > { %11322 = vmatpush1.bf16.msra.mxu0 %v16987_v53  ;;  %v17404_v20 = vcombine.high %v8433_v52, %v8441_v59  ;;  %v8161_v53 = vld [vmem:[%s20986_s22 + $0x590] sm:$0xff]  ;;  %v17403_v42 = vcombine.low %v8433_v52, %v8441_v59 }
0x1806   : > { %11365 = vmatpush1.bf16.msra.mxu1 %v17243_v45  ;;  %11323 = vmatprep.subr.bf16.mxu0 %v16972_v49  ;;  %v8169_v45 = vld [vmem:[%s20986_s22 + $0x5d0] sm:$0xff] }
0x1807   : > { %11366 = vmatprep.subr.bf16.mxu1 %v17228_v14  ;;  %v8417_v49 = vld [vmem:[%s20986_s22 + $0xd90] sm:$0xff]  ;;  %v17132_v13 = vcombine.high %v8161_v53, %v8169_v45  ;;  %v17131_v44 = vcombine.low %v8161_v53, %v8169_v45  ;;  %v8346_v53 = vld [vmem:[%s20986_s22 + $0xb58] sm:$0xff] }
0x1808   : > { %v8425_v14 = vld [vmem:[%s20986_s22 + $0xdd0] sm:$0xff] }
0x1809   : > { %11324 = vmatpush1.bf16.msra.mxu0 %v16971_v15  ;;  %v17388_v50 = vcombine.high %v8417_v49, %v8425_v14  ;;  %v8145_v15 = vld [vmem:[%s20986_s22 + $0x510] sm:$0xff]  ;;  %v17387_v26 = vcombine.low %v8417_v49, %v8425_v14  ;;  %v8066_v14 = vld [vmem:[%s20986_s22 + $0x298] sm:$0xff] }
0x180a   : > { %11367 = vmatpush1.bf16.msra.mxu1 %v17227_v54  ;;  %11325 = vmatprep.subr.bf16.mxu0 %v16956_v23  ;;  %v8153_v54 = vld [vmem:[%s20986_s22 + $0x550] sm:$0xff] }
0x180b   : > { %11368 = vmatprep.subr.bf16.mxu1 %v17212_v36  ;;  %v8401_v23 = vld [vmem:[%s20986_s22 + $0xd10] sm:$0xff]  ;;  %v17116_v51 = vcombine.high %v8145_v15, %v8153_v54  ;;  %v17115_v48 = vcombine.low %v8145_v15, %v8153_v54 }
0x180c   : > { %v8409_v36 = vld [vmem:[%s20986_s22 + $0xd50] sm:$0xff] }
0x180d   : > { %11326 = vmatpush1.bf16.msra.mxu0 %v16955_v61  ;;  %v17372_v9 = vcombine.high %v8401_v23, %v8409_v36  ;;  %v8129_v61 = vld [vmem:[%s20986_s22 + $0x490] sm:$0xff]  ;;  %v17371_v41 = vcombine.low %v8401_v23, %v8409_v36 }
0x180e   : > { %11369 = vmatpush1.bf16.msra.mxu1 %v17211_v25  ;;  %11327 = vmatprep.subr.bf16.mxu0 %v17196_v62  ;;  %v8137_v25 = vld [vmem:[%s20986_s22 + $0x4d0] sm:$0xff] }
0x180f   : > { %11370 = vmatprep.subr.bf16.mxu1 %v17452_v56  ;;  %v8385_v62 = vld [vmem:[%s20986_s22 + $0xc90] sm:$0xff]  ;;  %v17100_v19 = vcombine.high %v8129_v61, %v8137_v25  ;;  %v17099_v2 = vcombine.low %v8129_v61, %v8137_v25 }
0x1810   : > { %v8393_v56 = vld [vmem:[%s20986_s22 + $0xcd0] sm:$0xff] }
0x1811   : > { %11328 = vmatpush2.bf16.msra.mxu0 %v17195_v27  ;;  %v17356_v39 = vcombine.high %v8385_v62, %v8393_v56  ;;  %v8113_v27 = vld [vmem:[%s20986_s22 + $0x410] sm:$0xff]  ;;  %v17355_v5 = vcombine.low %v8385_v62, %v8393_v56 }
0x1812   : > { %11371 = vmatpush2.bf16.msra.mxu1 %v17451_v32  ;;  %11329 = vmatprep.subr.bf16.mxu0 %v17180_v21  ;;  %v8121_v32 = vld [vmem:[%s20986_s22 + $0x450] sm:$0xff] }
0x1813   : > { %11372 = vmatprep.subr.bf16.mxu1 %v17436_v31  ;;  %v8369_v21 = vld [vmem:[%s20986_s22 + $0xc10] sm:$0xff]  ;;  %v17084_v3 = vcombine.high %v8113_v27, %v8121_v32  ;;  %v17083_v1 = vcombine.low %v8113_v27, %v8121_v32 }
0x1814   : > { %v8377_v31 = vld [vmem:[%s20986_s22 + $0xc50] sm:$0xff] }
0x1815   : > { %11330 = vmatpush2.bf16.msra.mxu0 %v17179_v60  ;;  %v17340_v55 = vcombine.high %v8369_v21, %v8377_v31  ;;  %v8098_v60 = vld [vmem:[%s20986_s22 + $0x398] sm:$0xff]  ;;  %v17339_v16 = vcombine.low %v8369_v21, %v8377_v31 }
0x1816   : > { %11373 = vmatpush2.bf16.msra.mxu1 %v17435_v6  ;;  %11331 = vmatprep.subr.bf16.mxu0 %v17164_v4  ;;  %v8106_v6 = vld [vmem:[%s20986_s22 + $0x3d8] sm:$0xff] }
0x1817   : > { %11374 = vmatprep.subr.bf16.mxu1 %v17420_v43  ;;  %v8354_v4 = vld [vmem:[%s20986_s22 + $0xb98] sm:$0xff]  ;;  %v17070_v52 = vcombine.high %v8098_v60, %v8106_v6 }
0x1818   : > { %v8362_v43 = vld [vmem:[%s20986_s22 + $0xbd8] sm:$0xff] }
0x1819   : > { %11332 = vmatpush2.bf16.msra.mxu0 %v17163_v11  ;;  %v17326_v59 = vcombine.high %v8354_v4, %v8362_v43  ;;  %v8082_v11 = vld [vmem:[%s20986_s22 + $0x318] sm:$0xff]  ;;  %v17325_v45 = vcombine.low %v8354_v4, %v8362_v43 }
0x181a   : > { %11375 = vmatpush2.bf16.msra.mxu1 %v17419_v30  ;;  %11333 = vmatprep.subr.bf16.mxu0 %v17148_v0  ;;  %v8090_v30 = vld [vmem:[%s20986_s22 + $0x358] sm:$0xff]  ;;  %v17069_v0 = vcombine.low %v8098_v60, %v8106_v6 }
0x181b   : > { %11376 = vmatprep.subr.bf16.mxu1 %v17404_v20  ;;  %v8338_v20 = vld [vmem:[%s20986_s22 + $0xb18] sm:$0xff]  ;;  %v17054_v49 = vcombine.high %v8082_v11, %v8090_v30  ;;  %v17053_v15 = vcombine.low %v8082_v11, %v8090_v30 }
0x181c   : > { %v17309_v54 = vcombine.low %v8338_v20, %v8346_v53 }
0x181d   : > { %11334 = vmatpush2.bf16.msra.mxu0 %v17147_v29  ;;  %v8074_v29 = vld [vmem:[%s20986_s22 + $0x2d8] sm:$0xff] }
0x181e   : > { %11377 = vmatpush2.bf16.msra.mxu1 %v17403_v42  ;;  %11335 = vmatprep.subr.bf16.mxu0 %v17132_v13  ;;  %v17310_v42 = vcombine.high %v8338_v20, %v8346_v53  ;;  %v8322_v13 = vld [vmem:[%s20986_s22 + $0xa98] sm:$0xff]  ;;  %v17038_v23 = vcombine.high %v8066_v14, %v8074_v29  ;;  %v17037_v61 = vcombine.low %v8066_v14, %v8074_v29 }
0x181f   : > { %11378 = vmatprep.subr.bf16.mxu1 %v17388_v50  ;;  %v8330_v50 = vld [vmem:[%s20986_s22 + $0xad8] sm:$0xff] }
0x1820   : > { %v17294_v36 = vcombine.high %v8322_v13, %v8330_v50  ;;  %v17293_v25 = vcombine.low %v8322_v13, %v8330_v50  ;;  %v7986_v53 = vld [vmem:[%s20986_s22 + $0x18] sm:$0xff] }
0x1821   : > { %11336 = vmatpush2.bf16.msra.mxu0 %v17131_v44  ;;  %v8050_v44 = vld [vmem:[%s20986_s22 + $0x218] sm:$0xff] }
0x1822   : > { %11379 = vmatpush2.bf16.msra.mxu1 %v17387_v26  ;;  %11337 = vmatprep.subr.bf16.mxu0 %v17116_v51  ;;  %v8058_v26 = vld [vmem:[%s20986_s22 + $0x258] sm:$0xff] }
0x1823   : > { %11380 = vmatprep.subr.bf16.mxu1 %v17372_v9  ;;  %v8306_v51 = vld [vmem:[%s20986_s22 + $0xa18] sm:$0xff]  ;;  %v17022_v62 = vcombine.high %v8050_v44, %v8058_v26  ;;  %v17021_v27 = vcombine.low %v8050_v44, %v8058_v26 }
0x1824   : > { %v8314_v9 = vld [vmem:[%s20986_s22 + $0xa58] sm:$0xff] }
0x1825   : > { %11338 = vmatpush2.bf16.msra.mxu0 %v17115_v48  ;;  %v17278_v56 = vcombine.high %v8306_v51, %v8314_v9  ;;  %v8034_v48 = vld [vmem:[%s20986_s22 + $0x198] sm:$0xff]  ;;  %v17277_v32 = vcombine.low %v8306_v51, %v8314_v9 }
0x1826   : > { %11381 = vmatpush2.bf16.msra.mxu1 %v17371_v41  ;;  %11339 = vmatprep.subr.bf16.mxu0 %v17100_v19  ;;  %v8042_v41 = vld [vmem:[%s20986_s22 + $0x1d8] sm:$0xff] }
0x1827   : > { %11382 = vmatprep.subr.bf16.mxu1 %v17356_v39  ;;  %v8290_v19 = vld [vmem:[%s20986_s22 + $0x998] sm:$0xff]  ;;  %v17006_v21 = vcombine.high %v8034_v48, %v8042_v41  ;;  %v17005_v60 = vcombine.low %v8034_v48, %v8042_v41 }
0x1828   : > { %v8298_v39 = vld [vmem:[%s20986_s22 + $0x9d8] sm:$0xff] }
0x1829   : > { %11340 = vmatpush2.bf16.msra.mxu0 %v17099_v2  ;;  %v17262_v31 = vcombine.high %v8290_v19, %v8298_v39  ;;  %v8018_v2 = vld [vmem:[%s20986_s22 + $0x118] sm:$0xff]  ;;  %v17261_v6 = vcombine.low %v8290_v19, %v8298_v39 }
0x182a   : > { %11383 = vmatpush2.bf16.msra.mxu1 %v17355_v5  ;;  %11341 = vmatprep.subr.bf16.mxu0 %v17084_v3  ;;  %v8026_v5 = vld [vmem:[%s20986_s22 + $0x158] sm:$0xff] }
0x182b   : > { %11384 = vmatprep.subr.bf16.mxu1 %v17340_v55  ;;  %v8274_v3 = vld [vmem:[%s20986_s22 + $0x918] sm:$0xff]  ;;  %v16990_v4 = vcombine.high %v8018_v2, %v8026_v5  ;;  %v16989_v11 = vcombine.low %v8018_v2, %v8026_v5 }
0x182c   : > { %v8282_v55 = vld [vmem:[%s20986_s22 + $0x958] sm:$0xff] }
0x182d   : > { %11342 = vmatpush2.bf16.msra.mxu0 %v17083_v1  ;;  %v17246_v43 = vcombine.high %v8274_v3, %v8282_v55  ;;  %v8002_v1 = vld [vmem:[%s20986_s22 + $0x98] sm:$0xff]  ;;  %v17245_v30 = vcombine.low %v8274_v3, %v8282_v55 }
0x182e   : > { %11385 = vmatpush2.bf16.msra.mxu1 %v17339_v16  ;;  %11397 = vmatprep.subr.bf16.mxu0 %v17070_v52  ;;  %v8010_v16 = vld [vmem:[%s20986_s22 + $0xd8] sm:$0xff] }
0x182f   : > { %11440 = vmatprep.subr.bf16.mxu1 %v17326_v59  ;;  %v8258_v52 = vld [vmem:[%s20986_s22 + $0x898] sm:$0xff]  ;;  %v16973_v29 = vcombine.low %v8002_v1, %v8010_v16 }
0x1830   : > { %11344 = vmatmul.mubr.bf16.vlgmr.msra.gmra.mxu0 %v22273_v38  ;;  %v8266_v59 = vld [vmem:[%s20986_s22 + $0x8d8] sm:$0xff] }
0x1831   : > { %11387 = vmatmul.mubr.bf16.vlgmr.msra.gmra.mxu1 %v22277_v40  ;;  %11398 = vmatpush1.bf16.msra.mxu0 %v17069_v0  ;;  %v16974_v0 = vcombine.high %v8002_v1, %v8010_v16  ;;  %v17230_v20 = vcombine.high %v8258_v52, %v8266_v59  ;;  %v8250_v14 = vld [vmem:[%s20986_s22 + $0x858] sm:$0xff] }
0x1832   : > { %11429 = vmatprep.mubr.bf16.mxu0 %v22265_v18  ;;  %11441 = vmatpush1.bf16.msra.mxu1 %v17325_v45  ;;  %v7994_v45 = vld [vmem:[%s20986_s22 + $0x58] sm:$0xff] }
0x1833   : > { %11472 = vmatprep.mubr.bf16.mxu1 %v22269_v22  ;;  %11399 = vmatprep.subr.bf16.mxu0 %v17054_v49  ;;  %v8242_v49 = vld [vmem:[%s20986_s22 + $0x818] sm:$0xff]  ;;  %v16958_v13 = vcombine.high %v7986_v53, %v7994_v45  ;;  %v16957_v44 = vcombine.low %v7986_v53, %v7994_v45 }
0x1834   : > { %11442 = vmatprep.subr.bf16.mxu1 %v17310_v42  ;;  %v17229_v42 = vcombine.low %v8258_v52, %v8266_v59  ;;  %v17214_v50 = vcombine.high %v8242_v49, %v8250_v14  ;;  %v17213_v26 = vcombine.low %v8242_v49, %v8250_v14 }
0x1835   : > { %11400 = vmatpush1.bf16.msra.mxu0 %v17053_v15  ;;  %v8226_v15 = vld [vmem:[%s20986_s22 + $0x798] sm:$0xff] }
0x1836   : > { %11443 = vmatpush1.bf16.msra.mxu1 %v17309_v54  ;;  %11401 = vmatprep.subr.bf16.mxu0 %v17038_v23  ;;  %v8234_v54 = vld [vmem:[%s20986_s22 + $0x7d8] sm:$0xff] }
0x1837   : > { %11444 = vmatprep.subr.bf16.mxu1 %v17294_v36  ;;  %v8482_v23 = vld [vmem:[%s20986_s22 + $0xf98] sm:$0xff]  ;;  %v17198_v51 = vcombine.high %v8226_v15, %v8234_v54  ;;  %v17197_v48 = vcombine.low %v8226_v15, %v8234_v54 }
0x1838   : > { %v8490_v36 = vld [vmem:[%s20986_s22 + $0xfd8] sm:$0xff] }
0x1839   : > { %11402 = vmatpush1.bf16.msra.mxu0 %v17037_v61  ;;  %v17454_v9 = vcombine.high %v8482_v23, %v8490_v36  ;;  %v8210_v61 = vld [vmem:[%s20986_s22 + $0x718] sm:$0xff]  ;;  %v17453_v41 = vcombine.low %v8482_v23, %v8490_v36 }
0x183a   : > { %11445 = vmatpush1.bf16.msra.mxu1 %v17293_v25  ;;  %11403 = vmatprep.subr.bf16.mxu0 %v17022_v62  ;;  %v8218_v25 = vld [vmem:[%s20986_s22 + $0x758] sm:$0xff] }
0x183b   : > { %11446 = vmatprep.subr.bf16.mxu1 %v17278_v56  ;;  %v8466_v62 = vld [vmem:[%s20986_s22 + $0xf18] sm:$0xff]  ;;  %v17182_v19 = vcombine.high %v8210_v61, %v8218_v25  ;;  %v17181_v2 = vcombine.low %v8210_v61, %v8218_v25 }
0x183c   : > { %v8474_v56 = vld [vmem:[%s20986_s22 + $0xf58] sm:$0xff] }
0x183d   : > { %11404 = vmatpush1.bf16.msra.mxu0 %v17021_v27  ;;  %v17438_v39 = vcombine.high %v8466_v62, %v8474_v56  ;;  %v8194_v27 = vld [vmem:[%s20986_s22 + $0x698] sm:$0xff]  ;;  %v17437_v5 = vcombine.low %v8466_v62, %v8474_v56 }
0x183e   : > { %11447 = vmatpush1.bf16.msra.mxu1 %v17277_v32  ;;  %11405 = vmatprep.subr.bf16.mxu0 %v17006_v21  ;;  %v8202_v32 = vld [vmem:[%s20986_s22 + $0x6d8] sm:$0xff] }
0x183f   : > { %11448 = vmatprep.subr.bf16.mxu1 %v17262_v31  ;;  %v8450_v21 = vld [vmem:[%s20986_s22 + $0xe98] sm:$0xff]  ;;  %v17166_v3 = vcombine.high %v8194_v27, %v8202_v32  ;;  %v17165_v1 = vcombine.low %v8194_v27, %v8202_v32 }
0x1840   : > { %v8458_v31 = vld [vmem:[%s20986_s22 + $0xed8] sm:$0xff] }
0x1841   : > { %11406 = vmatpush1.bf16.msra.mxu0 %v17005_v60  ;;  %v17422_v55 = vcombine.high %v8450_v21, %v8458_v31  ;;  %v8178_v60 = vld [vmem:[%s20986_s22 + $0x618] sm:$0xff]  ;;  %v17421_v16 = vcombine.low %v8450_v21, %v8458_v31 }
0x1842   : > { %11449 = vmatpush1.bf16.msra.mxu1 %v17261_v6  ;;  %11407 = vmatprep.subr.bf16.mxu0 %v16990_v4  ;;  %v8186_v6 = vld [vmem:[%s20986_s22 + $0x658] sm:$0xff] }
0x1843   : > { %11450 = vmatprep.subr.bf16.mxu1 %v17246_v43  ;;  %v8434_v4 = vld [vmem:[%s20986_s22 + $0xe18] sm:$0xff]  ;;  %v17150_v52 = vcombine.high %v8178_v60, %v8186_v6  ;;  %v17149_v53 = vcombine.low %v8178_v60, %v8186_v6 }
0x1844   : > { %v8442_v43 = vld [vmem:[%s20986_s22 + $0xe58] sm:$0xff] }
0x1845   : > { %11408 = vmatpush1.bf16.msra.mxu0 %v16989_v11  ;;  %v17406_v59 = vcombine.high %v8434_v4, %v8442_v43  ;;  %v8162_v11 = vld [vmem:[%s20986_s22 + $0x598] sm:$0xff]  ;;  %v17405_v45 = vcombine.low %v8434_v4, %v8442_v43  ;;  %v22488_v43 = vld [vmem:[%s20993_s20] sm:$0xff] }
0x1846   : > { %11451 = vmatpush1.bf16.msra.mxu1 %v17245_v30  ;;  %11409 = vmatprep.subr.bf16.mxu0 %v16974_v0  ;;  %v8170_v30 = vld [vmem:[%s20986_s22 + $0x5d8] sm:$0xff] }
0x1847   : > { %11452 = vmatprep.subr.bf16.mxu1 %v17230_v20  ;;  %v8418_v0 = vld [vmem:[%s20986_s22 + $0xd98] sm:$0xff]  ;;  %v17134_v49 = vcombine.high %v8162_v11, %v8170_v30  ;;  %v17133_v15 = vcombine.low %v8162_v11, %v8170_v30  ;;  %v8502_v11 = vrot.slane %v22488_v43, %v21483_v34  ;;  %v8339_v30 = vld [vmem:[%s20986_s22 + $0xb20] sm:$0xff] }
0x1848   : > { %v8426_v20 = vld [vmem:[%s20986_s22 + $0xdd8] sm:$0xff] }
0x1849   : > { %11410 = vmatpush1.bf16.msra.mxu0 %v16973_v29  ;;  %v17390_v14 = vcombine.high %v8418_v0, %v8426_v20  ;;  %v8146_v29 = vld [vmem:[%s20986_s22 + $0x518] sm:$0xff]  ;;  %v17389_v54 = vcombine.low %v8418_v0, %v8426_v20  ;;  %v8347_v0 = vld [vmem:[%s20986_s22 + $0xb60] sm:$0xff] }
0x184a   : > { %11453 = vmatpush1.bf16.msra.mxu1 %v17229_v42  ;;  %11411 = vmatprep.subr.bf16.mxu0 %v16958_v13  ;;  %v8154_v42 = vld [vmem:[%s20986_s22 + $0x558] sm:$0xff] }
0x184b   : > { %11454 = vmatprep.subr.bf16.mxu1 %v17214_v50  ;;  %v8402_v13 = vld [vmem:[%s20986_s22 + $0xd18] sm:$0xff]  ;;  %v17118_v23 = vcombine.high %v8146_v29, %v8154_v42  ;;  %v17117_v61 = vcombine.low %v8146_v29, %v8154_v42  ;;  %v17312_v42 = vcombine.high %v8339_v30, %v8347_v0 }
0x184c   : > { %v8410_v50 = vld [vmem:[%s20986_s22 + $0xd58] sm:$0xff] }
0x184d   : > { %11412 = vmatpush1.bf16.msra.mxu0 %v16957_v44  ;;  %v17374_v36 = vcombine.high %v8402_v13, %v8410_v50  ;;  %v8130_v44 = vld [vmem:[%s20986_s22 + $0x498] sm:$0xff]  ;;  %v17373_v25 = vcombine.low %v8402_v13, %v8410_v50  ;;  %v8323_v13 = vld [vmem:[%s20986_s22 + $0xaa0] sm:$0xff] }
0x184e   : > { %11455 = vmatpush1.bf16.msra.mxu1 %v17213_v26  ;;  %11413 = vmatprep.subr.bf16.mxu0 %v17198_v51  ;;  %v8138_v26 = vld [vmem:[%s20986_s22 + $0x4d8] sm:$0xff]  ;;  %v8331_v50 = vld [vmem:[%s20986_s22 + $0xae0] sm:$0xff] }
0x184f   : > { %11456 = vmatprep.subr.bf16.mxu1 %v17454_v9  ;;  %v8386_v51 = vld [vmem:[%s20986_s22 + $0xc98] sm:$0xff]  ;;  %v17102_v62 = vcombine.high %v8130_v44, %v8138_v26  ;;  %v17101_v27 = vcombine.low %v8130_v44, %v8138_v26  ;;  %v17311_v44 = vcombine.low %v8339_v30, %v8347_v0  ;;  %v8027_v30 = vld [vmem:[%s20986_s22 + $0x160] sm:$0xff] }
0x1850   : > { %v8394_v9 = vld [vmem:[%s20986_s22 + $0xcd8] sm:$0xff]  ;;  %v8275_v0 = vld [vmem:[%s20986_s22 + $0x920] sm:$0xff] }
0x1851   : > { %11414 = vmatpush2.bf16.msra.mxu0 %v17197_v48  ;;  %v17358_v56 = vcombine.high %v8386_v51, %v8394_v9  ;;  %v8114_v48 = vld [vmem:[%s20986_s22 + $0x418] sm:$0xff]  ;;  %v17357_v32 = vcombine.low %v8386_v51, %v8394_v9  ;;  %v17296_v9 = vcombine.high %v8323_v13, %v8331_v50 }
0x1852   : > { %11457 = vmatpush2.bf16.msra.mxu1 %v17453_v41  ;;  %11415 = vmatprep.subr.bf16.mxu0 %v17182_v19  ;;  %v8122_v41 = vld [vmem:[%s20986_s22 + $0x458] sm:$0xff] }
0x1853   : > { %11458 = vmatprep.subr.bf16.mxu1 %v17438_v39  ;;  %v8370_v19 = vld [vmem:[%s20986_s22 + $0xc18] sm:$0xff]  ;;  %v17086_v21 = vcombine.high %v8114_v48, %v8122_v41  ;;  %v17085_v60 = vcombine.low %v8114_v48, %v8122_v41  ;;  %v8315_v48 = vld [vmem:[%s20986_s22 + $0xa60] sm:$0xff] }
0x1854   : > { %v8378_v39 = vld [vmem:[%s20986_s22 + $0xc58] sm:$0xff] }
0x1855   : > { %11416 = vmatpush2.bf16.msra.mxu0 %v17181_v2  ;;  %v17342_v31 = vcombine.high %v8370_v19, %v8378_v39  ;;  %v8099_v2 = vld [vmem:[%s20986_s22 + $0x3a0] sm:$0xff]  ;;  %v17341_v6 = vcombine.low %v8370_v19, %v8378_v39 }
0x1856   : > { %11459 = vmatpush2.bf16.msra.mxu1 %v17437_v5  ;;  %11417 = vmatprep.subr.bf16.mxu0 %v17166_v3  ;;  %v8107_v5 = vld [vmem:[%s20986_s22 + $0x3e0] sm:$0xff] }
0x1857   : > { %11460 = vmatprep.subr.bf16.mxu1 %v17422_v55  ;;  %v8355_v3 = vld [vmem:[%s20986_s22 + $0xba0] sm:$0xff]  ;;  %v17072_v4 = vcombine.high %v8099_v2, %v8107_v5 }
0x1858   : > { %v8363_v55 = vld [vmem:[%s20986_s22 + $0xbe0] sm:$0xff] }
0x1859   : > { %11418 = vmatpush2.bf16.msra.mxu0 %v17165_v1  ;;  %v17328_v1 = vcombine.high %v8355_v3, %v8363_v55  ;;  %v17327_v20 = vcombine.low %v8355_v3, %v8363_v55  ;;  %v8291_v3 = vld [vmem:[%s20986_s22 + $0x9a0] sm:$0xff] }
0x185a   : > { %11461 = vmatpush2.bf16.msra.mxu1 %v17421_v16  ;;  %11419 = vmatprep.subr.bf16.mxu0 %v17150_v52  ;;  %v8083_v16 = vld [vmem:[%s20986_s22 + $0x320] sm:$0xff] }
0x185b   : > { %11462 = vmatprep.subr.bf16.mxu1 %v17406_v59  ;;  %v8091_v52 = vld [vmem:[%s20986_s22 + $0x360] sm:$0xff]  ;;  %v17071_v59 = vcombine.low %v8099_v2, %v8107_v5 }
0x185c   : > { %v8035_v2 = vld [vmem:[%s20986_s22 + $0x1a0] sm:$0xff] }
0x185d   : > { %11420 = vmatpush2.bf16.msra.mxu0 %v17149_v53  ;;  %v17056_v53 = vcombine.high %v8083_v16, %v8091_v52  ;;  %v8043_v5 = vld [vmem:[%s20986_s22 + $0x1e0] sm:$0xff] }
0x185e   : > { %11463 = vmatpush2.bf16.msra.mxu1 %v17405_v45  ;;  %11421 = vmatprep.subr.bf16.mxu0 %v17134_v49  ;;  %v8067_v45 = vld [vmem:[%s20986_s22 + $0x2a0] sm:$0xff] }
0x185f   : > { %11464 = vmatprep.subr.bf16.mxu1 %v17390_v14  ;;  %v8075_v49 = vld [vmem:[%s20986_s22 + $0x2e0] sm:$0xff] }
0x1860   : > { %v17040_v26 = vcombine.high %v8067_v45, %v8075_v49  ;;  %v17039_v19 = vcombine.low %v8067_v45, %v8075_v49  ;;  %v8299_v55 = vld [vmem:[%s20986_s22 + $0x9e0] sm:$0xff] }
0x1861   : > { %11422 = vmatpush2.bf16.msra.mxu0 %v17133_v15  ;;  %v17263_v45 = vcombine.low %v8291_v3, %v8299_v55 }
0x1862   : > { %11465 = vmatpush2.bf16.msra.mxu1 %v17389_v54  ;;  %11423 = vmatprep.subr.bf16.mxu0 %v17118_v23  ;;  %v17055_v54 = vcombine.low %v8083_v16, %v8091_v52  ;;  %v17008_v16 = vcombine.high %v8035_v2, %v8043_v5 }
0x1863   : > { %11466 = vmatprep.subr.bf16.mxu1 %v17374_v36 }
0x1865   : > { %11424 = vmatpush2.bf16.msra.mxu0 %v17117_v61  ;;  %v8051_v61 = vld [vmem:[%s20986_s22 + $0x220] sm:$0xff] }
0x1866   : > { %11467 = vmatpush2.bf16.msra.mxu1 %v17373_v25  ;;  %11425 = vmatprep.subr.bf16.mxu0 %v17102_v62  ;;  %v8059_v25 = vld [vmem:[%s20986_s22 + $0x260] sm:$0xff] }
0x1867   : > { %11468 = vmatprep.subr.bf16.mxu1 %v17358_v56  ;;  %v8307_v56 = vld [vmem:[%s20986_s22 + $0xa20] sm:$0xff] }
0x1869   : > { %11426 = vmatpush2.bf16.msra.mxu0 %v17101_v27  ;;  %v17295_v27 = vcombine.low %v8323_v13, %v8331_v50  ;;  %v8259_v13 = vld [vmem:[%s20986_s22 + $0x8a0] sm:$0xff] }
0x186a   : > { %11469 = vmatpush2.bf16.msra.mxu1 %v17357_v32  ;;  %11427 = vmatprep.subr.bf16.mxu0 %v17086_v21  ;;  %v17024_v32 = vcombine.high %v8051_v61, %v8059_v25  ;;  %v8267_v50 = vld [vmem:[%s20986_s22 + $0x8e0] sm:$0xff] }
0x186b   : > { %11470 = vmatprep.subr.bf16.mxu1 %v17342_v31  ;;  %v17280_v31 = vcombine.high %v8307_v56, %v8315_v48 }
0x186d   : > { %11428 = vmatpush2.bf16.msra.mxu0 %v17085_v60 }
0x186e   : > { %11471 = vmatpush2.bf16.msra.mxu1 %v17341_v6  ;;  %11483 = vmatprep.subr.bf16.mxu0 %v17072_v4  ;;  %v17023_v4 = vcombine.low %v8051_v61, %v8059_v25  ;;  %v8243_v61 = vld [vmem:[%s20986_s22 + $0x820] sm:$0xff] }
0x186f   : > { %11526 = vmatprep.subr.bf16.mxu1 %v17328_v1  ;;  %v17279_v1 = vcombine.low %v8307_v56, %v8315_v48  ;;  %v8251_v25 = vld [vmem:[%s20986_s22 + $0x860] sm:$0xff]  ;;  %v17231_v56 = vcombine.low %v8259_v13, %v8267_v50 }
0x1870   : > { %11430 = vmatmul.mubr.bf16.vlgmr.msra.gmra.mxu0 %v22273_v38  ;;  %v11173_v14 = vpop.f32.mrf.mxu0  ;;  %v11216_v29 = vpop.f32.mrf.mxu1 }
0x1871   : > { %11473 = vmatmul.mubr.bf16.vlgmr.msra.gmra.mxu1 %v22277_v40  ;;  %v11174_v15 = vadd.f32 %v11173_v14, %v8502_v11  ;;  %11484 = vmatpush1.bf16.msra.mxu0 %v17071_v59  ;;  %v17264_v59 = vcombine.high %v8291_v3, %v8299_v55  ;;  %v8211_v3 = vld [vmem:[%s20986_s22 + $0x720] sm:$0xff] }
0x1872   : > { %11515 = vmatprep.mubr.bf16.mxu0 %v22265_v18  ;;  %11527 = vmatpush1.bf16.msra.mxu1 %v17327_v20  ;;  %v22503_v23 = vpop.f32.mrf.mxu0  ;;  %v22505_v36 = vpop.f32.mrf.mxu1  ;;  %v8283_v20 = vld [vmem:[%s20986_s22 + $0x960] sm:$0xff] }
0x1873   : > { %v11217_v51 = vadd.f32 %v11216_v29, %v11174_v15  ;;  %11558 = vmatprep.mubr.bf16.mxu1 %v22269_v22  ;;  %11485 = vmatprep.subr.bf16.mxu0 %v17056_v53  ;;  %v17007_v53 = vcombine.low %v8035_v2, %v8043_v5  ;;  %v17248_v14 = vcombine.high %v8275_v0, %v8283_v20  ;;  %v8003_v29 = vld [vmem:[%s20986_s22 + $0xa0] sm:$0xff] }
0x1874   : > { %11528 = vmatprep.subr.bf16.mxu1 %v17312_v42  ;;  %v11177_v62 = vpop.f32.mrf.mxu0  ;;  %v11220_v39 = vpop.f32.mrf.mxu1  ;;  %v8011_v42 = vld [vmem:[%s20986_s22 + $0xe0] sm:$0xff] }
0x1875   : > { %v11178_v41 = vadd.f32 %v11177_v62, %v8502_v11  ;;  %11486 = vmatpush1.bf16.msra.mxu0 %v17055_v54  ;;  %v11827_v60 = vmax.f32 %v11217_v51, 0.0  ;;  %v8019_v11 = vld [vmem:[%s20986_s22 + $0x120] sm:$0xff]  ;;  %v17247_v54 = vcombine.low %v8275_v0, %v8283_v20  ;;  %v16975_v62 = vcombine.low %v8003_v29, %v8011_v42 }
0x1876   : > { %11529 = vmatpush1.bf16.msra.mxu1 %v17311_v44  ;;  %11487 = vmatprep.subr.bf16.mxu0 %v17040_v26  ;;  %v16992_v49 = vcombine.high %v8019_v11, %v8027_v30  ;;  %v16991_v15 = vcombine.low %v8019_v11, %v8027_v30  ;;  %v16976_v44 = vcombine.high %v8003_v29, %v8011_v42  ;;  %v7987_v51 = vld [vmem:[%s20986_s22 + $0x20] sm:$0xff] }
0x1877   : > { %v11221_v21 = vadd.f32 %v11220_v39, %v11178_v41  ;;  %11530 = vmatprep.subr.bf16.mxu1 %v17296_v9  ;;  %v17232_v26 = vcombine.high %v8259_v13, %v8267_v50  ;;  %v7995_v9 = vld [vmem:[%s20986_s22 + $0x60] sm:$0xff]  ;;  %v17216_v41 = vcombine.high %v8243_v61, %v8251_v25 }
0x1878   : > { %v16960_v48 = vcombine.high %v7987_v51, %v7995_v9  ;;  %v8235_v39 = vld [vmem:[%s20986_s22 + $0x7e0] sm:$0xff] }
0x1879   : > { %v11843_v6 = vmax.f32 %v11221_v21, 0.0  ;;  %11488 = vmatpush1.bf16.msra.mxu0 %v17039_v19  ;;  %v8227_v19 = vld [vmem:[%s20986_s22 + $0x7a0] sm:$0xff]  ;;  %v16959_v21 = vcombine.low %v7987_v51, %v7995_v9 }
0x187a   : > { %11531 = vmatpush1.bf16.msra.mxu1 %v17295_v27  ;;  %11489 = vmatprep.subr.bf16.mxu0 %v17024_v32  ;;  %v8483_v27 = vld [vmem:[%s20986_s22 + $0xfa0] sm:$0xff]  ;;  %v17200_v2 = vcombine.high %v8227_v19, %v8235_v39 }
0x187b   : > { %v22516_v52 = vpack.c.bf16 %v11843_v6, %v11827_v60  ;;  %11532 = vmatprep.subr.bf16.mxu1 %v17280_v31  ;;  %v8491_v32 = vld [vmem:[%s20986_s22 + $0xfe0] sm:$0xff]  ;;  %v17215_v31 = vcombine.low %v8243_v61, %v8251_v25 }
0x187c   : > { %v17456_v5 = vcombine.high %v8483_v27, %v8491_v32  ;;  %v8219_v55 = vld [vmem:[%s20986_s22 + $0x760] sm:$0xff] }
0x187d   : > { %11490 = vmatpush1.bf16.msra.mxu0 %v17023_v4  ;;  %v8467_v60 = vld [vmem:[%s20986_s22 + $0xf20] sm:$0xff]  ;;  %v17199_v4 = vcombine.low %v8227_v19, %v8235_v39 }
0x187e   : > { %11533 = vmatpush1.bf16.msra.mxu1 %v17279_v1  ;;  %11491 = vmatprep.subr.bf16.mxu0 %v17008_v16  ;;  %v8475_v6 = vld [vmem:[%s20986_s22 + $0xf60] sm:$0xff]  ;;  %v17455_v1 = vcombine.low %v8483_v27, %v8491_v32  ;;  %v17184_v16 = vcombine.high %v8211_v3, %v8219_v55 }
0x187f   : > { %11534 = vmatprep.subr.bf16.mxu1 %v17264_v59  ;;  %v17440_v59 = vcombine.high %v8467_v60, %v8475_v6  ;;  %v8195_v11 = vld [vmem:[%s20986_s22 + $0x6a0] sm:$0xff] }
0x1880   : > { %v8203_v30 = vld [vmem:[%s20986_s22 + $0x6e0] sm:$0xff] }
0x1881   : > { %11492 = vmatpush1.bf16.msra.mxu0 %v17007_v53  ;;  %v8451_v0 = vld [vmem:[%s20986_s22 + $0xea0] sm:$0xff]  ;;  %v17183_v53 = vcombine.low %v8211_v3, %v8219_v55 }
0x1882   : > { %11535 = vmatpush1.bf16.msra.mxu1 %v17263_v45  ;;  %11493 = vmatprep.subr.bf16.mxu0 %v16992_v49  ;;  %v8459_v20 = vld [vmem:[%s20986_s22 + $0xee0] sm:$0xff]  ;;  %v17439_v45 = vcombine.low %v8467_v60, %v8475_v6  ;;  %v17168_v49 = vcombine.high %v8195_v11, %v8203_v30 }
0x1883   : > { %11536 = vmatprep.subr.bf16.mxu1 %v17248_v14  ;;  %v17424_v14 = vcombine.high %v8451_v0, %v8459_v20  ;;  %v8179_v29 = vld [vmem:[%s20986_s22 + $0x620] sm:$0xff] }
0x1884   : > { %v8187_v42 = vld [vmem:[%s20986_s22 + $0x660] sm:$0xff] }
0x1885   : > { %11494 = vmatpush1.bf16.msra.mxu0 %v16991_v15  ;;  %v8435_v13 = vld [vmem:[%s20986_s22 + $0xe20] sm:$0xff]  ;;  %v17167_v15 = vcombine.low %v8195_v11, %v8203_v30 }
0x1886   : > { %11537 = vmatpush1.bf16.msra.mxu1 %v17247_v54  ;;  %11495 = vmatprep.subr.bf16.mxu0 %v16976_v44  ;;  %v8443_v50 = vld [vmem:[%s20986_s22 + $0xe60] sm:$0xff]  ;;  %v17423_v54 = vcombine.low %v8451_v0, %v8459_v20  ;;  %v17152_v44 = vcombine.high %v8179_v29, %v8187_v42 }
0x1887   : > { %11538 = vmatprep.subr.bf16.mxu1 %v17232_v26  ;;  %v17408_v26 = vcombine.high %v8435_v13, %v8443_v50  ;;  %v8163_v51 = vld [vmem:[%s20986_s22 + $0x5a0] sm:$0xff] }
0x1888   : > { %v8171_v9 = vld [vmem:[%s20986_s22 + $0x5e0] sm:$0xff] }
0x1889   : > { %11496 = vmatpush1.bf16.msra.mxu0 %v16975_v62  ;;  %v8419_v61 = vld [vmem:[%s20986_s22 + $0xda0] sm:$0xff]  ;;  %v17151_v62 = vcombine.low %v8179_v29, %v8187_v42  ;;  %v8100_v29 = vld [vmem:[%s20986_s22 + $0x3a8] sm:$0xff] }
0x188a   : > { %11539 = vmatpush1.bf16.msra.mxu1 %v17231_v56  ;;  %11497 = vmatprep.subr.bf16.mxu0 %v16960_v48  ;;  %v8427_v25 = vld [vmem:[%s20986_s22 + $0xde0] sm:$0xff]  ;;  %v17407_v56 = vcombine.low %v8435_v13, %v8443_v50  ;;  %v17136_v48 = vcombine.high %v8163_v51, %v8171_v9  ;;  %v8108_v42 = vld [vmem:[%s20986_s22 + $0x3e8] sm:$0xff] }
0x188b   : > { %11540 = vmatprep.subr.bf16.mxu1 %v17216_v41  ;;  %v17392_v41 = vcombine.high %v8419_v61, %v8427_v25  ;;  %v8147_v19 = vld [vmem:[%s20986_s22 + $0x520] sm:$0xff]  ;;  %v8356_v13 = vld [vmem:[%s20986_s22 + $0xba8] sm:$0xff] }
0x188c   : > { %v8155_v39 = vld [vmem:[%s20986_s22 + $0x560] sm:$0xff]  ;;  %v8364_v50 = vld [vmem:[%s20986_s22 + $0xbe8] sm:$0xff] }
0x188d   : > { %11498 = vmatpush1.bf16.msra.mxu0 %v16959_v21  ;;  %v8403_v27 = vld [vmem:[%s20986_s22 + $0xd20] sm:$0xff]  ;;  %v17135_v21 = vcombine.low %v8163_v51, %v8171_v9  ;;  %v8084_v51 = vld [vmem:[%s20986_s22 + $0x328] sm:$0xff] }
0x188e   : > { %11541 = vmatpush1.bf16.msra.mxu1 %v17215_v31  ;;  %11499 = vmatprep.subr.bf16.mxu0 %v17200_v2  ;;  %v8411_v32 = vld [vmem:[%s20986_s22 + $0xd60] sm:$0xff]  ;;  %v17391_v31 = vcombine.low %v8419_v61, %v8427_v25  ;;  %v17120_v2 = vcombine.high %v8147_v19, %v8155_v39  ;;  %v8092_v9 = vld [vmem:[%s20986_s22 + $0x368] sm:$0xff]  ;;  %v8510_v61 = vrot.slane %v22488_v43, %v21387_v57 }
0x188f   : > { %11542 = vmatprep.subr.bf16.mxu1 %v17456_v5  ;;  %v17376_v5 = vcombine.high %v8403_v27, %v8411_v32  ;;  %v8131_v3 = vld [vmem:[%s20986_s22 + $0x4a0] sm:$0xff]  ;;  %v17073_v25 = vcombine.low %v8100_v29, %v8108_v42 }
0x1890   : > { %v8139_v55 = vld [vmem:[%s20986_s22 + $0x4e0] sm:$0xff] }
0x1891   : > { %11500 = vmatpush2.bf16.msra.mxu0 %v17199_v4  ;;  %v8387_v60 = vld [vmem:[%s20986_s22 + $0xca0] sm:$0xff]  ;;  %v17119_v4 = vcombine.low %v8147_v19, %v8155_v39  ;;  %v17329_v19 = vcombine.low %v8356_v13, %v8364_v50  ;;  %v17058_v39 = vcombine.high %v8084_v51, %v8092_v9 }
0x1892   : > { %11543 = vmatpush2.bf16.msra.mxu1 %v17455_v1  ;;  %11501 = vmatprep.subr.bf16.mxu0 %v17184_v16  ;;  %v8395_v6 = vld [vmem:[%s20986_s22 + $0xce0] sm:$0xff]  ;;  %v17375_v1 = vcombine.low %v8403_v27, %v8411_v32  ;;  %v17104_v16 = vcombine.high %v8131_v3, %v8139_v55  ;;  %v8068_v27 = vld [vmem:[%s20986_s22 + $0x2a8] sm:$0xff] }
0x1893   : > { %11544 = vmatprep.subr.bf16.mxu1 %v17440_v59  ;;  %v17360_v59 = vcombine.high %v8387_v60, %v8395_v6  ;;  %v8115_v11 = vld [vmem:[%s20986_s22 + $0x420] sm:$0xff]  ;;  %v8076_v32 = vld [vmem:[%s20986_s22 + $0x2e8] sm:$0xff] }
0x1894   : > { %v8123_v30 = vld [vmem:[%s20986_s22 + $0x460] sm:$0xff] }
0x1895   : > { %11502 = vmatpush2.bf16.msra.mxu0 %v17183_v53  ;;  %v8371_v0 = vld [vmem:[%s20986_s22 + $0xc20] sm:$0xff]  ;;  %v17103_v53 = vcombine.low %v8131_v3, %v8139_v55  ;;  %v8332_v3 = vld [vmem:[%s20986_s22 + $0xae8] sm:$0xff] }
0x1896   : > { %11545 = vmatpush2.bf16.msra.mxu1 %v17439_v45  ;;  %11503 = vmatprep.subr.bf16.mxu0 %v17168_v49  ;;  %v8379_v20 = vld [vmem:[%s20986_s22 + $0xc60] sm:$0xff]  ;;  %v17359_v45 = vcombine.low %v8387_v60, %v8395_v6  ;;  %v17088_v49 = vcombine.high %v8115_v11, %v8123_v30  ;;  %v17057_v60 = vcombine.low %v8084_v51, %v8092_v9  ;;  %v8300_v51 = vld [vmem:[%s20986_s22 + $0x9e8] sm:$0xff] }
0x1897   : > { %11546 = vmatprep.subr.bf16.mxu1 %v17424_v14  ;;  %v17344_v14 = vcombine.high %v8371_v0, %v8379_v20 }
0x1899   : > { %11504 = vmatpush2.bf16.msra.mxu0 %v17167_v15  ;;  %v17087_v15 = vcombine.low %v8115_v11, %v8123_v30  ;;  %v8052_v30 = vld [vmem:[%s20986_s22 + $0x228] sm:$0xff] }
0x189a   : > { %11547 = vmatpush2.bf16.msra.mxu1 %v17423_v54  ;;  %11505 = vmatprep.subr.bf16.mxu0 %v17152_v44  ;;  %v17343_v54 = vcombine.low %v8371_v0, %v8379_v20  ;;  %v17074_v44 = vcombine.high %v8100_v29, %v8108_v42  ;;  %v8060_v0 = vld [vmem:[%s20986_s22 + $0x268] sm:$0xff] }
0x189b   : > { %11548 = vmatprep.subr.bf16.mxu1 %v17408_v26  ;;  %v17330_v26 = vcombine.high %v8356_v13, %v8364_v50  ;;  %v17026_v13 = vcombine.high %v8052_v30, %v8060_v0 }
0x189d   : > { %11506 = vmatpush2.bf16.msra.mxu0 %v17151_v62  ;;  %v8340_v62 = vld [vmem:[%s20986_s22 + $0xb28] sm:$0xff] }
0x189e   : > { %11549 = vmatpush2.bf16.msra.mxu1 %v17407_v56  ;;  %11507 = vmatprep.subr.bf16.mxu0 %v17136_v48  ;;  %v8348_v56 = vld [vmem:[%s20986_s22 + $0xb68] sm:$0xff]  ;;  %v22572_v48 = vpop.f32.mrf.mxu0 }
0x189f   : > { %11550 = vmatprep.subr.bf16.mxu1 %v17392_v41  ;;  %v22574_v41 = vpop.f32.mrf.mxu1 }
0x18a1   : > { %11508 = vmatpush2.bf16.msra.mxu0 %v17135_v21 }
0x18a2   : > { %11551 = vmatpush2.bf16.msra.mxu1 %v17391_v31  ;;  %11509 = vmatprep.subr.bf16.mxu0 %v17120_v2  ;;  %v17314_v2 = vcombine.high %v8340_v62, %v8348_v56 }
0x18a3   : > { %11552 = vmatprep.subr.bf16.mxu1 %v17376_v5  ;;  %v8324_v5 = vld [vmem:[%s20986_s22 + $0xaa8] sm:$0xff] }
0x18a4   : > { %v17298_v11 = vcombine.high %v8324_v5, %v8332_v3  ;;  %v17297_v42 = vcombine.low %v8324_v5, %v8332_v3 }
0x18a5   : > { %11510 = vmatpush2.bf16.msra.mxu0 %v17119_v4 }
0x18a6   : > { %11553 = vmatpush2.bf16.msra.mxu1 %v17375_v1  ;;  %11511 = vmatprep.subr.bf16.mxu0 %v17104_v16  ;;  %v17313_v1 = vcombine.low %v8340_v62, %v8348_v56  ;;  %v17042_v16 = vcombine.high %v8068_v27, %v8076_v32 }
0x18a7   : > { %11554 = vmatprep.subr.bf16.mxu1 %v17360_v59 }
0x18a9   : > { %11512 = vmatpush2.bf16.msra.mxu0 %v17103_v53  ;;  %v8308_v53 = vld [vmem:[%s20986_s22 + $0xa28] sm:$0xff] }
0x18aa   : > { %11555 = vmatpush2.bf16.msra.mxu1 %v17359_v45  ;;  %11513 = vmatprep.subr.bf16.mxu0 %v17088_v49  ;;  %v8316_v45 = vld [vmem:[%s20986_s22 + $0xa68] sm:$0xff] }
0x18ab   : > { %11556 = vmatprep.subr.bf16.mxu1 %v17344_v14  ;;  %v17041_v14 = vcombine.low %v8068_v27, %v8076_v32  ;;  %v17281_v62 = vcombine.low %v8308_v53, %v8316_v45  ;;  %v8020_v27 = vld [vmem:[%s20986_s22 + $0x128] sm:$0xff] }
0x18ac   : > { %v8028_v32 = vld [vmem:[%s20986_s22 + $0x168] sm:$0xff] }
0x18ad   : > { %11514 = vmatpush2.bf16.msra.mxu0 %v17087_v15  ;;  %v17282_v15 = vcombine.high %v8308_v53, %v8316_v45  ;;  %v16994_v3 = vcombine.high %v8020_v27, %v8028_v32  ;;  %v7988_v53 = vld [vmem:[%s20986_s22 + $0x28] sm:$0xff] }
0x18ae   : > { %11557 = vmatpush2.bf16.msra.mxu1 %v17343_v54  ;;  %11569 = vmatprep.subr.bf16.mxu0 %v17074_v44  ;;  %v8036_v54 = vld [vmem:[%s20986_s22 + $0x1a8] sm:$0xff] }
0x18af   : > { %11612 = vmatprep.subr.bf16.mxu1 %v17330_v26  ;;  %v8044_v44 = vld [vmem:[%s20986_s22 + $0x1e8] sm:$0xff] }
0x18b0   : > { %v11259_v21 = vpop.f32.mrf.mxu0  ;;  %v11302_v31 = vpop.f32.mrf.mxu1  ;;  %11516 = vmatmul.mubr.bf16.vlgmr.msra.gmra.mxu0 %v22273_v38  ;;  %v8292_v26 = vld [vmem:[%s20986_s22 + $0x9a8] sm:$0xff]  ;;  %v17010_v56 = vcombine.high %v8036_v54, %v8044_v44 }
0x18b1   : > { %v11260_v55 = vadd.f32 %v11259_v21, %v8510_v61  ;;  %11559 = vmatmul.mubr.bf16.vlgmr.msra.gmra.mxu1 %v22277_v40  ;;  %11570 = vmatpush1.bf16.msra.mxu0 %v17073_v25  ;;  %v17025_v25 = vcombine.low %v8052_v30, %v8060_v0  ;;  %v8276_v21 = vld [vmem:[%s20986_s22 + $0x928] sm:$0xff]  ;;  %v17265_v5 = vcombine.low %v8292_v26, %v8300_v51 }
0x18b2   : > { %11601 = vmatprep.mubr.bf16.mxu0 %v22265_v18  ;;  %11613 = vmatpush1.bf16.msra.mxu1 %v17329_v19  ;;  %v22583_v6 = vpop.f32.mrf.mxu0  ;;  %v22585_v4 = vpop.f32.mrf.mxu1  ;;  %v7996_v45 = vld [vmem:[%s20986_s22 + $0x68] sm:$0xff] }
0x18b3   : > { %v11303_v59 = vadd.f32 %v11302_v31, %v11260_v55  ;;  %11644 = vmatprep.mubr.bf16.mxu1 %v22269_v22  ;;  %11571 = vmatprep.subr.bf16.mxu0 %v17058_v39  ;;  %v17266_v39 = vcombine.high %v8292_v26, %v8300_v51  ;;  %v8284_v31 = vld [vmem:[%s20986_s22 + $0x968] sm:$0xff]  ;;  %v16961_v51 = vcombine.low %v7988_v53, %v7996_v45 }
0x18b4   : > { %v11263_v20 = vpop.f32.mrf.mxu0  ;;  %11614 = vmatprep.subr.bf16.mxu1 %v17314_v2  ;;  %v11306_v29 = vpop.f32.mrf.mxu1  ;;  %v17009_v2 = vcombine.low %v8036_v54, %v8044_v44  ;;  %v17250_v55 = vcombine.high %v8276_v21, %v8284_v31  ;;  %v17249_v30 = vcombine.low %v8276_v21, %v8284_v31  ;;  %v8236_v54 = vld [vmem:[%s20986_s22 + $0x7e8] sm:$0xff] }
0x18b5   : > { %v11264_v49 = vadd.f32 %v11263_v20, %v8510_v61  ;;  %11572 = vmatpush1.bf16.msra.mxu0 %v17057_v60  ;;  %v11829_v9 = vmax.f32 %v11303_v59, 0.0  ;;  %v8004_v60 = vld [vmem:[%s20986_s22 + $0xa8] sm:$0xff] }
0x18b6   : > { %11615 = vmatpush1.bf16.msra.mxu1 %v17313_v1  ;;  %11573 = vmatprep.subr.bf16.mxu0 %v17042_v16  ;;  %v8012_v1 = vld [vmem:[%s20986_s22 + $0xe8] sm:$0xff] }
0x18b7   : > { %v11307_v50 = vadd.f32 %v11306_v29, %v11264_v49  ;;  %11616 = vmatprep.subr.bf16.mxu1 %v17298_v11  ;;  %v8260_v16 = vld [vmem:[%s20986_s22 + $0x8a8] sm:$0xff]  ;;  %v16993_v11 = vcombine.low %v8020_v27, %v8028_v32  ;;  %v16978_v0 = vcombine.high %v8004_v60, %v8012_v1  ;;  %v16977_v29 = vcombine.low %v8004_v60, %v8012_v1 }
0x18b8   : > { %v8268_v59 = vld [vmem:[%s20986_s22 + $0x8e8] sm:$0xff] }
0x18b9   : > { %v11845_v61 = vmax.f32 %v11307_v50, 0.0  ;;  %11574 = vmatpush1.bf16.msra.mxu0 %v17041_v14  ;;  %v17234_v20 = vcombine.high %v8260_v16, %v8268_v59  ;;  %v8244_v49 = vld [vmem:[%s20986_s22 + $0x828] sm:$0xff] }
0x18ba   : > { %11617 = vmatpush1.bf16.msra.mxu1 %v17297_v42  ;;  %11575 = vmatprep.subr.bf16.mxu0 %v17026_v13  ;;  %v8252_v14 = vld [vmem:[%s20986_s22 + $0x868] sm:$0xff]  ;;  %v17233_v42 = vcombine.low %v8260_v16, %v8268_v59  ;;  %v16962_v13 = vcombine.high %v7988_v53, %v7996_v45 }
0x18bb   : > { %v22596_v19 = vpack.c.bf16 %v11845_v61, %v11829_v9  ;;  %11618 = vmatprep.subr.bf16.mxu1 %v17282_v15  ;;  %v17218_v50 = vcombine.high %v8244_v49, %v8252_v14  ;;  %v8228_v15 = vld [vmem:[%s20986_s22 + $0x7a8] sm:$0xff]  ;;  %v17217_v9 = vcombine.low %v8244_v49, %v8252_v14 }
0x18bc   : > { %v8484_v44 = vld [vmem:[%s20986_s22 + $0xfa8] sm:$0xff]  ;;  %v17202_v61 = vcombine.high %v8228_v15, %v8236_v54  ;;  %v17201_v32 = vcombine.low %v8228_v15, %v8236_v54 }
0x18bd   : > { %11576 = vmatpush1.bf16.msra.mxu0 %v17025_v25  ;;  %v8492_v26 = vld [vmem:[%s20986_s22 + $0xfe8] sm:$0xff] }
0x18be   : > { %11619 = vmatpush1.bf16.msra.mxu1 %v17281_v62  ;;  %11577 = vmatprep.subr.bf16.mxu0 %v17010_v56  ;;  %v17458_v25 = vcombine.high %v8484_v44, %v8492_v26  ;;  %v8212_v62 = vld [vmem:[%s20986_s22 + $0x728] sm:$0xff]  ;;  %v17457_v21 = vcombine.low %v8484_v44, %v8492_v26 }
0x18bf   : > { %11620 = vmatprep.subr.bf16.mxu1 %v17266_v39  ;;  %v8220_v56 = vld [vmem:[%s20986_s22 + $0x768] sm:$0xff] }
0x18c0   : > { %v8468_v39 = vld [vmem:[%s20986_s22 + $0xf28] sm:$0xff]  ;;  %v17186_v31 = vcombine.high %v8212_v62, %v8220_v56  ;;  %v17185_v1 = vcombine.low %v8212_v62, %v8220_v56 }
0x18c1   : > { %11578 = vmatpush1.bf16.msra.mxu0 %v17009_v2  ;;  %v8476_v27 = vld [vmem:[%s20986_s22 + $0xf68] sm:$0xff] }
0x18c2   : > { %11621 = vmatpush1.bf16.msra.mxu1 %v17265_v5  ;;  %11579 = vmatprep.subr.bf16.mxu0 %v16994_v3  ;;  %v17442_v2 = vcombine.high %v8468_v39, %v8476_v27  ;;  %v8196_v5 = vld [vmem:[%s20986_s22 + $0x6a8] sm:$0xff]  ;;  %v17441_v16 = vcombine.low %v8468_v39, %v8476_v27 }
0x18c3   : > { %11622 = vmatprep.subr.bf16.mxu1 %v17250_v55  ;;  %v8204_v3 = vld [vmem:[%s20986_s22 + $0x6e8] sm:$0xff] }
0x18c4   : > { %v8452_v55 = vld [vmem:[%s20986_s22 + $0xea8] sm:$0xff]  ;;  %v17170_v59 = vcombine.high %v8196_v5, %v8204_v3  ;;  %v17169_v45 = vcombine.low %v8196_v5, %v8204_v3 }
0x18c5   : > { %11580 = vmatpush1.bf16.msra.mxu0 %v16993_v11  ;;  %v8460_v60 = vld [vmem:[%s20986_s22 + $0xee8] sm:$0xff] }
0x18c6   : > { %11623 = vmatpush1.bf16.msra.mxu1 %v17249_v30  ;;  %11581 = vmatprep.subr.bf16.mxu0 %v16978_v0  ;;  %v17426_v11 = vcombine.high %v8452_v55, %v8460_v60  ;;  %v8180_v30 = vld [vmem:[%s20986_s22 + $0x628] sm:$0xff]  ;;  %v17425_v49 = vcombine.low %v8452_v55, %v8460_v60 }
0x18c7   : > { %11624 = vmatprep.subr.bf16.mxu1 %v17234_v20  ;;  %v8188_v0 = vld [vmem:[%s20986_s22 + $0x668] sm:$0xff] }
0x18c8   : > { %v8436_v20 = vld [vmem:[%s20986_s22 + $0xe28] sm:$0xff]  ;;  %v17154_v14 = vcombine.high %v8180_v30, %v8188_v0  ;;  %v17153_v54 = vcombine.low %v8180_v30, %v8188_v0 }
0x18c9   : > { %11582 = vmatpush1.bf16.msra.mxu0 %v16977_v29  ;;  %v8444_v53 = vld [vmem:[%s20986_s22 + $0xe68] sm:$0xff] }
0x18ca   : > { %11625 = vmatpush1.bf16.msra.mxu1 %v17233_v42  ;;  %11583 = vmatprep.subr.bf16.mxu0 %v16962_v13  ;;  %v17410_v29 = vcombine.high %v8436_v20, %v8444_v53  ;;  %v8164_v42 = vld [vmem:[%s20986_s22 + $0x5a8] sm:$0xff]  ;;  %v17409_v44 = vcombine.low %v8436_v20, %v8444_v53 }
0x18cb   : > { %11626 = vmatprep.subr.bf16.mxu1 %v17218_v50  ;;  %v8172_v13 = vld [vmem:[%s20986_s22 + $0x5e8] sm:$0xff] }
0x18cc   : > { %v8420_v50 = vld [vmem:[%s20986_s22 + $0xda8] sm:$0xff]  ;;  %v17138_v26 = vcombine.high %v8164_v42, %v8172_v13  ;;  %v17137_v56 = vcombine.low %v8164_v42, %v8172_v13  ;;  %v8365_v42 = vld [vmem:[%s20986_s22 + $0xbf0] sm:$0xff] }
0x18cd   : > { %11584 = vmatpush1.bf16.msra.mxu0 %v16961_v51  ;;  %v8428_v15 = vld [vmem:[%s20986_s22 + $0xde8] sm:$0xff] }
0x18ce   : > { %11627 = vmatpush1.bf16.msra.mxu1 %v17217_v9  ;;  %11585 = vmatprep.subr.bf16.mxu0 %v17202_v61  ;;  %v17394_v51 = vcombine.high %v8420_v50, %v8428_v15  ;;  %v8148_v9 = vld [vmem:[%s20986_s22 + $0x528] sm:$0xff]  ;;  %v17393_v39 = vcombine.low %v8420_v50, %v8428_v15 }
0x18cf   : > { %11628 = vmatprep.subr.bf16.mxu1 %v17458_v25  ;;  %v8156_v61 = vld [vmem:[%s20986_s22 + $0x568] sm:$0xff] }
0x18d0   : > { %v8404_v25 = vld [vmem:[%s20986_s22 + $0xd28] sm:$0xff]  ;;  %v17122_v27 = vcombine.high %v8148_v9, %v8156_v61  ;;  %v17121_v3 = vcombine.low %v8148_v9, %v8156_v61  ;;  %v8341_v61 = vld [vmem:[%s20986_s22 + $0xb30] sm:$0xff] }
0x18d1   : > { %11586 = vmatpush2.bf16.msra.mxu0 %v17201_v32  ;;  %v8412_v62 = vld [vmem:[%s20986_s22 + $0xd68] sm:$0xff] }
0x18d2   : > { %11629 = vmatpush2.bf16.msra.mxu1 %v17457_v21  ;;  %11587 = vmatprep.subr.bf16.mxu0 %v17186_v31  ;;  %v17378_v32 = vcombine.high %v8404_v25, %v8412_v62  ;;  %v8132_v21 = vld [vmem:[%s20986_s22 + $0x4a8] sm:$0xff]  ;;  %v17377_v55 = vcombine.low %v8404_v25, %v8412_v62  ;;  %v8349_v25 = vld [vmem:[%s20986_s22 + $0xb70] sm:$0xff]  ;;  %v22652_v62 = vpop.f32.mrf.mxu0 }
0x18d3   : > { %11630 = vmatprep.subr.bf16.mxu1 %v17442_v2  ;;  %v8140_v31 = vld [vmem:[%s20986_s22 + $0x4e8] sm:$0xff] }
0x18d4   : > { %v8388_v2 = vld [vmem:[%s20986_s22 + $0xca8] sm:$0xff]  ;;  %v17106_v60 = vcombine.high %v8132_v21, %v8140_v31  ;;  %v17105_v0 = vcombine.low %v8132_v21, %v8140_v31  ;;  %v8077_v21 = vld [vmem:[%s20986_s22 + $0x2f0] sm:$0xff] }
0x18d5   : > { %11588 = vmatpush2.bf16.msra.mxu0 %v17185_v1  ;;  %v8396_v5 = vld [vmem:[%s20986_s22 + $0xce8] sm:$0xff] }
0x18d6   : > { %11631 = vmatpush2.bf16.msra.mxu1 %v17441_v16  ;;  %11589 = vmatprep.subr.bf16.mxu0 %v17170_v59  ;;  %v17362_v1 = vcombine.high %v8388_v2, %v8396_v5  ;;  %v8116_v16 = vld [vmem:[%s20986_s22 + $0x428] sm:$0xff]  ;;  %v17361_v20 = vcombine.low %v8388_v2, %v8396_v5  ;;  %v8325_v2 = vld [vmem:[%s20986_s22 + $0xab0] sm:$0xff] }
0x18d7   : > { %11632 = vmatprep.subr.bf16.mxu1 %v17426_v11  ;;  %v8124_v59 = vld [vmem:[%s20986_s22 + $0x468] sm:$0xff]  ;;  %v8333_v5 = vld [vmem:[%s20986_s22 + $0xaf0] sm:$0xff] }
0x18d8   : > { %v8372_v11 = vld [vmem:[%s20986_s22 + $0xc28] sm:$0xff]  ;;  %v17090_v53 = vcombine.high %v8116_v16, %v8124_v59  ;;  %v17089_v13 = vcombine.low %v8116_v16, %v8124_v59  ;;  %v17315_v16 = vcombine.low %v8341_v61, %v8349_v25 }
0x18d9   : > { %11590 = vmatpush2.bf16.msra.mxu0 %v17169_v45  ;;  %v8380_v30 = vld [vmem:[%s20986_s22 + $0xc68] sm:$0xff] }
0x18da   : > { %11633 = vmatpush2.bf16.msra.mxu1 %v17425_v49  ;;  %11591 = vmatprep.subr.bf16.mxu0 %v17154_v14  ;;  %v17346_v45 = vcombine.high %v8372_v11, %v8380_v30  ;;  %v8101_v49 = vld [vmem:[%s20986_s22 + $0x3b0] sm:$0xff]  ;;  %v17345_v50 = vcombine.low %v8372_v11, %v8380_v30 }
0x18db   : > { %11634 = vmatprep.subr.bf16.mxu1 %v17410_v29  ;;  %v8109_v14 = vld [vmem:[%s20986_s22 + $0x3f0] sm:$0xff] }
0x18dc   : > { %v8357_v29 = vld [vmem:[%s20986_s22 + $0xbb0] sm:$0xff]  ;;  %v17076_v15 = vcombine.high %v8101_v49, %v8109_v14  ;;  %v17075_v9 = vcombine.low %v8101_v49, %v8109_v14 }
0x18dd   : > { %11592 = vmatpush2.bf16.msra.mxu0 %v17153_v54  ;;  %v17332_v54 = vcombine.high %v8357_v29, %v8365_v42  ;;  %v8309_v49 = vld [vmem:[%s20986_s22 + $0xa30] sm:$0xff] }
0x18de   : > { %11635 = vmatpush2.bf16.msra.mxu1 %v17409_v44  ;;  %11593 = vmatprep.subr.bf16.mxu0 %v17138_v26  ;;  %v8085_v44 = vld [vmem:[%s20986_s22 + $0x330] sm:$0xff] }
0x18df   : > { %11636 = vmatprep.subr.bf16.mxu1 %v17394_v51  ;;  %v8093_v26 = vld [vmem:[%s20986_s22 + $0x370] sm:$0xff]  ;;  %v8518_v51 = vrot.slane %v22488_v43, %v21480_v33  ;;  %v17316_v43 = vcombine.high %v8341_v61, %v8349_v25 }
0x18e0   : > { %v8317_v14 = vld [vmem:[%s20986_s22 + $0xa70] sm:$0xff] }
0x18e1   : > { %11594 = vmatpush2.bf16.msra.mxu0 %v17137_v56  ;;  %v17331_v56 = vcombine.low %v8357_v29, %v8365_v42  ;;  %v8293_v61 = vld [vmem:[%s20986_s22 + $0x9b0] sm:$0xff] }
0x18e2   : > { %11637 = vmatpush2.bf16.msra.mxu1 %v17393_v39  ;;  %11595 = vmatprep.subr.bf16.mxu0 %v17122_v27  ;;  %v22654_v39 = vpop.f32.mrf.mxu1  ;;  %v17060_v27 = vcombine.high %v8085_v44, %v8093_v26  ;;  %v8301_v25 = vld [vmem:[%s20986_s22 + $0x9f0] sm:$0xff] }
0x18e3   : > { %11638 = vmatprep.subr.bf16.mxu1 %v17378_v32  ;;  %v8069_v32 = vld [vmem:[%s20986_s22 + $0x2b0] sm:$0xff] }
0x18e4   : > { %v17044_v59 = vcombine.high %v8069_v32, %v8077_v21  ;;  %v17043_v42 = vcombine.low %v8069_v32, %v8077_v21  ;;  %v17283_v32 = vcombine.low %v8309_v49, %v8317_v14 }
0x18e5   : > { %11596 = vmatpush2.bf16.msra.mxu0 %v17121_v3 }
0x18e6   : > { %11639 = vmatpush2.bf16.msra.mxu1 %v17377_v55  ;;  %11597 = vmatprep.subr.bf16.mxu0 %v17106_v60  ;;  %v17059_v60 = vcombine.low %v8085_v44, %v8093_v26  ;;  %v17284_v44 = vcombine.high %v8309_v49, %v8317_v14  ;;  %v8037_v26 = vld [vmem:[%s20986_s22 + $0x1b0] sm:$0xff] }
0x18e7   : > { %11640 = vmatprep.subr.bf16.mxu1 %v17362_v1 }
0x18e9   : > { %11598 = vmatpush2.bf16.msra.mxu0 %v17105_v0  ;;  %v17300_v0 = vcombine.high %v8325_v2, %v8333_v5 }
0x18ea   : > { %11641 = vmatpush2.bf16.msra.mxu1 %v17361_v20  ;;  %11599 = vmatprep.subr.bf16.mxu0 %v17090_v53  ;;  %v8053_v20 = vld [vmem:[%s20986_s22 + $0x230] sm:$0xff] }
0x18eb   : > { %11642 = vmatprep.subr.bf16.mxu1 %v17346_v45  ;;  %v8061_v53 = vld [vmem:[%s20986_s22 + $0x270] sm:$0xff] }
0x18ed   : > { %11600 = vmatpush2.bf16.msra.mxu0 %v17089_v13 }
0x18ee   : > { %11643 = vmatpush2.bf16.msra.mxu1 %v17345_v50  ;;  %11655 = vmatprep.subr.bf16.mxu0 %v17076_v15  ;;  %v17299_v50 = vcombine.low %v8325_v2, %v8333_v5  ;;  %v17028_v15 = vcombine.high %v8053_v20, %v8061_v53  ;;  %v8021_v2 = vld [vmem:[%s20986_s22 + $0x130] sm:$0xff] }
0x18ef   : > { %11698 = vmatprep.subr.bf16.mxu1 %v17332_v54  ;;  %v8029_v5 = vld [vmem:[%s20986_s22 + $0x170] sm:$0xff] }
0x18f0   : > { %v11345_v31 = vpop.f32.mrf.mxu0  ;;  %11602 = vmatmul.mubr.bf16.vlgmr.msra.gmra.mxu0 %v22273_v38  ;;  %v16995_v49 = vcombine.low %v8021_v2, %v8029_v5 }
0x18f1   : > { %v11346_v3 = vadd.f32 %v11345_v31, %v8518_v51  ;;  %v11388_v55 = vpop.f32.mrf.mxu1  ;;  %11645 = vmatmul.mubr.bf16.vlgmr.msra.gmra.mxu1 %v22277_v40  ;;  %11656 = vmatpush1.bf16.msra.mxu0 %v17075_v9  ;;  %v8045_v9 = vld [vmem:[%s20986_s22 + $0x1f0] sm:$0xff] }
0x18f2   : > { %11687 = vmatprep.mubr.bf16.mxu0 %v22265_v18  ;;  %11699 = vmatpush1.bf16.msra.mxu1 %v17331_v56  ;;  %v22663_v1 = vpop.f32.mrf.mxu0  ;;  %v17012_v21 = vcombine.high %v8037_v26, %v8045_v9 }
0x18f3   : > { %v11389_v11 = vadd.f32 %v11388_v55, %v11346_v3  ;;  %11730 = vmatprep.mubr.bf16.mxu1 %v22269_v22  ;;  %v22666_v30 = vpop.f32.mrf.mxu1  ;;  %11657 = vmatprep.subr.bf16.mxu0 %v17060_v27  ;;  %v17027_v27 = vcombine.low %v8053_v20, %v8061_v53  ;;  %v8277_v3 = vld [vmem:[%s20986_s22 + $0x930] sm:$0xff] }
0x18f4   : > { %v11349_v45 = vpop.f32.mrf.mxu0  ;;  %11700 = vmatprep.subr.bf16.mxu1 %v17316_v43  ;;  %v17268_v43 = vcombine.high %v8293_v61, %v8301_v25  ;;  %v8285_v55 = vld [vmem:[%s20986_s22 + $0x970] sm:$0xff] }
0x18f5   : > { %v11350_v29 = vadd.f32 %v11349_v45, %v8518_v51  ;;  %11658 = vmatpush1.bf16.msra.mxu0 %v17059_v60  ;;  %v11392_v13 = vpop.f32.mrf.mxu1  ;;  %v11831_v56 = vmax.f32 %v11389_v11, 0.0  ;;  %v17011_v60 = vcombine.low %v8037_v26, %v8045_v9  ;;  %v17252_v11 = vcombine.high %v8277_v3, %v8285_v55  ;;  %v8013_v20 = vld [vmem:[%s20986_s22 + $0xf0] sm:$0xff] }
0x18f6   : > { %11701 = vmatpush1.bf16.msra.mxu1 %v17315_v16  ;;  %11659 = vmatprep.subr.bf16.mxu0 %v17044_v59  ;;  %v17267_v16 = vcombine.low %v8293_v61, %v8301_v25  ;;  %v16996_v59 = vcombine.high %v8021_v2, %v8029_v5  ;;  %v8261_v53 = vld [vmem:[%s20986_s22 + $0x8b0] sm:$0xff]  ;;  %v17251_v14 = vcombine.low %v8277_v3, %v8285_v55 }
0x18f7   : > { %v11393_v54 = vadd.f32 %v11392_v13, %v11350_v29  ;;  %11702 = vmatprep.subr.bf16.mxu1 %v17300_v0  ;;  %v8005_v0 = vld [vmem:[%s20986_s22 + $0xb0] sm:$0xff] }
0x18f8   : > { %v8269_v45 = vld [vmem:[%s20986_s22 + $0x8f0] sm:$0xff]  ;;  %v16980_v29 = vcombine.high %v8005_v0, %v8013_v20 }
0x18f9   : > { %v11847_v51 = vmax.f32 %v11393_v54, 0.0  ;;  %11660 = vmatpush1.bf16.msra.mxu0 %v17043_v42  ;;  %v17236_v42 = vcombine.high %v8261_v53, %v8269_v45  ;;  %v7989_v13 = vld [vmem:[%s20986_s22 + $0x30] sm:$0xff]  ;;  %v17235_v26 = vcombine.low %v8261_v53, %v8269_v45 }
0x18fa   : > { %11703 = vmatpush1.bf16.msra.mxu1 %v17299_v50  ;;  %11661 = vmatprep.subr.bf16.mxu0 %v17028_v15  ;;  %v7997_v50 = vld [vmem:[%s20986_s22 + $0x70] sm:$0xff] }
0x18fb   : > { %v22676_v31 = vpack.c.bf16 %v11847_v51, %v11831_v56  ;;  %11704 = vmatprep.subr.bf16.mxu1 %v17284_v44  ;;  %v8245_v15 = vld [vmem:[%s20986_s22 + $0x830] sm:$0xff]  ;;  %v16979_v44 = vcombine.low %v8005_v0, %v8013_v20  ;;  %v16964_v9 = vcombine.high %v7989_v13, %v7997_v50 }
0x18fc   : > { %v8253_v54 = vld [vmem:[%s20986_s22 + $0x870] sm:$0xff] }
0x18fd   : > { %11662 = vmatpush1.bf16.msra.mxu0 %v17027_v27  ;;  %v17220_v61 = vcombine.high %v8245_v15, %v8253_v54  ;;  %v8229_v25 = vld [vmem:[%s20986_s22 + $0x7b0] sm:$0xff] }
0x18fe   : > { %11705 = vmatpush1.bf16.msra.mxu1 %v17283_v32  ;;  %11663 = vmatprep.subr.bf16.mxu0 %v17012_v21  ;;  %v8237_v56 = vld [vmem:[%s20986_s22 + $0x7f0] sm:$0xff]  ;;  %v16963_v32 = vcombine.low %v7989_v13, %v7997_v50  ;;  %v17219_v21 = vcombine.low %v8245_v15, %v8253_v54 }
0x18ff   : > { %11706 = vmatprep.subr.bf16.mxu1 %v17268_v43  ;;  %v8485_v51 = vld [vmem:[%s20986_s22 + $0xfb0] sm:$0xff]  ;;  %v17204_v43 = vcombine.high %v8229_v25, %v8237_v56 }
0x1900   : > { %v8493_v27 = vld [vmem:[%s20986_s22 + $0xff0] sm:$0xff] }
0x1901   : > { %11664 = vmatpush1.bf16.msra.mxu0 %v17011_v60  ;;  %v17460_v2 = vcombine.high %v8485_v51, %v8493_v27  ;;  %v8213_v5 = vld [vmem:[%s20986_s22 + $0x730] sm:$0xff] }
0x1902   : > { %11707 = vmatpush1.bf16.msra.mxu1 %v17267_v16  ;;  %11665 = vmatprep.subr.bf16.mxu0 %v16996_v59  ;;  %v8221_v3 = vld [vmem:[%s20986_s22 + $0x770] sm:$0xff]  ;;  %v17203_v16 = vcombine.low %v8229_v25, %v8237_v56  ;;  %v17459_v59 = vcombine.low %v8485_v51, %v8493_v27 }
0x1903   : > { %11708 = vmatprep.subr.bf16.mxu1 %v17252_v11  ;;  %v8469_v55 = vld [vmem:[%s20986_s22 + $0xf30] sm:$0xff]  ;;  %v17188_v11 = vcombine.high %v8213_v5, %v8221_v3 }
0x1904   : > { %v8477_v60 = vld [vmem:[%s20986_s22 + $0xf70] sm:$0xff] }
0x1905   : > { %11666 = vmatpush1.bf16.msra.mxu0 %v16995_v49  ;;  %v17444_v0 = vcombine.high %v8469_v55, %v8477_v60  ;;  %v8197_v20 = vld [vmem:[%s20986_s22 + $0x6b0] sm:$0xff] }
0x1906   : > { %11709 = vmatpush1.bf16.msra.mxu1 %v17251_v14  ;;  %11667 = vmatprep.subr.bf16.mxu0 %v16980_v29  ;;  %v8205_v53 = vld [vmem:[%s20986_s22 + $0x6f0] sm:$0xff]  ;;  %v17187_v14 = vcombine.low %v8213_v5, %v8221_v3  ;;  %v17443_v29 = vcombine.low %v8469_v55, %v8477_v60 }
0x1907   : > { %11710 = vmatprep.subr.bf16.mxu1 %v17236_v42  ;;  %v8453_v45 = vld [vmem:[%s20986_s22 + $0xeb0] sm:$0xff]  ;;  %v17172_v42 = vcombine.high %v8197_v20, %v8205_v53 }
0x1908   : > { %v8461_v49 = vld [vmem:[%s20986_s22 + $0xef0] sm:$0xff] }
0x1909   : > { %11668 = vmatpush1.bf16.msra.mxu0 %v16979_v44  ;;  %v17428_v13 = vcombine.high %v8453_v45, %v8461_v49  ;;  %v8181_v50 = vld [vmem:[%s20986_s22 + $0x630] sm:$0xff] }
0x190a   : > { %11711 = vmatpush1.bf16.msra.mxu1 %v17235_v26  ;;  %11669 = vmatprep.subr.bf16.mxu0 %v16964_v9  ;;  %v8189_v15 = vld [vmem:[%s20986_s22 + $0x670] sm:$0xff]  ;;  %v17171_v26 = vcombine.low %v8197_v20, %v8205_v53  ;;  %v17427_v9 = vcombine.low %v8453_v45, %v8461_v49 }
0x190b   : > { %11712 = vmatprep.subr.bf16.mxu1 %v17220_v61  ;;  %v8437_v54 = vld [vmem:[%s20986_s22 + $0xe30] sm:$0xff]  ;;  %v17156_v61 = vcombine.high %v8181_v50, %v8189_v15 }
0x190c   : > { %v8445_v44 = vld [vmem:[%s20986_s22 + $0xe70] sm:$0xff] }
0x190d   : > { %11670 = vmatpush1.bf16.msra.mxu0 %v16963_v32  ;;  %v17412_v25 = vcombine.high %v8437_v54, %v8445_v44  ;;  %v8165_v56 = vld [vmem:[%s20986_s22 + $0x5b0] sm:$0xff] }
0x190e   : > { %11713 = vmatpush1.bf16.msra.mxu1 %v17219_v21  ;;  %11671 = vmatprep.subr.bf16.mxu0 %v17204_v43  ;;  %v8173_v51 = vld [vmem:[%s20986_s22 + $0x5f0] sm:$0xff]  ;;  %v17155_v21 = vcombine.low %v8181_v50, %v8189_v15  ;;  %v17411_v43 = vcombine.low %v8437_v54, %v8445_v44 }
0x190f   : > { %11714 = vmatprep.subr.bf16.mxu1 %v17460_v2  ;;  %v8421_v27 = vld [vmem:[%s20986_s22 + $0xdb0] sm:$0xff]  ;;  %v17140_v2 = vcombine.high %v8165_v56, %v8173_v51 }
0x1910   : > { %v8429_v32 = vld [vmem:[%s20986_s22 + $0xdf0] sm:$0xff] }
0x1911   : > { %11672 = vmatpush2.bf16.msra.mxu0 %v17203_v16  ;;  %v17396_v5 = vcombine.high %v8421_v27, %v8429_v32  ;;  %v8149_v3 = vld [vmem:[%s20986_s22 + $0x530] sm:$0xff] }
0x1912   : > { %11715 = vmatpush2.bf16.msra.mxu1 %v17459_v59  ;;  %11673 = vmatprep.subr.bf16.mxu0 %v17188_v11  ;;  %v8157_v55 = vld [vmem:[%s20986_s22 + $0x570] sm:$0xff]  ;;  %v17139_v59 = vcombine.low %v8165_v56, %v8173_v51  ;;  %v17395_v11 = vcombine.low %v8421_v27, %v8429_v32  ;;  %v8102_v51 = vld [vmem:[%s20986_s22 + $0x3b8] sm:$0xff] }
0x1913   : > { %11716 = vmatprep.subr.bf16.mxu1 %v17444_v0  ;;  %v8405_v60 = vld [vmem:[%s20986_s22 + $0xd30] sm:$0xff]  ;;  %v17124_v0 = vcombine.high %v8149_v3, %v8157_v55  ;;  %v8110_v27 = vld [vmem:[%s20986_s22 + $0x3f8] sm:$0xff] }
0x1914   : > { %v8413_v16 = vld [vmem:[%s20986_s22 + $0xd70] sm:$0xff]  ;;  %v8358_v32 = vld [vmem:[%s20986_s22 + $0xbb8] sm:$0xff] }
0x1915   : > { %11674 = vmatpush2.bf16.msra.mxu0 %v17187_v14  ;;  %v17380_v20 = vcombine.high %v8405_v60, %v8413_v16  ;;  %v8133_v53 = vld [vmem:[%s20986_s22 + $0x4b0] sm:$0xff] }
0x1916   : > { %11717 = vmatpush2.bf16.msra.mxu1 %v17443_v29  ;;  %11675 = vmatprep.subr.bf16.mxu0 %v17172_v42  ;;  %v8141_v45 = vld [vmem:[%s20986_s22 + $0x4f0] sm:$0xff]  ;;  %v17123_v29 = vcombine.low %v8149_v3, %v8157_v55  ;;  %v17379_v42 = vcombine.low %v8405_v60, %v8413_v16  ;;  %v8086_v55 = vld [vmem:[%s20986_s22 + $0x338] sm:$0xff] }
0x1917   : > { %11718 = vmatprep.subr.bf16.mxu1 %v17428_v13  ;;  %v8389_v49 = vld [vmem:[%s20986_s22 + $0xcb0] sm:$0xff]  ;;  %v17108_v13 = vcombine.high %v8133_v53, %v8141_v45  ;;  %v8094_v60 = vld [vmem:[%s20986_s22 + $0x378] sm:$0xff] }
0x1918   : > { %v8397_v14 = vld [vmem:[%s20986_s22 + $0xcf0] sm:$0xff] }
0x1919   : > { %11676 = vmatpush2.bf16.msra.mxu0 %v17171_v26  ;;  %v17364_v50 = vcombine.high %v8389_v49, %v8397_v14  ;;  %v8117_v15 = vld [vmem:[%s20986_s22 + $0x430] sm:$0xff] }
0x191a   : > { %11719 = vmatpush2.bf16.msra.mxu1 %v17427_v9  ;;  %11677 = vmatprep.subr.bf16.mxu0 %v17156_v61  ;;  %v8125_v54 = vld [vmem:[%s20986_s22 + $0x470] sm:$0xff]  ;;  %v17107_v9 = vcombine.low %v8133_v53, %v8141_v45  ;;  %v17363_v61 = vcombine.low %v8389_v49, %v8397_v14  ;;  %v22735_v53 = vpop.f32.mrf.mxu0  ;;  %v22737_v49 = vpop.f32.mrf.mxu1  ;;  %v17062_v14 = vcombine.high %v8086_v55, %v8094_v60 }
0x191b   : > { %11720 = vmatprep.subr.bf16.mxu1 %v17412_v25  ;;  %v8373_v44 = vld [vmem:[%s20986_s22 + $0xc30] sm:$0xff]  ;;  %v17092_v25 = vcombine.high %v8117_v15, %v8125_v54 }
0x191c   : > { %v8381_v26 = vld [vmem:[%s20986_s22 + $0xc70] sm:$0xff] }
0x191d   : > { %11678 = vmatpush2.bf16.msra.mxu0 %v17155_v21  ;;  %v17348_v56 = vcombine.high %v8373_v44, %v8381_v26  ;;  %v8366_v21 = vld [vmem:[%s20986_s22 + $0xbf8] sm:$0xff]  ;;  %v22729_v16 = vld [vmem:[%s20993_s20] sm:$0xff] }
0x191e   : > { %11721 = vmatpush2.bf16.msra.mxu1 %v17411_v43  ;;  %11679 = vmatprep.subr.bf16.mxu0 %v17140_v2  ;;  %v17091_v43 = vcombine.low %v8117_v15, %v8125_v54  ;;  %v17347_v2 = vcombine.low %v8373_v44, %v8381_v26  ;;  %v17334_v3 = vcombine.high %v8358_v32, %v8366_v21  ;;  %v8326_v15 = vld [vmem:[%s20986_s22 + $0xab8] sm:$0xff] }
0x191f   : > { %11722 = vmatprep.subr.bf16.mxu1 %v17396_v5  ;;  %v17078_v5 = vcombine.high %v8102_v51, %v8110_v27  ;;  %v17333_v45 = vcombine.low %v8358_v32, %v8366_v21  ;;  %v8334_v54 = vld [vmem:[%s20986_s22 + $0xaf8] sm:$0xff] }
0x1920   : > { %v17302_v32 = vcombine.high %v8326_v15, %v8334_v54  ;;  %v8054_v21 = vld [vmem:[%s20986_s22 + $0x238] sm:$0xff] }
0x1921   : > { %11680 = vmatpush2.bf16.msra.mxu0 %v17139_v59  ;;  %v8526_v59 = vrot.slane %v22729_v16, %v21532_v46 }
0x1922   : > { %11723 = vmatpush2.bf16.msra.mxu1 %v17395_v11  ;;  %11681 = vmatprep.subr.bf16.mxu0 %v17124_v0  ;;  %v17077_v11 = vcombine.low %v8102_v51, %v8110_v27  ;;  %v8342_v0 = vld [vmem:[%s20986_s22 + $0xb38] sm:$0xff] }
0x1923   : > { %11724 = vmatprep.subr.bf16.mxu1 %v17380_v20  ;;  %v8350_v20 = vld [vmem:[%s20986_s22 + $0xb78] sm:$0xff] }
0x1925   : > { %11682 = vmatpush2.bf16.msra.mxu0 %v17123_v29  ;;  %v8070_v29 = vld [vmem:[%s20986_s22 + $0x2b8] sm:$0xff] }
0x1926   : > { %11725 = vmatpush2.bf16.msra.mxu1 %v17379_v42  ;;  %11683 = vmatprep.subr.bf16.mxu0 %v17108_v13  ;;  %v8078_v42 = vld [vmem:[%s20986_s22 + $0x2f8] sm:$0xff] }
0x1927   : > { %11726 = vmatprep.subr.bf16.mxu1 %v17364_v50  ;;  %v17318_v50 = vcombine.high %v8342_v0, %v8350_v20 }
0x1929   : > { %11684 = vmatpush2.bf16.msra.mxu0 %v17107_v9  ;;  %v17061_v9 = vcombine.low %v8086_v55, %v8094_v60  ;;  %v17045_v55 = vcombine.low %v8070_v29, %v8078_v42 }
0x192a   : > { %11727 = vmatpush2.bf16.msra.mxu1 %v17363_v61  ;;  %11685 = vmatprep.subr.bf16.mxu0 %v17092_v25  ;;  %v17317_v25 = vcombine.low %v8342_v0, %v8350_v20 }
0x192b   : > { %11728 = vmatprep.subr.bf16.mxu1 %v17348_v56  ;;  %v17046_v56 = vcombine.high %v8070_v29, %v8078_v42 }
0x192d   : > { %11686 = vmatpush2.bf16.msra.mxu0 %v17091_v43  ;;  %v8062_v43 = vld [vmem:[%s20986_s22 + $0x278] sm:$0xff] }
0x192e   : > { %11729 = vmatpush2.bf16.msra.mxu1 %v17347_v2  ;;  %11741 = vmatprep.subr.bf16.mxu0 %v17078_v5  ;;  %v8318_v5 = vld [vmem:[%s20986_s22 + $0xa78] sm:$0xff]  ;;  %v17029_v29 = vcombine.low %v8054_v21, %v8062_v43 }
0x192f   : > { %11784 = vmatprep.subr.bf16.mxu1 %v17334_v3 }
0x1930   : > { %v11431_v13 = vpop.f32.mrf.mxu0  ;;  %11688 = vmatmul.mubr.bf16.vlgmr.msra.gmra.mxu0 %v22273_v38 }
0x1931   : > { %v11432_v44 = vadd.f32 %v11431_v13, %v8526_v59  ;;  %v11474_v26 = vpop.f32.mrf.mxu1  ;;  %11731 = vmatmul.mubr.bf16.vlgmr.msra.gmra.mxu1 %v22277_v40  ;;  %11742 = vmatpush1.bf16.msra.mxu0 %v17077_v11  ;;  %v17030_v11 = vcombine.high %v8054_v21, %v8062_v43  ;;  %v8294_v13 = vld [vmem:[%s20986_s22 + $0x9b8] sm:$0xff] }
0x1932   : > { %11773 = vmatprep.mubr.bf16.mxu0 %v22265_v18  ;;  %11785 = vmatpush1.bf16.msra.mxu1 %v17333_v45  ;;  %v22746_v61 = vpop.f32.mrf.mxu0  ;;  %v8310_v18 = vld [vmem:[%s20986_s22 + $0xa38] sm:$0xff] }
0x1933   : > { %v11475_v51 = vadd.f32 %v11474_v26, %v11432_v44  ;;  %11816 = vmatprep.mubr.bf16.mxu1 %v22269_v22  ;;  %v22749_v27 = vpop.f32.mrf.mxu1  ;;  %11743 = vmatprep.subr.bf16.mxu0 %v17062_v14  ;;  %v17301_v22 = vcombine.low %v8326_v15, %v8334_v54  ;;  %v17286_v20 = vcombine.high %v8310_v18, %v8318_v5  ;;  %v8038_v45 = vld [vmem:[%s20986_s22 + $0x1b8] sm:$0xff] }
0x1934   : > { %v11435_v2 = vpop.f32.mrf.mxu0  ;;  %11786 = vmatprep.subr.bf16.mxu1 %v17318_v50  ;;  %v8046_v14 = vld [vmem:[%s20986_s22 + $0x1f8] sm:$0xff]  ;;  %v17285_v42 = vcombine.low %v8310_v18, %v8318_v5 }
0x1935   : > { %v11436_v3 = vadd.f32 %v11435_v2, %v8526_v59  ;;  %11744 = vmatpush1.bf16.msra.mxu0 %v17061_v9  ;;  %v11478_v60 = vpop.f32.mrf.mxu1  ;;  %v8302_v50 = vld [vmem:[%s20986_s22 + $0x9f8] sm:$0xff]  ;;  %v11833_v44 = vmax.f32 %v11475_v51, 0.0  ;;  %v17014_v15 = vcombine.high %v8038_v45, %v8046_v14  ;;  %v17013_v51 = vcombine.low %v8038_v45, %v8046_v14 }
0x1936   : > { %11787 = vmatpush1.bf16.msra.mxu1 %v17317_v25  ;;  %11745 = vmatprep.subr.bf16.mxu0 %v17046_v56  ;;  %v17270_v26 = vcombine.high %v8294_v13, %v8302_v50  ;;  %v8022_v9 = vld [vmem:[%s20986_s22 + $0x138] sm:$0xff]  ;;  %v17269_v21 = vcombine.low %v8294_v13, %v8302_v50 }
0x1937   : > { %v11479_v0 = vadd.f32 %v11478_v60, %v11436_v3  ;;  %11788 = vmatprep.subr.bf16.mxu1 %v17302_v32  ;;  %v8030_v25 = vld [vmem:[%s20986_s22 + $0x178] sm:$0xff] }
0x1938   : > { %v8278_v56 = vld [vmem:[%s20986_s22 + $0x938] sm:$0xff]  ;;  %v16998_v43 = vcombine.high %v8022_v9, %v8030_v25  ;;  %v16997_v60 = vcombine.low %v8022_v9, %v8030_v25 }
0x1939   : > { %v11849_v59 = vmax.f32 %v11479_v0, 0.0  ;;  %11746 = vmatpush1.bf16.msra.mxu0 %v17045_v55  ;;  %v8286_v32 = vld [vmem:[%s20986_s22 + $0x978] sm:$0xff] }
0x193a   : > { %11789 = vmatpush1.bf16.msra.mxu1 %v17301_v22  ;;  %11747 = vmatprep.subr.bf16.mxu0 %v17030_v11  ;;  %v17254_v2 = vcombine.high %v8278_v56, %v8286_v32  ;;  %v8006_v18 = vld [vmem:[%s20986_s22 + $0xb8] sm:$0xff]  ;;  %v17253_v22 = vcombine.low %v8278_v56, %v8286_v32 }
0x193b   : > { %v22759_v54 = vpack.c.bf16 %v11849_v59, %v11833_v44  ;;  %11790 = vmatprep.subr.bf16.mxu1 %v17286_v20  ;;  %v8014_v5 = vld [vmem:[%s20986_s22 + $0xf8] sm:$0xff] }
0x193c   : > { %v8262_v3 = vld [vmem:[%s20986_s22 + $0x8b8] sm:$0xff]  ;;  %v16982_v11 = vcombine.high %v8006_v18, %v8014_v5  ;;  %v16981_v50 = vcombine.low %v8006_v18, %v8014_v5 }
0x193d   : > { %11748 = vmatpush1.bf16.msra.mxu0 %v17029_v29  ;;  %v8270_v55 = vld [vmem:[%s20986_s22 + $0x8f8] sm:$0xff] }
0x193e   : > { %11791 = vmatpush1.bf16.msra.mxu1 %v17285_v42  ;;  %11749 = vmatprep.subr.bf16.mxu0 %v17014_v15  ;;  %v17238_v0 = vcombine.high %v8262_v3, %v8270_v55  ;;  %v7990_v20 = vld [vmem:[%s20986_s22 + $0x38] sm:$0xff]  ;;  %v17237_v44 = vcombine.low %v8262_v3, %v8270_v55 }
0x193f   : > { %11792 = vmatprep.subr.bf16.mxu1 %v17270_v26  ;;  %v7998_v45 = vld [vmem:[%s20986_s22 + $0x78] sm:$0xff] }
0x1940   : > { %v8246_v14 = vld [vmem:[%s20986_s22 + $0x838] sm:$0xff]  ;;  %v16966_v59 = vcombine.high %v7990_v20, %v7998_v45  ;;  %v16965_v25 = vcombine.low %v7990_v20, %v7998_v45 }
0x1941   : > { %11750 = vmatpush1.bf16.msra.mxu0 %v17013_v51  ;;  %v8254_v13 = vld [vmem:[%s20986_s22 + $0x878] sm:$0xff] }
0x1942   : > { %11793 = vmatpush1.bf16.msra.mxu1 %v17269_v21  ;;  %11751 = vmatprep.subr.bf16.mxu0 %v16998_v43  ;;  %v17222_v29 = vcombine.high %v8246_v14, %v8254_v13  ;;  %v8230_v42 = vld [vmem:[%s20986_s22 + $0x7b8] sm:$0xff]  ;;  %v17221_v56 = vcombine.low %v8246_v14, %v8254_v13 }
0x1943   : > { %11794 = vmatprep.subr.bf16.mxu1 %v17254_v2  ;;  %v8238_v15 = vld [vmem:[%s20986_s22 + $0x7f8] sm:$0xff] }
0x1944   : > { %v8486_v26 = vld [vmem:[%s20986_s22 + $0xfb8] sm:$0xff]  ;;  %v17206_v32 = vcombine.high %v8230_v42, %v8238_v15  ;;  %v17205_v5 = vcombine.low %v8230_v42, %v8238_v15 }
0x1945   : > { %11752 = vmatpush1.bf16.msra.mxu0 %v16997_v60  ;;  %v8494_v9 = vld [vmem:[%s20986_s22 + $0xff8] sm:$0xff] }
0x1946   : > { %11795 = vmatpush1.bf16.msra.mxu1 %v17253_v22  ;;  %11753 = vmatprep.subr.bf16.mxu0 %v16982_v11  ;;  %v17462_v51 = vcombine.high %v8486_v26, %v8494_v9  ;;  %v8214_v21 = vld [vmem:[%s20986_s22 + $0x738] sm:$0xff]  ;;  %v17461_v3 = vcombine.low %v8486_v26, %v8494_v9 }
0x1947   : > { %11796 = vmatprep.subr.bf16.mxu1 %v17238_v0  ;;  %v8222_v43 = vld [vmem:[%s20986_s22 + $0x778] sm:$0xff] }
0x1948   : > { %v8470_v2 = vld [vmem:[%s20986_s22 + $0xf38] sm:$0xff]  ;;  %v17190_v55 = vcombine.high %v8214_v21, %v8222_v43  ;;  %v17189_v45 = vcombine.low %v8214_v21, %v8222_v43 }
0x1949   : > { %11754 = vmatpush1.bf16.msra.mxu0 %v16981_v50  ;;  %v8478_v18 = vld [vmem:[%s20986_s22 + $0xf78] sm:$0xff] }
0x194a   : > { %11797 = vmatpush1.bf16.msra.mxu1 %v17237_v44  ;;  %11755 = vmatprep.subr.bf16.mxu0 %v16966_v59  ;;  %v17446_v60 = vcombine.high %v8470_v2, %v8478_v18  ;;  %v8198_v22 = vld [vmem:[%s20986_s22 + $0x6b8] sm:$0xff]  ;;  %v17445_v14 = vcombine.low %v8470_v2, %v8478_v18 }
0x194b   : > { %11798 = vmatprep.subr.bf16.mxu1 %v17222_v29  ;;  %v8206_v11 = vld [vmem:[%s20986_s22 + $0x6f8] sm:$0xff] }
0x194c   : > { %v8454_v0 = vld [vmem:[%s20986_s22 + $0xeb8] sm:$0xff]  ;;  %v17174_v13 = vcombine.high %v8198_v22, %v8206_v11  ;;  %v17173_v15 = vcombine.low %v8198_v22, %v8206_v11 }
0x194d   : > { %11756 = vmatpush1.bf16.msra.mxu0 %v16965_v25  ;;  %v8462_v20 = vld [vmem:[%s20986_s22 + $0xef8] sm:$0xff] }
0x194e   : > { %11799 = vmatpush1.bf16.msra.mxu1 %v17221_v56  ;;  %11757 = vmatprep.subr.bf16.mxu0 %v17206_v32  ;;  %v17430_v50 = vcombine.high %v8454_v0, %v8462_v20  ;;  %v8182_v44 = vld [vmem:[%s20986_s22 + $0x638] sm:$0xff]  ;;  %v17429_v26 = vcombine.low %v8454_v0, %v8462_v20 }
0x194f   : > { %11800 = vmatprep.subr.bf16.mxu1 %v17462_v51  ;;  %v8190_v59 = vld [vmem:[%s20986_s22 + $0x678] sm:$0xff] }
0x1950   : > { %v8438_v29 = vld [vmem:[%s20986_s22 + $0xe38] sm:$0xff]  ;;  %v17158_v9 = vcombine.high %v8182_v44, %v8190_v59  ;;  %v17157_v43 = vcombine.low %v8182_v44, %v8190_v59 }
0x1951   : > { %11758 = vmatpush2.bf16.msra.mxu0 %v17205_v5  ;;  %v8446_v42 = vld [vmem:[%s20986_s22 + $0xe78] sm:$0xff] }
0x1952   : > { %11801 = vmatpush2.bf16.msra.mxu1 %v17461_v3  ;;  %11759 = vmatprep.subr.bf16.mxu0 %v17190_v55  ;;  %v17414_v25 = vcombine.high %v8438_v29, %v8446_v42  ;;  %v8166_v56 = vld [vmem:[%s20986_s22 + $0x5b8] sm:$0xff]  ;;  %v17413_v2 = vcombine.low %v8438_v29, %v8446_v42  ;;  %v8506_v29 = vrot.slane %v22729_v16, %v21305_v37 }
0x1953   : > { %11802 = vmatprep.subr.bf16.mxu1 %v17446_v60  ;;  %v8174_v32 = vld [vmem:[%s20986_s22 + $0x5f8] sm:$0xff] }
0x1954   : > { %v8422_v51 = vld [vmem:[%s20986_s22 + $0xdb8] sm:$0xff]  ;;  %v17142_v18 = vcombine.high %v8166_v56, %v8174_v32  ;;  %v17141_v11 = vcombine.low %v8166_v56, %v8174_v32  ;;  %v11180_v32 = vadd.f32 %v22572_v48, %v8506_v29 }
0x1955   : > { %11760 = vmatpush2.bf16.msra.mxu0 %v17189_v45  ;;  %v8430_v21 = vld [vmem:[%s20986_s22 + $0xdf8] sm:$0xff] }
0x1956   : > { %11803 = vmatpush2.bf16.msra.mxu1 %v17445_v14  ;;  %11761 = vmatprep.subr.bf16.mxu0 %v17174_v13  ;;  %v17398_v5 = vcombine.high %v8422_v51, %v8430_v21  ;;  %v8150_v3 = vld [vmem:[%s20986_s22 + $0x538] sm:$0xff]  ;;  %v17397_v0 = vcombine.low %v8422_v51, %v8430_v21  ;;  %v11223_v48 = vadd.f32 %v22574_v41, %v11180_v32  ;;  %v19109_v32 = vld [vmem:[%s20996_s19 + $0xc0] ss:$16 sps:$4 sm:$0xff]  }
0x1957   : > { %11804 = vmatprep.subr.bf16.mxu1 %v17430_v50  ;;  %v8158_v55 = vld [vmem:[%s20986_s22 + $0x578] sm:$0xff] }
0x1958   : > { %v8406_v60 = vld [vmem:[%s20986_s22 + $0xd38] sm:$0xff]  ;;  %v17126_v20 = vcombine.high %v8150_v3, %v8158_v55  ;;  %v17125_v59 = vcombine.low %v8150_v3, %v8158_v55  ;;  %v11844_v41 = vmax.f32 %v11223_v48, 0.0  ;;  %v19123_v48 = vld [vmem:[%s20996_s19 + $0x84] ss:$16 sps:$4 sm:$0xff]  }
0x1959   : > { %11762 = vmatpush2.bf16.msra.mxu0 %v17173_v15  ;;  %v8414_v22 = vld [vmem:[%s20986_s22 + $0xd78] sm:$0xff] }
0x195a   : > { %11805 = vmatpush2.bf16.msra.mxu1 %v17429_v26  ;;  %11763 = vmatprep.subr.bf16.mxu0 %v17158_v9  ;;  %v17382_v45 = vcombine.high %v8406_v60, %v8414_v22  ;;  %v8134_v14 = vld [vmem:[%s20986_s22 + $0x4b8] sm:$0xff]  ;;  %v17381_v42 = vcombine.low %v8406_v60, %v8414_v22  ;;  %v8514_v26 = vrot.slane %v22729_v16, %v21395_v63 }
0x195b   : > { %11806 = vmatprep.subr.bf16.mxu1 %v17414_v25  ;;  %v8142_v13 = vld [vmem:[%s20986_s22 + $0x4f8] sm:$0xff] }
0x195c   : > { %v8390_v50 = vld [vmem:[%s20986_s22 + $0xcb8] sm:$0xff]  ;;  %v17110_v15 = vcombine.high %v8134_v14, %v8142_v13  ;;  %v11262_v55 = vadd.f32 %v22583_v6, %v8514_v26 }
0x195d   : > { %11764 = vmatpush2.bf16.msra.mxu0 %v17157_v43  ;;  %v8398_v44 = vld [vmem:[%s20986_s22 + $0xcf8] sm:$0xff]  ;;  %v11266_v43 = vadd.f32 %v22652_v62, %v8514_v26  ;;  %v19114_v26 = vld [vmem:[%s20996_s19 + $0x2c4] ss:$16 sps:$4 sm:$0xff]  }
0x195e   : > { %11807 = vmatpush2.bf16.msra.mxu1 %v17413_v2  ;;  %11765 = vmatprep.subr.bf16.mxu0 %v17142_v18  ;;  %v17366_v9 = vcombine.high %v8390_v50, %v8398_v44  ;;  %v8118_v25 = vld [vmem:[%s20986_s22 + $0x438] sm:$0xff]  ;;  %v17109_v2 = vcombine.low %v8134_v14, %v8142_v13  ;;  %v11176_v18 = vadd.f32 %v22503_v23, %v8506_v29  ;;  %v19111_v29 = vld [vmem:[%s20996_s19 + $0xc4] ss:$16 sps:$4 sm:$0xff]  }
0x195f   : > { %11808 = vmatprep.subr.bf16.mxu1 %v17398_v5  ;;  %v8126_v56 = vld [vmem:[%s20986_s22 + $0x478] sm:$0xff]  ;;  %v17365_v5 = vcombine.low %v8390_v50, %v8398_v44  ;;  %v11309_v22 = vadd.f32 %v22654_v39, %v11266_v43  ;;  %v11305_v6 = vadd.f32 %v22585_v4, %v11262_v55  ;;  %v22825_v50 = vpop.f32.mrf.mxu0  ;;  %v19106_v44 = vld [vmem:[%s20996_s19 + $0x2e0] ss:$16 sps:$4 sm:$0xff]   ;;  %v22828_v4 = vpop.f32.mrf.mxu1 }
0x1960   : > { %v8374_v51 = vld [vmem:[%s20986_s22 + $0xc38] sm:$0xff]  ;;  %v17094_v3 = vcombine.high %v8118_v25, %v8126_v56  ;;  %v17093_v62 = vcombine.low %v8118_v25, %v8126_v56  ;;  %v11219_v23 = vadd.f32 %v22505_v36, %v11176_v18  ;;  %v19103_v36 = vld [vmem:[%s20996_s19 + $0xe0] ss:$16 sps:$4 sm:$0xff]  }
0x1961   : > { %11766 = vmatpush2.bf16.msra.mxu0 %v17141_v11  ;;  %v8382_v21 = vld [vmem:[%s20986_s22 + $0xc78] sm:$0xff]  ;;  %v11846_v14 = vmax.f32 %v11309_v22, 0.0 }
0x1962   : > { %11809 = vmatpush2.bf16.msra.mxu1 %v17397_v0  ;;  %11767 = vmatprep.subr.bf16.mxu0 %v17126_v20  ;;  %v17350_v60 = vcombine.high %v8374_v51, %v8382_v21  ;;  %v17349_v11 = vcombine.low %v8374_v51, %v8382_v21  ;;  %v22817_v0 = vld [vmem:[%s20993_s20 + $0x8] sm:$0xff]  ;;  %v19105_v20 = vld [vmem:[%s20996_s19 + $0xe4] ss:$16 sps:$4 sm:$0xff]   ;;  %v11828_v13 = vmax.f32 %v11219_v23, 0.0  ;;  %v19112_v21 = vld [vmem:[%s20996_s19 + $0x2c0] ss:$16 sps:$4 sm:$0xff]  }
0x1963   : > { %11810 = vmatprep.subr.bf16.mxu1 %v17382_v45  ;;  %v19108_v45 = vld [vmem:[%s20996_s19 + $0x2e4] ss:$16 sps:$4 sm:$0xff]   ;;  %v8534_v39 = vrot.slane %v22817_v0, %v21483_v34 }
0x1965   : > { %11768 = vmatpush2.bf16.msra.mxu0 %v17125_v59  ;;  %v11830_v59 = vmax.f32 %v11305_v6, 0.0  ;;  %v19124_v6 = vld [vmem:[%s20996_s19 + $0x280] ss:$16 sps:$4 sm:$0xff]  }
0x1966   : > { %11811 = vmatpush2.bf16.msra.mxu1 %v17381_v42  ;;  %11769 = vmatprep.subr.bf16.mxu0 %v17110_v15  ;;  %v22831_v42 = vpack.c.bf16 %v11844_v41, %v11828_v13  ;;  %v19135_v13 = vld [vmem:[%s20996_s19 + $0x44] ss:$16 sps:$4 sm:$0xff]  }
0x1967   : > { %11812 = vmatprep.subr.bf16.mxu1 %v17366_v9  ;;  %v22835_v9 = vpack.c.bf16 %v11846_v14, %v11830_v59  ;;  %v19132_v14 = vld [vmem:[%s20996_s19 + $0x264] ss:$16 sps:$4 sm:$0xff]   ;;  %v19133_v59 = vld [vmem:[%s20996_s19 + $0x40] ss:$16 sps:$4 sm:$0xff]  }
0x1969   : > { %11770 = vmatpush2.bf16.msra.mxu0 %v17109_v2 }
0x196a   : > { %11813 = vmatpush2.bf16.msra.mxu1 %v17365_v5  ;;  %11771 = vmatprep.subr.bf16.mxu0 %v17094_v3  ;;  %v19115_v3 = vld [vmem:[%s20996_s19 + $0xa0] ss:$16 sps:$4 sm:$0xff]  }
0x196b   : > { %11814 = vmatprep.subr.bf16.mxu1 %v17350_v60  ;;  %v19118_v60 = vld [vmem:[%s20996_s19 + $0x2a0] ss:$16 sps:$4 sm:$0xff]  }
0x196d   : > { %11772 = vmatpush2.bf16.msra.mxu0 %v17093_v62  ;;  %v19126_v62 = vld [vmem:[%s20996_s19 + $0x284] ss:$16 sps:$4 sm:$0xff]  }
0x196e   : > { %11815 = vmatpush2.bf16.msra.mxu1 %v17349_v11  ;;  %14969 = vmatprep.subr.bf16.mxu0 %v19105_v20  ;;  %v19121_v20 = vld [vmem:[%s20996_s19 + $0x80] ss:$16 sps:$4 sm:$0xff]  }
0x196f   : > { %15012 = vmatprep.subr.bf16.mxu1 %v19108_v45  ;;  %v19129_v45 = vld [vmem:[%s20996_s19 + $0x64] ss:$16 sps:$4 sm:$0xff]  }
0x1970   : > { %v11517_v15 = vpop.f32.mrf.mxu0  ;;  %11774 = vmatmul.mubr.bf16.vlgmr.msra.gmra.mxu0 %v22273_v38  ;;  %v19117_v38 = vld [vmem:[%s20996_s19 + $0xa4] ss:$16 sps:$4 sm:$0xff]  }
0x1971   : > { %v11518_v25 = vadd.f32 %v11517_v15, %v8534_v39  ;;  %v11560_v56 = vpop.f32.mrf.mxu1  ;;  %11817 = vmatmul.mubr.bf16.vlgmr.msra.gmra.mxu1 %v22277_v40  ;;  %14970 = vmatpush1.bf16.msra.mxu0 %v19103_v36  ;;  %v19120_v40 = vld [vmem:[%s20996_s19 + $0x2a4] ss:$16 sps:$4 sm:$0xff]   ;;  %v19130_v36 = vld [vmem:[%s20996_s19 + $0x260] ss:$16 sps:$4 sm:$0xff]  }
0x1972   : > { %15001 = vmatprep.mubr.bf16.mxu0 %v22831_v42  ;;  %15013 = vmatpush1.bf16.msra.mxu1 %v19106_v44  ;;  %v22840_v51 = vpop.f32.mrf.mxu0  ;;  %v19138_v44 = vld [vmem:[%s20996_s19 + $0x244] ss:$16 sps:$4 sm:$0xff]  }
0x1973   : > { %v11561_v43 = vadd.f32 %v11560_v56, %v11518_v25  ;;  %15044 = vmatprep.mubr.bf16.mxu1 %v22835_v9  ;;  %v22845_v2 = vpop.f32.mrf.mxu1  ;;  %14971 = vmatprep.subr.bf16.mxu0 %v19111_v29  ;;  %v19136_v29 = vld [vmem:[%s20996_s19 + $0x240] ss:$16 sps:$4 sm:$0xff]   ;;  %v19141_v15 = vld [vmem:[%s20996_s19 + $0x24] ss:$16 sps:$4 sm:$0xff]  }
0x1974   : > { %v11521_v18 = vpop.f32.mrf.mxu0  ;;  %15014 = vmatprep.subr.bf16.mxu1 %v19114_v26  ;;  %v19144_v26 = vld [vmem:[%s20996_s19 + $0x224] ss:$16 sps:$4 sm:$0xff]   ;;  %v19139_v25 = vld [vmem:[%s20996_s19 + $0x20] ss:$16 sps:$4 sm:$0xff]  }
0x1975   : > { %v11522_v5 = vadd.f32 %v11521_v18, %v8534_v39  ;;  %14972 = vmatpush1.bf16.msra.mxu0 %v19109_v32  ;;  %v11564_v55 = vpop.f32.mrf.mxu1  ;;  %v11835_v23 = vmax.f32 %v11561_v43, 0.0  ;;  %v19127_v39 = vld [vmem:[%s20996_s19 + $0x60] ss:$16 sps:$4 sm:$0xff]   ;;  %v19147_v32 = vld [vmem:[%s20996_s19 + $0x4] ss:$16 sps:$4 sm:$0xff]  }
0x1976   : > { %15015 = vmatpush1.bf16.msra.mxu1 %v19112_v21  ;;  %14973 = vmatprep.subr.bf16.mxu0 %v19117_v38  ;;  %v19142_v56 = vld [vmem:[%s20996_s19 + $0x220] ss:$16 sps:$4 sm:$0xff]   ;;  %v19150_v21 = vld [vmem:[%s20996_s19 + $0x204] ss:$16 sps:$4 sm:$0xff]  }
0x1977   : > { %v11565_v22 = vadd.f32 %v11564_v55, %v11522_v5  ;;  %15016 = vmatprep.subr.bf16.mxu1 %v19120_v40  ;;  %v19145_v38 = vld [vmem:[%s20996_s19] ss:$16 sps:$4 sm:$0xff]   ;;  %v19153_v40 = vld [vmem:[%s20996_s19 + $0x1e4] ss:$16 sps:$4 sm:$0xff]  }
0x1978   : > { %v19148_v43 = vld [vmem:[%s20996_s19 + $0x200] ss:$16 sps:$4 sm:$0xff]   ;;  %v19156_v18 = vld [vmem:[%s20996_s19 + $0x3e4] ss:$16 sps:$4 sm:$0xff]  }
0x1979   : > { %v11851_v11 = vmax.f32 %v11565_v22, 0.0  ;;  %14974 = vmatpush1.bf16.msra.mxu0 %v19115_v3  ;;  %v19151_v5 = vld [vmem:[%s20996_s19 + $0x1e0] ss:$16 sps:$4 sm:$0xff]   ;;  %v19159_v55 = vld [vmem:[%s20996_s19 + $0x1c4] ss:$16 sps:$4 sm:$0xff]  }
0x197a   : > { %15017 = vmatpush1.bf16.msra.mxu1 %v19118_v60  ;;  %14975 = vmatprep.subr.bf16.mxu0 %v19123_v48  ;;  %v19154_v3 = vld [vmem:[%s20996_s19 + $0x3e0] ss:$16 sps:$4 sm:$0xff]   ;;  %v19162_v60 = vld [vmem:[%s20996_s19 + $0x3c4] ss:$16 sps:$4 sm:$0xff]  }
0x197b   : > { %v22855_v41 = vpack.c.bf16 %v11851_v11, %v11835_v23  ;;  %15018 = vmatprep.subr.bf16.mxu1 %v19126_v62  ;;  %v19157_v48 = vld [vmem:[%s20996_s19 + $0x1c0] ss:$16 sps:$4 sm:$0xff]   ;;  %v19165_v62 = vld [vmem:[%s20996_s19 + $0x1a4] ss:$16 sps:$4 sm:$0xff]  }
0x197c   : > { %v19160_v22 = vld [vmem:[%s20996_s19 + $0x3c0] ss:$16 sps:$4 sm:$0xff]   ;;  %v19168_v23 = vld [vmem:[%s20996_s19 + $0x3a4] ss:$16 sps:$4 sm:$0xff]  }
0x197d   : > { %14976 = vmatpush1.bf16.msra.mxu0 %v19121_v20  ;;  %v19163_v11 = vld [vmem:[%s20996_s19 + $0x1a0] ss:$16 sps:$4 sm:$0xff]  }
0x197e   : > { %15019 = vmatpush1.bf16.msra.mxu1 %v19124_v6  ;;  %14977 = vmatprep.subr.bf16.mxu0 %v19129_v45  ;;  %v19166_v20 = vld [vmem:[%s20996_s19 + $0x3a0] ss:$16 sps:$4 sm:$0xff]   ;;  %v19171_v6 = vld [vmem:[%s20996_s19 + $0x184] ss:$16 sps:$4 sm:$0xff]  }
0x197f   : > { %15020 = vmatprep.subr.bf16.mxu1 %v19132_v14  ;;  %v19174_v45 = vld [vmem:[%s20996_s19 + $0x384] ss:$16 sps:$4 sm:$0xff]   ;;  %v19169_v14 = vld [vmem:[%s20996_s19 + $0x180] ss:$16 sps:$4 sm:$0xff]  }
0x1981   : > { %14978 = vmatpush1.bf16.msra.mxu0 %v19127_v39  ;;  %v19172_v39 = vld [vmem:[%s20996_s19 + $0x380] ss:$16 sps:$4 sm:$0xff]  }
0x1982   : > { %15021 = vmatpush1.bf16.msra.mxu1 %v19130_v36  ;;  %14979 = vmatprep.subr.bf16.mxu0 %v19135_v13  ;;  %v19177_v36 = vld [vmem:[%s20996_s19 + $0x164] ss:$16 sps:$4 sm:$0xff]  }
0x1983   : > { %15022 = vmatprep.subr.bf16.mxu1 %v19138_v44  ;;  %v19180_v13 = vld [vmem:[%s20996_s19 + $0x364] ss:$16 sps:$4 sm:$0xff]   ;;  %v19175_v44 = vld [vmem:[%s20996_s19 + $0x160] ss:$16 sps:$4 sm:$0xff]  }
0x1985   : > { %14980 = vmatpush1.bf16.msra.mxu0 %v19133_v59  ;;  %v19178_v59 = vld [vmem:[%s20996_s19 + $0x360] ss:$16 sps:$4 sm:$0xff]  }
0x1986   : > { %15023 = vmatpush1.bf16.msra.mxu1 %v19136_v29  ;;  %14981 = vmatprep.subr.bf16.mxu0 %v19141_v15  ;;  %v19183_v29 = vld [vmem:[%s20996_s19 + $0x144] ss:$16 sps:$4 sm:$0xff]  }
0x1987   : > { %15024 = vmatprep.subr.bf16.mxu1 %v19144_v26  ;;  %v19186_v15 = vld [vmem:[%s20996_s19 + $0x344] ss:$16 sps:$4 sm:$0xff]   ;;  %v19181_v26 = vld [vmem:[%s20996_s19 + $0x140] ss:$16 sps:$4 sm:$0xff]  }
0x1989   : > { %14982 = vmatpush1.bf16.msra.mxu0 %v19139_v25  ;;  %v8522_v25 = vrot.slane %v22729_v16, %v21486_v35 }
0x198a   : > { %15025 = vmatpush1.bf16.msra.mxu1 %v19142_v56  ;;  %14983 = vmatprep.subr.bf16.mxu0 %v19147_v32  ;;  %v19184_v56 = vld [vmem:[%s20996_s19 + $0x340] ss:$16 sps:$4 sm:$0xff]   ;;  %v19189_v32 = vld [vmem:[%s20996_s19 + $0x124] ss:$16 sps:$4 sm:$0xff]  }
0x198b   : > { %15026 = vmatprep.subr.bf16.mxu1 %v19150_v21  ;;  %v8530_v21 = vrot.slane %v22729_v16, %v21535_v58 }
0x198d   : > { %14984 = vmatpush1.bf16.msra.mxu0 %v19145_v38  ;;  %v19192_v38 = vld [vmem:[%s20996_s19 + $0x324] ss:$16 sps:$4 sm:$0xff]   ;;  %v11434_v16 = vadd.f32 %v22746_v61, %v8530_v21 }
0x198e   : > { %15027 = vmatpush1.bf16.msra.mxu1 %v19148_v43  ;;  %14985 = vmatprep.subr.bf16.mxu0 %v19153_v40  ;;  %v11352_v43 = vadd.f32 %v22735_v53, %v8522_v25  ;;  %v11438_v40 = vadd.f32 %v22825_v50, %v8530_v21  ;;  %v19193_v50 = vld [vmem:[%s20996_s19 + $0x100] ss:$16 sps:$4 sm:$0xff]   ;;  %v19204_v61 = vld [vmem:[%s20996_s19 + $0x6e4] ss:$16 sps:$4 sm:$0xff]  }
0x198f   : > { %15028 = vmatprep.subr.bf16.mxu1 %v19156_v18  ;;  %v19187_v18 = vld [vmem:[%s20996_s19 + $0x120] ss:$16 sps:$4 sm:$0xff]  }
0x1990   : > { %v11481_v53 = vadd.f32 %v22828_v4, %v11438_v40  ;;  %v19199_v4 = vld [vmem:[%s20996_s19 + $0x4e0] ss:$16 sps:$4 sm:$0xff]  }
0x1991   : > { %14986 = vmatpush2.bf16.msra.mxu0 %v19151_v5  ;;  %v11348_v5 = vadd.f32 %v22663_v1, %v8522_v25  ;;  %v19196_v1 = vld [vmem:[%s20996_s19 + $0x300] ss:$16 sps:$4 sm:$0xff]  }
0x1992   : > { %15029 = vmatpush2.bf16.msra.mxu1 %v19154_v3  ;;  %14987 = vmatprep.subr.bf16.mxu0 %v19159_v55  ;;  %v19190_v3 = vld [vmem:[%s20996_s19 + $0x320] ss:$16 sps:$4 sm:$0xff]   ;;  %v19195_v55 = vld [vmem:[%s20996_s19 + $0x104] ss:$16 sps:$4 sm:$0xff]  }
0x1993   : > { %15030 = vmatprep.subr.bf16.mxu1 %v19162_v60  ;;  %v19198_v60 = vld [vmem:[%s20996_s19 + $0x304] ss:$16 sps:$4 sm:$0xff]  }
0x1995   : > { %14988 = vmatpush2.bf16.msra.mxu0 %v19157_v48  ;;  %v11395_v48 = vadd.f32 %v22737_v49, %v11352_v43  ;;  %v8542_v49 = vrot.slane %v22817_v0, %v21387_v57  ;;  %v19216_v43 = vld [vmem:[%s20996_s19 + $0x6a4] ss:$16 sps:$4 sm:$0xff]  }
0x1996   : > { %15031 = vmatpush2.bf16.msra.mxu1 %v19160_v22  ;;  %14989 = vmatprep.subr.bf16.mxu0 %v19165_v62  ;;  %v11391_v22 = vadd.f32 %v22666_v30, %v11348_v5  ;;  %v19201_v62 = vld [vmem:[%s20996_s19 + $0x4e4] ss:$16 sps:$4 sm:$0xff]   ;;  %v22921_v30 = vpop.f32.mrf.mxu0  ;;  %v19211_v5 = vld [vmem:[%s20996_s19 + $0x4a0] ss:$16 sps:$4 sm:$0xff]  }
0x1997   : > { %15032 = vmatprep.subr.bf16.mxu1 %v19168_v23  ;;  %v11477_v23 = vadd.f32 %v22749_v27, %v11434_v16  ;;  %v22924_v27 = vpop.f32.mrf.mxu1  ;;  %v19219_v16 = vld [vmem:[%s20996_s19 + $0x484] ss:$16 sps:$4 sm:$0xff]  }
0x1999   : > { %14990 = vmatpush2.bf16.msra.mxu0 %v19163_v11  ;;  %v11848_v11 = vmax.f32 %v11395_v48, 0.0  ;;  %v19222_v48 = vld [vmem:[%s20996_s19 + $0x684] ss:$16 sps:$4 sm:$0xff]  }
0x199a   : > { %15033 = vmatpush2.bf16.msra.mxu1 %v19166_v20  ;;  %14991 = vmatprep.subr.bf16.mxu0 %v19171_v6  ;;  %v11850_v20 = vmax.f32 %v11481_v53, 0.0  ;;  %v11832_v6 = vmax.f32 %v11391_v22, 0.0  ;;  %v19217_v22 = vld [vmem:[%s20996_s19 + $0x480] ss:$16 sps:$4 sm:$0xff]  }
0x199b   : > { %15034 = vmatprep.subr.bf16.mxu1 %v19174_v45  ;;  %v19202_v45 = vld [vmem:[%s20996_s19 + $0x6e0] ss:$16 sps:$4 sm:$0xff]  }
0x199d   : > { %14992 = vmatpush2.bf16.msra.mxu0 %v19169_v14  ;;  %v11834_v14 = vmax.f32 %v11477_v23, 0.0 }
0x199e   : > { %15035 = vmatpush2.bf16.msra.mxu1 %v19172_v39  ;;  %14993 = vmatprep.subr.bf16.mxu0 %v19177_v36  ;;  %v19207_v39 = vld [vmem:[%s20996_s19 + $0x4c4] ss:$16 sps:$4 sm:$0xff]   ;;  %v22927_v36 = vpack.c.bf16 %v11848_v11, %v11832_v6  ;;  %v19223_v11 = vld [vmem:[%s20996_s19 + $0x460] ss:$16 sps:$4 sm:$0xff]  }
0x199f   : > { %15036 = vmatprep.subr.bf16.mxu1 %v19180_v13  ;;  %v19229_v6 = vld [vmem:[%s20996_s19 + $0x440] ss:$16 sps:$4 sm:$0xff]  }
0x19a1   : > { %14994 = vmatpush2.bf16.msra.mxu0 %v19175_v44  ;;  %v19210_v44 = vld [vmem:[%s20996_s19 + $0x6c4] ss:$16 sps:$4 sm:$0xff]  }
0x19a2   : > { %15037 = vmatpush2.bf16.msra.mxu1 %v19178_v59  ;;  %14995 = vmatprep.subr.bf16.mxu0 %v19183_v29  ;;  %v22931_v59 = vpack.c.bf16 %v11850_v20, %v11834_v14  ;;  %v19226_v20 = vld [vmem:[%s20996_s19 + $0x660] ss:$16 sps:$4 sm:$0xff]   ;;  %v19237_v14 = vld [vmem:[%s20996_s19 + $0x424] ss:$16 sps:$4 sm:$0xff]  }
0x19a3   : > { %15038 = vmatprep.subr.bf16.mxu1 %v19186_v15 }
0x19a5   : > { %14996 = vmatpush2.bf16.msra.mxu0 %v19181_v26  ;;  %v19205_v26 = vld [vmem:[%s20996_s19 + $0x4c0] ss:$16 sps:$4 sm:$0xff]  }
0x19a6   : > { %15039 = vmatpush2.bf16.msra.mxu1 %v19184_v56  ;;  %14997 = vmatprep.subr.bf16.mxu0 %v19189_v32  ;;  %v19208_v56 = vld [vmem:[%s20996_s19 + $0x6c0] ss:$16 sps:$4 sm:$0xff]   ;;  %v19213_v32 = vld [vmem:[%s20996_s19 + $0x4a4] ss:$16 sps:$4 sm:$0xff]  }
0x19a7   : > { %15040 = vmatprep.subr.bf16.mxu1 %v19192_v38 }
0x19a9   : > { %14998 = vmatpush2.bf16.msra.mxu0 %v19187_v18 }
0x19aa   : > { %15041 = vmatpush2.bf16.msra.mxu1 %v19190_v3  ;;  %14999 = vmatprep.subr.bf16.mxu0 %v19195_v55  ;;  %v19214_v55 = vld [vmem:[%s20996_s19 + $0x6a0] ss:$16 sps:$4 sm:$0xff]  }
0x19ab   : > { %15042 = vmatprep.subr.bf16.mxu1 %v19198_v60 }
0x19ad   : > { %15000 = vmatpush2.bf16.msra.mxu0 %v19193_v50 }
0x19ae   : > { %15043 = vmatpush2.bf16.msra.mxu1 %v19196_v1  ;;  %15055 = vmatprep.subr.bf16.mxu0 %v19201_v62  ;;  %v19220_v1 = vld [vmem:[%s20996_s19 + $0x680] ss:$16 sps:$4 sm:$0xff]   ;;  %v19225_v62 = vld [vmem:[%s20996_s19 + $0x464] ss:$16 sps:$4 sm:$0xff]  }
0x19af   : > { %15098 = vmatprep.subr.bf16.mxu1 %v19204_v61  ;;  %v19228_v61 = vld [vmem:[%s20996_s19 + $0x664] ss:$16 sps:$4 sm:$0xff]  }
0x19b0   : > { %v11603_v13 = vpop.f32.mrf.mxu0  ;;  %15002 = vmatmul.mubr.bf16.vlgmr.msra.gmra.mxu0 %v22516_v52 }
0x19b1   : > { %v11604_v29 = vadd.f32 %v11603_v13, %v8542_v49  ;;  %v11646_v15 = vpop.f32.mrf.mxu1  ;;  %15045 = vmatmul.mubr.bf16.vlgmr.msra.gmra.mxu1 %v22596_v19  ;;  %15056 = vmatpush1.bf16.msra.mxu0 %v19199_v4  ;;  %v19234_v4 = vld [vmem:[%s20996_s19 + $0x644] ss:$16 sps:$4 sm:$0xff]   ;;  %v19235_v13 = vld [vmem:[%s20996_s19 + $0x420] ss:$16 sps:$4 sm:$0xff]  }
0x19b2   : > { %15087 = vmatprep.mubr.bf16.mxu0 %v22927_v36  ;;  %15099 = vmatpush1.bf16.msra.mxu1 %v19202_v45  ;;  %v22936_v25 = vpop.f32.mrf.mxu0  ;;  %v19232_v45 = vld [vmem:[%s20996_s19 + $0x640] ss:$16 sps:$4 sm:$0xff]  }
0x19b3   : > { %v11647_v21 = vadd.f32 %v11646_v15, %v11604_v29  ;;  %15130 = vmatprep.mubr.bf16.mxu1 %v22931_v59  ;;  %v22941_v38 = vpop.f32.mrf.mxu1  ;;  %15057 = vmatprep.subr.bf16.mxu0 %v19207_v39  ;;  %v19240_v39 = vld [vmem:[%s20996_s19 + $0x624] ss:$16 sps:$4 sm:$0xff]  }
0x19b4   : > { %v11607_v40 = vpop.f32.mrf.mxu0  ;;  %15100 = vmatprep.subr.bf16.mxu1 %v19210_v44  ;;  %v19238_v44 = vld [vmem:[%s20996_s19 + $0x620] ss:$16 sps:$4 sm:$0xff]   ;;  %v19243_v29 = vld [vmem:[%s20996_s19 + $0x404] ss:$16 sps:$4 sm:$0xff]  }
0x19b5   : > { %v11608_v18 = vadd.f32 %v11607_v40, %v8542_v49  ;;  %15058 = vmatpush1.bf16.msra.mxu0 %v19205_v26  ;;  %v11650_v3 = vpop.f32.mrf.mxu1  ;;  %v11837_v53 = vmax.f32 %v11647_v21, 0.0  ;;  %v19231_v49 = vld [vmem:[%s20996_s19 + $0x444] ss:$16 sps:$4 sm:$0xff]   ;;  %v19241_v26 = vld [vmem:[%s20996_s19 + $0x400] ss:$16 sps:$4 sm:$0xff]  }
0x19b6   : > { %15101 = vmatpush1.bf16.msra.mxu1 %v19208_v56  ;;  %15059 = vmatprep.subr.bf16.mxu0 %v19213_v32  ;;  %v19246_v15 = vld [vmem:[%s20996_s19 + $0x604] ss:$16 sps:$4 sm:$0xff]   ;;  %v19244_v56 = vld [vmem:[%s20996_s19 + $0x600] ss:$16 sps:$4 sm:$0xff]  }
0x19b7   : > { %v11651_v60 = vadd.f32 %v11650_v3, %v11608_v18  ;;  %15102 = vmatprep.subr.bf16.mxu1 %v19216_v43  ;;  %v19249_v32 = vld [vmem:[%s20996_s19 + $0x5e4] ss:$16 sps:$4 sm:$0xff]   ;;  %v19247_v43 = vld [vmem:[%s20996_s19 + $0x5e0] ss:$16 sps:$4 sm:$0xff]  }
0x19b8   : > { %v19252_v21 = vld [vmem:[%s20996_s19 + $0x7e4] ss:$16 sps:$4 sm:$0xff]   ;;  %v19250_v40 = vld [vmem:[%s20996_s19 + $0x7e0] ss:$16 sps:$4 sm:$0xff]  }
0x19b9   : > { %v11853_v50 = vmax.f32 %v11651_v60, 0.0  ;;  %15060 = vmatpush1.bf16.msra.mxu0 %v19211_v5  ;;  %v19255_v18 = vld [vmem:[%s20996_s19 + $0x5c4] ss:$16 sps:$4 sm:$0xff]   ;;  %v19253_v3 = vld [vmem:[%s20996_s19 + $0x5c0] ss:$16 sps:$4 sm:$0xff]  }
0x19ba   : > { %15103 = vmatpush1.bf16.msra.mxu1 %v19214_v55  ;;  %15061 = vmatprep.subr.bf16.mxu0 %v19219_v16  ;;  %v19258_v5 = vld [vmem:[%s20996_s19 + $0x7c4] ss:$16 sps:$4 sm:$0xff]   ;;  %v19256_v55 = vld [vmem:[%s20996_s19 + $0x7c0] ss:$16 sps:$4 sm:$0xff]  }
0x19bb   : > { %v22951_v23 = vpack.c.bf16 %v11853_v50, %v11837_v53  ;;  %15104 = vmatprep.subr.bf16.mxu1 %v19222_v48  ;;  %v19261_v16 = vld [vmem:[%s20996_s19 + $0x5a4] ss:$16 sps:$4 sm:$0xff]   ;;  %v19259_v48 = vld [vmem:[%s20996_s19 + $0x5a0] ss:$16 sps:$4 sm:$0xff]  }
0x19bc   : > { %v19264_v60 = vld [vmem:[%s20996_s19 + $0x7a4] ss:$16 sps:$4 sm:$0xff]   ;;  %v19262_v53 = vld [vmem:[%s20996_s19 + $0x7a0] ss:$16 sps:$4 sm:$0xff]  }
0x19bd   : > { %15062 = vmatpush1.bf16.msra.mxu0 %v19217_v22  ;;  %v19267_v50 = vld [vmem:[%s20996_s19 + $0x584] ss:$16 sps:$4 sm:$0xff]  }
0x19be   : > { %15105 = vmatpush1.bf16.msra.mxu1 %v19220_v1  ;;  %15063 = vmatprep.subr.bf16.mxu0 %v19225_v62  ;;  %v19270_v22 = vld [vmem:[%s20996_s19 + $0x784] ss:$16 sps:$4 sm:$0xff]   ;;  %v19265_v1 = vld [vmem:[%s20996_s19 + $0x580] ss:$16 sps:$4 sm:$0xff]  }
0x19bf   : > { %15106 = vmatprep.subr.bf16.mxu1 %v19228_v61  ;;  %v19268_v62 = vld [vmem:[%s20996_s19 + $0x780] ss:$16 sps:$4 sm:$0xff]   ;;  %v19273_v61 = vld [vmem:[%s20996_s19 + $0x564] ss:$16 sps:$4 sm:$0xff]  }
0x19c1   : > { %15064 = vmatpush1.bf16.msra.mxu0 %v19223_v11  ;;  %v19276_v11 = vld [vmem:[%s20996_s19 + $0x764] ss:$16 sps:$4 sm:$0xff]  }
0x19c2   : > { %15107 = vmatpush1.bf16.msra.mxu1 %v19226_v20  ;;  %15065 = vmatprep.subr.bf16.mxu0 %v19231_v49  ;;  %v19271_v20 = vld [vmem:[%s20996_s19 + $0x560] ss:$16 sps:$4 sm:$0xff]  }
0x19c3   : > { %15108 = vmatprep.subr.bf16.mxu1 %v19234_v4  ;;  %v19274_v49 = vld [vmem:[%s20996_s19 + $0x760] ss:$16 sps:$4 sm:$0xff]   ;;  %v19279_v4 = vld [vmem:[%s20996_s19 + $0x544] ss:$16 sps:$4 sm:$0xff]  }
0x19c5   : > { %15066 = vmatpush1.bf16.msra.mxu0 %v19229_v6  ;;  %v19282_v6 = vld [vmem:[%s20996_s19 + $0x744] ss:$16 sps:$4 sm:$0xff]  }
0x19c6   : > { %15109 = vmatpush1.bf16.msra.mxu1 %v19232_v45  ;;  %15067 = vmatprep.subr.bf16.mxu0 %v19237_v14  ;;  %v19277_v45 = vld [vmem:[%s20996_s19 + $0x540] ss:$16 sps:$4 sm:$0xff]   ;;  %v8538_v14 = vrot.slane %v22817_v0, %v21305_v37 }
0x19c7   : > { %15110 = vmatprep.subr.bf16.mxu1 %v19240_v39  ;;  %v11609_v39 = vpop.f32.mrf.mxu0 }
0x19c9   : > { %15068 = vmatpush1.bf16.msra.mxu0 %v19235_v13  ;;  %v19280_v13 = vld [vmem:[%s20996_s19 + $0x740] ss:$16 sps:$4 sm:$0xff]  }
0x19ca   : > { %15111 = vmatpush1.bf16.msra.mxu1 %v19238_v44  ;;  %15069 = vmatprep.subr.bf16.mxu0 %v19243_v29  ;;  %v19285_v44 = vld [vmem:[%s20996_s19 + $0x524] ss:$16 sps:$4 sm:$0xff]   ;;  %v8546_v29 = vrot.slane %v22817_v0, %v21395_v63 }
0x19cb   : > { %15112 = vmatprep.subr.bf16.mxu1 %v19246_v15  ;;  %v19288_v15 = vld [vmem:[%s20996_s19 + $0x724] ss:$16 sps:$4 sm:$0xff]  }
0x19cd   : > { %15070 = vmatpush1.bf16.msra.mxu0 %v19241_v26  ;;  %v11524_v26 = vadd.f32 %v22921_v30, %v8538_v14  ;;  %v11652_v30 = vpop.f32.mrf.mxu1 }
0x19ce   : > { %15113 = vmatpush1.bf16.msra.mxu1 %v19244_v56  ;;  %15071 = vmatprep.subr.bf16.mxu0 %v19249_v32  ;;  %v11610_v56 = vadd.f32 %v11609_v39, %v8546_v29  ;;  %v19283_v32 = vld [vmem:[%s20996_s19 + $0x520] ss:$16 sps:$4 sm:$0xff]  }
0x19cf   : > { %15114 = vmatprep.subr.bf16.mxu1 %v19252_v21  ;;  %v11520_v21 = vadd.f32 %v22840_v51, %v8538_v14  ;;  %v19304_v39 = vld [vmem:[%s20996_s19 + $0xac0] ss:$16 sps:$4 sm:$0xff]  }
0x19d1   : > { %15072 = vmatpush2.bf16.msra.mxu0 %v19247_v43  ;;  %v19286_v43 = vld [vmem:[%s20996_s19 + $0x720] ss:$16 sps:$4 sm:$0xff]   ;;  %v11563_v51 = vadd.f32 %v22845_v2, %v11520_v21 }
0x19d2   : > { %15115 = vmatpush2.bf16.msra.mxu1 %v19250_v40  ;;  %15073 = vmatprep.subr.bf16.mxu0 %v19255_v18  ;;  %v19291_v40 = vld [vmem:[%s20996_s19 + $0x504] ss:$16 sps:$4 sm:$0xff]   ;;  %v11606_v18 = vadd.f32 %v22936_v25, %v8546_v29  ;;  %v19298_v2 = vld [vmem:[%s20996_s19 + $0xae0] ss:$16 sps:$4 sm:$0xff]  }
0x19d3   : > { %15116 = vmatprep.subr.bf16.mxu1 %v19258_v5  ;;  %v19294_v5 = vld [vmem:[%s20996_s19 + $0x704] ss:$16 sps:$4 sm:$0xff]  }
0x19d4   : > { %v19300_v25 = vld [vmem:[%s20996_s19 + $0xae4] ss:$16 sps:$4 sm:$0xff]  }
0x19d5   : > { %15074 = vmatpush2.bf16.msra.mxu0 %v19253_v3  ;;  %v11567_v3 = vadd.f32 %v22924_v27, %v11524_v26 }
0x19d6   : > { %15117 = vmatpush2.bf16.msra.mxu1 %v19256_v55  ;;  %15075 = vmatprep.subr.bf16.mxu0 %v19261_v16  ;;  %v11653_v55 = vadd.f32 %v11652_v30, %v11610_v56  ;;  %v19289_v16 = vld [vmem:[%s20996_s19 + $0x500] ss:$16 sps:$4 sm:$0xff]  }
0x19d7   : > { %15118 = vmatprep.subr.bf16.mxu1 %v19264_v60  ;;  %v19292_v60 = vld [vmem:[%s20996_s19 + $0x700] ss:$16 sps:$4 sm:$0xff]  }
0x19d8   : > { %v11854_v27 = vmax.f32 %v11653_v55, 0.0  ;;  %v19313_v55 = vld [vmem:[%s20996_s19 + $0x880] ss:$16 sps:$4 sm:$0xff]  }
0x19d9   : > { %15076 = vmatpush2.bf16.msra.mxu0 %v19259_v48  ;;  %v19297_v48 = vld [vmem:[%s20996_s19 + $0x8e4] ss:$16 sps:$4 sm:$0xff]  }
0x19da   : > { %15119 = vmatpush2.bf16.msra.mxu1 %v19262_v53  ;;  %15077 = vmatprep.subr.bf16.mxu0 %v19267_v50  ;;  %v11649_v53 = vadd.f32 %v22941_v38, %v11606_v18  ;;  %v11852_v50 = vmax.f32 %v11567_v3, 0.0  ;;  %v19303_v38 = vld [vmem:[%s20996_s19 + $0x8c4] ss:$16 sps:$4 sm:$0xff]  }
0x19db   : > { %15120 = vmatprep.subr.bf16.mxu1 %v19270_v22  ;;  %v8550_v22 = vrot.slane %v22817_v0, %v21480_v33 }
0x19dd   : > { %15078 = vmatpush2.bf16.msra.mxu0 %v19265_v1  ;;  %v19295_v1 = vld [vmem:[%s20996_s19 + $0x8e0] ss:$16 sps:$4 sm:$0xff]  }
0x19de   : > { %15121 = vmatpush2.bf16.msra.mxu1 %v19268_v62  ;;  %15079 = vmatprep.subr.bf16.mxu0 %v19273_v61  ;;  %v11836_v62 = vmax.f32 %v11563_v51, 0.0  ;;  %v11838_v61 = vmax.f32 %v11649_v53, 0.0  ;;  %v19321_v51 = vld [vmem:[%s20996_s19 + $0x864] ss:$16 sps:$4 sm:$0xff]   ;;  %v19319_v53 = vld [vmem:[%s20996_s19 + $0x860] ss:$16 sps:$4 sm:$0xff]  }
0x19df   : > { %15122 = vmatprep.subr.bf16.mxu1 %v19276_v11 }
0x19e0   : > { %v23017_v11 = vpack.c.bf16 %v11852_v50, %v11836_v62  ;;  %v19327_v50 = vld [vmem:[%s20996_s19 + $0x844] ss:$16 sps:$4 sm:$0xff]  }
0x19e1   : > { %15080 = vmatpush2.bf16.msra.mxu0 %v19271_v20  ;;  %v19333_v62 = vld [vmem:[%s20996_s19 + $0x824] ss:$16 sps:$4 sm:$0xff]  }
0x19e2   : > { %15123 = vmatpush2.bf16.msra.mxu1 %v19274_v49  ;;  %15081 = vmatprep.subr.bf16.mxu0 %v19279_v4  ;;  %v19306_v49 = vld [vmem:[%s20996_s19 + $0xac4] ss:$16 sps:$4 sm:$0xff]   ;;  %v23021_v4 = vpack.c.bf16 %v11854_v27, %v11838_v61  ;;  %v19331_v61 = vld [vmem:[%s20996_s19 + $0x820] ss:$16 sps:$4 sm:$0xff]  }
0x19e3   : > { %15124 = vmatprep.subr.bf16.mxu1 %v19282_v6  ;;  %v19330_v27 = vld [vmem:[%s20996_s19 + $0xa44] ss:$16 sps:$4 sm:$0xff]  }
0x19e5   : > { %15082 = vmatpush2.bf16.msra.mxu0 %v19277_v45  ;;  %v19301_v45 = vld [vmem:[%s20996_s19 + $0x8c0] ss:$16 sps:$4 sm:$0xff]  }
0x19e6   : > { %15125 = vmatpush2.bf16.msra.mxu1 %v19280_v13  ;;  %15083 = vmatprep.subr.bf16.mxu0 %v19285_v44  ;;  %v19309_v13 = vld [vmem:[%s20996_s19 + $0x8a4] ss:$16 sps:$4 sm:$0xff]  }
0x19e7   : > { %15126 = vmatprep.subr.bf16.mxu1 %v19288_v15  ;;  %v19312_v15 = vld [vmem:[%s20996_s19 + $0xaa4] ss:$16 sps:$4 sm:$0xff]  }
0x19e9   : > { %15084 = vmatpush2.bf16.msra.mxu0 %v19283_v32  ;;  %v19307_v32 = vld [vmem:[%s20996_s19 + $0x8a0] ss:$16 sps:$4 sm:$0xff]  }
0x19ea   : > { %15127 = vmatpush2.bf16.msra.mxu1 %v19286_v43  ;;  %15085 = vmatprep.subr.bf16.mxu0 %v19291_v40  ;;  %v19310_v43 = vld [vmem:[%s20996_s19 + $0xaa0] ss:$16 sps:$4 sm:$0xff]   ;;  %v19315_v40 = vld [vmem:[%s20996_s19 + $0x884] ss:$16 sps:$4 sm:$0xff]  }
0x19eb   : > { %15128 = vmatprep.subr.bf16.mxu1 %v19294_v5  ;;  %v19318_v5 = vld [vmem:[%s20996_s19 + $0xa84] ss:$16 sps:$4 sm:$0xff]  }
0x19ed   : > { %15086 = vmatpush2.bf16.msra.mxu0 %v19289_v16  ;;  %v19316_v16 = vld [vmem:[%s20996_s19 + $0xa80] ss:$16 sps:$4 sm:$0xff]  }
0x19ee   : > { %15129 = vmatpush2.bf16.msra.mxu1 %v19292_v60  ;;  %15141 = vmatprep.subr.bf16.mxu0 %v19297_v48  ;;  %v19324_v48 = vld [vmem:[%s20996_s19 + $0xa64] ss:$16 sps:$4 sm:$0xff]  }
0x19ef   : > { %15184 = vmatprep.subr.bf16.mxu1 %v19300_v25  ;;  %v19322_v25 = vld [vmem:[%s20996_s19 + $0xa60] ss:$16 sps:$4 sm:$0xff]  }
0x19f0   : > { %v11689_v20 = vpop.f32.mrf.mxu0  ;;  %15088 = vmatmul.mubr.bf16.vlgmr.msra.gmra.mxu0 %v22676_v31 }
0x19f1   : > { %v11690_v33 = vadd.f32 %v11689_v20, %v8550_v22  ;;  %v11732_v6 = vpop.f32.mrf.mxu1  ;;  %15131 = vmatmul.mubr.bf16.vlgmr.msra.gmra.mxu1 %v22759_v54  ;;  %15142 = vmatpush1.bf16.msra.mxu0 %v19295_v1  ;;  %v19328_v1 = vld [vmem:[%s20996_s19 + $0xa40] ss:$16 sps:$4 sm:$0xff]   ;;  %v19339_v20 = vld [vmem:[%s20996_s19 + $0x804] ss:$16 sps:$4 sm:$0xff]  }
0x19f2   : > { %15173 = vmatprep.mubr.bf16.mxu0 %v23017_v11  ;;  %15185 = vmatpush1.bf16.msra.mxu1 %v19298_v2  ;;  %v23026_v14 = vpop.f32.mrf.mxu0  ;;  %v19336_v2 = vld [vmem:[%s20996_s19 + $0xa24] ss:$16 sps:$4 sm:$0xff]  }
0x19f3   : > { %v11733_v44 = vadd.f32 %v11732_v6, %v11690_v33  ;;  %15216 = vmatprep.mubr.bf16.mxu1 %v23021_v4  ;;  %v23031_v29 = vpop.f32.mrf.mxu1  ;;  %15143 = vmatprep.subr.bf16.mxu0 %v19303_v38  ;;  %v19334_v38 = vld [vmem:[%s20996_s19 + $0xa20] ss:$16 sps:$4 sm:$0xff]  }
0x19f4   : > { %v11693_v26 = vpop.f32.mrf.mxu0  ;;  %15186 = vmatprep.subr.bf16.mxu1 %v19306_v49  ;;  %v19342_v49 = vld [vmem:[%s20996_s19 + $0xa04] ss:$16 sps:$4 sm:$0xff]   ;;  %v19337_v33 = vld [vmem:[%s20996_s19 + $0x800] ss:$16 sps:$4 sm:$0xff]  }
0x19f5   : > { %v11694_v56 = vadd.f32 %v11693_v26, %v8550_v22  ;;  %15144 = vmatpush1.bf16.msra.mxu0 %v19301_v45  ;;  %v11736_v21 = vpop.f32.mrf.mxu1  ;;  %v11839_v3 = vmax.f32 %v11733_v44, 0.0  ;;  %v19325_v22 = vld [vmem:[%s20996_s19 + $0x840] ss:$16 sps:$4 sm:$0xff]   ;;  %v19345_v45 = vld [vmem:[%s20996_s19 + $0x9e4] ss:$16 sps:$4 sm:$0xff]  }
0x19f6   : > { %15187 = vmatpush1.bf16.msra.mxu1 %v19304_v39  ;;  %15145 = vmatprep.subr.bf16.mxu0 %v19309_v13  ;;  %v19340_v6 = vld [vmem:[%s20996_s19 + $0xa00] ss:$16 sps:$4 sm:$0xff]   ;;  %v19348_v39 = vld [vmem:[%s20996_s19 + $0xbe4] ss:$16 sps:$4 sm:$0xff]  }
0x19f7   : > { %v11737_v18 = vadd.f32 %v11736_v21, %v11694_v56  ;;  %15188 = vmatprep.subr.bf16.mxu1 %v19312_v15  ;;  %v19343_v13 = vld [vmem:[%s20996_s19 + $0x9e0] ss:$16 sps:$4 sm:$0xff]   ;;  %v19351_v15 = vld [vmem:[%s20996_s19 + $0x9c4] ss:$16 sps:$4 sm:$0xff]  }
0x19f8   : > { %v19346_v44 = vld [vmem:[%s20996_s19 + $0xbe0] ss:$16 sps:$4 sm:$0xff]   ;;  %v19354_v26 = vld [vmem:[%s20996_s19 + $0xbc4] ss:$16 sps:$4 sm:$0xff]  }
0x19f9   : > { %v11855_v30 = vmax.f32 %v11737_v18, 0.0  ;;  %15146 = vmatpush1.bf16.msra.mxu0 %v19307_v32  ;;  %v19349_v56 = vld [vmem:[%s20996_s19 + $0x9c0] ss:$16 sps:$4 sm:$0xff]   ;;  %v19357_v21 = vld [vmem:[%s20996_s19 + $0x9a4] ss:$16 sps:$4 sm:$0xff]  }
0x19fa   : > { %15189 = vmatpush1.bf16.msra.mxu1 %v19310_v43  ;;  %15147 = vmatprep.subr.bf16.mxu0 %v19315_v40  ;;  %v19352_v32 = vld [vmem:[%s20996_s19 + $0xbc0] ss:$16 sps:$4 sm:$0xff]   ;;  %v19360_v43 = vld [vmem:[%s20996_s19 + $0xba4] ss:$16 sps:$4 sm:$0xff]  }
0x19fb   : > { %v23041_v60 = vpack.c.bf16 %v11855_v30, %v11839_v3  ;;  %15190 = vmatprep.subr.bf16.mxu1 %v19318_v5  ;;  %v19355_v40 = vld [vmem:[%s20996_s19 + $0x9a0] ss:$16 sps:$4 sm:$0xff]   ;;  %v19363_v5 = vld [vmem:[%s20996_s19 + $0x984] ss:$16 sps:$4 sm:$0xff]  }
0x19fc   : > { %v19358_v18 = vld [vmem:[%s20996_s19 + $0xba0] ss:$16 sps:$4 sm:$0xff]   ;;  %v19366_v3 = vld [vmem:[%s20996_s19 + $0xb84] ss:$16 sps:$4 sm:$0xff]  }
0x19fd   : > { %15148 = vmatpush1.bf16.msra.mxu0 %v19313_v55  ;;  %v19361_v30 = vld [vmem:[%s20996_s19 + $0x980] ss:$16 sps:$4 sm:$0xff]  }
0x19fe   : > { %15191 = vmatpush1.bf16.msra.mxu1 %v19316_v16  ;;  %15149 = vmatprep.subr.bf16.mxu0 %v19321_v51  ;;  %v19364_v55 = vld [vmem:[%s20996_s19 + $0xb80] ss:$16 sps:$4 sm:$0xff]   ;;  %v19369_v16 = vld [vmem:[%s20996_s19 + $0x964] ss:$16 sps:$4 sm:$0xff]  }
0x19ff   : > { %15192 = vmatprep.subr.bf16.mxu1 %v19324_v48  ;;  %v19372_v51 = vld [vmem:[%s20996_s19 + $0xb64] ss:$16 sps:$4 sm:$0xff]   ;;  %v19367_v48 = vld [vmem:[%s20996_s19 + $0x960] ss:$16 sps:$4 sm:$0xff]  }
0x1a01   : > { %15150 = vmatpush1.bf16.msra.mxu0 %v19319_v53  ;;  %v19370_v53 = vld [vmem:[%s20996_s19 + $0xb60] ss:$16 sps:$4 sm:$0xff]  }
0x1a02   : > { %15193 = vmatpush1.bf16.msra.mxu1 %v19322_v25  ;;  %15151 = vmatprep.subr.bf16.mxu0 %v19327_v50  ;;  %v19375_v25 = vld [vmem:[%s20996_s19 + $0x944] ss:$16 sps:$4 sm:$0xff]  }
0x1a03   : > { %15194 = vmatprep.subr.bf16.mxu1 %v19330_v27  ;;  %v19378_v50 = vld [vmem:[%s20996_s19 + $0xb44] ss:$16 sps:$4 sm:$0xff]   ;;  %v11695_v27 = vpop.f32.mrf.mxu0 }
0x1a05   : > { %15152 = vmatpush1.bf16.msra.mxu0 %v19325_v22  ;;  %v19373_v22 = vld [vmem:[%s20996_s19 + $0x940] ss:$16 sps:$4 sm:$0xff]  }
0x1a06   : > { %15195 = vmatpush1.bf16.msra.mxu1 %v19328_v1  ;;  %15153 = vmatprep.subr.bf16.mxu0 %v19333_v62  ;;  %v8554_v1 = vrot.slane %v22817_v0, %v21486_v35  ;;  %v19376_v62 = vld [vmem:[%s20996_s19 + $0xb40] ss:$16 sps:$4 sm:$0xff]   ;;  %v19387_v35 = vld [vmem:[%s20996_s19 + $0x904] ss:$16 sps:$4 sm:$0xff]  }
0x1a07   : > { %15196 = vmatprep.subr.bf16.mxu1 %v19336_v2  ;;  %v19381_v2 = vld [vmem:[%s20996_s19 + $0x924] ss:$16 sps:$4 sm:$0xff]  }
0x1a09   : > { %15154 = vmatpush1.bf16.msra.mxu0 %v19331_v61  ;;  %v19384_v61 = vld [vmem:[%s20996_s19 + $0xb24] ss:$16 sps:$4 sm:$0xff]  }
0x1a0a   : > { %15197 = vmatpush1.bf16.msra.mxu1 %v19334_v38  ;;  %15155 = vmatprep.subr.bf16.mxu0 %v19339_v20  ;;  %v11696_v38 = vadd.f32 %v11695_v27, %v8554_v1  ;;  %v19379_v20 = vld [vmem:[%s20996_s19 + $0x920] ss:$16 sps:$4 sm:$0xff]  }
0x1a0b   : > { %15198 = vmatprep.subr.bf16.mxu1 %v19342_v49  ;;  %v11692_v49 = vadd.f32 %v23026_v14, %v8554_v1  ;;  %v19388_v14 = vld [vmem:[%s20996_s19 + $0xb00] ss:$16 sps:$4 sm:$0xff]  }
0x1a0c   : > { %v19403_v27 = vld [vmem:[%s20996_s19 + $0xca0] ss:$16 sps:$4 sm:$0xff]  }
0x1a0d   : > { %15156 = vmatpush1.bf16.msra.mxu0 %v19337_v33  ;;  %v19382_v33 = vld [vmem:[%s20996_s19 + $0xb20] ss:$16 sps:$4 sm:$0xff]  }
0x1a0e   : > { %15199 = vmatpush1.bf16.msra.mxu1 %v19340_v6  ;;  %15157 = vmatprep.subr.bf16.mxu0 %v19345_v45  ;;  %v11738_v6 = vpop.f32.mrf.mxu1  ;;  %v19390_v45 = vld [vmem:[%s20996_s19 + $0xb04] ss:$16 sps:$4 sm:$0xff]   ;;  %v19406_v1 = vld [vmem:[%s20996_s19 + $0xea0] ss:$16 sps:$4 sm:$0xff]  }
0x1a0f   : > { %15200 = vmatprep.subr.bf16.mxu1 %v19348_v39  ;;  %v11739_v39 = vadd.f32 %v11738_v6, %v11696_v38  ;;  %v19414_v38 = vld [vmem:[%s20996_s19 + $0xe84] ss:$16 sps:$4 sm:$0xff]  }
0x1a10   : > { %v19417_v6 = vld [vmem:[%s20996_s19 + $0xc64] ss:$16 sps:$4 sm:$0xff]  }
0x1a11   : > { %15158 = vmatpush2.bf16.msra.mxu0 %v19343_v13  ;;  %v19385_v13 = vld [vmem:[%s20996_s19 + $0x900] ss:$16 sps:$4 sm:$0xff]  }
0x1a12   : > { %15201 = vmatpush2.bf16.msra.mxu1 %v19346_v44  ;;  %15159 = vmatprep.subr.bf16.mxu0 %v19351_v15  ;;  %v11735_v44 = vadd.f32 %v23031_v29, %v11692_v49  ;;  %v19393_v15 = vld [vmem:[%s20996_s19 + $0xce4] ss:$16 sps:$4 sm:$0xff]   ;;  %v8562_v29 = vrot.slane %v22817_v0, %v21535_v58  ;;  %v19400_v0 = vld [vmem:[%s20996_s19 + $0xec0] ss:$16 sps:$4 sm:$0xff]  }
0x1a13   : > { %15202 = vmatprep.subr.bf16.mxu1 %v19354_v26  ;;  %v19396_v26 = vld [vmem:[%s20996_s19 + $0xee4] ss:$16 sps:$4 sm:$0xff]  }
0x1a15   : > { %15160 = vmatpush2.bf16.msra.mxu0 %v19349_v56  ;;  %v11856_v56 = vmax.f32 %v11739_v39, 0.0 }
0x1a16   : > { %15203 = vmatpush2.bf16.msra.mxu1 %v19352_v32  ;;  %15161 = vmatprep.subr.bf16.mxu0 %v19357_v21  ;;  %v19391_v32 = vld [vmem:[%s20996_s19 + $0xce0] ss:$16 sps:$4 sm:$0xff]   ;;  %v11840_v21 = vmax.f32 %v11735_v44, 0.0 }
0x1a17   : > { %15204 = vmatprep.subr.bf16.mxu1 %v19360_v43  ;;  %v19394_v43 = vld [vmem:[%s20996_s19 + $0xee0] ss:$16 sps:$4 sm:$0xff]  }
0x1a19   : > { %15162 = vmatpush2.bf16.msra.mxu0 %v19355_v40  ;;  %v19399_v40 = vld [vmem:[%s20996_s19 + $0xcc4] ss:$16 sps:$4 sm:$0xff]  }
0x1a1a   : > { %15205 = vmatpush2.bf16.msra.mxu1 %v19358_v18  ;;  %15163 = vmatprep.subr.bf16.mxu0 %v19363_v5  ;;  %v19402_v18 = vld [vmem:[%s20996_s19 + $0xec4] ss:$16 sps:$4 sm:$0xff]   ;;  %v23102_v5 = vpack.c.bf16 %v11856_v56, %v11840_v21  ;;  %v19424_v21 = vld [vmem:[%s20996_s19 + $0xe40] ss:$16 sps:$4 sm:$0xff]  }
0x1a1b   : > { %15206 = vmatprep.subr.bf16.mxu1 %v19366_v3  ;;  %v19426_v56 = vld [vmem:[%s20996_s19 + $0xe44] ss:$16 sps:$4 sm:$0xff]  }
0x1a1d   : > { %15164 = vmatpush2.bf16.msra.mxu0 %v19361_v30 }
0x1a1e   : > { %15207 = vmatpush2.bf16.msra.mxu1 %v19364_v55  ;;  %15165 = vmatprep.subr.bf16.mxu0 %v19369_v16  ;;  %v19397_v55 = vld [vmem:[%s20996_s19 + $0xcc0] ss:$16 sps:$4 sm:$0xff]   ;;  %v19405_v16 = vld [vmem:[%s20996_s19 + $0xca4] ss:$16 sps:$4 sm:$0xff]  }
0x1a1f   : > { %15208 = vmatprep.subr.bf16.mxu1 %v19372_v51 }
0x1a21   : > { %15166 = vmatpush2.bf16.msra.mxu0 %v19367_v48 }
0x1a22   : > { %15209 = vmatpush2.bf16.msra.mxu1 %v19370_v53  ;;  %15167 = vmatprep.subr.bf16.mxu0 %v19375_v25  ;;  %v19408_v53 = vld [vmem:[%s20996_s19 + $0xea4] ss:$16 sps:$4 sm:$0xff]  }
0x1a23   : > { %15210 = vmatprep.subr.bf16.mxu1 %v19378_v50 }
0x1a25   : > { %15168 = vmatpush2.bf16.msra.mxu0 %v19373_v22 }
0x1a26   : > { %15211 = vmatpush2.bf16.msra.mxu1 %v19376_v62  ;;  %15169 = vmatprep.subr.bf16.mxu0 %v19381_v2  ;;  %v19411_v62 = vld [vmem:[%s20996_s19 + $0xc84] ss:$16 sps:$4 sm:$0xff]  }
0x1a27   : > { %15212 = vmatprep.subr.bf16.mxu1 %v19384_v61 }
0x1a29   : > { %15170 = vmatpush2.bf16.msra.mxu0 %v19379_v20 }
0x1a2a   : > { %15213 = vmatpush2.bf16.msra.mxu1 %v19382_v33  ;;  %15171 = vmatprep.subr.bf16.mxu0 %v19387_v35  ;;  %v19409_v33 = vld [vmem:[%s20996_s19 + $0xc80] ss:$16 sps:$4 sm:$0xff]  }
0x1a2b   : > { %15214 = vmatprep.subr.bf16.mxu1 %v19390_v45  ;;  %v19412_v35 = vld [vmem:[%s20996_s19 + $0xe80] ss:$16 sps:$4 sm:$0xff]  }
0x1a2d   : > { %15172 = vmatpush2.bf16.msra.mxu0 %v19385_v13  ;;  %v19420_v13 = vld [vmem:[%s20996_s19 + $0xe64] ss:$16 sps:$4 sm:$0xff]  }
0x1a2e   : > { %15215 = vmatpush2.bf16.msra.mxu1 %v19388_v14  ;;  %15227 = vmatprep.subr.bf16.mxu0 %v19393_v15  ;;  %v19415_v14 = vld [vmem:[%s20996_s19 + $0xc60] ss:$16 sps:$4 sm:$0xff]  }
0x1a2f   : > { %15270 = vmatprep.subr.bf16.mxu1 %v19396_v26  ;;  %v19418_v15 = vld [vmem:[%s20996_s19 + $0xe60] ss:$16 sps:$4 sm:$0xff]   ;;  %v19423_v26 = vld [vmem:[%s20996_s19 + $0xc44] ss:$16 sps:$4 sm:$0xff]  }
0x1a30   : > { %v23104_v3 = vpop.f32.mrf.mxu0  ;;  %15174 = vmatmul.mubr.bf16.vlgmr.msra.gmra.mxu0 %v22855_v41 }
0x1a31   : > { %v23107_v30 = vpop.f32.mrf.mxu1  ;;  %15217 = vmatmul.mubr.bf16.vlgmr.msra.gmra.mxu1 %v22951_v23  ;;  %15228 = vmatpush1.bf16.msra.mxu0 %v19391_v32  ;;  %v19421_v32 = vld [vmem:[%s20996_s19 + $0xc40] ss:$16 sps:$4 sm:$0xff]  }
0x1a32   : > { %15259 = vmatprep.mubr.bf16.mxu0 %v23102_v5  ;;  %15271 = vmatpush1.bf16.msra.mxu1 %v19394_v43  ;;  %v11777_v58 = vpop.f32.mrf.mxu0  ;;  %v19429_v43 = vld [vmem:[%s20996_s19 + $0xc24] ss:$16 sps:$4 sm:$0xff]  }
0x1a33   : > { %v11778_v51 = vadd.f32 %v11777_v58, %v8562_v29  ;;  %v11820_v48 = vpop.f32.mrf.mxu1  ;;  %15229 = vmatprep.subr.bf16.mxu0 %v19399_v40  ;;  %15272 = vmatprep.subr.bf16.mxu1 %v19402_v18  ;;  %v19427_v40 = vld [vmem:[%s20996_s19 + $0xc20] ss:$16 sps:$4 sm:$0xff]   ;;  %v19438_v58 = vld [vmem:[%s20996_s19 + $0xe04] ss:$16 sps:$4 sm:$0xff]  }
0x1a34   : > { %v23115_v25 = vpop.f32.mrf.mxu0  ;;  %v19430_v18 = vld [vmem:[%s20996_s19 + $0xe20] ss:$16 sps:$4 sm:$0xff]  }
0x1a35   : > { %v23117_v50 = vpop.f32.mrf.mxu1  ;;  %15230 = vmatpush1.bf16.msra.mxu0 %v19397_v55  ;;  %v11821_v2 = vadd.f32 %v11820_v48, %v11778_v51  ;;  %v19435_v55 = vld [vmem:[%s20996_s19 + $0xc04] ss:$16 sps:$4 sm:$0xff]  }
0x1a36   : > { %15273 = vmatpush1.bf16.msra.mxu1 %v19400_v0  ;;  %v11781_v22 = vpop.f32.mrf.mxu0  ;;  %15231 = vmatprep.subr.bf16.mxu0 %v19405_v16  ;;  %v19433_v0 = vld [vmem:[%s20996_s19 + $0xc00] ss:$16 sps:$4 sm:$0xff]   ;;  %v19441_v51 = vld [vmem:[%s20996_s19 + $0xde4] ss:$16 sps:$4 sm:$0xff]  }
0x1a37   : > { %v11782_v61 = vadd.f32 %v11781_v22, %v8562_v29  ;;  %15274 = vmatprep.subr.bf16.mxu1 %v19408_v53  ;;  %v11824_v20 = vpop.f32.mrf.mxu1  ;;  %v11842_v45 = vmax.f32 %v11821_v2, 0.0  ;;  %v19432_v29 = vld [vmem:[%s20996_s19 + $0xe24] ss:$16 sps:$4 sm:$0xff]   ;;  %v19436_v16 = vld [vmem:[%s20996_s19 + $0xe00] ss:$16 sps:$4 sm:$0xff]  }
0x1a38   : > { %v19444_v48 = vld [vmem:[%s20996_s19 + $0xfe4] ss:$16 sps:$4 sm:$0xff]   ;;  %v19439_v53 = vld [vmem:[%s20996_s19 + $0xde0] ss:$16 sps:$4 sm:$0xff]  }
0x1a39   : > { %v11825_v49 = vadd.f32 %v11824_v20, %v11782_v61  ;;  %15232 = vmatpush1.bf16.msra.mxu0 %v19403_v27  ;;  %v19442_v27 = vld [vmem:[%s20996_s19 + $0xfe0] ss:$16 sps:$4 sm:$0xff]   ;;  %v19447_v22 = vld [vmem:[%s20996_s19 + $0xdc4] ss:$16 sps:$4 sm:$0xff]  }
0x1a3a   : > { %15275 = vmatpush1.bf16.msra.mxu1 %v19406_v1  ;;  %15233 = vmatprep.subr.bf16.mxu0 %v19411_v62  ;;  %v19450_v1 = vld [vmem:[%s20996_s19 + $0xfc4] ss:$16 sps:$4 sm:$0xff]   ;;  %v19445_v62 = vld [vmem:[%s20996_s19 + $0xdc0] ss:$16 sps:$4 sm:$0xff]  }
0x1a3b   : > { %v11858_v39 = vmax.f32 %v11825_v49, 0.0  ;;  %15276 = vmatprep.subr.bf16.mxu1 %v19414_v38  ;;  %v19448_v2 = vld [vmem:[%s20996_s19 + $0xfc0] ss:$16 sps:$4 sm:$0xff]   ;;  %v19453_v61 = vld [vmem:[%s20996_s19 + $0xda4] ss:$16 sps:$4 sm:$0xff]  }
0x1a3c   : > { %v19456_v38 = vld [vmem:[%s20996_s19 + $0xfa4] ss:$16 sps:$4 sm:$0xff]   ;;  %v19451_v20 = vld [vmem:[%s20996_s19 + $0xda0] ss:$16 sps:$4 sm:$0xff]  }
0x1a3d   : > { %v23127_v44 = vpack.c.bf16 %v11858_v39, %v11842_v45  ;;  %15234 = vmatpush1.bf16.msra.mxu0 %v19409_v33  ;;  %v19454_v49 = vld [vmem:[%s20996_s19 + $0xfa0] ss:$16 sps:$4 sm:$0xff]   ;;  %v19459_v33 = vld [vmem:[%s20996_s19 + $0xd84] ss:$16 sps:$4 sm:$0xff]  }
0x1a3e   : > { %15277 = vmatpush1.bf16.msra.mxu1 %v19412_v35  ;;  %15235 = vmatprep.subr.bf16.mxu0 %v19417_v6  ;;  %v19462_v35 = vld [vmem:[%s20996_s19 + $0xf84] ss:$16 sps:$4 sm:$0xff]   ;;  %v19457_v6 = vld [vmem:[%s20996_s19 + $0xd80] ss:$16 sps:$4 sm:$0xff]  }
0x1a3f   : > { %15302 = vmatprep.mubr.bf16.mxu1 %v23127_v44  ;;  %15278 = vmatprep.subr.bf16.mxu1 %v19420_v13  ;;  %v19460_v45 = vld [vmem:[%s20996_s19 + $0xf80] ss:$16 sps:$4 sm:$0xff]   ;;  %v19465_v39 = vld [vmem:[%s20996_s19 + $0xd64] ss:$16 sps:$4 sm:$0xff]  }
0x1a40   : > { %v19468_v13 = vld [vmem:[%s20996_s19 + $0xf64] ss:$16 sps:$4 sm:$0xff]  }
0x1a41   : > { %15236 = vmatpush1.bf16.msra.mxu0 %v19415_v14  ;;  %v19463_v14 = vld [vmem:[%s20996_s19 + $0xd60] ss:$16 sps:$4 sm:$0xff]  }
0x1a42   : > { %15279 = vmatpush1.bf16.msra.mxu1 %v19418_v15  ;;  %15237 = vmatprep.subr.bf16.mxu0 %v19423_v26  ;;  %v19466_v15 = vld [vmem:[%s20996_s19 + $0xf60] ss:$16 sps:$4 sm:$0xff]   ;;  %v19471_v26 = vld [vmem:[%s20996_s19 + $0xd44] ss:$16 sps:$4 sm:$0xff]  }
0x1a43   : > { %15280 = vmatprep.subr.bf16.mxu1 %v19426_v56  ;;  %v19474_v56 = vld [vmem:[%s20996_s19 + $0xf44] ss:$16 sps:$4 sm:$0xff]  }
0x1a45   : > { %15238 = vmatpush1.bf16.msra.mxu0 %v19421_v32  ;;  %v19961_v32 = vld [vmem:[%s20993_s20 + $0x8] sm:$0xff] }
0x1a46   : > { %15281 = vmatpush1.bf16.msra.mxu1 %v19424_v21  ;;  %15239 = vmatprep.subr.bf16.mxu0 %v19429_v43  ;;  %v8558_v21 = vrot.slane %v19961_v32, %v21532_v46  ;;  %v19469_v43 = vld [vmem:[%s20996_s19 + $0xd40] ss:$16 sps:$4 sm:$0xff]   ;;  %v19519_v32 = vld [vmem:[%s20996_s19 + $0x4c] ss:$16 sps:$4 sm:$0xff]  }
0x1a47   : > { %15282 = vmatprep.subr.bf16.mxu1 %v19432_v29  ;;  %v19472_v29 = vld [vmem:[%s20996_s19 + $0xf40] ss:$16 sps:$4 sm:$0xff]  }
0x1a48   : > { %v19478_v46 = vld [vmem:[%s20996_s19 + $0xf20] ss:$16 sps:$4 sm:$0xff]  }
0x1a49   : > { %15240 = vmatpush1.bf16.msra.mxu0 %v19427_v40  ;;  %v19477_v40 = vld [vmem:[%s20996_s19 + $0xd24] ss:$16 sps:$4 sm:$0xff]  }
0x1a4a   : > { %15283 = vmatpush1.bf16.msra.mxu1 %v19430_v18  ;;  %15241 = vmatprep.subr.bf16.mxu0 %v19435_v55  ;;  %v11780_v18 = vadd.f32 %v23115_v25, %v8558_v21  ;;  %v19480_v55 = vld [vmem:[%s20996_s19 + $0xf24] ss:$16 sps:$4 sm:$0xff]  }
0x1a4b   : > { %15284 = vmatprep.subr.bf16.mxu1 %v19438_v58  ;;  %v11776_v58 = vadd.f32 %v23104_v3, %v8558_v21  ;;  %v19484_v3 = vld [vmem:[%s20996_s19 + $0xf00] ss:$16 sps:$4 sm:$0xff]   ;;  %v19522_v21 = vld [vmem:[%s20996_s19 + $0x24c] ss:$16 sps:$4 sm:$0xff]  }
0x1a4d   : > { %15242 = vmatpush1.bf16.msra.mxu0 %v19433_v0  ;;  %v19475_v0 = vld [vmem:[%s20996_s19 + $0xd20] ss:$16 sps:$4 sm:$0xff]   ;;  %v11819_v25 = vadd.f32 %v23107_v30, %v11776_v58  ;;  %v19490_v30 = vld [vmem:[%s20996_s19 + $0x2e8] ss:$16 sps:$4 sm:$0xff]  }
0x1a4e   : > { %15285 = vmatpush1.bf16.msra.mxu1 %v19436_v16  ;;  %15243 = vmatprep.subr.bf16.mxu0 %v19441_v51  ;;  %v19483_v16 = vld [vmem:[%s20996_s19 + $0xd04] ss:$16 sps:$4 sm:$0xff]   ;;  %v11823_v51 = vadd.f32 %v23117_v50, %v11780_v18  ;;  %v19487_v50 = vld [vmem:[%s20996_s19 + $0xe8] ss:$16 sps:$4 sm:$0xff]   ;;  %v19528_v18 = vld [vmem:[%s20996_s19 + $0x22c] ss:$16 sps:$4 sm:$0xff]  }
0x1a4f   : > { %15286 = vmatprep.subr.bf16.mxu1 %v19444_v48  ;;  %v19486_v48 = vld [vmem:[%s20996_s19 + $0xf04] ss:$16 sps:$4 sm:$0xff]   ;;  %v19526_v58 = vld [vmem:[%s20996_s19 + $0x228] ss:$16 sps:$4 sm:$0xff]  }
0x1a51   : > { %15244 = vmatpush2.bf16.msra.mxu0 %v19439_v53  ;;  %v19481_v53 = vld [vmem:[%s20996_s19 + $0xd00] ss:$16 sps:$4 sm:$0xff]  }
0x1a52   : > { %15287 = vmatpush2.bf16.msra.mxu1 %v19442_v27  ;;  %15245 = vmatprep.subr.bf16.mxu0 %v19447_v22  ;;  %v19489_v27 = vld [vmem:[%s20996_s19 + $0xec] ss:$16 sps:$4 sm:$0xff]   ;;  %v11857_v22 = vmax.f32 %v11823_v51, 0.0  ;;  %v19532_v51 = vld [vmem:[%s20996_s19 + $0x208] ss:$16 sps:$4 sm:$0xff]  }
0x1a53   : > { %15288 = vmatprep.subr.bf16.mxu1 %v19450_v1  ;;  %v19492_v1 = vld [vmem:[%s20996_s19 + $0x2ec] ss:$16 sps:$4 sm:$0xff]  }
0x1a55   : > { %15246 = vmatpush2.bf16.msra.mxu0 %v19445_v62  ;;  %v11841_v62 = vmax.f32 %v11819_v25, 0.0  ;;  %v19540_v25 = vld [vmem:[%s20996_s19 + $0x3ec] ss:$16 sps:$4 sm:$0xff]  }
0x1a56   : > { %15289 = vmatpush2.bf16.msra.mxu1 %v19448_v2  ;;  %15247 = vmatprep.subr.bf16.mxu0 %v19453_v61  ;;  %v19495_v61 = vld [vmem:[%s20996_s19 + $0xcc] ss:$16 sps:$4 sm:$0xff]  }
0x1a57   : > { %15290 = vmatprep.subr.bf16.mxu1 %v19456_v38  ;;  %v23186_v2 = vpack.c.bf16 %v11857_v22, %v11841_v62  ;;  %v19498_v38 = vld [vmem:[%s20996_s19 + $0x2cc] ss:$16 sps:$4 sm:$0xff]   ;;  %v19544_v62 = vld [vmem:[%s20996_s19 + $0x3c8] ss:$16 sps:$4 sm:$0xff]  }
0x1a58   : > { %v19546_v22 = vld [vmem:[%s20996_s19 + $0x3cc] ss:$16 sps:$4 sm:$0xff]  }
0x1a59   : > { %15248 = vmatpush2.bf16.msra.mxu0 %v19451_v20  ;;  %v19493_v20 = vld [vmem:[%s20996_s19 + $0xc8] ss:$16 sps:$4 sm:$0xff]  }
0x1a5a   : > { %15291 = vmatpush2.bf16.msra.mxu1 %v19454_v49  ;;  %15249 = vmatprep.subr.bf16.mxu0 %v19459_v33  ;;  %v19496_v49 = vld [vmem:[%s20996_s19 + $0x2c8] ss:$16 sps:$4 sm:$0xff]   ;;  %v19501_v33 = vld [vmem:[%s20996_s19 + $0xac] ss:$16 sps:$4 sm:$0xff]  }
0x1a5b   : > { %15292 = vmatprep.subr.bf16.mxu1 %v19462_v35  ;;  %v19504_v35 = vld [vmem:[%s20996_s19 + $0x2ac] ss:$16 sps:$4 sm:$0xff]  }
0x1a5d   : > { %15250 = vmatpush2.bf16.msra.mxu0 %v19457_v6  ;;  %v19499_v6 = vld [vmem:[%s20996_s19 + $0xa8] ss:$16 sps:$4 sm:$0xff]  }
0x1a5e   : > { %15293 = vmatpush2.bf16.msra.mxu1 %v19460_v45  ;;  %15251 = vmatprep.subr.bf16.mxu0 %v19465_v39  ;;  %v19502_v45 = vld [vmem:[%s20996_s19 + $0x2a8] ss:$16 sps:$4 sm:$0xff]   ;;  %v19510_v39 = vld [vmem:[%s20996_s19 + $0x28c] ss:$16 sps:$4 sm:$0xff]  }
0x1a5f   : > { %15294 = vmatprep.subr.bf16.mxu1 %v19468_v13  ;;  %v19508_v13 = vld [vmem:[%s20996_s19 + $0x288] ss:$16 sps:$4 sm:$0xff]  }
0x1a61   : > { %15252 = vmatpush2.bf16.msra.mxu0 %v19463_v14  ;;  %v19513_v14 = vld [vmem:[%s20996_s19 + $0x6c] ss:$16 sps:$4 sm:$0xff]  }
0x1a62   : > { %15295 = vmatpush2.bf16.msra.mxu1 %v19466_v15  ;;  %15253 = vmatprep.subr.bf16.mxu0 %v19471_v26  ;;  %v19516_v15 = vld [vmem:[%s20996_s19 + $0x26c] ss:$16 sps:$4 sm:$0xff]   ;;  %v19511_v26 = vld [vmem:[%s20996_s19 + $0x68] ss:$16 sps:$4 sm:$0xff]  }
0x1a63   : > { %15296 = vmatprep.subr.bf16.mxu1 %v19474_v56  ;;  %v19514_v56 = vld [vmem:[%s20996_s19 + $0x268] ss:$16 sps:$4 sm:$0xff]  }
0x1a65   : > { %15254 = vmatpush2.bf16.msra.mxu0 %v19469_v43  ;;  %v19517_v43 = vld [vmem:[%s20996_s19 + $0x48] ss:$16 sps:$4 sm:$0xff]  }
0x1a66   : > { %15297 = vmatpush2.bf16.msra.mxu1 %v19472_v29  ;;  %15255 = vmatprep.subr.bf16.mxu0 %v19477_v40  ;;  %v19520_v29 = vld [vmem:[%s20996_s19 + $0x248] ss:$16 sps:$4 sm:$0xff]   ;;  %v19525_v40 = vld [vmem:[%s20996_s19 + $0x2c] ss:$16 sps:$4 sm:$0xff]  }
0x1a67   : > { %15298 = vmatprep.subr.bf16.mxu1 %v19480_v55  ;;  %v19523_v55 = vld [vmem:[%s20996_s19 + $0x28] ss:$16 sps:$4 sm:$0xff]  }
0x1a69   : > { %15256 = vmatpush2.bf16.msra.mxu0 %v19475_v0  ;;  %v19531_v0 = vld [vmem:[%s20996_s19 + $0xc] ss:$16 sps:$4 sm:$0xff]  }
0x1a6a   : > { %15299 = vmatpush2.bf16.msra.mxu1 %v19478_v46  ;;  %15257 = vmatprep.subr.bf16.mxu0 %v19483_v16  ;;  %v19534_v46 = vld [vmem:[%s20996_s19 + $0x20c] ss:$16 sps:$4 sm:$0xff]   ;;  %v19529_v16 = vld [vmem:[%s20996_s19 + $0x8] ss:$16 sps:$4 sm:$0xff]  }
0x1a6b   : > { %15300 = vmatprep.subr.bf16.mxu1 %v19486_v48  ;;  %v19537_v48 = vld [vmem:[%s20996_s19 + $0x1ec] ss:$16 sps:$4 sm:$0xff]  }
0x1a6d   : > { %15258 = vmatpush2.bf16.msra.mxu0 %v19481_v53  ;;  %v19535_v53 = vld [vmem:[%s20996_s19 + $0x1e8] ss:$16 sps:$4 sm:$0xff]  }
0x1a6e   : > { %15301 = vmatpush2.bf16.msra.mxu1 %v19484_v3  ;;  %15313 = vmatprep.subr.bf16.mxu0 %v19489_v27  ;;  %v19538_v3 = vld [vmem:[%s20996_s19 + $0x3e8] ss:$16 sps:$4 sm:$0xff]   ;;  %v19543_v27 = vld [vmem:[%s20996_s19 + $0x1cc] ss:$16 sps:$4 sm:$0xff]  }
0x1a6f   : > { %15356 = vmatprep.subr.bf16.mxu1 %v19492_v1  ;;  %v19541_v1 = vld [vmem:[%s20996_s19 + $0x1c8] ss:$16 sps:$4 sm:$0xff]  }
0x1a70   : > { %15260 = vmatmul.mubr.bf16.vlgmr.msra.gmra.mxu0 %v23041_v60 }
0x1a71   : > { %15303 = vmatmul.mubr.bf16.vlgmr.msra.gmra.mxu1 %v23186_v2  ;;  %15314 = vmatpush1.bf16.msra.mxu0 %v19487_v50  ;;  %v19549_v50 = vld [vmem:[%s20996_s19 + $0x1ac] ss:$16 sps:$4 sm:$0xff]  }
0x1a72   : > { %15345 = vmatprep.mubr.bf16.mxu0 %v22831_v42  ;;  %15357 = vmatpush1.bf16.msra.mxu1 %v19490_v30  ;;  %v19507_v42 = vld [vmem:[%s20996_s19 + $0x8c] ss:$16 sps:$4 sm:$0xff]  }
0x1a73   : > { %15388 = vmatprep.mubr.bf16.mxu1 %v22835_v9  ;;  %15315 = vmatprep.subr.bf16.mxu0 %v19495_v61  ;;  %v19505_v9 = vld [vmem:[%s20996_s19 + $0x88] ss:$16 sps:$4 sm:$0xff]   ;;  %v19552_v30 = vld [vmem:[%s20996_s19 + $0x3ac] ss:$16 sps:$4 sm:$0xff]  }
0x1a74   : > { %15358 = vmatprep.subr.bf16.mxu1 %v19498_v38  ;;  %v19547_v61 = vld [vmem:[%s20996_s19 + $0x1a8] ss:$16 sps:$4 sm:$0xff]  }
0x1a75   : > { %15316 = vmatpush1.bf16.msra.mxu0 %v19493_v20  ;;  %v19550_v38 = vld [vmem:[%s20996_s19 + $0x3a8] ss:$16 sps:$4 sm:$0xff]   ;;  %v19555_v20 = vld [vmem:[%s20996_s19 + $0x18c] ss:$16 sps:$4 sm:$0xff]  }
0x1a76   : > { %15359 = vmatpush1.bf16.msra.mxu1 %v19496_v49  ;;  %15317 = vmatprep.subr.bf16.mxu0 %v19501_v33  ;;  %v19558_v49 = vld [vmem:[%s20996_s19 + $0x38c] ss:$16 sps:$4 sm:$0xff]   ;;  %v19553_v33 = vld [vmem:[%s20996_s19 + $0x188] ss:$16 sps:$4 sm:$0xff]  }
0x1a77   : > { %15360 = vmatprep.subr.bf16.mxu1 %v19504_v35  ;;  %v19556_v35 = vld [vmem:[%s20996_s19 + $0x388] ss:$16 sps:$4 sm:$0xff]  }
0x1a79   : > { %15318 = vmatpush1.bf16.msra.mxu0 %v19499_v6  ;;  %v19561_v6 = vld [vmem:[%s20996_s19 + $0x16c] ss:$16 sps:$4 sm:$0xff]  }
0x1a7a   : > { %15361 = vmatpush1.bf16.msra.mxu1 %v19502_v45  ;;  %15319 = vmatprep.subr.bf16.mxu0 %v19507_v42  ;;  %v19564_v45 = vld [vmem:[%s20996_s19 + $0x36c] ss:$16 sps:$4 sm:$0xff]   ;;  %v19559_v42 = vld [vmem:[%s20996_s19 + $0x168] ss:$16 sps:$4 sm:$0xff]  }
0x1a7b   : > { %15362 = vmatprep.subr.bf16.mxu1 %v19510_v39  ;;  %v19562_v39 = vld [vmem:[%s20996_s19 + $0x368] ss:$16 sps:$4 sm:$0xff]  }
0x1a7d   : > { %15320 = vmatpush1.bf16.msra.mxu0 %v19505_v9  ;;  %v19567_v9 = vld [vmem:[%s20996_s19 + $0x14c] ss:$16 sps:$4 sm:$0xff]  }
0x1a7e   : > { %15363 = vmatpush1.bf16.msra.mxu1 %v19508_v13  ;;  %15321 = vmatprep.subr.bf16.mxu0 %v19513_v14  ;;  %v19570_v13 = vld [vmem:[%s20996_s19 + $0x34c] ss:$16 sps:$4 sm:$0xff]   ;;  %v19565_v14 = vld [vmem:[%s20996_s19 + $0x148] ss:$16 sps:$4 sm:$0xff]  }
0x1a7f   : > { %15364 = vmatprep.subr.bf16.mxu1 %v19516_v15  ;;  %v19568_v15 = vld [vmem:[%s20996_s19 + $0x348] ss:$16 sps:$4 sm:$0xff]  }
0x1a81   : > { %15322 = vmatpush1.bf16.msra.mxu0 %v19511_v26  ;;  %v19573_v26 = vld [vmem:[%s20996_s19 + $0x12c] ss:$16 sps:$4 sm:$0xff]  }
0x1a82   : > { %15365 = vmatpush1.bf16.msra.mxu1 %v19514_v56  ;;  %15323 = vmatprep.subr.bf16.mxu0 %v19519_v32  ;;  %v19576_v56 = vld [vmem:[%s20996_s19 + $0x32c] ss:$16 sps:$4 sm:$0xff]   ;;  %v19571_v32 = vld [vmem:[%s20996_s19 + $0x128] ss:$16 sps:$4 sm:$0xff]  }
0x1a83   : > { %15366 = vmatprep.subr.bf16.mxu1 %v19522_v21  ;;  %v19574_v21 = vld [vmem:[%s20996_s19 + $0x328] ss:$16 sps:$4 sm:$0xff]  }
0x1a85   : > { %15324 = vmatpush1.bf16.msra.mxu0 %v19517_v43  ;;  %v19579_v43 = vld [vmem:[%s20996_s19 + $0x10c] ss:$16 sps:$4 sm:$0xff]  }
0x1a86   : > { %15367 = vmatpush1.bf16.msra.mxu1 %v19520_v29  ;;  %15325 = vmatprep.subr.bf16.mxu0 %v19525_v40  ;;  %v19582_v29 = vld [vmem:[%s20996_s19 + $0x30c] ss:$16 sps:$4 sm:$0xff]   ;;  %v19577_v40 = vld [vmem:[%s20996_s19 + $0x108] ss:$16 sps:$4 sm:$0xff]  }
0x1a87   : > { %15368 = vmatprep.subr.bf16.mxu1 %v19528_v18  ;;  %v19580_v18 = vld [vmem:[%s20996_s19 + $0x308] ss:$16 sps:$4 sm:$0xff]  }
0x1a89   : > { %15326 = vmatpush1.bf16.msra.mxu0 %v19523_v55  ;;  %v19585_v55 = vld [vmem:[%s20996_s19 + $0x4ec] ss:$16 sps:$4 sm:$0xff]  }
0x1a8a   : > { %15369 = vmatpush1.bf16.msra.mxu1 %v19526_v58  ;;  %15327 = vmatprep.subr.bf16.mxu0 %v19531_v0  ;;  %v19588_v58 = vld [vmem:[%s20996_s19 + $0x6ec] ss:$16 sps:$4 sm:$0xff]   ;;  %v19583_v0 = vld [vmem:[%s20996_s19 + $0x4e8] ss:$16 sps:$4 sm:$0xff]  }
0x1a8b   : > { %15370 = vmatprep.subr.bf16.mxu1 %v19534_v46  ;;  %v19586_v46 = vld [vmem:[%s20996_s19 + $0x6e8] ss:$16 sps:$4 sm:$0xff]  }
0x1a8d   : > { %15328 = vmatpush1.bf16.msra.mxu0 %v19529_v16  ;;  %v19591_v16 = vld [vmem:[%s20996_s19 + $0x4cc] ss:$16 sps:$4 sm:$0xff]  }
0x1a8e   : > { %15371 = vmatpush1.bf16.msra.mxu1 %v19532_v51  ;;  %15329 = vmatprep.subr.bf16.mxu0 %v19537_v48  ;;  %v19594_v51 = vld [vmem:[%s20996_s19 + $0x6cc] ss:$16 sps:$4 sm:$0xff]   ;;  %v19589_v48 = vld [vmem:[%s20996_s19 + $0x4c8] ss:$16 sps:$4 sm:$0xff]  }
0x1a8f   : > { %15372 = vmatprep.subr.bf16.mxu1 %v19540_v25  ;;  %v19592_v25 = vld [vmem:[%s20996_s19 + $0x6c8] ss:$16 sps:$4 sm:$0xff]  }
0x1a91   : > { %15330 = vmatpush2.bf16.msra.mxu0 %v19535_v53  ;;  %v19597_v53 = vld [vmem:[%s20996_s19 + $0x4ac] ss:$16 sps:$4 sm:$0xff]  }
0x1a92   : > { %15373 = vmatpush2.bf16.msra.mxu1 %v19538_v3  ;;  %15331 = vmatprep.subr.bf16.mxu0 %v19543_v27  ;;  %v19598_v3 = vld [vmem:[%s20996_s19 + $0x6a8] ss:$16 sps:$4 sm:$0xff]   ;;  %v19606_v27 = vld [vmem:[%s20996_s19 + $0x68c] ss:$16 sps:$4 sm:$0xff]  }
0x1a93   : > { %15374 = vmatprep.subr.bf16.mxu1 %v19546_v22  ;;  %v19604_v22 = vld [vmem:[%s20996_s19 + $0x688] ss:$16 sps:$4 sm:$0xff]  }
0x1a95   : > { %15332 = vmatpush2.bf16.msra.mxu0 %v19541_v1  ;;  %v19609_v1 = vld [vmem:[%s20996_s19 + $0x46c] ss:$16 sps:$4 sm:$0xff]  }
0x1a96   : > { %15375 = vmatpush2.bf16.msra.mxu1 %v19544_v62  ;;  %15333 = vmatprep.subr.bf16.mxu0 %v19549_v50  ;;  %v19612_v62 = vld [vmem:[%s20996_s19 + $0x66c] ss:$16 sps:$4 sm:$0xff]   ;;  %v19607_v50 = vld [vmem:[%s20996_s19 + $0x468] ss:$16 sps:$4 sm:$0xff]  }
0x1a97   : > { %15376 = vmatprep.subr.bf16.mxu1 %v19552_v30  ;;  %v19610_v30 = vld [vmem:[%s20996_s19 + $0x668] ss:$16 sps:$4 sm:$0xff]  }
0x1a99   : > { %15334 = vmatpush2.bf16.msra.mxu0 %v19547_v61  ;;  %v19615_v61 = vld [vmem:[%s20996_s19 + $0x44c] ss:$16 sps:$4 sm:$0xff]  }
0x1a9a   : > { %15377 = vmatpush2.bf16.msra.mxu1 %v19550_v38  ;;  %15335 = vmatprep.subr.bf16.mxu0 %v19555_v20  ;;  %v19618_v38 = vld [vmem:[%s20996_s19 + $0x64c] ss:$16 sps:$4 sm:$0xff]   ;;  %v19613_v20 = vld [vmem:[%s20996_s19 + $0x448] ss:$16 sps:$4 sm:$0xff]  }
0x1a9b   : > { %15378 = vmatprep.subr.bf16.mxu1 %v19558_v49  ;;  %v19616_v49 = vld [vmem:[%s20996_s19 + $0x648] ss:$16 sps:$4 sm:$0xff]  }
0x1a9d   : > { %15336 = vmatpush2.bf16.msra.mxu0 %v19553_v33  ;;  %v19621_v33 = vld [vmem:[%s20996_s19 + $0x42c] ss:$16 sps:$4 sm:$0xff]  }
0x1a9e   : > { %15379 = vmatpush2.bf16.msra.mxu1 %v19556_v35  ;;  %15337 = vmatprep.subr.bf16.mxu0 %v19561_v6  ;;  %v19624_v35 = vld [vmem:[%s20996_s19 + $0x62c] ss:$16 sps:$4 sm:$0xff]   ;;  %v19619_v6 = vld [vmem:[%s20996_s19 + $0x428] ss:$16 sps:$4 sm:$0xff]  }
0x1a9f   : > { %15380 = vmatprep.subr.bf16.mxu1 %v19564_v45  ;;  %v19622_v45 = vld [vmem:[%s20996_s19 + $0x628] ss:$16 sps:$4 sm:$0xff]  }
0x1aa1   : > { %15338 = vmatpush2.bf16.msra.mxu0 %v19559_v42  ;;  %v19627_v42 = vld [vmem:[%s20996_s19 + $0x40c] ss:$16 sps:$4 sm:$0xff]  }
0x1aa2   : > { %15381 = vmatpush2.bf16.msra.mxu1 %v19562_v39  ;;  %15339 = vmatprep.subr.bf16.mxu0 %v19567_v9  ;;  %v19630_v39 = vld [vmem:[%s20996_s19 + $0x60c] ss:$16 sps:$4 sm:$0xff]   ;;  %v19625_v9 = vld [vmem:[%s20996_s19 + $0x408] ss:$16 sps:$4 sm:$0xff]  }
0x1aa3   : > { %15382 = vmatprep.subr.bf16.mxu1 %v19570_v13  ;;  %v19628_v13 = vld [vmem:[%s20996_s19 + $0x608] ss:$16 sps:$4 sm:$0xff]  }
0x1aa5   : > { %15340 = vmatpush2.bf16.msra.mxu0 %v19565_v14  ;;  %v19633_v14 = vld [vmem:[%s20996_s19 + $0x5ec] ss:$16 sps:$4 sm:$0xff]  }
0x1aa6   : > { %15383 = vmatpush2.bf16.msra.mxu1 %v19568_v15  ;;  %15341 = vmatprep.subr.bf16.mxu0 %v19573_v26  ;;  %v19636_v15 = vld [vmem:[%s20996_s19 + $0x7ec] ss:$16 sps:$4 sm:$0xff]   ;;  %v19631_v26 = vld [vmem:[%s20996_s19 + $0x5e8] ss:$16 sps:$4 sm:$0xff]  }
0x1aa7   : > { %15384 = vmatprep.subr.bf16.mxu1 %v19576_v56  ;;  %v19634_v56 = vld [vmem:[%s20996_s19 + $0x7e8] ss:$16 sps:$4 sm:$0xff]  }
0x1aa9   : > { %15342 = vmatpush2.bf16.msra.mxu0 %v19571_v32  ;;  %v19639_v32 = vld [vmem:[%s20996_s19 + $0x5cc] ss:$16 sps:$4 sm:$0xff]  }
0x1aaa   : > { %15385 = vmatpush2.bf16.msra.mxu1 %v19574_v21  ;;  %15343 = vmatprep.subr.bf16.mxu0 %v19579_v43  ;;  %v19642_v21 = vld [vmem:[%s20996_s19 + $0x7cc] ss:$16 sps:$4 sm:$0xff]   ;;  %v19637_v43 = vld [vmem:[%s20996_s19 + $0x5c8] ss:$16 sps:$4 sm:$0xff]  }
0x1aab   : > { %15386 = vmatprep.subr.bf16.mxu1 %v19582_v29  ;;  %v19640_v29 = vld [vmem:[%s20996_s19 + $0x7c8] ss:$16 sps:$4 sm:$0xff]  }
0x1aad   : > { %15344 = vmatpush2.bf16.msra.mxu0 %v19577_v40  ;;  %v19645_v40 = vld [vmem:[%s20996_s19 + $0x5ac] ss:$16 sps:$4 sm:$0xff]  }
0x1aae   : > { %15387 = vmatpush2.bf16.msra.mxu1 %v19580_v18  ;;  %15399 = vmatprep.subr.bf16.mxu0 %v19585_v55  ;;  %v19648_v18 = vld [vmem:[%s20996_s19 + $0x7ac] ss:$16 sps:$4 sm:$0xff]   ;;  %v19643_v55 = vld [vmem:[%s20996_s19 + $0x5a8] ss:$16 sps:$4 sm:$0xff]  }
0x1aaf   : > { %15442 = vmatprep.subr.bf16.mxu1 %v19588_v58  ;;  %v19646_v58 = vld [vmem:[%s20996_s19 + $0x7a8] ss:$16 sps:$4 sm:$0xff]  }
0x1ab0   : > { %15346 = vmatmul.mubr.bf16.vlgmr.msra.gmra.mxu0 %v22516_v52  ;;  %v19600_v52 = vld [vmem:[%s20996_s19 + $0x6ac] ss:$16 sps:$4 sm:$0xff]  }
0x1ab1   : > { %15389 = vmatmul.mubr.bf16.vlgmr.msra.gmra.mxu1 %v22596_v19  ;;  %15400 = vmatpush1.bf16.msra.mxu0 %v19583_v0  ;;  %v19595_v19 = vld [vmem:[%s20996_s19 + $0x4a8] ss:$16 sps:$4 sm:$0xff]   ;;  %v19651_v0 = vld [vmem:[%s20996_s19 + $0x58c] ss:$16 sps:$4 sm:$0xff]  }
0x1ab2   : > { %15431 = vmatprep.mubr.bf16.mxu0 %v22927_v36  ;;  %15443 = vmatpush1.bf16.msra.mxu1 %v19586_v46  ;;  %v19603_v36 = vld [vmem:[%s20996_s19 + $0x48c] ss:$16 sps:$4 sm:$0xff]  }
0x1ab3   : > { %15474 = vmatprep.mubr.bf16.mxu1 %v22931_v59  ;;  %15401 = vmatprep.subr.bf16.mxu0 %v19591_v16  ;;  %v19601_v59 = vld [vmem:[%s20996_s19 + $0x488] ss:$16 sps:$4 sm:$0xff]   ;;  %v19654_v46 = vld [vmem:[%s20996_s19 + $0x78c] ss:$16 sps:$4 sm:$0xff]  }
0x1ab4   : > { %15444 = vmatprep.subr.bf16.mxu1 %v19594_v51  ;;  %v19649_v16 = vld [vmem:[%s20996_s19 + $0x588] ss:$16 sps:$4 sm:$0xff]  }
0x1ab5   : > { %15402 = vmatpush1.bf16.msra.mxu0 %v19589_v48  ;;  %v19652_v51 = vld [vmem:[%s20996_s19 + $0x788] ss:$16 sps:$4 sm:$0xff]   ;;  %v19657_v48 = vld [vmem:[%s20996_s19 + $0x56c] ss:$16 sps:$4 sm:$0xff]  }
0x1ab6   : > { %15445 = vmatpush1.bf16.msra.mxu1 %v19592_v25  ;;  %15403 = vmatprep.subr.bf16.mxu0 %v19597_v53  ;;  %v19660_v25 = vld [vmem:[%s20996_s19 + $0x76c] ss:$16 sps:$4 sm:$0xff]   ;;  %v19655_v53 = vld [vmem:[%s20996_s19 + $0x568] ss:$16 sps:$4 sm:$0xff]  }
0x1ab7   : > { %15446 = vmatprep.subr.bf16.mxu1 %v19600_v52  ;;  %v19658_v52 = vld [vmem:[%s20996_s19 + $0x768] ss:$16 sps:$4 sm:$0xff]  }
0x1ab9   : > { %15404 = vmatpush1.bf16.msra.mxu0 %v19595_v19  ;;  %v19663_v19 = vld [vmem:[%s20996_s19 + $0x54c] ss:$16 sps:$4 sm:$0xff]  }
0x1aba   : > { %15447 = vmatpush1.bf16.msra.mxu1 %v19598_v3  ;;  %15405 = vmatprep.subr.bf16.mxu0 %v19603_v36  ;;  %v19666_v3 = vld [vmem:[%s20996_s19 + $0x74c] ss:$16 sps:$4 sm:$0xff]   ;;  %v19661_v36 = vld [vmem:[%s20996_s19 + $0x548] ss:$16 sps:$4 sm:$0xff]  }
0x1abb   : > { %15448 = vmatprep.subr.bf16.mxu1 %v19606_v27  ;;  %v19664_v27 = vld [vmem:[%s20996_s19 + $0x748] ss:$16 sps:$4 sm:$0xff]  }
0x1abd   : > { %15406 = vmatpush1.bf16.msra.mxu0 %v19601_v59  ;;  %v19669_v59 = vld [vmem:[%s20996_s19 + $0x52c] ss:$16 sps:$4 sm:$0xff]  }
0x1abe   : > { %15449 = vmatpush1.bf16.msra.mxu1 %v19604_v22  ;;  %15407 = vmatprep.subr.bf16.mxu0 %v19609_v1  ;;  %v19672_v22 = vld [vmem:[%s20996_s19 + $0x72c] ss:$16 sps:$4 sm:$0xff]   ;;  %v19667_v1 = vld [vmem:[%s20996_s19 + $0x528] ss:$16 sps:$4 sm:$0xff]  }
0x1abf   : > { %15450 = vmatprep.subr.bf16.mxu1 %v19612_v62  ;;  %v19670_v62 = vld [vmem:[%s20996_s19 + $0x728] ss:$16 sps:$4 sm:$0xff]  }
0x1ac1   : > { %15408 = vmatpush1.bf16.msra.mxu0 %v19607_v50  ;;  %v19675_v50 = vld [vmem:[%s20996_s19 + $0x50c] ss:$16 sps:$4 sm:$0xff]  }
0x1ac2   : > { %15451 = vmatpush1.bf16.msra.mxu1 %v19610_v30  ;;  %15409 = vmatprep.subr.bf16.mxu0 %v19615_v61  ;;  %v19678_v30 = vld [vmem:[%s20996_s19 + $0x70c] ss:$16 sps:$4 sm:$0xff]   ;;  %v19673_v61 = vld [vmem:[%s20996_s19 + $0x508] ss:$16 sps:$4 sm:$0xff]  }
0x1ac3   : > { %15452 = vmatprep.subr.bf16.mxu1 %v19618_v38  ;;  %v19676_v38 = vld [vmem:[%s20996_s19 + $0x708] ss:$16 sps:$4 sm:$0xff]  }
0x1ac5   : > { %15410 = vmatpush1.bf16.msra.mxu0 %v19613_v20  ;;  %v19681_v20 = vld [vmem:[%s20996_s19 + $0x8ec] ss:$16 sps:$4 sm:$0xff]  }
0x1ac6   : > { %15453 = vmatpush1.bf16.msra.mxu1 %v19616_v49  ;;  %15411 = vmatprep.subr.bf16.mxu0 %v19621_v33  ;;  %v19684_v49 = vld [vmem:[%s20996_s19 + $0xaec] ss:$16 sps:$4 sm:$0xff]   ;;  %v19679_v33 = vld [vmem:[%s20996_s19 + $0x8e8] ss:$16 sps:$4 sm:$0xff]  }
0x1ac7   : > { %15454 = vmatprep.subr.bf16.mxu1 %v19624_v35  ;;  %v19682_v35 = vld [vmem:[%s20996_s19 + $0xae8] ss:$16 sps:$4 sm:$0xff]  }
0x1ac9   : > { %15412 = vmatpush1.bf16.msra.mxu0 %v19619_v6  ;;  %v19687_v6 = vld [vmem:[%s20996_s19 + $0x8cc] ss:$16 sps:$4 sm:$0xff]  }
0x1aca   : > { %15455 = vmatpush1.bf16.msra.mxu1 %v19622_v45  ;;  %15413 = vmatprep.subr.bf16.mxu0 %v19627_v42  ;;  %v19690_v45 = vld [vmem:[%s20996_s19 + $0xacc] ss:$16 sps:$4 sm:$0xff]   ;;  %v19685_v42 = vld [vmem:[%s20996_s19 + $0x8c8] ss:$16 sps:$4 sm:$0xff]  }
0x1acb   : > { %15456 = vmatprep.subr.bf16.mxu1 %v19630_v39  ;;  %v19688_v39 = vld [vmem:[%s20996_s19 + $0xac8] ss:$16 sps:$4 sm:$0xff]  }
0x1acd   : > { %15414 = vmatpush1.bf16.msra.mxu0 %v19625_v9  ;;  %v19693_v9 = vld [vmem:[%s20996_s19 + $0x8ac] ss:$16 sps:$4 sm:$0xff]  }
0x1ace   : > { %15457 = vmatpush1.bf16.msra.mxu1 %v19628_v13  ;;  %15415 = vmatprep.subr.bf16.mxu0 %v19633_v14  ;;  %v19694_v13 = vld [vmem:[%s20996_s19 + $0xaa8] ss:$16 sps:$4 sm:$0xff]   ;;  %v19702_v14 = vld [vmem:[%s20996_s19 + $0xa8c] ss:$16 sps:$4 sm:$0xff]  }
0x1acf   : > { %15458 = vmatprep.subr.bf16.mxu1 %v19636_v15  ;;  %v19700_v15 = vld [vmem:[%s20996_s19 + $0xa88] ss:$16 sps:$4 sm:$0xff]  }
0x1ad1   : > { %15416 = vmatpush2.bf16.msra.mxu0 %v19631_v26  ;;  %v19705_v26 = vld [vmem:[%s20996_s19 + $0x86c] ss:$16 sps:$4 sm:$0xff]  }
0x1ad2   : > { %15459 = vmatpush2.bf16.msra.mxu1 %v19634_v56  ;;  %15417 = vmatprep.subr.bf16.mxu0 %v19639_v32  ;;  %v19708_v56 = vld [vmem:[%s20996_s19 + $0xa6c] ss:$16 sps:$4 sm:$0xff]   ;;  %v19703_v32 = vld [vmem:[%s20996_s19 + $0x868] ss:$16 sps:$4 sm:$0xff]  }
0x1ad3   : > { %15460 = vmatprep.subr.bf16.mxu1 %v19642_v21  ;;  %v19706_v21 = vld [vmem:[%s20996_s19 + $0xa68] ss:$16 sps:$4 sm:$0xff]  }
0x1ad5   : > { %15418 = vmatpush2.bf16.msra.mxu0 %v19637_v43  ;;  %v19711_v43 = vld [vmem:[%s20996_s19 + $0x84c] ss:$16 sps:$4 sm:$0xff]  }
0x1ad6   : > { %15461 = vmatpush2.bf16.msra.mxu1 %v19640_v29  ;;  %15419 = vmatprep.subr.bf16.mxu0 %v19645_v40  ;;  %v19714_v29 = vld [vmem:[%s20996_s19 + $0xa4c] ss:$16 sps:$4 sm:$0xff]   ;;  %v19709_v40 = vld [vmem:[%s20996_s19 + $0x848] ss:$16 sps:$4 sm:$0xff]  }
0x1ad7   : > { %15462 = vmatprep.subr.bf16.mxu1 %v19648_v18  ;;  %v19712_v18 = vld [vmem:[%s20996_s19 + $0xa48] ss:$16 sps:$4 sm:$0xff]  }
0x1ad9   : > { %15420 = vmatpush2.bf16.msra.mxu0 %v19643_v55  ;;  %v19717_v55 = vld [vmem:[%s20996_s19 + $0x82c] ss:$16 sps:$4 sm:$0xff]  }
0x1ada   : > { %15463 = vmatpush2.bf16.msra.mxu1 %v19646_v58  ;;  %15421 = vmatprep.subr.bf16.mxu0 %v19651_v0  ;;  %v19720_v58 = vld [vmem:[%s20996_s19 + $0xa2c] ss:$16 sps:$4 sm:$0xff]   ;;  %v19715_v0 = vld [vmem:[%s20996_s19 + $0x828] ss:$16 sps:$4 sm:$0xff]  }
0x1adb   : > { %15464 = vmatprep.subr.bf16.mxu1 %v19654_v46  ;;  %v19718_v46 = vld [vmem:[%s20996_s19 + $0xa28] ss:$16 sps:$4 sm:$0xff]  }
0x1add   : > { %15422 = vmatpush2.bf16.msra.mxu0 %v19649_v16  ;;  %v19723_v16 = vld [vmem:[%s20996_s19 + $0x80c] ss:$16 sps:$4 sm:$0xff]  }
0x1ade   : > { %15465 = vmatpush2.bf16.msra.mxu1 %v19652_v51  ;;  %15423 = vmatprep.subr.bf16.mxu0 %v19657_v48  ;;  %v19726_v51 = vld [vmem:[%s20996_s19 + $0xa0c] ss:$16 sps:$4 sm:$0xff]   ;;  %v19721_v48 = vld [vmem:[%s20996_s19 + $0x808] ss:$16 sps:$4 sm:$0xff]  }
0x1adf   : > { %15466 = vmatprep.subr.bf16.mxu1 %v19660_v25  ;;  %v19724_v25 = vld [vmem:[%s20996_s19 + $0xa08] ss:$16 sps:$4 sm:$0xff]  }
0x1ae1   : > { %15424 = vmatpush2.bf16.msra.mxu0 %v19655_v53  ;;  %v19729_v53 = vld [vmem:[%s20996_s19 + $0x9ec] ss:$16 sps:$4 sm:$0xff]  }
0x1ae2   : > { %15467 = vmatpush2.bf16.msra.mxu1 %v19658_v52  ;;  %15425 = vmatprep.subr.bf16.mxu0 %v19663_v19  ;;  %v19732_v52 = vld [vmem:[%s20996_s19 + $0xbec] ss:$16 sps:$4 sm:$0xff]   ;;  %v19727_v19 = vld [vmem:[%s20996_s19 + $0x9e8] ss:$16 sps:$4 sm:$0xff]  }
0x1ae3   : > { %15468 = vmatprep.subr.bf16.mxu1 %v19666_v3  ;;  %v19730_v3 = vld [vmem:[%s20996_s19 + $0xbe8] ss:$16 sps:$4 sm:$0xff]  }
0x1ae5   : > { %15426 = vmatpush2.bf16.msra.mxu0 %v19661_v36  ;;  %v19735_v36 = vld [vmem:[%s20996_s19 + $0x9cc] ss:$16 sps:$4 sm:$0xff]  }
0x1ae6   : > { %15469 = vmatpush2.bf16.msra.mxu1 %v19664_v27  ;;  %15427 = vmatprep.subr.bf16.mxu0 %v19669_v59  ;;  %v19738_v27 = vld [vmem:[%s20996_s19 + $0xbcc] ss:$16 sps:$4 sm:$0xff]   ;;  %v19733_v59 = vld [vmem:[%s20996_s19 + $0x9c8] ss:$16 sps:$4 sm:$0xff]  }
0x1ae7   : > { %15470 = vmatprep.subr.bf16.mxu1 %v19672_v22  ;;  %v19736_v22 = vld [vmem:[%s20996_s19 + $0xbc8] ss:$16 sps:$4 sm:$0xff]  }
0x1ae9   : > { %15428 = vmatpush2.bf16.msra.mxu0 %v19667_v1  ;;  %v19741_v1 = vld [vmem:[%s20996_s19 + $0x9ac] ss:$16 sps:$4 sm:$0xff]  }
0x1aea   : > { %15471 = vmatpush2.bf16.msra.mxu1 %v19670_v62  ;;  %15429 = vmatprep.subr.bf16.mxu0 %v19675_v50  ;;  %v19744_v62 = vld [vmem:[%s20996_s19 + $0xbac] ss:$16 sps:$4 sm:$0xff]   ;;  %v19739_v50 = vld [vmem:[%s20996_s19 + $0x9a8] ss:$16 sps:$4 sm:$0xff]  }
0x1aeb   : > { %15472 = vmatprep.subr.bf16.mxu1 %v19678_v30  ;;  %v19742_v30 = vld [vmem:[%s20996_s19 + $0xba8] ss:$16 sps:$4 sm:$0xff]  }
0x1aed   : > { %15430 = vmatpush2.bf16.msra.mxu0 %v19673_v61  ;;  %v19747_v61 = vld [vmem:[%s20996_s19 + $0x98c] ss:$16 sps:$4 sm:$0xff]  }
0x1aee   : > { %15473 = vmatpush2.bf16.msra.mxu1 %v19676_v38  ;;  %15485 = vmatprep.subr.bf16.mxu0 %v19681_v20  ;;  %v19750_v38 = vld [vmem:[%s20996_s19 + $0xb8c] ss:$16 sps:$4 sm:$0xff]   ;;  %v19745_v20 = vld [vmem:[%s20996_s19 + $0x988] ss:$16 sps:$4 sm:$0xff]  }
0x1aef   : > { %15528 = vmatprep.subr.bf16.mxu1 %v19684_v49  ;;  %v19748_v49 = vld [vmem:[%s20996_s19 + $0xb88] ss:$16 sps:$4 sm:$0xff]  }
0x1af0   : > { %15432 = vmatmul.mubr.bf16.vlgmr.msra.gmra.mxu0 %v22676_v31  ;;  %v19696_v31 = vld [vmem:[%s20996_s19 + $0xaac] ss:$16 sps:$4 sm:$0xff]  }
0x1af1   : > { %15475 = vmatmul.mubr.bf16.vlgmr.msra.gmra.mxu1 %v22759_v54  ;;  %15486 = vmatpush1.bf16.msra.mxu0 %v19679_v33  ;;  %v19691_v54 = vld [vmem:[%s20996_s19 + $0x8a8] ss:$16 sps:$4 sm:$0xff]   ;;  %v19753_v33 = vld [vmem:[%s20996_s19 + $0x96c] ss:$16 sps:$4 sm:$0xff]  }
0x1af2   : > { %15517 = vmatprep.mubr.bf16.mxu0 %v23017_v11  ;;  %15529 = vmatpush1.bf16.msra.mxu1 %v19682_v35  ;;  %v19699_v11 = vld [vmem:[%s20996_s19 + $0x88c] ss:$16 sps:$4 sm:$0xff]  }
0x1af3   : > { %15560 = vmatprep.mubr.bf16.mxu1 %v23021_v4  ;;  %15487 = vmatprep.subr.bf16.mxu0 %v19687_v6  ;;  %v19697_v4 = vld [vmem:[%s20996_s19 + $0x888] ss:$16 sps:$4 sm:$0xff]   ;;  %v19756_v35 = vld [vmem:[%s20996_s19 + $0xb6c] ss:$16 sps:$4 sm:$0xff]  }
0x1af4   : > { %15530 = vmatprep.subr.bf16.mxu1 %v19690_v45  ;;  %v19751_v6 = vld [vmem:[%s20996_s19 + $0x968] ss:$16 sps:$4 sm:$0xff]  }
0x1af5   : > { %15488 = vmatpush1.bf16.msra.mxu0 %v19685_v42  ;;  %v19754_v45 = vld [vmem:[%s20996_s19 + $0xb68] ss:$16 sps:$4 sm:$0xff]   ;;  %v19759_v42 = vld [vmem:[%s20996_s19 + $0x94c] ss:$16 sps:$4 sm:$0xff]  }
0x1af6   : > { %15531 = vmatpush1.bf16.msra.mxu1 %v19688_v39  ;;  %15489 = vmatprep.subr.bf16.mxu0 %v19693_v9  ;;  %v19762_v39 = vld [vmem:[%s20996_s19 + $0xb4c] ss:$16 sps:$4 sm:$0xff]   ;;  %v19757_v9 = vld [vmem:[%s20996_s19 + $0x948] ss:$16 sps:$4 sm:$0xff]  }
0x1af7   : > { %15532 = vmatprep.subr.bf16.mxu1 %v19696_v31  ;;  %v19760_v31 = vld [vmem:[%s20996_s19 + $0xb48] ss:$16 sps:$4 sm:$0xff]  }
0x1af9   : > { %15490 = vmatpush1.bf16.msra.mxu0 %v19691_v54  ;;  %v19765_v54 = vld [vmem:[%s20996_s19 + $0x92c] ss:$16 sps:$4 sm:$0xff]  }
0x1afa   : > { %15533 = vmatpush1.bf16.msra.mxu1 %v19694_v13  ;;  %15491 = vmatprep.subr.bf16.mxu0 %v19699_v11  ;;  %v19768_v13 = vld [vmem:[%s20996_s19 + $0xb2c] ss:$16 sps:$4 sm:$0xff]   ;;  %v19763_v11 = vld [vmem:[%s20996_s19 + $0x928] ss:$16 sps:$4 sm:$0xff]  }
0x1afb   : > { %15534 = vmatprep.subr.bf16.mxu1 %v19702_v14  ;;  %v19766_v14 = vld [vmem:[%s20996_s19 + $0xb28] ss:$16 sps:$4 sm:$0xff]  }
0x1afd   : > { %15492 = vmatpush1.bf16.msra.mxu0 %v19697_v4  ;;  %v19771_v4 = vld [vmem:[%s20996_s19 + $0x90c] ss:$16 sps:$4 sm:$0xff]  }
0x1afe   : > { %15535 = vmatpush1.bf16.msra.mxu1 %v19700_v15  ;;  %15493 = vmatprep.subr.bf16.mxu0 %v19705_v26  ;;  %v19774_v15 = vld [vmem:[%s20996_s19 + $0xb0c] ss:$16 sps:$4 sm:$0xff]   ;;  %v19769_v26 = vld [vmem:[%s20996_s19 + $0x908] ss:$16 sps:$4 sm:$0xff]  }
0x1aff   : > { %15536 = vmatprep.subr.bf16.mxu1 %v19708_v56  ;;  %v19772_v56 = vld [vmem:[%s20996_s19 + $0xb08] ss:$16 sps:$4 sm:$0xff]  }
0x1b01   : > { %15494 = vmatpush1.bf16.msra.mxu0 %v19703_v32  ;;  %v19777_v32 = vld [vmem:[%s20996_s19 + $0xcec] ss:$16 sps:$4 sm:$0xff]  }
0x1b02   : > { %15537 = vmatpush1.bf16.msra.mxu1 %v19706_v21  ;;  %15495 = vmatprep.subr.bf16.mxu0 %v19711_v43  ;;  %v19780_v21 = vld [vmem:[%s20996_s19 + $0xeec] ss:$16 sps:$4 sm:$0xff]   ;;  %v19775_v43 = vld [vmem:[%s20996_s19 + $0xce8] ss:$16 sps:$4 sm:$0xff]  }
0x1b03   : > { %15538 = vmatprep.subr.bf16.mxu1 %v19714_v29  ;;  %v19778_v29 = vld [vmem:[%s20996_s19 + $0xee8] ss:$16 sps:$4 sm:$0xff]  }
0x1b05   : > { %15496 = vmatpush1.bf16.msra.mxu0 %v19709_v40  ;;  %v19783_v40 = vld [vmem:[%s20996_s19 + $0xccc] ss:$16 sps:$4 sm:$0xff]  }
0x1b06   : > { %15539 = vmatpush1.bf16.msra.mxu1 %v19712_v18  ;;  %15497 = vmatprep.subr.bf16.mxu0 %v19717_v55  ;;  %v19786_v18 = vld [vmem:[%s20996_s19 + $0xecc] ss:$16 sps:$4 sm:$0xff]   ;;  %v19781_v55 = vld [vmem:[%s20996_s19 + $0xcc8] ss:$16 sps:$4 sm:$0xff]  }
0x1b07   : > { %15540 = vmatprep.subr.bf16.mxu1 %v19720_v58  ;;  %v19784_v58 = vld [vmem:[%s20996_s19 + $0xec8] ss:$16 sps:$4 sm:$0xff]  }
0x1b09   : > { %15498 = vmatpush1.bf16.msra.mxu0 %v19715_v0  ;;  %v19789_v0 = vld [vmem:[%s20996_s19 + $0xcac] ss:$16 sps:$4 sm:$0xff]  }
0x1b0a   : > { %15541 = vmatpush1.bf16.msra.mxu1 %v19718_v46  ;;  %15499 = vmatprep.subr.bf16.mxu0 %v19723_v16  ;;  %v19790_v46 = vld [vmem:[%s20996_s19 + $0xea8] ss:$16 sps:$4 sm:$0xff]   ;;  %v19798_v16 = vld [vmem:[%s20996_s19 + $0xe8c] ss:$16 sps:$4 sm:$0xff]  }
0x1b0b   : > { %15542 = vmatprep.subr.bf16.mxu1 %v19726_v51  ;;  %v19796_v51 = vld [vmem:[%s20996_s19 + $0xe88] ss:$16 sps:$4 sm:$0xff]  }
0x1b0d   : > { %15500 = vmatpush1.bf16.msra.mxu0 %v19721_v48  ;;  %v19801_v48 = vld [vmem:[%s20996_s19 + $0xc6c] ss:$16 sps:$4 sm:$0xff]  }
0x1b0e   : > { %15543 = vmatpush1.bf16.msra.mxu1 %v19724_v25  ;;  %15501 = vmatprep.subr.bf16.mxu0 %v19729_v53  ;;  %v19804_v25 = vld [vmem:[%s20996_s19 + $0xe6c] ss:$16 sps:$4 sm:$0xff]   ;;  %v19799_v53 = vld [vmem:[%s20996_s19 + $0xc68] ss:$16 sps:$4 sm:$0xff]  }
0x1b0f   : > { %15544 = vmatprep.subr.bf16.mxu1 %v19732_v52  ;;  %v19802_v52 = vld [vmem:[%s20996_s19 + $0xe68] ss:$16 sps:$4 sm:$0xff]  }
0x1b11   : > { %15502 = vmatpush2.bf16.msra.mxu0 %v19727_v19  ;;  %v19807_v19 = vld [vmem:[%s20996_s19 + $0xc4c] ss:$16 sps:$4 sm:$0xff]  }
0x1b12   : > { %15545 = vmatpush2.bf16.msra.mxu1 %v19730_v3  ;;  %15503 = vmatprep.subr.bf16.mxu0 %v19735_v36  ;;  %v19810_v3 = vld [vmem:[%s20996_s19 + $0xe4c] ss:$16 sps:$4 sm:$0xff]   ;;  %v19805_v36 = vld [vmem:[%s20996_s19 + $0xc48] ss:$16 sps:$4 sm:$0xff]  }
0x1b13   : > { %15546 = vmatprep.subr.bf16.mxu1 %v19738_v27  ;;  %v19808_v27 = vld [vmem:[%s20996_s19 + $0xe48] ss:$16 sps:$4 sm:$0xff]  }
0x1b15   : > { %15504 = vmatpush2.bf16.msra.mxu0 %v19733_v59  ;;  %v19813_v59 = vld [vmem:[%s20996_s19 + $0xc2c] ss:$16 sps:$4 sm:$0xff]  }
0x1b16   : > { %15547 = vmatpush2.bf16.msra.mxu1 %v19736_v22  ;;  %15505 = vmatprep.subr.bf16.mxu0 %v19741_v1  ;;  %v19816_v22 = vld [vmem:[%s20996_s19 + $0xe2c] ss:$16 sps:$4 sm:$0xff]   ;;  %v19811_v1 = vld [vmem:[%s20996_s19 + $0xc28] ss:$16 sps:$4 sm:$0xff]  }
0x1b17   : > { %15548 = vmatprep.subr.bf16.mxu1 %v19744_v62  ;;  %v19814_v62 = vld [vmem:[%s20996_s19 + $0xe28] ss:$16 sps:$4 sm:$0xff]  }
0x1b19   : > { %15506 = vmatpush2.bf16.msra.mxu0 %v19739_v50  ;;  %v19819_v50 = vld [vmem:[%s20996_s19 + $0xc0c] ss:$16 sps:$4 sm:$0xff]  }
0x1b1a   : > { %15549 = vmatpush2.bf16.msra.mxu1 %v19742_v30  ;;  %15507 = vmatprep.subr.bf16.mxu0 %v19747_v61  ;;  %v19822_v30 = vld [vmem:[%s20996_s19 + $0xe0c] ss:$16 sps:$4 sm:$0xff]   ;;  %v19817_v61 = vld [vmem:[%s20996_s19 + $0xc08] ss:$16 sps:$4 sm:$0xff]  }
0x1b1b   : > { %15550 = vmatprep.subr.bf16.mxu1 %v19750_v38  ;;  %v19820_v38 = vld [vmem:[%s20996_s19 + $0xe08] ss:$16 sps:$4 sm:$0xff]  }
0x1b1d   : > { %15508 = vmatpush2.bf16.msra.mxu0 %v19745_v20  ;;  %v19825_v20 = vld [vmem:[%s20996_s19 + $0xdec] ss:$16 sps:$4 sm:$0xff]  }
0x1b1e   : > { %15551 = vmatpush2.bf16.msra.mxu1 %v19748_v49  ;;  %15509 = vmatprep.subr.bf16.mxu0 %v19753_v33  ;;  %v19828_v49 = vld [vmem:[%s20996_s19 + $0xfec] ss:$16 sps:$4 sm:$0xff]   ;;  %v19823_v33 = vld [vmem:[%s20996_s19 + $0xde8] ss:$16 sps:$4 sm:$0xff]  }
0x1b1f   : > { %15552 = vmatprep.subr.bf16.mxu1 %v19756_v35  ;;  %v19826_v35 = vld [vmem:[%s20996_s19 + $0xfe8] ss:$16 sps:$4 sm:$0xff]  }
0x1b21   : > { %15510 = vmatpush2.bf16.msra.mxu0 %v19751_v6  ;;  %v19831_v6 = vld [vmem:[%s20996_s19 + $0xdcc] ss:$16 sps:$4 sm:$0xff]  }
0x1b22   : > { %15553 = vmatpush2.bf16.msra.mxu1 %v19754_v45  ;;  %15511 = vmatprep.subr.bf16.mxu0 %v19759_v42  ;;  %v19834_v45 = vld [vmem:[%s20996_s19 + $0xfcc] ss:$16 sps:$4 sm:$0xff]   ;;  %v19829_v42 = vld [vmem:[%s20996_s19 + $0xdc8] ss:$16 sps:$4 sm:$0xff]  }
0x1b23   : > { %15554 = vmatprep.subr.bf16.mxu1 %v19762_v39  ;;  %v19832_v39 = vld [vmem:[%s20996_s19 + $0xfc8] ss:$16 sps:$4 sm:$0xff]  }
0x1b25   : > { %15512 = vmatpush2.bf16.msra.mxu0 %v19757_v9  ;;  %v19837_v9 = vld [vmem:[%s20996_s19 + $0xdac] ss:$16 sps:$4 sm:$0xff]  }
0x1b26   : > { %15555 = vmatpush2.bf16.msra.mxu1 %v19760_v31  ;;  %15513 = vmatprep.subr.bf16.mxu0 %v19765_v54  ;;  %v19840_v31 = vld [vmem:[%s20996_s19 + $0xfac] ss:$16 sps:$4 sm:$0xff]   ;;  %v19835_v54 = vld [vmem:[%s20996_s19 + $0xda8] ss:$16 sps:$4 sm:$0xff]  }
0x1b27   : > { %15556 = vmatprep.subr.bf16.mxu1 %v19768_v13  ;;  %v19838_v13 = vld [vmem:[%s20996_s19 + $0xfa8] ss:$16 sps:$4 sm:$0xff]  }
0x1b29   : > { %15514 = vmatpush2.bf16.msra.mxu0 %v19763_v11  ;;  %v19843_v11 = vld [vmem:[%s20996_s19 + $0xd8c] ss:$16 sps:$4 sm:$0xff]  }
0x1b2a   : > { %15557 = vmatpush2.bf16.msra.mxu1 %v19766_v14  ;;  %15515 = vmatprep.subr.bf16.mxu0 %v19771_v4  ;;  %v19846_v14 = vld [vmem:[%s20996_s19 + $0xf8c] ss:$16 sps:$4 sm:$0xff]   ;;  %v19841_v4 = vld [vmem:[%s20996_s19 + $0xd88] ss:$16 sps:$4 sm:$0xff]  }
0x1b2b   : > { %15558 = vmatprep.subr.bf16.mxu1 %v19774_v15  ;;  %v19844_v15 = vld [vmem:[%s20996_s19 + $0xf88] ss:$16 sps:$4 sm:$0xff]  }
0x1b2d   : > { %15516 = vmatpush2.bf16.msra.mxu0 %v19769_v26  ;;  %v19849_v26 = vld [vmem:[%s20996_s19 + $0xd6c] ss:$16 sps:$4 sm:$0xff]  }
0x1b2e   : > { %15559 = vmatpush2.bf16.msra.mxu1 %v19772_v56  ;;  %15571 = vmatprep.subr.bf16.mxu0 %v19777_v32  ;;  %v19852_v56 = vld [vmem:[%s20996_s19 + $0xf6c] ss:$16 sps:$4 sm:$0xff]   ;;  %v19847_v32 = vld [vmem:[%s20996_s19 + $0xd68] ss:$16 sps:$4 sm:$0xff]  }
0x1b2f   : > { %15614 = vmatprep.subr.bf16.mxu1 %v19780_v21  ;;  %v19850_v21 = vld [vmem:[%s20996_s19 + $0xf68] ss:$16 sps:$4 sm:$0xff]  }
0x1b30   : > { %15518 = vmatmul.mubr.bf16.vlgmr.msra.gmra.mxu0 %v22855_v41  ;;  %v19792_v41 = vld [vmem:[%s20996_s19 + $0xeac] ss:$16 sps:$4 sm:$0xff]  }
0x1b31   : > { %15561 = vmatmul.mubr.bf16.vlgmr.msra.gmra.mxu1 %v22951_v23  ;;  %15572 = vmatpush1.bf16.msra.mxu0 %v19775_v43  ;;  %v19787_v23 = vld [vmem:[%s20996_s19 + $0xca8] ss:$16 sps:$4 sm:$0xff]   ;;  %v19855_v43 = vld [vmem:[%s20996_s19 + $0xd4c] ss:$16 sps:$4 sm:$0xff]  }
0x1b32   : > { %15603 = vmatprep.mubr.bf16.mxu0 %v23102_v5  ;;  %15615 = vmatpush1.bf16.msra.mxu1 %v19778_v29  ;;  %v19795_v5 = vld [vmem:[%s20996_s19 + $0xc8c] ss:$16 sps:$4 sm:$0xff]  }
0x1b33   : > { %15646 = vmatprep.mubr.bf16.mxu1 %v23127_v44  ;;  %15573 = vmatprep.subr.bf16.mxu0 %v19783_v40  ;;  %v19793_v44 = vld [vmem:[%s20996_s19 + $0xc88] ss:$16 sps:$4 sm:$0xff]   ;;  %v19858_v29 = vld [vmem:[%s20996_s19 + $0xf4c] ss:$16 sps:$4 sm:$0xff]  }
0x1b34   : > { %15616 = vmatprep.subr.bf16.mxu1 %v19786_v18  ;;  %v19853_v40 = vld [vmem:[%s20996_s19 + $0xd48] ss:$16 sps:$4 sm:$0xff]  }
0x1b35   : > { %15574 = vmatpush1.bf16.msra.mxu0 %v19781_v55  ;;  %v19856_v18 = vld [vmem:[%s20996_s19 + $0xf48] ss:$16 sps:$4 sm:$0xff]   ;;  %v19861_v55 = vld [vmem:[%s20996_s19 + $0xd2c] ss:$16 sps:$4 sm:$0xff]  }
0x1b36   : > { %15617 = vmatpush1.bf16.msra.mxu1 %v19784_v58  ;;  %15575 = vmatprep.subr.bf16.mxu0 %v19789_v0  ;;  %v19864_v58 = vld [vmem:[%s20996_s19 + $0xf2c] ss:$16 sps:$4 sm:$0xff]   ;;  %v19859_v0 = vld [vmem:[%s20996_s19 + $0xd28] ss:$16 sps:$4 sm:$0xff]  }
0x1b37   : > { %15618 = vmatprep.subr.bf16.mxu1 %v19792_v41  ;;  %v19862_v41 = vld [vmem:[%s20996_s19 + $0xf28] ss:$16 sps:$4 sm:$0xff]  }
0x1b39   : > { %15576 = vmatpush1.bf16.msra.mxu0 %v19787_v23  ;;  %v19867_v23 = vld [vmem:[%s20996_s19 + $0xd0c] ss:$16 sps:$4 sm:$0xff]  }
0x1b3a   : > { %15619 = vmatpush1.bf16.msra.mxu1 %v19790_v46  ;;  %15577 = vmatprep.subr.bf16.mxu0 %v19795_v5  ;;  %v19870_v46 = vld [vmem:[%s20996_s19 + $0xf0c] ss:$16 sps:$4 sm:$0xff]   ;;  %v19865_v5 = vld [vmem:[%s20996_s19 + $0xd08] ss:$16 sps:$4 sm:$0xff]  }
0x1b3b   : > { %15620 = vmatprep.subr.bf16.mxu1 %v19798_v16  ;;  %v19868_v16 = vld [vmem:[%s20996_s19 + $0xf08] ss:$16 sps:$4 sm:$0xff]  }
0x1b3d   : > { %15578 = vmatpush1.bf16.msra.mxu0 %v19793_v44  ;;  %v15003_v44 = vpop.f32.mrf.mxu0 }
0x1b3e   : > { %15621 = vmatpush1.bf16.msra.mxu1 %v19796_v51  ;;  %15579 = vmatprep.subr.bf16.mxu0 %v19801_v48  ;;  %v15046_v51 = vpop.f32.mrf.mxu1 }
0x1b3f   : > { %15622 = vmatprep.subr.bf16.mxu1 %v19804_v25  ;;  %v15005_v48 = vpop.f32.mrf.mxu0 }
0x1b40   : > { %v15048_v25 = vpop.f32.mrf.mxu1 }
0x1b41   : > { %15580 = vmatpush1.bf16.msra.mxu0 %v19799_v53  ;;  %v15007_v53 = vpop.f32.mrf.mxu0 }
0x1b42   : > { %15623 = vmatpush1.bf16.msra.mxu1 %v19802_v52  ;;  %15581 = vmatprep.subr.bf16.mxu0 %v19807_v19  ;;  %v15050_v52 = vpop.f32.mrf.mxu1 }
0x1b43   : > { %15624 = vmatprep.subr.bf16.mxu1 %v19810_v3  ;;  %v15009_v19 = vpop.f32.mrf.mxu0 }
0x1b44   : > { %v15052_v3 = vpop.f32.mrf.mxu1 }
0x1b45   : > { %15582 = vmatpush1.bf16.msra.mxu0 %v19805_v36  ;;  %v15089_v36 = vpop.f32.mrf.mxu0 }
0x1b46   : > { %15625 = vmatpush1.bf16.msra.mxu1 %v19808_v27  ;;  %15583 = vmatprep.subr.bf16.mxu0 %v19813_v59  ;;  %v15132_v27 = vpop.f32.mrf.mxu1 }
0x1b47   : > { %15626 = vmatprep.subr.bf16.mxu1 %v19816_v22  ;;  %v15091_v59 = vpop.f32.mrf.mxu0 }
0x1b48   : > { %v15134_v22 = vpop.f32.mrf.mxu1 }
0x1b49   : > { %15584 = vmatpush1.bf16.msra.mxu0 %v19811_v1  ;;  %v15093_v1 = vpop.f32.mrf.mxu0 }
0x1b4a   : > { %15627 = vmatpush1.bf16.msra.mxu1 %v19814_v62  ;;  %15585 = vmatprep.subr.bf16.mxu0 %v19819_v50  ;;  %v23458_v62 = vpop.f32.mrf.mxu1 }
0x1b4b   : > { %15628 = vmatprep.subr.bf16.mxu1 %v19822_v30  ;;  %v15095_v50 = vpop.f32.mrf.mxu0 }
0x1b4c   : > { %v15138_v30 = vpop.f32.mrf.mxu1 }
0x1b4d   : > { %15586 = vmatpush1.bf16.msra.mxu0 %v19817_v61 }
0x1b4e   : > { %15629 = vmatpush1.bf16.msra.mxu1 %v19820_v38  ;;  %15587 = vmatprep.subr.bf16.mxu0 %v19825_v20  ;;  %v23460_v61 = vpop.f32.mrf.mxu1 }
0x1b4f   : > { %15630 = vmatprep.subr.bf16.mxu1 %v19828_v49 }
0x1b50   : > { %v15220_v38 = vpop.f32.mrf.mxu1 }
0x1b51   : > { %15588 = vmatpush2.bf16.msra.mxu0 %v19823_v33 }
0x1b52   : > { %15631 = vmatpush2.bf16.msra.mxu1 %v19826_v35  ;;  %15589 = vmatprep.subr.bf16.mxu0 %v19831_v6  ;;  %v23464_v49 = vpop.f32.mrf.mxu1 }
0x1b53   : > { %15632 = vmatprep.subr.bf16.mxu1 %v19834_v45 }
0x1b54   : > { %v23466_v35 = vpop.f32.mrf.mxu1 }
0x1b55   : > { %15590 = vmatpush2.bf16.msra.mxu0 %v19829_v42 }
0x1b56   : > { %15633 = vmatpush2.bf16.msra.mxu1 %v19832_v39  ;;  %15591 = vmatprep.subr.bf16.mxu0 %v19837_v9  ;;  %v23470_v45 = vpop.f32.mrf.mxu1 }
0x1b57   : > { %15634 = vmatprep.subr.bf16.mxu1 %v19840_v31 }
0x1b58   : > { %v23472_v39 = vpop.f32.mrf.mxu1 }
0x1b59   : > { %15592 = vmatpush2.bf16.msra.mxu0 %v19835_v54 }
0x1b5a   : > { %15635 = vmatpush2.bf16.msra.mxu1 %v19838_v13  ;;  %15593 = vmatprep.subr.bf16.mxu0 %v19843_v11  ;;  %v23476_v31 = vpop.f32.mrf.mxu1 }
0x1b5b   : > { %15636 = vmatprep.subr.bf16.mxu1 %v19846_v14  ;;  %23695 = vst [vmem:[#allocation62_spill] sm:$0xff] %v23476_v31 }
0x1b5c   : > { %v23480_v13 = vpop.f32.mrf.mxu1 }
0x1b5d   : > { %15594 = vmatpush2.bf16.msra.mxu0 %v19841_v4  ;;  %23696 = vst [vmem:[#allocation63_spill] sm:$0xff] %v23480_v13 }
0x1b5e   : > { %15637 = vmatpush2.bf16.msra.mxu1 %v19844_v15  ;;  %15595 = vmatprep.subr.bf16.mxu0 %v19849_v26 }
0x1b5f   : > { %15638 = vmatprep.subr.bf16.mxu1 %v19852_v56 }
0x1b61   : > { %15596 = vmatpush2.bf16.msra.mxu0 %v19847_v32  ;;  %v12387_v32 = vld [vmem:[%s991_s17] sm:$0xf] }
0x1b62   : > { %15639 = vmatpush2.bf16.msra.mxu1 %v19850_v21  ;;  %15597 = vmatprep.subr.bf16.mxu0 %v19855_v43  ;;  %v12396_v21 = vrot.slane %v12387_v32, %v21305_v37  ;;  %v12404_v37 = vrot.slane %v12387_v32, %v21395_v63 }
0x1b63   : > { %15640 = vmatprep.subr.bf16.mxu1 %v19858_v29 }
0x1b65   : > { %15598 = vmatpush2.bf16.msra.mxu0 %v19853_v40  ;;  %v12392_v40 = vrot.slane %v12387_v32, %v21483_v34 }
0x1b66   : > { %15641 = vmatpush2.bf16.msra.mxu1 %v19856_v18  ;;  %15599 = vmatprep.subr.bf16.mxu0 %v19861_v55 }
0x1b67   : > { %15642 = vmatprep.subr.bf16.mxu1 %v19864_v58  ;;  %v15006_v58 = vadd.f32 %v15005_v48, %v12396_v21  ;;  %v15008_v10 = vadd.f32 %v15007_v53, %v12392_v40 }
0x1b69   : > { %15600 = vmatpush2.bf16.msra.mxu0 %v19859_v0  ;;  %v15004_v0 = vadd.f32 %v15003_v44, %v12392_v40  ;;  %v15051_v8 = vadd.f32 %v15050_v52, %v15008_v10 }
0x1b6a   : > { %15643 = vmatpush2.bf16.msra.mxu1 %v19862_v41  ;;  %15601 = vmatprep.subr.bf16.mxu0 %v19867_v23 }
0x1b6b   : > { %15644 = vmatprep.subr.bf16.mxu1 %v19870_v46  ;;  %v15049_v46 = vadd.f32 %v15048_v25, %v15006_v58  ;;  %v15047_v28 = vadd.f32 %v15046_v51, %v15004_v0 }
0x1b6d   : > { %15602 = vmatpush2.bf16.msra.mxu0 %v19865_v5  ;;  %v15010_v5 = vadd.f32 %v15009_v19, %v12396_v21  ;;  %v15092_v17 = vadd.f32 %v15091_v59, %v15049_v46  ;;  %v15090_v31 = vadd.f32 %v15089_v36, %v15047_v28  ;;  %v15094_v19 = vadd.f32 %v15093_v1, %v15051_v8 }
0x1b6e   : > { %15645 = vmatpush2.bf16.msra.mxu1 %v19868_v16  ;;  %v12400_v16 = vrot.slane %v12387_v32, %v21387_v57 }
0x1b6f   : > { %v15053_v24 = vadd.f32 %v15052_v3, %v15010_v5  ;;  %v15135_v13 = vadd.f32 %v15134_v22, %v15092_v17  ;;  %v15133_v25 = vadd.f32 %v15132_v27, %v15090_v31  ;;  %v15137_v28 = vadd.f32 %v23458_v62, %v15094_v19  ;;  %v23701_v5 = vld [vmem:[#allocation62_spill] sm:$0xff] }
0x1b70   : > { %15604 = vmatmul.mubr.bf16.vlgmr.msra.gmra.mxu0 %v23041_v60  ;;  %v15175_v60 = vpop.f32.mrf.mxu0 }
0x1b71   : > { %15647 = vmatmul.mubr.bf16.vlgmr.msra.gmra.mxu1 %v23186_v2  ;;  %v15390_v14 = vpop.f32.mrf.mxu1  ;;  %v15096_v48 = vadd.f32 %v15095_v50, %v15053_v24  ;;  %v15176_v0 = vadd.f32 %v15175_v60, %v15133_v25 }
0x1b72   : > { %v15177_v2 = vpop.f32.mrf.mxu0 }
0x1b73   : > { %v15392_v15 = vpop.f32.mrf.mxu1  ;;  %v15178_v21 = vadd.f32 %v15177_v2, %v15135_v13  ;;  %v15139_v40 = vadd.f32 %v15138_v30, %v15096_v48  ;;  %v15219_v8 = vadd.f32 %v23460_v61, %v15176_v0 }
0x1b74   : > { %v23462_v20 = vpop.f32.mrf.mxu0 }
0x1b75   : > { %v15394_v56 = vpop.f32.mrf.mxu1  ;;  %v15221_v10 = vadd.f32 %v15220_v38, %v15178_v21  ;;  %v15180_v27 = vadd.f32 %v23462_v20, %v15137_v28  ;;  %v23702_v21 = vld [vmem:[#allocation57_spill] sm:$0xff] }
0x1b76   : > { %v15181_v33 = vpop.f32.mrf.mxu0 }
0x1b77   : > { %v15396_v29 = vpop.f32.mrf.mxu1  ;;  %v15182_v17 = vadd.f32 %v15181_v33, %v15139_v40  ;;  %v15223_v31 = vadd.f32 %v23464_v49, %v15180_v27 }
0x1b78   : > { %v23468_v6 = vpop.f32.mrf.mxu0 }
0x1b7a   : > { %v15263_v42 = vpop.f32.mrf.mxu0 }
0x1b7c   : > { %v23474_v9 = vpop.f32.mrf.mxu0 }
0x1b7d   : > { %23694 = vst [vmem:[#allocation61_spill] sm:$0xff] %v23474_v9 }
0x1b7e   : > { %v23478_v54 = vpop.f32.mrf.mxu0 }
0x1b80   : > { %v15347_v11 = vpop.f32.mrf.mxu0 }
0x1b81   : > { %v15348_v34 = vadd.f32 %v15347_v11, %v12400_v16 }
0x1b82   : > { %v15349_v4 = vpop.f32.mrf.mxu0 }
0x1b83   : > { %v15350_v47 = vadd.f32 %v15349_v4, %v12404_v37  ;;  %v15391_v51 = vadd.f32 %v15390_v14, %v15348_v34  ;;  %v15264_v34 = vadd.f32 %v15263_v42, %v15221_v10 }
0x1b84   : > { %v15351_v26 = vpop.f32.mrf.mxu0 }
0x1b85   : > { %v15352_v53 = vadd.f32 %v15351_v26, %v12400_v16  ;;  %v15393_v32 = vadd.f32 %v15392_v15, %v15350_v47  ;;  %v15225_v47 = vadd.f32 %v23466_v35, %v15182_v17  ;;  %v15307_v13 = vadd.f32 %v23472_v39, %v15264_v34  ;;  %v23705_v17 = vld [vmem:[#allocation54_spill] sm:$0xff]  ;;  %v23706_v34 = vld [vmem:[#allocation60_spill] sm:$0xff] }
0x1b86   : > { %v15353_v43 = vpop.f32.mrf.mxu0 }
0x1b87   : > { %v15354_v46 = vadd.f32 %v15353_v43, %v12404_v37  ;;  %v15395_v52 = vadd.f32 %v15394_v56, %v15352_v53  ;;  %v15262_v37 = vadd.f32 %v23468_v6, %v15219_v8  ;;  %v15268_v61 = vadd.f32 %v23478_v54, %v15225_v47  ;;  %v23698_v56 = vld [vmem:[#allocation53_spill] sm:$0xff]  ;;  %v23707_v47 = vld [vmem:[#allocation58_spill] sm:$0xff] }
0x1b88   : > { %v15658_v43 = vadd.f32 %v15307_v13, %v23698_v56 }
0x1b89   : > { %v15397_v1 = vadd.f32 %v15396_v29, %v15354_v46  ;;  %v15305_v11 = vadd.f32 %v23470_v45, %v15262_v37  ;;  %v23699_v29 = vld [vmem:[#allocation63_spill] sm:$0xff] }
0x1bb0   : > { %v15433_v18 = vpop.f32.mrf.mxu0 }
0x1bb1   : > { %v15476_v55 = vpop.f32.mrf.mxu1  ;;  %v15434_v3 = vadd.f32 %v15433_v18, %v15391_v51  ;;  %v15311_v18 = vadd.f32 %v23699_v29, %v15268_v61 }
0x1bb2   : > { %v15435_v41 = vpop.f32.mrf.mxu0 }
0x1bb3   : > { %v15478_v23 = vpop.f32.mrf.mxu1  ;;  %v15436_v36 = vadd.f32 %v15435_v41, %v15393_v32  ;;  %v15477_v50 = vadd.f32 %v15476_v55, %v15434_v3  ;;  %v23704_v3 = vld [vmem:[#allocation59_spill] sm:$0xff] }
0x1bb4   : > { %v15437_v12 = vpop.f32.mrf.mxu0 }
0x1bb5   : > { %v15480_v7 = vpop.f32.mrf.mxu1  ;;  %v15438_v30 = vadd.f32 %v15437_v12, %v15395_v52  ;;  %v15479_v62 = vadd.f32 %v15478_v23, %v15436_v36  ;;  %v23697_v12 = vld [vmem:[#allocation61_spill] sm:$0xff] }
0x1bb6   : > { %v15439_v44 = vpop.f32.mrf.mxu0  ;;  %v15266_v14 = vadd.f32 %v23697_v12, %v15223_v31 }
0x1bb7   : > { %v15482_v9 = vpop.f32.mrf.mxu1  ;;  %v15440_v2 = vadd.f32 %v15439_v44, %v15397_v1  ;;  %v15481_v20 = vadd.f32 %v15480_v7, %v15438_v30  ;;  %v23700_v7 = vld [vmem:[#allocation55_spill] sm:$0xff] }
0x1bb8   : > { %v15657_v23 = vadd.f32 %v15305_v11, %v23700_v7  ;;  %v15309_v45 = vadd.f32 %v23701_v5, %v15266_v14 }
0x1bb9   : > { %v15483_v4 = vadd.f32 %v15482_v9, %v15440_v2 }
0x1bba   : > { %v15667_v19 = vadd.f32 %v15658_v43, %v15657_v23  ;;  %v15661_v28 = vadd.f32 %v15309_v45, %v23704_v3 }
0x1bf0   : > { %v15519_v58 = vpop.f32.mrf.mxu0 }
0x1bf1   : > { %v15562_v59 = vpop.f32.mrf.mxu1  ;;  %v15520_v38 = vadd.f32 %v15519_v58, %v15477_v50  ;;  %v15662_v58 = vadd.f32 %v15311_v18, %v23702_v21 }
0x1bf2   : > { %v15521_v24 = vpop.f32.mrf.mxu0 }
0x1bf3   : > { %v15564_v22 = vpop.f32.mrf.mxu1  ;;  %v15522_v42 = vadd.f32 %v15521_v24, %v15479_v62  ;;  %v15563_v6 = vadd.f32 %v15562_v59, %v15520_v38  ;;  %v23703_v59 = vld [vmem:[#allocation56_spill] sm:$0xff]  ;;  %v15672_v27 = vadd.f32 %v15662_v58, %v15661_v28 }
0x1bf4   : > { %v15523_v60 = vpop.f32.mrf.mxu0 }
0x1bf5   : > { %v15566_v33 = vpop.f32.mrf.mxu1  ;;  %v15524_v15 = vadd.f32 %v15523_v60, %v15481_v20  ;;  %v15565_v55 = vadd.f32 %v15564_v22, %v15522_v42 }
0x1bf6   : > { %v15525_v35 = vpop.f32.mrf.mxu0 }
0x1bf7   : > { %v15568_v26 = vpop.f32.mrf.mxu1  ;;  %v15526_v39 = vadd.f32 %v15525_v35, %v15483_v4  ;;  %v15567_v48 = vadd.f32 %v15566_v33, %v15524_v15 }
0x1bf9   : > { %v15569_v53 = vadd.f32 %v15568_v26, %v15526_v39 }
0x1c30   : > { %v15605_v49 = vpop.f32.mrf.mxu0 }
0x1c31   : > { %v15606_v41 = vadd.f32 %v15605_v49, %v15563_v6  ;;  %v15648_v54 = vpop.f32.mrf.mxu1 }
0x1c32   : > { %v15607_v16 = vpop.f32.mrf.mxu0 }
0x1c33   : > { %v15649_v44 = vadd.f32 %v15648_v54, %v15606_v41  ;;  %v15608_v9 = vadd.f32 %v15607_v16, %v15565_v55  ;;  %v15650_v25 = vpop.f32.mrf.mxu1 }
0x1c34   : > { %v15609_v51 = vpop.f32.mrf.mxu0 }
0x1c35   : > { %v15659_v40 = vadd.f32 %v15649_v44, %v23703_v59  ;;  %v15651_v0 = vadd.f32 %v15650_v25, %v15608_v9  ;;  %v15610_v32 = vadd.f32 %v15609_v51, %v15567_v48  ;;  %v15652_v46 = vpop.f32.mrf.mxu1  ;;  %v23709_v51 = vld [vmem:[#allocation52_spill] sm:$0xff] }
0x1c36   : > { %v15611_v10 = vpop.f32.mrf.mxu0 }
0x1c37   : > { %v15660_v24 = vadd.f32 %v15651_v0, %v23705_v17  ;;  %v15653_v52 = vadd.f32 %v15652_v46, %v15610_v32  ;;  %v15612_v36 = vadd.f32 %v15611_v10, %v15569_v53  ;;  %v15668_v22 = vadd.f32 %v15667_v19, %v15659_v40  ;;  %v15654_v8 = vpop.f32.mrf.mxu1  ;;  %v15665_v19 = vld [vmem:[%s23708_s10] sm:$0xf] }
0x1c38   : > { %v15723_v53 = vrot.slane %v15665_v19, %v23709_v51  ;;  %v15731_v32 = vrot.slane %v15665_v19, %v21387_v57  ;;  %v15735_v46 = vrot.slane %v15665_v19, %v21395_v63 }
0x1c39   : > { %v15663_v1 = vadd.f32 %v15653_v52, %v23706_v34  ;;  %v15655_v50 = vadd.f32 %v15654_v8, %v15612_v36  ;;  %v15669_v30 = vadd.f32 %v15668_v22, %v15660_v24 }
0x1c3b   : > { %v15664_v37 = vadd.f32 %v15655_v50, %v23707_v47  ;;  %15670 = vadd.xlane.f32.xlu0 %v15669_v30  ;;  %v15673_v60 = vadd.f32 %v15672_v27, %v15663_v1 }
0x1c3d   : > { %v15674_v62 = vadd.f32 %v15673_v60, %v15664_v37 }
0x1c3f   : > { %15675 = vadd.xlane.f32.xlu1 %v15674_v62 }
0x1cc4   : > { %v15671_v2 = vpop.xlane.xlu0 %15670 }
0x1cc5   : > { %v15677_v38 = vmul.f32 0.001953125, %v15671_v2 }
0x1cc7   : > { %v15679_v33 = vsub.f32 %v15657_v23, %v15677_v38  ;;  %v15680_v31 = vsub.f32 %v15658_v43, %v15677_v38  ;;  %v15681_v13 = vsub.f32 %v15659_v40, %v15677_v38  ;;  %v15682_v20 = vsub.f32 %v15660_v24, %v15677_v38  ;;  %v23710_v40 = vld [vmem:[#allocation51_spill] sm:$0xff] }
0x1cc8   : > { %v15676_v61 = vpop.xlane.xlu1 %15675  ;;  %v15727_v0 = vrot.slane %v15665_v19, %v23710_v40 }
0x1cc9   : > { %v15678_v42 = vmul.f32 0.001953125, %v15676_v61  ;;  %v15687_v11 = vmul.f32 %v15679_v33, %v15679_v33  ;;  %v15688_v12 = vmul.f32 %v15680_v31, %v15680_v31  ;;  %v15689_v14 = vmul.f32 %v15681_v13, %v15681_v13 }
0x1cca   : > { %v15690_v26 = vmul.f32 %v15682_v20, %v15682_v20 }
0x1ccb   : > { %v15683_v35 = vsub.f32 %v15661_v28, %v15678_v42  ;;  %v15684_v4 = vsub.f32 %v15662_v58, %v15678_v42  ;;  %v15695_v6 = vadd.f32 %v15688_v12, %v15687_v11  ;;  %v15685_v15 = vsub.f32 %v15663_v1, %v15678_v42  ;;  %v15666_v58 = vld [vmem:[%s1009_s0] sm:$0xf] }
0x1ccc   : > { %v15686_v18 = vsub.f32 %v15664_v37, %v15678_v42  ;;  %v15752_v10 = vrot.slane %v15666_v58, %v23709_v51  ;;  %v15756_v24 = vrot.slane %v15666_v58, %v23710_v40  ;;  %v15760_v52 = vrot.slane %v15666_v58, %v21387_v57 }
0x1ccd   : > { %v15696_v29 = vadd.f32 %v15695_v6, %v15689_v14  ;;  %v15691_v49 = vmul.f32 %v15683_v35, %v15683_v35  ;;  %v15692_v55 = vmul.f32 %v15684_v4, %v15684_v4  ;;  %v15693_v41 = vmul.f32 %v15685_v15, %v15685_v15 }
0x1cce   : > { %v15694_v54 = vmul.f32 %v15686_v18, %v15686_v18  ;;  %v15764_v1 = vrot.slane %v15666_v58, %v21395_v63 }
0x1ccf   : > { %v15697_v39 = vadd.f32 %v15696_v29, %v15690_v26  ;;  %v15700_v43 = vadd.f32 %v15692_v55, %v15691_v49 }
0x1cd1   : > { %15698 = vadd.xlane.f32.xlu0 %v15697_v39  ;;  %v15701_v23 = vadd.f32 %v15700_v43, %v15693_v41 }
0x1cd3   : > { %v15702_v5 = vadd.f32 %v15701_v23, %v15694_v54 }
0x1cd5   : > { %15703 = vadd.xlane.f32.xlu1 %v15702_v5 }
0x1d5a   : > { %v15699_v45 = vpop.xlane.xlu0 %15698 }
0x1d5b   : > { %v15705_v16 = vmul.f32 0.001953125, %v15699_v45 }
0x1d5d   : > { %v15707_v48 = vadd.f32 1e-05, %v15705_v16 }
0x1d5e   : > { %v15704_v44 = vpop.xlane.xlu1 %15703 }
0x1d5f   : > { %19943 = vrsqrt.f32 %v15707_v48  ;;  %v15706_v9 = vmul.f32 0.001953125, %v15704_v44 }
0x1d61   : > { %v15708_v25 = vadd.f32 1e-05, %v15706_v9 }
0x1d63   : > { %19945 = vrsqrt.f32 %v15708_v25 }
0x1d6c   : > { %v19944_v28 = vpop.eup %19943 }
0x1d6d   : > { %v15711_v36 = vmul.f32 %v19944_v28, %v15679_v33  ;;  %v15712_v22 = vmul.f32 %v19944_v28, %v15680_v31  ;;  %v15713_v8 = vmul.f32 %v19944_v28, %v15681_v13  ;;  %v15714_v27 = vmul.f32 %v19944_v28, %v15682_v20 }
0x1d6f   : > { %v15740_v50 = vmul.f32 %v15723_v53, %v15711_v36  ;;  %v15741_v30 = vmul.f32 %v15727_v0, %v15712_v22  ;;  %v15742_v37 = vmul.f32 %v15731_v32, %v15713_v8  ;;  %v15743_v60 = vmul.f32 %v15735_v46, %v15714_v27 }
0x1d70   : > { %v19946_v62 = vpop.eup %19945 }
0x1d71   : > { %v15769_v2 = vadd.f32 %v15752_v10, %v15740_v50  ;;  %v15770_v38 = vadd.f32 %v15756_v24, %v15741_v30  ;;  %v15771_v61 = vadd.f32 %v15760_v52, %v15742_v37  ;;  %v15715_v42 = vmul.f32 %v19946_v62, %v15683_v35 }
0x1d72   : > { %v15716_v11 = vmul.f32 %v19946_v62, %v15684_v4  ;;  %v15717_v12 = vmul.f32 %v19946_v62, %v15685_v15  ;;  %v15718_v14 = vmul.f32 %v19946_v62, %v15686_v18  ;;  %v15772_v6 = vadd.f32 %v15764_v1, %v15743_v60 }
0x1d73   : > { %v15777_v33 = vadd.f32 %v15769_v2, %v23700_v7  ;;  %v15778_v31 = vadd.f32 %v15770_v38, %v23698_v56  ;;  %v15744_v13 = vmul.f32 %v15723_v53, %v15715_v42  ;;  %v15779_v49 = vadd.f32 %v15771_v61, %v23703_v59  ;;  %v15785_v61 = vld [vmem:[%s1018_s8] sm:$0xf]  ;;  %v15786_v42 = vld [vmem:[%s1027_s29] sm:$0xf] }
0x1d74   : > { %v15745_v20 = vmul.f32 %v15727_v0, %v15716_v11  ;;  %v15746_v26 = vmul.f32 %v15731_v32, %v15717_v12  ;;  %v15747_v29 = vmul.f32 %v15735_v46, %v15718_v14  ;;  %v15780_v35 = vadd.f32 %v15772_v6, %v23705_v17 }
0x1d75   : > { %v15787_v55 = vadd.f32 %v15778_v31, %v15777_v33  ;;  %v15773_v39 = vadd.f32 %v15752_v10, %v15744_v13  ;;  %v15843_v11 = vrot.slane %v15785_v61, %v23709_v51  ;;  %v15847_v12 = vrot.slane %v15785_v61, %v23710_v40 }
0x1d76   : > { %v15774_v41 = vadd.f32 %v15756_v24, %v15745_v20  ;;  %v15775_v43 = vadd.f32 %v15760_v52, %v15746_v26  ;;  %v15776_v15 = vadd.f32 %v15764_v1, %v15747_v29  ;;  %v15851_v14 = vrot.slane %v15785_v61, %v21387_v57 }
0x1d77   : > { %v15788_v4 = vadd.f32 %v15787_v55, %v15779_v49  ;;  %v15781_v18 = vadd.f32 %v15773_v39, %v23704_v3  ;;  %v15855_v6 = vrot.slane %v15785_v61, %v21395_v63  ;;  %v15876_v13 = vrot.slane %v15786_v42, %v23710_v40 }
0x1d78   : > { %v15782_v7 = vadd.f32 %v15774_v41, %v23702_v21  ;;  %v15783_v56 = vadd.f32 %v15775_v43, %v23706_v34  ;;  %v15784_v5 = vadd.f32 %v15776_v15, %v23707_v47  ;;  %v15880_v20 = vrot.slane %v15786_v42, %v21387_v57 }
0x1d79   : > { %v15789_v54 = vadd.f32 %v15788_v4, %v15780_v35  ;;  %v15884_v26 = vrot.slane %v15786_v42, %v21395_v63 }
0x1d7a   : > { %v15792_v23 = vadd.f32 %v15782_v7, %v15781_v18 }
0x1d7b   : > { %15790 = vadd.xlane.f32.xlu0 %v15789_v54 }
0x1d7c   : > { %v15793_v59 = vadd.f32 %v15792_v23, %v15783_v56 }
0x1d7e   : > { %v15794_v45 = vadd.f32 %v15793_v59, %v15784_v5 }
0x1d80   : > { %15795 = vadd.xlane.f32.xlu1 %v15794_v45 }
0x1e04   : > { %v15791_v16 = vpop.xlane.xlu0 %15790 }
0x1e05   : > { %v15797_v48 = vmul.f32 0.001953125, %v15791_v16 }
0x1e07   : > { %v15799_v44 = vsub.f32 %v15777_v33, %v15797_v48  ;;  %v15800_v17 = vsub.f32 %v15778_v31, %v15797_v48  ;;  %v15801_v9 = vsub.f32 %v15779_v49, %v15797_v48  ;;  %v15802_v19 = vsub.f32 %v15780_v35, %v15797_v48 }
0x1e08   : > { %v15872_v31 = vrot.slane %v15786_v42, %v23709_v51 }
0x1e09   : > { %v15796_v25 = vpop.xlane.xlu1 %15795  ;;  %v15807_v3 = vmul.f32 %v15799_v44, %v15799_v44  ;;  %v15808_v58 = vmul.f32 %v15800_v17, %v15800_v17  ;;  %v15809_v53 = vmul.f32 %v15801_v9, %v15801_v9  ;;  %v15810_v28 = vmul.f32 %v15802_v19, %v15802_v19 }
0x1e0a   : > { %v15798_v21 = vmul.f32 0.001953125, %v15796_v25 }
0x1e0b   : > { %v15815_v0 = vadd.f32 %v15808_v58, %v15807_v3 }
0x1e0c   : > { %v15803_v34 = vsub.f32 %v15781_v18, %v15798_v21  ;;  %v15804_v32 = vsub.f32 %v15782_v7, %v15798_v21  ;;  %v15805_v46 = vsub.f32 %v15783_v56, %v15798_v21  ;;  %v15806_v10 = vsub.f32 %v15784_v5, %v15798_v21 }
0x1e0d   : > { %v15816_v47 = vadd.f32 %v15815_v0, %v15809_v53 }
0x1e0e   : > { %v15811_v24 = vmul.f32 %v15803_v34, %v15803_v34  ;;  %v15812_v52 = vmul.f32 %v15804_v32, %v15804_v32  ;;  %v15813_v22 = vmul.f32 %v15805_v46, %v15805_v46  ;;  %v15814_v27 = vmul.f32 %v15806_v10, %v15806_v10 }
0x1e0f   : > { %v15817_v36 = vadd.f32 %v15816_v47, %v15810_v28 }
0x1e10   : > { %v15820_v8 = vadd.f32 %v15812_v52, %v15811_v24 }
0x1e11   : > { %15818 = vadd.xlane.f32.xlu0 %v15817_v36 }
0x1e12   : > { %v15821_v1 = vadd.f32 %v15820_v8, %v15813_v22 }
0x1e14   : > { %v15822_v50 = vadd.f32 %v15821_v1, %v15814_v27 }
0x1e16   : > { %15823 = vadd.xlane.f32.xlu1 %v15822_v50 }
0x1e9a   : > { %v15819_v30 = vpop.xlane.xlu0 %15818 }
0x1e9b   : > { %v15825_v37 = vmul.f32 0.001953125, %v15819_v30 }
0x1e9d   : > { %v15827_v60 = vadd.f32 1e-05, %v15825_v37 }
0x1e9f   : > { %19947 = vrsqrt.f32 %v15827_v60  ;;  %v15824_v62 = vpop.xlane.xlu1 %15823 }
0x1ea0   : > { %v15826_v2 = vmul.f32 0.001953125, %v15824_v62 }
0x1ea2   : > { %v15828_v38 = vadd.f32 1e-05, %v15826_v2 }
0x1ea4   : > { %19949 = vrsqrt.f32 %v15828_v38 }
0x1eac   : > { %v19948_v33 = vpop.eup %19947 }
0x1ead   : > { %v15831_v29 = vmul.f32 %v19948_v33, %v15799_v44  ;;  %v15832_v49 = vmul.f32 %v19948_v33, %v15800_v17  ;;  %v15833_v55 = vmul.f32 %v19948_v33, %v15801_v9  ;;  %v15834_v39 = vmul.f32 %v19948_v33, %v15802_v19 }
0x1eaf   : > { %v15860_v41 = vmul.f32 %v15843_v11, %v15831_v29  ;;  %v15861_v43 = vmul.f32 %v15847_v12, %v15832_v49  ;;  %v15862_v35 = vmul.f32 %v15851_v14, %v15833_v55  ;;  %v15863_v4 = vmul.f32 %v15855_v6, %v15834_v39 }
0x1eb1   : > { %v19950_v15 = vpop.eup %19949  ;;  %v15889_v18 = vadd.f32 %v15872_v31, %v15860_v41  ;;  %v15890_v7 = vadd.f32 %v15876_v13, %v15861_v43  ;;  %v15891_v54 = vadd.f32 %v15880_v20, %v15862_v35  ;;  %v15892_v56 = vadd.f32 %v15884_v26, %v15863_v4 }
0x1eb2   : > { %v15835_v51 = vmul.f32 %v19950_v15, %v15803_v34  ;;  %v15836_v23 = vmul.f32 %v19950_v15, %v15804_v32  ;;  %v15837_v40 = vmul.f32 %v19950_v15, %v15805_v46  ;;  %v15838_v5 = vmul.f32 %v19950_v15, %v15806_v10 }
0x1eb3   : > { %15897 = vst [vmem:[#allocation2 + $0x30] sm:$0xff] %v15889_v18  ;;  %15898 = vst [vmem:[#allocation2] sm:$0xff] %v15890_v7 }
0x1eb4   : > { %15899 = vst [vmem:[#allocation2 + $0x18] sm:$0xff] %v15891_v54  ;;  %15900 = vst [vmem:[#allocation2 + $0x10] sm:$0xff] %v15892_v56  ;;  %v15864_v57 = vmul.f32 %v15843_v11, %v15835_v51  ;;  %v15865_v63 = vmul.f32 %v15847_v12, %v15836_v23  ;;  %v15866_v59 = vmul.f32 %v15851_v14, %v15837_v40 }
0x1eb5   : > { %v15867_v45 = vmul.f32 %v15855_v6, %v15838_v5  ;;  %15908 = sbr.rel (%p17975_p10) target bundleno = 7870 (0x1ebe), region = 164 }
0x1eb6   : > { %v15893_v16 = vadd.f32 %v15872_v31, %v15864_v57  ;;  %v15894_v48 = vadd.f32 %v15876_v13, %v15865_v63  ;;  %v15895_v44 = vadd.f32 %v15880_v20, %v15866_v59 }
0x1eb7   : > { %v15896_v17 = vadd.f32 %v15884_v26, %v15867_v45 }
0x1eb8   : > { %15901 = vst [vmem:[#allocation2 + $0x8] sm:$0xff] %v15893_v16  ;;  %15902 = vst [vmem:[#allocation2 + $0x20] sm:$0xff] %v15894_v48 }
0x1eb9   : > { %15903 = vst [vmem:[#allocation2 + $0x28] sm:$0xff] %v15895_v44  ;;  %15904 = vst [vmem:[#allocation2 + $0x38] sm:$0xff] %v15896_v17 }
0x1eba   : > { %15909 = vst [vmem:[#allocation31] sm:$0xff] %v15889_v18  ;;  %15910 = vst [vmem:[#allocation31 + $0x8] sm:$0xff] %v15890_v7 }
0x1ebb   : > { %15911 = vst [vmem:[#allocation31 + $0x10] sm:$0xff] %v15891_v54  ;;  %15912 = vst [vmem:[#allocation31 + $0x18] sm:$0xff] %v15892_v56 }
0x1ebc   : > { %15913 = vst [vmem:[#allocation31 + $0x20] sm:$0xff] %v15893_v16  ;;  %15914 = vst [vmem:[#allocation31 + $0x28] sm:$0xff] %v15894_v48 }
0x1ebd   : > { %15915 = vst [vmem:[#allocation31 + $0x30] sm:$0xff] %v15895_v44  ;;  %15916 = vst [vmem:[#allocation31 + $0x38] sm:$0xff] %v15896_v17 }
0x1ebe PF: > { %s23712_s24 = sld [smem:[#allocation46_spill]]  ;;  %s20544_s26 = smov [#allocation31]  }
0x1ebf   : > { %s15927_s1 = sshll.u32 %s20544_s26, 4  ;;  %s15928_s1 = int_to_ptr.vmem [resolvable:$true] %s15927_s1 }
0x1ec0   : > { %s20404_s19 = scalar_lea.vmem %s15928_s1, 1024  ;;  %p20411_p2 = scmp.lt.s32.totalorder %s15928_s1, %s15928_s1 }
0x1ec1   : > { %p20405_p13 = scmp.ne.s32.totalorder %s15928_s1, %s20404_s19  ;;  %p20412_p4 = scmp.lt.s32.totalorder %s20404_s19, %s20404_s19 }
0x1ec3   : > { %p20413_p6 = por %p20412_p4, %p20411_p2 }
0x1ec4   : > { %p18270_p12 = scmp.eq.s32.totalorder %s23712_s24, 5 }
0x1ec6   : > { %p20406_p0 = pnand %p20405_p13, %p18270_p12 }
0x1ec8   : > { %p20407_p1 = pneg %p20406_p0 }
0x1eca   : > { %p20414_p7 = pnand %p20413_p6, %p20407_p1 }
0x1ecc   : > { %20417 = shalt.err (!%p20414_p7)
}
0x1ecd   : > { %s20545_s17 = smov 512   ;;  %s20546_s22 = smov 32  }
0x1ece   : > { %s23713_s0 = sld [smem:[#allocation73_spill]] }
0x1ed4   : > { %18261 = dma.vmem_to_hbm [thread:$0]  (%p18270_p12), %s15928_s1, 1024, %s23713_s0, [#allocation6], %s20545_s17, %s20545_s17, %s20546_s22  }
0x1ed5   : > { %20489 = dma.done.wait (%p18270_p12), [#allocation6], 1024  }
0x1ed6   : > { %20491 = vsyncadd (%p18270_p12), [#allocation6], 4294966272 }
0x1ed7 PF: > { %s23714_s30 = sld [smem:[#allocation45_spill]]  ;;  %s23719_s27 = smov %s20510_s28 }
0x1ed8   : > { %s23715_s24 = sld [smem:[#allocation42_spill]] }
0x1ed9   : > { %s23716_s25 = sld [smem:[#allocation43_spill]] }
0x1eda   : > { %s23717_s26 = sld [smem:[#allocation49_spill]] }
0x1edb   : > { %s23718_s8 = sld [smem:[#allocation47_spill]] }
0x1edd   : > { %s53_s29 = sadd.s32 1, %s23714_s30  }
0x1ede   : > { %p50_p9 = scmp.ge.s32.totalorder %s53_s29, 8  }
0x1ee0   :  { %52 = sbr.rel (!%p50_p9) target bundleno = 31 (0x1f), region = 319 }
0x1ee1   : > { %s23720_s28 = smov %s23718_s8 }
0x1ee5   :  { %15943 = vsyncpa [#allocation5], 1 }
0x1ee6   :  { %15945 = vsyncpa [#allocation5 + $0x1], 1 }
0x1ee7   :  { %15946 = vsyncpa [#allocation8], 1 }
0x1ee8   :  { %15948 = vsyncpa [#allocation8 + $0x1], 1 }
0x1ee9   :  { %15949 = vsyncpa [#allocation11], 1 }
0x1eea   :  { %15951 = vsyncpa [#allocation11 + $0x1], 1 }
0x1eeb   :  { %15952 = vsyncpa [#allocation14], 1 }
0x1eec   :  { %15954 = vsyncpa [#allocation14 + $0x1], 1 }
0x1eed   :  { %15955 = vsyncpa [#allocation17], 1 }
0x1eee   :  { %15957 = vsyncpa [#allocation17 + $0x1], 1 }
0x1eef   :  { %15958 = vsyncpa [#allocation20], 1 }
0x1ef0   :  { %15960 = vsyncpa [#allocation20 + $0x1], 1 }
0x1ef1   :  { %15961 = vsyncpa [#allocation23], 1 }
0x1ef2   :  { %15963 = vsyncpa [#allocation23 + $0x1], 1 }
0x1ef3   :  { %15964 = vsyncpa [#allocation26], 1 }
0x1ef4   :  { %15966 = vsyncpa [#allocation26 + $0x1], 1 }
0x1ef5   :  { %15967 = vsyncpa [#allocation29], 1 }
0x1ef6   :  { %15969 = vsyncpa [#allocation29 + $0x1], 1 }
0x1ef7   :  { %15970 = vsyncpa [#allocation6], 1 }
0x1ef8   :  { %15972 = vsyncpa [#allocation6 + $0x1], 1 }

</bundles_post_ra>
